<compile_context>
chip_gen: v7x
topology: tpu7x:2x2x1
jax: 0.10.0
libtpu: 0.0.40
codegen_flags: <defaults>
</compile_context>

<pallas_src>
import math

import jax
import jax.numpy as jnp
from jax.experimental import pallas as pl
from jax.experimental.pallas import tpu as pltpu

# ----------------------------- config (small synthetic shapes) ---------------
VOCAB = 100
MAX_POS = 16
TYPE_VOCAB = 2
D_MODEL = 32          # "BERT" hidden size (small stand-in for 768)
N_HEADS = 4
D_HEAD = D_MODEL // N_HEADS
D_FF = 64
N_BERT_LAYERS = 2
LSTM_HIDDEN = 16      # nn.LSTM(hidden_size) -> classifier sees 2*LSTM_HIDDEN
NUM_LSTM_LAYERS = 2
NUM_CLASSES = 3
BATCH = 2
SEQ = 8
LN_EPS = 1e-12


# ----------------------------- in-kernel helpers ------------------------------
def _ln(x, g, b):
    mean = jnp.mean(x, axis=-1, keepdims=True)
    var = jnp.mean((x - mean) ** 2, axis=-1, keepdims=True)
    return (x - mean) * jax.lax.rsqrt(var + LN_EPS) * g + b


def _gelu(x):
    # TODO(synk): tanh-approximate GELU; HF BERT default is the exact erf form.
    c = math.sqrt(2.0 / math.pi)
    return 0.5 * x * (1.0 + jnp.tanh(c * (x + 0.044715 * x * x * x)))


# ----------------------------- fused transformer layer ------------------------
def _bert_layer_kernel(x_ref, mask_ref, wqkv_ref, bqkv_ref, wo_ref, bo_ref,
                       g1_ref, b1_ref, wi_ref, bi_ref, wo2_ref, bo2_ref,
                       g2_ref, b2_ref, o_ref):
    # x_ref: (T, D); mask_ref: (1, T) additive over keys
    T, D = x_ref.shape
    nH, dH = N_HEADS, D_HEAD

    x = x_ref[...]                                   # (T, D)
    mask = mask_ref[...]                             # (1, T)
    xb = jnp.broadcast_to(x, (nH, T, D))             # hoisted; reused for q/k/v

    def head_proj(idx):
        w = wqkv_ref[idx]                            # (nH, D, dH)
        bias = bqkv_ref[idx]                         # (nH, 1, dH)
        return jax.lax.dot_general(
            xb, w, (((2,), (1,)), ((0,), (0,))),
            preferred_element_type=jnp.float32) + bias

    q = head_proj(0)                                 # (nH, T, dH)
    k = head_proj(1)
    v = head_proj(2)

    scale = 1.0 / math.sqrt(dH)
    s = jax.lax.dot_general(q, k, (((2,), (2,)), ((0,), (0,))),
                            preferred_element_type=jnp.float32) * scale
    s = s + mask[None, :, :]                         # (nH, T, T)
    s = s - jnp.max(s, axis=-1, keepdims=True)
    p = jnp.exp(s)
    p = p * pl.reciprocal(jnp.sum(p, axis=-1, keepdims=True), approx=True)

    ctx = jax.lax.dot_general(p, v, (((2,), (1,)), ((0,), (0,))),
                              preferred_element_type=jnp.float32)  # (nH, T, dH)
    # output projection with head-merge folded in: sum_h ctx[h] @ wo[h]
    attn_h = jax.lax.dot_general(ctx, wo_ref[...], (((2,), (1,)), ((0,), (0,))),
                                 preferred_element_type=jnp.float32)  # (nH, T, D)
    attn_out = jnp.sum(attn_h, axis=0) + bo_ref[...]                  # (T, D)

    h1 = _ln(attn_out + x, g1_ref[...], b1_ref[...])

    ff = jnp.dot(h1, wi_ref[...], preferred_element_type=jnp.float32) + bi_ref[...]
    ff = _gelu(ff)
    ffo = jnp.dot(ff, wo2_ref[...], preferred_element_type=jnp.float32) + bo2_ref[...]
    o_ref[...] = _ln(ffo + h1, g2_ref[...], b2_ref[...])


def bert_layer(x, add_mask, L):
    """x: (B, T, D); add_mask: (B, 1, T) additive -> (B, T, D)."""
    B, T, D = x.shape
    nH, dH, dFF = N_HEADS, D_HEAD, D_FF
    full2 = lambda shp: pl.BlockSpec(shp, lambda b: (0,) * len(shp))
    return pl.pallas_call(
        _bert_layer_kernel,
        out_shape=jax.ShapeDtypeStruct((B, T, D), jnp.float32),
        grid=(B,),
        in_specs=[
            pl.BlockSpec((None, T, D), lambda b: (b, 0, 0)),   # x (batch-squeezed)
            pl.BlockSpec((None, 1, T), lambda b: (b, 0, 0)),   # additive mask
            full2((3, nH, D, dH)),                             # wqkv (per-head)
            full2((3, nH, 1, dH)),                             # bqkv
            full2((nH, dH, D)),                                # wo (per-head)
            full2((1, D)),                                     # bo
            full2((1, D)), full2((1, D)),                      # ln1 gamma/beta
            full2((D, dFF)), full2((1, dFF)),                  # FFN in
            full2((dFF, D)), full2((1, D)),                    # FFN out
            full2((1, D)), full2((1, D)),                      # ln2 gamma/beta
        ],
        out_specs=pl.BlockSpec((None, T, D), lambda b: (b, 0, 0)),
        compiler_params=pltpu.CompilerParams(dimension_semantics=("parallel",)),
    )(x, add_mask, L["wqkv"], L["bqkv"], L["wo"], L["bo"],
      L["ln1_g"], L["ln1_b"], L["wi"], L["bi"], L["wo2"], L["bo2"],
      L["ln2_g"], L["ln2_b"])


# ----------------------------- embedding LayerNorm ----------------------------
def _layernorm_seq_kernel(x_ref, g_ref, b_ref, o_ref):
    o_ref[...] = _ln(x_ref[...], g_ref[...], b_ref[...])


def layernorm_seq(x, gamma, beta):
    """x: (B, T, D); gamma/beta: (1, D)."""
    B, T, D = x.shape
    return pl.pallas_call(
        _layernorm_seq_kernel,
        out_shape=jax.ShapeDtypeStruct((B, T, D), jnp.float32),
        grid=(B,),
        in_specs=[pl.BlockSpec((None, T, D), lambda b: (b, 0, 0)),
                  pl.BlockSpec((1, D), lambda b: (0, 0)),
                  pl.BlockSpec((1, D), lambda b: (0, 0))],
        out_specs=pl.BlockSpec((None, T, D), lambda b: (b, 0, 0)),
        compiler_params=pltpu.CompilerParams(dimension_semantics=("parallel",)),
    )(x, gamma, beta)


# ----------------------------- fused bidirectional LSTM layer -----------------
def _bilstm_kernel(x_ref, wih_ref, whh_ref, b_ref, seq_ref, hN_ref, h_sc, c_sc):
    # x_ref: (T, B, In) time-major (shared by both directions)
    # wih_ref: (4, In, H)  whh_ref: (4, H, H)  b_ref: (4, 1, H)  (per direction)
    # seq_ref: (T, B, H)   hN_ref: (B, H)      (per direction)
    T, B, _ = x_ref.shape
    H = h_sc.shape[-1]
    rev = pl.program_id(0) == 1          # grid axis 0: 0 = forward, 1 = backward

    wih = wih_ref[...]
    whh = whh_ref[...]
    bgb = jnp.broadcast_to(b_ref[...], (4, B, H))   # hoisted out of time loop

    h_sc[...] = jnp.zeros_like(h_sc)
    c_sc[...] = jnp.zeros_like(c_sc)

    # Static unroll over the fixed, short sequence (T = 8).
    for t in range(T):
        idx = jnp.where(rev, jnp.int32(T - 1 - t), jnp.int32(t))
        x_t = x_ref[idx]                                        # (B, In)
        xb = jnp.broadcast_to(x_t, (4,) + x_t.shape)            # (4, B, In)
        hb = jnp.broadcast_to(h_sc[...], (4, B, H))             # (4, B, H)
        gates = (jax.lax.dot_general(xb, wih, (((2,), (1,)), ((0,), (0,))),
                                     preferred_element_type=jnp.float32)
                 + jax.lax.dot_general(hb, whh, (((2,), (1,)), ((0,), (0,))),
                                       preferred_element_type=jnp.float32)
                 + bgb)                                          # (4, B, H)
        i_g = jax.nn.sigmoid(gates[0])
        f_g = jax.nn.sigmoid(gates[1])
        g_g = jnp.tanh(gates[2])
        o_g = jax.nn.sigmoid(gates[3])
        c_new = f_g * c_sc[...] + i_g * g_g
        h_new = o_g * jnp.tanh(c_new)
        h_sc[...] = h_new
        c_sc[...] = c_new
        seq_ref[idx] = h_new      # written at natural time position (no reversal)

    hN_ref[...] = h_sc[...]


def bilstm_layer(x_tm, w_ih, w_hh, b):
    """One bidirectional LSTM layer, both directions fused into one kernel.

    x_tm: (T, B, In) time-major
    w_ih: (2, 4, In, H)  w_hh: (2, 4, H, H)  b: (2, 4, 1, H)
    returns: seq (2, T, B, H) [dir 0 = fwd, 1 = bwd, natural time order],
             hN  (2, B, H)    final hidden per direction.
    """
    T, B, In = x_tm.shape
    H = w_hh.shape[-1]
    return pl.pallas_call(
        _bilstm_kernel,
        out_shape=(jax.ShapeDtypeStruct((2, T, B, H), jnp.float32),
                   jax.ShapeDtypeStruct((2, B, H), jnp.float32)),
        grid=(2,),
        in_specs=[pl.BlockSpec((T, B, In), lambda d: (0, 0, 0)),
                  pl.BlockSpec((None, 4, In, H), lambda d: (d, 0, 0, 0)),
                  pl.BlockSpec((None, 4, H, H), lambda d: (d, 0, 0, 0)),
                  pl.BlockSpec((None, 4, 1, H), lambda d: (d, 0, 0, 0))],
        out_specs=[pl.BlockSpec((None, T, B, H), lambda d: (d, 0, 0, 0)),
                   pl.BlockSpec((None, B, H), lambda d: (d, 0, 0))],
        scratch_shapes=[pltpu.VMEM((B, H), jnp.float32),
                        pltpu.VMEM((B, H), jnp.float32)],
        compiler_params=pltpu.CompilerParams(dimension_semantics=("parallel",)),
    )(x_tm, w_ih, w_hh, b)


# ----------------------------- classifier linear -------------------------------
def _linear_kernel(x_ref, w_ref, b_ref, o_ref):
    o_ref[...] = (jnp.dot(x_ref[...], w_ref[...],
                          preferred_element_type=jnp.float32) + b_ref[...])


def classifier(x, w, b):
    """x: (B, K), w: (K, C), b: (1, C) -> (B, C)."""
    B = x.shape[0]
    C = w.shape[1]
    return pl.pallas_call(
        _linear_kernel,
        out_shape=jax.ShapeDtypeStruct((B, C), jnp.float32),
    )(x, w, b)


# ----------------------------- parameters ------------------------------------
def init_params(key):
    def nrm(k, shape, scale=0.02):
        return scale * jax.random.normal(k, shape, dtype=jnp.float32)

    keys = iter(jax.random.split(key, 256))
    p = {
        "word_emb": nrm(next(keys), (VOCAB, D_MODEL)),
        "pos_emb": nrm(next(keys), (MAX_POS, D_MODEL)),
        "type_emb": nrm(next(keys), (TYPE_VOCAB, D_MODEL)),
        "emb_ln_g": jnp.ones((1, D_MODEL), jnp.float32),
        "emb_ln_b": jnp.zeros((1, D_MODEL), jnp.float32),
        "layers": [],
        "lstm": [],
    }
    for _ in range(N_BERT_LAYERS):
        p["layers"].append({
            # QKV weights pre-split per head: (3, nH, D, dH); biases (3, nH, 1, dH)
            "wqkv": nrm(next(keys), (3, N_HEADS, D_MODEL, D_HEAD)),
            "bqkv": jnp.zeros((3, N_HEADS, 1, D_HEAD), jnp.float32),
            # output projection pre-split per head: (nH, dH, D)
            "wo": nrm(next(keys), (N_HEADS, D_HEAD, D_MODEL)),
            "bo": jnp.zeros((1, D_MODEL), jnp.float32),
            "ln1_g": jnp.ones((1, D_MODEL), jnp.float32),
            "ln1_b": jnp.zeros((1, D_MODEL), jnp.float32),
            "wi": nrm(next(keys), (D_MODEL, D_FF)),
            "bi": jnp.zeros((1, D_FF), jnp.float32),
            "wo2": nrm(next(keys), (D_FF, D_MODEL)),
            "bo2": jnp.zeros((1, D_MODEL), jnp.float32),
            "ln2_g": jnp.ones((1, D_MODEL), jnp.float32),
            "ln2_b": jnp.zeros((1, D_MODEL), jnp.float32),
        })
    in_size = D_MODEL
    for _ in range(NUM_LSTM_LAYERS):
        # gate axis is a leading (non-lane) axis: (direction, gate, In, H)
        p["lstm"].append({
            "w_ih": nrm(next(keys), (2, 4, in_size, LSTM_HIDDEN), 0.1),
            "w_hh": nrm(next(keys), (2, 4, LSTM_HIDDEN, LSTM_HIDDEN), 0.1),
            "b": jnp.zeros((2, 4, 1, LSTM_HIDDEN), jnp.float32),
        })
        in_size = 2 * LSTM_HIDDEN
    p["cls_w"] = nrm(next(keys), (2 * LSTM_HIDDEN, NUM_CLASSES))
    p["cls_b"] = jnp.zeros((1, NUM_CLASSES), jnp.float32)
    return p


# ----------------------------- forward pass ----------------------------------
def bert_sentiment_forward(params, input_ids, attention_mask):
    B, T = input_ids.shape

    # --- BERT embeddings (gather = glue) + LayerNorm kernel ---
    x = (params["word_emb"][input_ids]
         + params["pos_emb"][:T][None, :, :]
         + params["type_emb"][0][None, None, :])
    x = layernorm_seq(x, params["emb_ln_g"], params["emb_ln_b"])       # (B, T, D)

    add_mask = ((1.0 - attention_mask.astype(jnp.float32))
                * -1e9).reshape(B, 1, T)

    # --- fully fused BERT encoder layers (one pallas_call each) ---
    for L in params["layers"]:
        x = bert_layer(x, add_mask, L)

    # --- 2-layer bidirectional LSTM (both directions fused per layer) ---
    x_tm = x.transpose(1, 0, 2)                                        # (T, B, D)
    hN = None
    for layer in params["lstm"]:
        seq, hN = bilstm_layer(x_tm, layer["w_ih"], layer["w_hh"], layer["b"])
        # next-layer input: [fwd | bwd] features (PyTorch bidirectional order)
        x_tm = jnp.concatenate([seq[0], seq[1]], axis=-1)              # (T, B, 2H)
        # TODO(synk): inter-layer LSTM dropout is identity (inference semantics).

    # hidden = cat(hidden[-2], hidden[-1]) == cat(last-layer fwd, last-layer bwd)
    hidden = jnp.concatenate([hN[0], hN[1]], axis=-1)                  # (B, 2H)
    # TODO(synk): self.dropout is identity (inference semantics, no RNG mask).

    logits = classifier(hidden, params["cls_w"], params["cls_b"])      # (B, 3)
    return logits


# ----------------------------- main -------------------------------------------
if __name__ == "__main__":
    key = jax.random.PRNGKey(0)
    pkey, ikey = jax.random.split(key)
    params = init_params(pkey)

    input_ids = jax.random.randint(ikey, (BATCH, SEQ), 0, VOCAB, dtype=jnp.int32)
    attention_mask = jnp.array(
        [[1] * SEQ, [1] * (SEQ - 2) + [0] * 2], dtype=jnp.float32)

    fwd = jax.jit(bert_sentiment_forward)
    logits = fwd(params, input_ids, attention_mask)
    logits = jax.block_until_ready(logits)
    assert logits.shape == (BATCH, NUM_CLASSES)
    assert bool(jnp.all(jnp.isfinite(logits)))
    print("KERNEL_OK")
</pallas_src>

<mosaic_0001>
module attributes {stable_mosaic.version = 11 : i64} {
  func.func @_layernorm_seq_kernel(%arg0: i32, %arg1: memref<1x8x32xf32, #tpu.memory_space<vmem>>, %arg2: memref<1x32xf32, #tpu.memory_space<vmem>>, %arg3: memref<1x32xf32, #tpu.memory_space<vmem>>, %arg4: memref<1x8x32xf32, #tpu.memory_space<vmem>>) attributes {dimension_semantics = [#tpu.dimension_semantics<parallel>], iteration_bounds = array<i64: 2>, scalar_prefetch = 0 : i64, scratch_operands = 0 : i64, tpu.core_type = #tpu.core_type<tc>, window_params = [{transform_indices = @transform_0, window_bounds = array<i64: 1, 8, 32>}, {pipeline_mode = #tpu.pipeline_mode<synchronous>, transform_indices = @transform_1, window_bounds = array<i64: 1, 32>}, {pipeline_mode = #tpu.pipeline_mode<synchronous>, transform_indices = @transform_2, window_bounds = array<i64: 1, 32>}, {transform_indices = @transform_3, window_bounds = array<i64: 1, 8, 32>}]} {
    %c0 = arith.constant 0 : index
    %c0_0 = arith.constant 0 : index
    %c0_1 = arith.constant 0 : index
    %0 = vector.load %arg1[%c0, %c0_0, %c0_1] : memref<1x8x32xf32, #tpu.memory_space<vmem>>, vector<1x8x32xf32>
    %1 = vector.shape_cast %0 : vector<1x8x32xf32> to vector<8x32xf32>
    %c0_2 = arith.constant 0 : index
    %c0_3 = arith.constant 0 : index
    %2 = vector.load %arg2[%c0_2, %c0_3] : memref<1x32xf32, #tpu.memory_space<vmem>>, vector<1x32xf32>
    %c0_4 = arith.constant 0 : index
    %c0_5 = arith.constant 0 : index
    %3 = vector.load %arg3[%c0_4, %c0_5] : memref<1x32xf32, #tpu.memory_space<vmem>>, vector<1x32xf32>
    %cst = arith.constant dense<0.000000e+00> : vector<8xf32>
    %4 = vector.multi_reduction <add>, %1, %cst [1] : vector<8x32xf32> to vector<8xf32>
    %5 = vector.shape_cast %4 : vector<8xf32> to vector<8x1xf32>
    %cst_6 = arith.constant 3.200000e+01 : f32
    %6 = vector.broadcast %cst_6 : f32 to vector<8x1xf32>
    %7 = arith.divf %5, %6 : vector<8x1xf32>
    %8 = vector.broadcast %7 : vector<8x1xf32> to vector<8x32xf32>
    %9 = arith.subf %1, %8 : vector<8x32xf32>
    %10 = arith.mulf %9, %9 : vector<8x32xf32>
    %cst_7 = arith.constant dense<0.000000e+00> : vector<8xf32>
    %11 = vector.multi_reduction <add>, %10, %cst_7 [1] : vector<8x32xf32> to vector<8xf32>
    %12 = vector.shape_cast %11 : vector<8xf32> to vector<8x1xf32>
    %cst_8 = arith.constant 3.200000e+01 : f32
    %13 = vector.broadcast %cst_8 : f32 to vector<8x1xf32>
    %14 = arith.divf %12, %13 : vector<8x1xf32>
    %15 = vector.broadcast %7 : vector<8x1xf32> to vector<8x32xf32>
    %16 = arith.subf %1, %15 : vector<8x32xf32>
    %cst_9 = arith.constant 9.99999996E-13 : f32
    %17 = vector.broadcast %cst_9 : f32 to vector<8x1xf32>
    %18 = arith.addf %14, %17 : vector<8x1xf32>
    %19 = math.rsqrt %18 : vector<8x1xf32>
    %20 = vector.broadcast %19 : vector<8x1xf32> to vector<8x32xf32>
    %21 = arith.mulf %16, %20 : vector<8x32xf32>
    %22 = vector.broadcast %2 : vector<1x32xf32> to vector<8x32xf32>
    %23 = arith.mulf %21, %22 : vector<8x32xf32>
    %24 = vector.broadcast %3 : vector<1x32xf32> to vector<8x32xf32>
    %25 = arith.addf %23, %24 : vector<8x32xf32>
    %c0_10 = arith.constant 0 : index
    %c0_11 = arith.constant 0 : index
    %c0_12 = arith.constant 0 : index
    %26 = vector.load %arg4[%c0_10, %c0_11, %c0_12] : memref<1x8x32xf32, #tpu.memory_space<vmem>>, vector<1x8x32xf32>
    %27 = vector.shape_cast %26 : vector<1x8x32xf32> to vector<8x32xf32>
    %28 = vector.shape_cast %25 : vector<8x32xf32> to vector<1x8x32xf32>
    tpu.vector_store %arg4[%c0_10, %c0_11, %c0_12], %28 {strides = array<i32>} : memref<1x8x32xf32, #tpu.memory_space<vmem>>, vector<1x8x32xf32>,
    return
  }
  func.func @transform_0(%arg0: i32) -> (i32, i32, i32) {
    %c0_i32 = arith.constant 0 : i32
    %c0_i32_0 = arith.constant 0 : i32
    %c0_i32_1 = arith.constant 0 : i32
    return %arg0, %c0_i32, %c0_i32_0 : i32, i32, i32
  }
  func.func @transform_1(%arg0: i32) -> (i32, i32) {
    %c0_i32 = arith.constant 0 : i32
    %c0_i32_0 = arith.constant 0 : i32
    %c0_i32_1 = arith.constant 0 : i32
    return %c0_i32, %c0_i32_0 : i32, i32
  }
  func.func @transform_2(%arg0: i32) -> (i32, i32) {
    %c0_i32 = arith.constant 0 : i32
    %c0_i32_0 = arith.constant 0 : i32
    %c0_i32_1 = arith.constant 0 : i32
    return %c0_i32, %c0_i32_0 : i32, i32
  }
  func.func @transform_3(%arg0: i32) -> (i32, i32, i32) {
    %c0_i32 = arith.constant 0 : i32
    %c0_i32_0 = arith.constant 0 : i32
    %c0_i32_1 = arith.constant 0 : i32
    return %arg0, %c0_i32, %c0_i32_0 : i32, i32, i32
  }
}

module attributes {stable_mosaic.version = 11 : i64} {
  func.func @_bert_layer_kernel(%arg0: i32, %arg1: memref<1x8x32xf32, #tpu.memory_space<vmem>>, %arg2: memref<1x1x8xf32, #tpu.memory_space<vmem>>, %arg3: memref<3x4x32x8xf32, #tpu.memory_space<vmem>>, %arg4: memref<3x4x1x8xf32, #tpu.memory_space<vmem>>, %arg5: memref<4x8x32xf32, #tpu.memory_space<vmem>>, %arg6: memref<1x32xf32, #tpu.memory_space<vmem>>, %arg7: memref<1x32xf32, #tpu.memory_space<vmem>>, %arg8: memref<1x32xf32, #tpu.memory_space<vmem>>, %arg9: memref<32x64xf32, #tpu.memory_space<vmem>>, %arg10: memref<1x64xf32, #tpu.memory_space<vmem>>, %arg11: memref<64x32xf32, #tpu.memory_space<vmem>>, %arg12: memref<1x32xf32, #tpu.memory_space<vmem>>, %arg13: memref<1x32xf32, #tpu.memory_space<vmem>>, %arg14: memref<1x32xf32, #tpu.memory_space<vmem>>, %arg15: memref<1x8x32xf32, #tpu.memory_space<vmem>>) attributes {dimension_semantics = [#tpu.dimension_semantics<parallel>], iteration_bounds = array<i64: 2>, scalar_prefetch = 0 : i64, scratch_operands = 0 : i64, tpu.core_type = #tpu.core_type<tc>, window_params = [{transform_indices = @transform_0, window_bounds = array<i64: 1, 8, 32>}, {transform_indices = @transform_1, window_bounds = array<i64: 1, 1, 8>}, {pipeline_mode = #tpu.pipeline_mode<synchronous>, transform_indices = @transform_2, window_bounds = array<i64: 3, 4, 32, 8>}, {pipeline_mode = #tpu.pipeline_mode<synchronous>, transform_indices = @transform_3, window_bounds = array<i64: 3, 4, 1, 8>}, {pipeline_mode = #tpu.pipeline_mode<synchronous>, transform_indices = @transform_4, window_bounds = array<i64: 4, 8, 32>}, {pipeline_mode = #tpu.pipeline_mode<synchronous>, transform_indices = @transform_5, window_bounds = array<i64: 1, 32>}, {pipeline_mode = #tpu.pipeline_mode<synchronous>, transform_indices = @transform_6, window_bounds = array<i64: 1, 32>}, {pipeline_mode = #tpu.pipeline_mode<synchronous>, transform_indices = @transform_7, window_bounds = array<i64: 1, 32>}, {pipeline_mode = #tpu.pipeline_mode<synchronous>, transform_indices = @transform_8, window_bounds = array<i64: 32, 64>}, {pipeline_mode = #tpu.pipeline_mode<synchronous>, transform_indices = @transform_9, window_bounds = array<i64: 1, 64>}, {pipeline_mode = #tpu.pipeline_mode<synchronous>, transform_indices = @transform_10, window_bounds = array<i64: 64, 32>}, {pipeline_mode = #tpu.pipeline_mode<synchronous>, transform_indices = @transform_11, window_bounds = array<i64: 1, 32>}, {pipeline_mode = #tpu.pipeline_mode<synchronous>, transform_indices = @transform_12, window_bounds = array<i64: 1, 32>}, {pipeline_mode = #tpu.pipeline_mode<synchronous>, transform_indices = @transform_13, window_bounds = array<i64: 1, 32>}, {transform_indices = @transform_14, window_bounds = array<i64: 1, 8, 32>}]} {
    %c0 = arith.constant 0 : index
    %c0_0 = arith.constant 0 : index
    %c0_1 = arith.constant 0 : index
    %0 = vector.load %arg1[%c0, %c0_0, %c0_1] : memref<1x8x32xf32, #tpu.memory_space<vmem>>, vector<1x8x32xf32>
    %1 = vector.shape_cast %0 : vector<1x8x32xf32> to vector<8x32xf32>
    %c0_2 = arith.constant 0 : index
    %c0_3 = arith.constant 0 : index
    %c0_4 = arith.constant 0 : index
    %2 = vector.load %arg2[%c0_2, %c0_3, %c0_4] : memref<1x1x8xf32, #tpu.memory_space<vmem>>, vector<1x1x8xf32>
    %3 = vector.shape_cast %2 : vector<1x1x8xf32> to vector<1x8xf32>
    %4 = vector.shape_cast %1 : vector<8x32xf32> to vector<1x8x32xf32>
    %5 = vector.broadcast %4 : vector<1x8x32xf32> to vector<4x8x32xf32>
    %c0_5 = arith.constant 0 : index
    %c0_6 = arith.constant 0 : index
    %c0_7 = arith.constant 0 : index
    %c0_8 = arith.constant 0 : index
    %6 = vector.load %arg3[%c0_5, %c0_6, %c0_7, %c0_8] : memref<3x4x32x8xf32, #tpu.memory_space<vmem>>, vector<1x4x32x8xf32>
    %7 = vector.shape_cast %6 : vector<1x4x32x8xf32> to vector<4x32x8xf32>
    %c0_9 = arith.constant 0 : index
    %c0_10 = arith.constant 0 : index
    %c0_11 = arith.constant 0 : index
    %c0_12 = arith.constant 0 : index
    %8 = vector.load %arg4[%c0_9, %c0_10, %c0_11, %c0_12] : memref<3x4x1x8xf32, #tpu.memory_space<vmem>>, vector<1x4x1x8xf32>
    %9 = vector.shape_cast %8 : vector<1x4x1x8xf32> to vector<4x1x8xf32>
    %cst = arith.constant dense<0.000000e+00> : vector<4x8x8xf32>
    %10 = tpu.matmul %5, %7, %cst {dimension_numbers = #tpu.dot_dimension_numbers<[2], [1], [1], [2], [0, 0, 0, 1, 1, 2], [0], [0]>} : vector<4x8x32xf32>, vector<4x32x8xf32>, vector<4x8x8xf32> -> vector<4x8x8xf32>
    %11 = vector.broadcast %9 : vector<4x1x8xf32> to vector<4x8x8xf32>
    %12 = arith.addf %10, %11 : vector<4x8x8xf32>
    %c1 = arith.constant 1 : index
    %c0_13 = arith.constant 0 : index
    %c0_14 = arith.constant 0 : index
    %c0_15 = arith.constant 0 : index
    %13 = vector.load %arg3[%c1, %c0_13, %c0_14, %c0_15] : memref<3x4x32x8xf32, #tpu.memory_space<vmem>>, vector<1x4x32x8xf32>
    %14 = vector.shape_cast %13 : vector<1x4x32x8xf32> to vector<4x32x8xf32>
    %c1_16 = arith.constant 1 : index
    %c0_17 = arith.constant 0 : index
    %c0_18 = arith.constant 0 : index
    %c0_19 = arith.constant 0 : index
    %15 = vector.load %arg4[%c1_16, %c0_17, %c0_18, %c0_19] : memref<3x4x1x8xf32, #tpu.memory_space<vmem>>, vector<1x4x1x8xf32>
    %16 = vector.shape_cast %15 : vector<1x4x1x8xf32> to vector<4x1x8xf32>
    %cst_20 = arith.constant dense<0.000000e+00> : vector<4x8x8xf32>
    %17 = tpu.matmul %5, %14, %cst_20 {dimension_numbers = #tpu.dot_dimension_numbers<[2], [1], [1], [2], [0, 0, 0, 1, 1, 2], [0], [0]>} : vector<4x8x32xf32>, vector<4x32x8xf32>, vector<4x8x8xf32> -> vector<4x8x8xf32>
    %18 = vector.broadcast %16 : vector<4x1x8xf32> to vector<4x8x8xf32>
    %19 = arith.addf %17, %18 : vector<4x8x8xf32>
    %c2 = arith.constant 2 : index
    %c0_21 = arith.constant 0 : index
    %c0_22 = arith.constant 0 : index
    %c0_23 = arith.constant 0 : index
    %20 = vector.load %arg3[%c2, %c0_21, %c0_22, %c0_23] : memref<3x4x32x8xf32, #tpu.memory_space<vmem>>, vector<1x4x32x8xf32>
    %21 = vector.shape_cast %20 : vector<1x4x32x8xf32> to vector<4x32x8xf32>
    %c2_24 = arith.constant 2 : index
    %c0_25 = arith.constant 0 : index
    %c0_26 = arith.constant 0 : index
    %c0_27 = arith.constant 0 : index
    %22 = vector.load %arg4[%c2_24, %c0_25, %c0_26, %c0_27] : memref<3x4x1x8xf32, #tpu.memory_space<vmem>>, vector<1x4x1x8xf32>
    %23 = vector.shape_cast %22 : vector<1x4x1x8xf32> to vector<4x1x8xf32>
    %cst_28 = arith.constant dense<0.000000e+00> : vector<4x8x8xf32>
    %24 = tpu.matmul %5, %21, %cst_28 {dimension_numbers = #tpu.dot_dimension_numbers<[2], [1], [1], [2], [0, 0, 0, 1, 1, 2], [0], [0]>} : vector<4x8x32xf32>, vector<4x32x8xf32>, vector<4x8x8xf32> -> vector<4x8x8xf32>
    %25 = vector.broadcast %23 : vector<4x1x8xf32> to vector<4x8x8xf32>
    %26 = arith.addf %24, %25 : vector<4x8x8xf32>
    %cst_29 = arith.constant dense<0.000000e+00> : vector<4x8x8xf32>
    %27 = tpu.matmul %12, %19, %cst_29 {dimension_numbers = #tpu.dot_dimension_numbers<[2], [2], [1], [1], [0, 0, 0, 1, 1, 1], [0], [0]>} : vector<4x8x8xf32>, vector<4x8x8xf32>, vector<4x8x8xf32> -> vector<4x8x8xf32>
    %cst_30 = arith.constant 0.353553385 : f32
    %28 = vector.broadcast %cst_30 : f32 to vector<4x8x8xf32>
    %29 = arith.mulf %27, %28 : vector<4x8x8xf32>
    %30 = vector.shape_cast %3 : vector<1x8xf32> to vector<1x1x8xf32>
    %31 = vector.broadcast %30 : vector<1x1x8xf32> to vector<4x8x8xf32>
    %32 = arith.addf %29, %31 : vector<4x8x8xf32>
    %cst_31 = arith.constant dense<0xFF800000> : vector<4x8xf32>
    %33 = vector.multi_reduction <maximumf>, %32, %cst_31 [2] : vector<4x8x8xf32> to vector<4x8xf32>
    %34 = vector.shape_cast %33 : vector<4x8xf32> to vector<4x8x1xf32>
    %35 = vector.broadcast %34 : vector<4x8x1xf32> to vector<4x8x8xf32>
    %36 = arith.subf %32, %35 : vector<4x8x8xf32>
    %37 = math.exp %36 : vector<4x8x8xf32>
    %cst_32 = arith.constant dense<0.000000e+00> : vector<4x8xf32>
    %38 = vector.multi_reduction <add>, %37, %cst_32 [2] : vector<4x8x8xf32> to vector<4x8xf32>
    %39 = vector.shape_cast %38 : vector<4x8xf32> to vector<4x8x1xf32>
    %40 = tpu.reciprocal %39 {approx = true} : vector<4x8x1xf32> -> vector<4x8x1xf32>
    %41 = vector.broadcast %40 : vector<4x8x1xf32> to vector<4x8x8xf32>
    %42 = arith.mulf %37, %41 : vector<4x8x8xf32>
    %cst_33 = arith.constant dense<0.000000e+00> : vector<4x8x8xf32>
    %43 = tpu.matmul %42, %26, %cst_33 {dimension_numbers = #tpu.dot_dimension_numbers<[2], [1], [1], [2], [0, 0, 0, 1, 1, 2], [0], [0]>} : vector<4x8x8xf32>, vector<4x8x8xf32>, vector<4x8x8xf32> -> vector<4x8x8xf32>
    %c0_34 = arith.constant 0 : index
    %c0_35 = arith.constant 0 : index
    %c0_36 = arith.constant 0 : index
    %44 = vector.load %arg5[%c0_34, %c0_35, %c0_36] : memref<4x8x32xf32, #tpu.memory_space<vmem>>, vector<4x8x32xf32>
    %cst_37 = arith.constant dense<0.000000e+00> : vector<4x8x32xf32>
    %45 = tpu.matmul %43, %44, %cst_37 {dimension_numbers = #tpu.dot_dimension_numbers<[2], [1], [1], [2], [0, 0, 0, 1, 1, 2], [0], [0]>} : vector<4x8x8xf32>, vector<4x8x32xf32>, vector<4x8x32xf32> -> vector<4x8x32xf32>
    %cst_38 = arith.constant dense<0.000000e+00> : vector<8x32xf32>
    %46 = vector.multi_reduction <add>, %45, %cst_38 [0] : vector<4x8x32xf32> to vector<8x32xf32>
    %c0_39 = arith.constant 0 : index
    %c0_40 = arith.constant 0 : index
    %47 = vector.load %arg6[%c0_39, %c0_40] : memref<1x32xf32, #tpu.memory_space<vmem>>, vector<1x32xf32>
    %48 = vector.broadcast %47 : vector<1x32xf32> to vector<8x32xf32>
    %49 = arith.addf %46, %48 : vector<8x32xf32>
    %50 = arith.addf %49, %1 : vector<8x32xf32>
    %c0_41 = arith.constant 0 : index
    %c0_42 = arith.constant 0 : index
    %51 = vector.load %arg7[%c0_41, %c0_42] : memref<1x32xf32, #tpu.memory_space<vmem>>, vector<1x32xf32>
    %c0_43 = arith.constant 0 : index
    %c0_44 = arith.constant 0 : index
    %52 = vector.load %arg8[%c0_43, %c0_44] : memref<1x32xf32, #tpu.memory_space<vmem>>, vector<1x32xf32>
    %cst_45 = arith.constant dense<0.000000e+00> : vector<8xf32>
    %53 = vector.multi_reduction <add>, %50, %cst_45 [1] : vector<8x32xf32> to vector<8xf32>
    %54 = vector.shape_cast %53 : vector<8xf32> to vector<8x1xf32>
    %cst_46 = arith.constant 3.200000e+01 : f32
    %55 = vector.broadcast %cst_46 : f32 to vector<8x1xf32>
    %56 = arith.divf %54, %55 : vector<8x1xf32>
    %57 = vector.broadcast %56 : vector<8x1xf32> to vector<8x32xf32>
    %58 = arith.subf %50, %57 : vector<8x32xf32>
    %59 = arith.mulf %58, %58 : vector<8x32xf32>
    %cst_47 = arith.constant dense<0.000000e+00> : vector<8xf32>
    %60 = vector.multi_reduction <add>, %59, %cst_47 [1] : vector<8x32xf32> to vector<8xf32>
    %61 = vector.shape_cast %60 : vector<8xf32> to vector<8x1xf32>
    %cst_48 = arith.constant 3.200000e+01 : f32
    %62 = vector.broadcast %cst_48 : f32 to vector<8x1xf32>
    %63 = arith.divf %61, %62 : vector<8x1xf32>
    %64 = vector.broadcast %56 : vector<8x1xf32> to vector<8x32xf32>
    %65 = arith.subf %50, %64 : vector<8x32xf32>
    %cst_49 = arith.constant 9.99999996E-13 : f32
    %66 = vector.broadcast %cst_49 : f32 to vector<8x1xf32>
    %67 = arith.addf %63, %66 : vector<8x1xf32>
    %68 = math.rsqrt %67 : vector<8x1xf32>
    %69 = vector.broadcast %68 : vector<8x1xf32> to vector<8x32xf32>
    %70 = arith.mulf %65, %69 : vector<8x32xf32>
    %71 = vector.broadcast %51 : vector<1x32xf32> to vector<8x32xf32>
    %72 = arith.mulf %70, %71 : vector<8x32xf32>
    %73 = vector.broadcast %52 : vector<1x32xf32> to vector<8x32xf32>
    %74 = arith.addf %72, %73 : vector<8x32xf32>
    %c0_50 = arith.constant 0 : index
    %c0_51 = arith.constant 0 : index
    %75 = vector.load %arg9[%c0_50, %c0_51] : memref<32x64xf32, #tpu.memory_space<vmem>>, vector<32x64xf32>
    %cst_52 = arith.constant dense<0.000000e+00> : vector<8x64xf32>
    %76 = tpu.matmul %74, %75, %cst_52 {dimension_numbers = #tpu.dot_dimension_numbers<[1], [0], [0], [1], [0, 0, 1, 1], [], []>} : vector<8x32xf32>, vector<32x64xf32>, vector<8x64xf32> -> vector<8x64xf32>
    %c0_53 = arith.constant 0 : index
    %c0_54 = arith.constant 0 : index
    %77 = vector.load %arg10[%c0_53, %c0_54] : memref<1x64xf32, #tpu.memory_space<vmem>>, vector<1x64xf32>
    %78 = vector.broadcast %77 : vector<1x64xf32> to vector<8x64xf32>
    %79 = arith.addf %76, %78 : vector<8x64xf32>
    %cst_55 = arith.constant 5.000000e-01 : f32
    %80 = vector.broadcast %cst_55 : f32 to vector<8x64xf32>
    %81 = arith.mulf %80, %79 : vector<8x64xf32>
    %cst_56 = arith.constant 4.471500e-02 : f32
    %82 = vector.broadcast %cst_56 : f32 to vector<8x64xf32>
    %83 = arith.mulf %82, %79 : vector<8x64xf32>
    %84 = arith.mulf %83, %79 : vector<8x64xf32>
    %85 = arith.mulf %84, %79 : vector<8x64xf32>
    %86 = arith.addf %79, %85 : vector<8x64xf32>
    %cst_57 = arith.constant 0.797884583 : f32
    %87 = vector.broadcast %cst_57 : f32 to vector<8x64xf32>
    %88 = arith.mulf %87, %86 : vector<8x64xf32>
    %89 = math.tanh %88 : vector<8x64xf32>
    %cst_58 = arith.constant 1.000000e+00 : f32
    %90 = vector.broadcast %cst_58 : f32 to vector<8x64xf32>
    %91 = arith.addf %90, %89 : vector<8x64xf32>
    %92 = arith.mulf %81, %91 : vector<8x64xf32>
    %c0_59 = arith.constant 0 : index
    %c0_60 = arith.constant 0 : index
    %93 = vector.load %arg11[%c0_59, %c0_60] : memref<64x32xf32, #tpu.memory_space<vmem>>, vector<64x32xf32>
    %cst_61 = arith.constant dense<0.000000e+00> : vector<8x32xf32>
    %94 = tpu.matmul %92, %93, %cst_61 {dimension_numbers = #tpu.dot_dimension_numbers<[1], [0], [0], [1], [0, 0, 1, 1], [], []>} : vector<8x64xf32>, vector<64x32xf32>, vector<8x32xf32> -> vector<8x32xf32>
    %c0_62 = arith.constant 0 : index
    %c0_63 = arith.constant 0 : index
    %95 = vector.load %arg12[%c0_62, %c0_63] : memref<1x32xf32, #tpu.memory_space<vmem>>, vector<1x32xf32>
    %96 = vector.broadcast %95 : vector<1x32xf32> to vector<8x32xf32>
    %97 = arith.addf %94, %96 : vector<8x32xf32>
    %98 = arith.addf %97, %74 : vector<8x32xf32>
    %c0_64 = arith.constant 0 : index
    %c0_65 = arith.constant 0 : index
    %99 = vector.load %arg13[%c0_64, %c0_65] : memref<1x32xf32, #tpu.memory_space<vmem>>, vector<1x32xf32>
    %c0_66 = arith.constant 0 : index
    %c0_67 = arith.constant 0 : index
    %100 = vector.load %arg14[%c0_66, %c0_67] : memref<1x32xf32, #tpu.memory_space<vmem>>, vector<1x32xf32>
    %cst_68 = arith.constant dense<0.000000e+00> : vector<8xf32>
    %101 = vector.multi_reduction <add>, %98, %cst_68 [1] : vector<8x32xf32> to vector<8xf32>
    %102 = vector.shape_cast %101 : vector<8xf32> to vector<8x1xf32>
    %cst_69 = arith.constant 3.200000e+01 : f32
    %103 = vector.broadcast %cst_69 : f32 to vector<8x1xf32>
    %104 = arith.divf %102, %103 : vector<8x1xf32>
    %105 = vector.broadcast %104 : vector<8x1xf32> to vector<8x32xf32>
    %106 = arith.subf %98, %105 : vector<8x32xf32>
    %107 = arith.mulf %106, %106 : vector<8x32xf32>
    %cst_70 = arith.constant dense<0.000000e+00> : vector<8xf32>
    %108 = vector.multi_reduction <add>, %107, %cst_70 [1] : vector<8x32xf32> to vector<8xf32>
    %109 = vector.shape_cast %108 : vector<8xf32> to vector<8x1xf32>
    %cst_71 = arith.constant 3.200000e+01 : f32
    %110 = vector.broadcast %cst_71 : f32 to vector<8x1xf32>
    %111 = arith.divf %109, %110 : vector<8x1xf32>
    %112 = vector.broadcast %104 : vector<8x1xf32> to vector<8x32xf32>
    %113 = arith.subf %98, %112 : vector<8x32xf32>
    %cst_72 = arith.constant 9.99999996E-13 : f32
    %114 = vector.broadcast %cst_72 : f32 to vector<8x1xf32>
    %115 = arith.addf %111, %114 : vector<8x1xf32>
    %116 = math.rsqrt %115 : vector<8x1xf32>
    %117 = vector.broadcast %116 : vector<8x1xf32> to vector<8x32xf32>
    %118 = arith.mulf %113, %117 : vector<8x32xf32>
    %119 = vector.broadcast %99 : vector<1x32xf32> to vector<8x32xf32>
    %120 = arith.mulf %118, %119 : vector<8x32xf32>
    %121 = vector.broadcast %100 : vector<1x32xf32> to vector<8x32xf32>
    %122 = arith.addf %120, %121 : vector<8x32xf32>
    %c0_73 = arith.constant 0 : index
    %c0_74 = arith.constant 0 : index
    %c0_75 = arith.constant 0 : index
    %123 = vector.load %arg15[%c0_73, %c0_74, %c0_75] : memref<1x8x32xf32, #tpu.memory_space<vmem>>, vector<1x8x32xf32>
    %124 = vector.shape_cast %123 : vector<1x8x32xf32> to vector<8x32xf32>
    %125 = vector.shape_cast %122 : vector<8x32xf32> to vector<1x8x32xf32>
    tpu.vector_store %arg15[%c0_73, %c0_74, %c0_75], %125 {strides = array<i32>} : memref<1x8x32xf32, #tpu.memory_space<vmem>>, vector<1x8x32xf32>,
    return
  }
  func.func @transform_0(%arg0: i32) -> (i32, i32, i32) {
    %c0_i32 = arith.constant 0 : i32
    %c0_i32_0 = arith.constant 0 : i32
    %c0_i32_1 = arith.constant 0 : i32
    return %arg0, %c0_i32, %c0_i32_0 : i32, i32, i32
  }
  func.func @transform_1(%arg0: i32) -> (i32, i32, i32) {
    %c0_i32 = arith.constant 0 : i32
    %c0_i32_0 = arith.constant 0 : i32
    %c0_i32_1 = arith.constant 0 : i32
    return %arg0, %c0_i32, %c0_i32_0 : i32, i32, i32
  }
  func.func @transform_2(%arg0: i32) -> (i32, i32, i32, i32) {
    %c0_i32 = arith.constant 0 : i32
    %c0_i32_0 = arith.constant 0 : i32
    %c0_i32_1 = arith.constant 0 : i32
    %c0_i32_2 = arith.constant 0 : i32
    %c0_i32_3 = arith.constant 0 : i32
    return %c0_i32, %c0_i32_0, %c0_i32_1, %c0_i32_2 : i32, i32, i32, i32
  }
  func.func @transform_3(%arg0: i32) -> (i32, i32, i32, i32) {
    %c0_i32 = arith.constant 0 : i32
    %c0_i32_0 = arith.constant 0 : i32
    %c0_i32_1 = arith.constant 0 : i32
    %c0_i32_2 = arith.constant 0 : i32
    %c0_i32_3 = arith.constant 0 : i32
    return %c0_i32, %c0_i32_0, %c0_i32_1, %c0_i32_2 : i32, i32, i32, i32
  }
  func.func @transform_4(%arg0: i32) -> (i32, i32, i32) {
    %c0_i32 = arith.constant 0 : i32
    %c0_i32_0 = arith.constant 0 : i32
    %c0_i32_1 = arith.constant 0 : i32
    %c0_i32_2 = arith.constant 0 : i32
    return %c0_i32, %c0_i32_0, %c0_i32_1 : i32, i32, i32
  }
  func.func @transform_5(%arg0: i32) -> (i32, i32) {
    %c0_i32 = arith.constant 0 : i32
    %c0_i32_0 = arith.constant 0 : i32
    %c0_i32_1 = arith.constant 0 : i32
    return %c0_i32, %c0_i32_0 : i32, i32
  }
  func.func @transform_6(%arg0: i32) -> (i32, i32) {
    %c0_i32 = arith.constant 0 : i32
    %c0_i32_0 = arith.constant 0 : i32
    %c0_i32_1 = arith.constant 0 : i32
    return %c0_i32, %c0_i32_0 : i32, i32
  }
  func.func @transform_7(%arg0: i32) -> (i32, i32) {
    %c0_i32 = arith.constant 0 : i32
    %c0_i32_0 = arith.constant 0 : i32
    %c0_i32_1 = arith.constant 0 : i32
    return %c0_i32, %c0_i32_0 : i32, i32
  }
  func.func @transform_8(%arg0: i32) -> (i32, i32) {
    %c0_i32 = arith.constant 0 : i32
    %c0_i32_0 = arith.constant 0 : i32
    %c0_i32_1 = arith.constant 0 : i32
    return %c0_i32, %c0_i32_0 : i32, i32
  }
  func.func @transform_9(%arg0: i32) -> (i32, i32) {
    %c0_i32 = arith.constant 0 : i32
    %c0_i32_0 = arith.constant 0 : i32
    %c0_i32_1 = arith.constant 0 : i32
    return %c0_i32, %c0_i32_0 : i32, i32
  }
  func.func @transform_10(%arg0: i32) -> (i32, i32) {
    %c0_i32 = arith.constant 0 : i32
    %c0_i32_0 = arith.constant 0 : i32
    %c0_i32_1 = arith.constant 0 : i32
    return %c0_i32, %c0_i32_0 : i32, i32
  }
  func.func @transform_11(%arg0: i32) -> (i32, i32) {
    %c0_i32 = arith.constant 0 : i32
    %c0_i32_0 = arith.constant 0 : i32
    %c0_i32_1 = arith.constant 0 : i32
    return %c0_i32, %c0_i32_0 : i32, i32
  }
  func.func @transform_12(%arg0: i32) -> (i32, i32) {
    %c0_i32 = arith.constant 0 : i32
    %c0_i32_0 = arith.constant 0 : i32
    %c0_i32_1 = arith.constant 0 : i32
    return %c0_i32, %c0_i32_0 : i32, i32
  }
  func.func @transform_13(%arg0: i32) -> (i32, i32) {
    %c0_i32 = arith.constant 0 : i32
    %c0_i32_0 = arith.constant 0 : i32
    %c0_i32_1 = arith.constant 0 : i32
    return %c0_i32, %c0_i32_0 : i32, i32
  }
  func.func @transform_14(%arg0: i32) -> (i32, i32, i32) {
    %c0_i32 = arith.constant 0 : i32
    %c0_i32_0 = arith.constant 0 : i32
    %c0_i32_1 = arith.constant 0 : i32
    return %arg0, %c0_i32, %c0_i32_0 : i32, i32, i32
  }
}

module attributes {stable_mosaic.version = 11 : i64} {
  func.func @_bilstm_kernel(%arg0: i32, %arg1: memref<8x2x32xf32, #tpu.memory_space<vmem>>, %arg2: memref<1x4x32x16xf32, #tpu.memory_space<vmem>>, %arg3: memref<1x4x16x16xf32, #tpu.memory_space<vmem>>, %arg4: memref<1x4x1x16xf32, #tpu.memory_space<vmem>>, %arg5: memref<1x8x2x16xf32, #tpu.memory_space<vmem>>, %arg6: memref<1x2x16xf32, #tpu.memory_space<vmem>>, %arg7: memref<2x16xf32, #tpu.memory_space<vmem>>, %arg8: memref<2x16xf32, #tpu.memory_space<vmem>>) attributes {dimension_semantics = [#tpu.dimension_semantics<parallel>], iteration_bounds = array<i64: 2>, scalar_prefetch = 0 : i64, scratch_operands = 2 : i64, tpu.core_type = #tpu.core_type<tc>, window_params = [{pipeline_mode = #tpu.pipeline_mode<synchronous>, transform_indices = @transform_0, window_bounds = array<i64: 8, 2, 32>}, {transform_indices = @transform_1, window_bounds = array<i64: 1, 4, 32, 16>}, {transform_indices = @transform_2, window_bounds = array<i64: 1, 4, 16, 16>}, {transform_indices = @transform_3, window_bounds = array<i64: 1, 4, 1, 16>}, {transform_indices = @transform_4, window_bounds = array<i64: 1, 8, 2, 16>}, {transform_indices = @transform_5, window_bounds = array<i64: 1, 2, 16>}]} {
    %c1_i32 = arith.constant 1 : i32
    %0 = arith.cmpi eq, %arg0, %c1_i32 : i32
    %c0 = arith.constant 0 : index
    %c0_0 = arith.constant 0 : index
    %c0_1 = arith.constant 0 : index
    %c0_2 = arith.constant 0 : index
    %1 = vector.load %arg2[%c0, %c0_0, %c0_1, %c0_2] : memref<1x4x32x16xf32, #tpu.memory_space<vmem>>, vector<1x4x32x16xf32>
    %2 = vector.shape_cast %1 : vector<1x4x32x16xf32> to vector<4x32x16xf32>
    %c0_3 = arith.constant 0 : index
    %c0_4 = arith.constant 0 : index
    %c0_5 = arith.constant 0 : index
    %c0_6 = arith.constant 0 : index
    %3 = vector.load %arg3[%c0_3, %c0_4, %c0_5, %c0_6] : memref<1x4x16x16xf32, #tpu.memory_space<vmem>>, vector<1x4x16x16xf32>
    %4 = vector.shape_cast %3 : vector<1x4x16x16xf32> to vector<4x16x16xf32>
    %c0_7 = arith.constant 0 : index
    %c0_8 = arith.constant 0 : index
    %c0_9 = arith.constant 0 : index
    %c0_10 = arith.constant 0 : index
    %5 = vector.load %arg4[%c0_7, %c0_8, %c0_9, %c0_10] : memref<1x4x1x16xf32, #tpu.memory_space<vmem>>, vector<1x4x1x16xf32>
    %6 = vector.shape_cast %5 : vector<1x4x1x16xf32> to vector<4x1x16xf32>
    %7 = vector.shape_cast %6 : vector<4x1x16xf32> to vector<4x1x16xf32>
    %8 = vector.broadcast %7 : vector<4x1x16xf32> to vector<4x2x16xf32>
    %cst = arith.constant 0.000000e+00 : f32
    %9 = vector.broadcast %cst : f32 to vector<2x16xf32>
    %c0_11 = arith.constant 0 : index
    %c0_12 = arith.constant 0 : index
    %10 = vector.load %arg7[%c0_11, %c0_12] : memref<2x16xf32, #tpu.memory_space<vmem>>, vector<2x16xf32>
    tpu.vector_store %arg7[%c0_11, %c0_12], %9 {strides = array<i32>} : memref<2x16xf32, #tpu.memory_space<vmem>>, vector<2x16xf32>,
    %cst_13 = arith.constant 0.000000e+00 : f32
    %11 = vector.broadcast %cst_13 : f32 to vector<2x16xf32>
    %c0_14 = arith.constant 0 : index
    %c0_15 = arith.constant 0 : index
    %12 = vector.load %arg8[%c0_14, %c0_15] : memref<2x16xf32, #tpu.memory_space<vmem>>, vector<2x16xf32>
    tpu.vector_store %arg8[%c0_14, %c0_15], %11 {strides = array<i32>} : memref<2x16xf32, #tpu.memory_space<vmem>>, vector<2x16xf32>,
    %c7_i32 = arith.constant 7 : i32
    %c0_i32 = arith.constant 0 : i32
    %13 = arith.select %0, %c7_i32, %c0_i32 : i32
    %14 = arith.index_cast %13 : i32 to index
    %c0_16 = arith.constant 0 : index
    %c0_17 = arith.constant 0 : index
    %15 = vector.load %arg1[%14, %c0_16, %c0_17] : memref<8x2x32xf32, #tpu.memory_space<vmem>>, vector<1x2x32xf32>
    %16 = vector.shape_cast %15 : vector<1x2x32xf32> to vector<2x32xf32>
    %17 = vector.shape_cast %16 : vector<2x32xf32> to vector<1x2x32xf32>
    %18 = vector.broadcast %17 : vector<1x2x32xf32> to vector<4x2x32xf32>
    %c0_18 = arith.constant 0 : index
    %c0_19 = arith.constant 0 : index
    %19 = vector.load %arg7[%c0_18, %c0_19] : memref<2x16xf32, #tpu.memory_space<vmem>>, vector<2x16xf32>
    %20 = vector.shape_cast %19 : vector<2x16xf32> to vector<1x2x16xf32>
    %21 = vector.broadcast %20 : vector<1x2x16xf32> to vector<4x2x16xf32>
    %cst_20 = arith.constant dense<0.000000e+00> : vector<4x2x16xf32>
    %22 = tpu.matmul %18, %2, %cst_20 {dimension_numbers = #tpu.dot_dimension_numbers<[2], [1], [1], [2], [0, 0, 0, 1, 1, 2], [0], [0]>} : vector<4x2x32xf32>, vector<4x32x16xf32>, vector<4x2x16xf32> -> vector<4x2x16xf32>
    %cst_21 = arith.constant dense<0.000000e+00> : vector<4x2x16xf32>
    %23 = tpu.matmul %21, %4, %cst_21 {dimension_numbers = #tpu.dot_dimension_numbers<[2], [1], [1], [2], [0, 0, 0, 1, 1, 2], [0], [0]>} : vector<4x2x16xf32>, vector<4x16x16xf32>, vector<4x2x16xf32> -> vector<4x2x16xf32>
    %24 = arith.addf %22, %23 : vector<4x2x16xf32>
    %25 = arith.addf %24, %8 : vector<4x2x16xf32>
    %26 = vector.extract_strided_slice %25 {offsets = [0, 0, 0], sizes = [1, 2, 16], strides = [1, 1, 1]} : vector<4x2x16xf32> to vector<1x2x16xf32>
    %27 = vector.shape_cast %26 : vector<1x2x16xf32> to vector<2x16xf32>
    %28 = arith.negf %27 : vector<2x16xf32>
    %29 = math.exp %28 : vector<2x16xf32>
    %cst_22 = arith.constant 1.000000e+00 : f32
    %30 = vector.broadcast %cst_22 : f32 to vector<2x16xf32>
    %31 = arith.addf %30, %29 : vector<2x16xf32>
    %32 = arith.divf %30, %31 : vector<2x16xf32>
    %33 = vector.extract_strided_slice %25 {offsets = [1, 0, 0], sizes = [1, 2, 16], strides = [1, 1, 1]} : vector<4x2x16xf32> to vector<1x2x16xf32>
    %34 = vector.shape_cast %33 : vector<1x2x16xf32> to vector<2x16xf32>
    %35 = arith.negf %34 : vector<2x16xf32>
    %36 = math.exp %35 : vector<2x16xf32>
    %cst_23 = arith.constant 1.000000e+00 : f32
    %37 = vector.broadcast %cst_23 : f32 to vector<2x16xf32>
    %38 = arith.addf %37, %36 : vector<2x16xf32>
    %39 = arith.divf %37, %38 : vector<2x16xf32>
    %40 = vector.extract_strided_slice %25 {offsets = [2, 0, 0], sizes = [1, 2, 16], strides = [1, 1, 1]} : vector<4x2x16xf32> to vector<1x2x16xf32>
    %41 = vector.shape_cast %40 : vector<1x2x16xf32> to vector<2x16xf32>
    %42 = math.tanh %41 : vector<2x16xf32>
    %43 = vector.extract_strided_slice %25 {offsets = [3, 0, 0], sizes = [1, 2, 16], strides = [1, 1, 1]} : vector<4x2x16xf32> to vector<1x2x16xf32>
    %44 = vector.shape_cast %43 : vector<1x2x16xf32> to vector<2x16xf32>
    %45 = arith.negf %44 : vector<2x16xf32>
    %46 = math.exp %45 : vector<2x16xf32>
    %cst_24 = arith.constant 1.000000e+00 : f32
    %47 = vector.broadcast %cst_24 : f32 to vector<2x16xf32>
    %48 = arith.addf %47, %46 : vector<2x16xf32>
    %49 = arith.divf %47, %48 : vector<2x16xf32>
    %c0_25 = arith.constant 0 : index
    %c0_26 = arith.constant 0 : index
    %50 = vector.load %arg8[%c0_25, %c0_26] : memref<2x16xf32, #tpu.memory_space<vmem>>, vector<2x16xf32>
    %51 = arith.mulf %39, %50 : vector<2x16xf32>
    %52 = arith.mulf %32, %42 : vector<2x16xf32>
    %53 = arith.addf %51, %52 : vector<2x16xf32>
    %54 = math.tanh %53 : vector<2x16xf32>
    %55 = arith.mulf %49, %54 : vector<2x16xf32>
    %c0_27 = arith.constant 0 : index
    %c0_28 = arith.constant 0 : index
    %56 = vector.load %arg7[%c0_27, %c0_28] : memref<2x16xf32, #tpu.memory_space<vmem>>, vector<2x16xf32>
    tpu.vector_store %arg7[%c0_27, %c0_28], %55 {strides = array<i32>} : memref<2x16xf32, #tpu.memory_space<vmem>>, vector<2x16xf32>,
    %c0_29 = arith.constant 0 : index
    %c0_30 = arith.constant 0 : index
    %57 = vector.load %arg8[%c0_29, %c0_30] : memref<2x16xf32, #tpu.memory_space<vmem>>, vector<2x16xf32>
    tpu.vector_store %arg8[%c0_29, %c0_30], %53 {strides = array<i32>} : memref<2x16xf32, #tpu.memory_space<vmem>>, vector<2x16xf32>,
    %c0_31 = arith.constant 0 : index
    %58 = arith.index_cast %13 : i32 to index
    %c0_32 = arith.constant 0 : index
    %c0_33 = arith.constant 0 : index
    %59 = vector.load %arg5[%c0_31, %58, %c0_32, %c0_33] : memref<1x8x2x16xf32, #tpu.memory_space<vmem>>, vector<1x1x2x16xf32>
    %60 = vector.shape_cast %59 : vector<1x1x2x16xf32> to vector<2x16xf32>
    %61 = vector.shape_cast %55 : vector<2x16xf32> to vector<1x1x2x16xf32>
    tpu.vector_store %arg5[%c0_31, %58, %c0_32, %c0_33], %61 {strides = array<i32>} : memref<1x8x2x16xf32, #tpu.memory_space<vmem>>, vector<1x1x2x16xf32>,
    %c6_i32 = arith.constant 6 : i32
    %c1_i32_34 = arith.constant 1 : i32
    %62 = arith.select %0, %c6_i32, %c1_i32_34 : i32
    %63 = arith.index_cast %62 : i32 to index
    %c0_35 = arith.constant 0 : index
    %c0_36 = arith.constant 0 : index
    %64 = vector.load %arg1[%63, %c0_35, %c0_36] : memref<8x2x32xf32, #tpu.memory_space<vmem>>, vector<1x2x32xf32>
    %65 = vector.shape_cast %64 : vector<1x2x32xf32> to vector<2x32xf32>
    %66 = vector.shape_cast %65 : vector<2x32xf32> to vector<1x2x32xf32>
    %67 = vector.broadcast %66 : vector<1x2x32xf32> to vector<4x2x32xf32>
    %c0_37 = arith.constant 0 : index
    %c0_38 = arith.constant 0 : index
    %68 = vector.load %arg7[%c0_37, %c0_38] : memref<2x16xf32, #tpu.memory_space<vmem>>, vector<2x16xf32>
    %69 = vector.shape_cast %68 : vector<2x16xf32> to vector<1x2x16xf32>
    %70 = vector.broadcast %69 : vector<1x2x16xf32> to vector<4x2x16xf32>
    %cst_39 = arith.constant dense<0.000000e+00> : vector<4x2x16xf32>
    %71 = tpu.matmul %67, %2, %cst_39 {dimension_numbers = #tpu.dot_dimension_numbers<[2], [1], [1], [2], [0, 0, 0, 1, 1, 2], [0], [0]>} : vector<4x2x32xf32>, vector<4x32x16xf32>, vector<4x2x16xf32> -> vector<4x2x16xf32>
    %cst_40 = arith.constant dense<0.000000e+00> : vector<4x2x16xf32>
    %72 = tpu.matmul %70, %4, %cst_40 {dimension_numbers = #tpu.dot_dimension_numbers<[2], [1], [1], [2], [0, 0, 0, 1, 1, 2], [0], [0]>} : vector<4x2x16xf32>, vector<4x16x16xf32>, vector<4x2x16xf32> -> vector<4x2x16xf32>
    %73 = arith.addf %71, %72 : vector<4x2x16xf32>
    %74 = arith.addf %73, %8 : vector<4x2x16xf32>
    %75 = vector.extract_strided_slice %74 {offsets = [0, 0, 0], sizes = [1, 2, 16], strides = [1, 1, 1]} : vector<4x2x16xf32> to vector<1x2x16xf32>
    %76 = vector.shape_cast %75 : vector<1x2x16xf32> to vector<2x16xf32>
    %77 = arith.negf %76 : vector<2x16xf32>
    %78 = math.exp %77 : vector<2x16xf32>
    %cst_41 = arith.constant 1.000000e+00 : f32
    %79 = vector.broadcast %cst_41 : f32 to vector<2x16xf32>
    %80 = arith.addf %79, %78 : vector<2x16xf32>
    %81 = arith.divf %79, %80 : vector<2x16xf32>
    %82 = vector.extract_strided_slice %74 {offsets = [1, 0, 0], sizes = [1, 2, 16], strides = [1, 1, 1]} : vector<4x2x16xf32> to vector<1x2x16xf32>
    %83 = vector.shape_cast %82 : vector<1x2x16xf32> to vector<2x16xf32>
    %84 = arith.negf %83 : vector<2x16xf32>
    %85 = math.exp %84 : vector<2x16xf32>
    %cst_42 = arith.constant 1.000000e+00 : f32
    %86 = vector.broadcast %cst_42 : f32 to vector<2x16xf32>
    %87 = arith.addf %86, %85 : vector<2x16xf32>
    %88 = arith.divf %86, %87 : vector<2x16xf32>
    %89 = vector.extract_strided_slice %74 {offsets = [2, 0, 0], sizes = [1, 2, 16], strides = [1, 1, 1]} : vector<4x2x16xf32> to vector<1x2x16xf32>
    %90 = vector.shape_cast %89 : vector<1x2x16xf32> to vector<2x16xf32>
    %91 = math.tanh %90 : vector<2x16xf32>
    %92 = vector.extract_strided_slice %74 {offsets = [3, 0, 0], sizes = [1, 2, 16], strides = [1, 1, 1]} : vector<4x2x16xf32> to vector<1x2x16xf32>
    %93 = vector.shape_cast %92 : vector<1x2x16xf32> to vector<2x16xf32>
    %94 = arith.negf %93 : vector<2x16xf32>
    %95 = math.exp %94 : vector<2x16xf32>
    %cst_43 = arith.constant 1.000000e+00 : f32
    %96 = vector.broadcast %cst_43 : f32 to vector<2x16xf32>
    %97 = arith.addf %96, %95 : vector<2x16xf32>
    %98 = arith.divf %96, %97 : vector<2x16xf32>
    %c0_44 = arith.constant 0 : index
    %c0_45 = arith.constant 0 : index
    %99 = vector.load %arg8[%c0_44, %c0_45] : memref<2x16xf32, #tpu.memory_space<vmem>>, vector<2x16xf32>
    %100 = arith.mulf %88, %99 : vector<2x16xf32>
    %101 = arith.mulf %81, %91 : vector<2x16xf32>
    %102 = arith.addf %100, %101 : vector<2x16xf32>
    %103 = math.tanh %102 : vector<2x16xf32>
    %104 = arith.mulf %98, %103 : vector<2x16xf32>
    %c0_46 = arith.constant 0 : index
    %c0_47 = arith.constant 0 : index
    %105 = vector.load %arg7[%c0_46, %c0_47] : memref<2x16xf32, #tpu.memory_space<vmem>>, vector<2x16xf32>
    tpu.vector_store %arg7[%c0_46, %c0_47], %104 {strides = array<i32>} : memref<2x16xf32, #tpu.memory_space<vmem>>, vector<2x16xf32>,
    %c0_48 = arith.constant 0 : index
    %c0_49 = arith.constant 0 : index
    %106 = vector.load %arg8[%c0_48, %c0_49] : memref<2x16xf32, #tpu.memory_space<vmem>>, vector<2x16xf32>
    tpu.vector_store %arg8[%c0_48, %c0_49], %102 {strides = array<i32>} : memref<2x16xf32, #tpu.memory_space<vmem>>, vector<2x16xf32>,
    %c0_50 = arith.constant 0 : index
    %107 = arith.index_cast %62 : i32 to index
    %c0_51 = arith.constant 0 : index
    %c0_52 = arith.constant 0 : index
    %108 = vector.load %arg5[%c0_50, %107, %c0_51, %c0_52] : memref<1x8x2x16xf32, #tpu.memory_space<vmem>>, vector<1x1x2x16xf32>
    %109 = vector.shape_cast %108 : vector<1x1x2x16xf32> to vector<2x16xf32>
    %110 = vector.shape_cast %104 : vector<2x16xf32> to vector<1x1x2x16xf32>
    tpu.vector_store %arg5[%c0_50, %107, %c0_51, %c0_52], %110 {strides = array<i32>} : memref<1x8x2x16xf32, #tpu.memory_space<vmem>>, vector<1x1x2x16xf32>,
    %c5_i32 = arith.constant 5 : i32
    %c2_i32 = arith.constant 2 : i32
    %111 = arith.select %0, %c5_i32, %c2_i32 : i32
    %112 = arith.index_cast %111 : i32 to index
    %c0_53 = arith.constant 0 : index
    %c0_54 = arith.constant 0 : index
    %113 = vector.load %arg1[%112, %c0_53, %c0_54] : memref<8x2x32xf32, #tpu.memory_space<vmem>>, vector<1x2x32xf32>
    %114 = vector.shape_cast %113 : vector<1x2x32xf32> to vector<2x32xf32>
    %115 = vector.shape_cast %114 : vector<2x32xf32> to vector<1x2x32xf32>
    %116 = vector.broadcast %115 : vector<1x2x32xf32> to vector<4x2x32xf32>
    %c0_55 = arith.constant 0 : index
    %c0_56 = arith.constant 0 : index
    %117 = vector.load %arg7[%c0_55, %c0_56] : memref<2x16xf32, #tpu.memory_space<vmem>>, vector<2x16xf32>
    %118 = vector.shape_cast %117 : vector<2x16xf32> to vector<1x2x16xf32>
    %119 = vector.broadcast %118 : vector<1x2x16xf32> to vector<4x2x16xf32>
    %cst_57 = arith.constant dense<0.000000e+00> : vector<4x2x16xf32>
    %120 = tpu.matmul %116, %2, %cst_57 {dimension_numbers = #tpu.dot_dimension_numbers<[2], [1], [1], [2], [0, 0, 0, 1, 1, 2], [0], [0]>} : vector<4x2x32xf32>, vector<4x32x16xf32>, vector<4x2x16xf32> -> vector<4x2x16xf32>
    %cst_58 = arith.constant dense<0.000000e+00> : vector<4x2x16xf32>
    %121 = tpu.matmul %119, %4, %cst_58 {dimension_numbers = #tpu.dot_dimension_numbers<[2], [1], [1], [2], [0, 0, 0, 1, 1, 2], [0], [0]>} : vector<4x2x16xf32>, vector<4x16x16xf32>, vector<4x2x16xf32> -> vector<4x2x16xf32>
    %122 = arith.addf %120, %121 : vector<4x2x16xf32>
    %123 = arith.addf %122, %8 : vector<4x2x16xf32>
    %124 = vector.extract_strided_slice %123 {offsets = [0, 0, 0], sizes = [1, 2, 16], strides = [1, 1, 1]} : vector<4x2x16xf32> to vector<1x2x16xf32>
    %125 = vector.shape_cast %124 : vector<1x2x16xf32> to vector<2x16xf32>
    %126 = arith.negf %125 : vector<2x16xf32>
    %127 = math.exp %126 : vector<2x16xf32>
    %cst_59 = arith.constant 1.000000e+00 : f32
    %128 = vector.broadcast %cst_59 : f32 to vector<2x16xf32>
    %129 = arith.addf %128, %127 : vector<2x16xf32>
    %130 = arith.divf %128, %129 : vector<2x16xf32>
    %131 = vector.extract_strided_slice %123 {offsets = [1, 0, 0], sizes = [1, 2, 16], strides = [1, 1, 1]} : vector<4x2x16xf32> to vector<1x2x16xf32>
    %132 = vector.shape_cast %131 : vector<1x2x16xf32> to vector<2x16xf32>
    %133 = arith.negf %132 : vector<2x16xf32>
    %134 = math.exp %133 : vector<2x16xf32>
    %cst_60 = arith.constant 1.000000e+00 : f32
    %135 = vector.broadcast %cst_60 : f32 to vector<2x16xf32>
    %136 = arith.addf %135, %134 : vector<2x16xf32>
    %137 = arith.divf %135, %136 : vector<2x16xf32>
    %138 = vector.extract_strided_slice %123 {offsets = [2, 0, 0], sizes = [1, 2, 16], strides = [1, 1, 1]} : vector<4x2x16xf32> to vector<1x2x16xf32>
    %139 = vector.shape_cast %138 : vector<1x2x16xf32> to vector<2x16xf32>
    %140 = math.tanh %139 : vector<2x16xf32>
    %141 = vector.extract_strided_slice %123 {offsets = [3, 0, 0], sizes = [1, 2, 16], strides = [1, 1, 1]} : vector<4x2x16xf32> to vector<1x2x16xf32>
    %142 = vector.shape_cast %141 : vector<1x2x16xf32> to vector<2x16xf32>
    %143 = arith.negf %142 : vector<2x16xf32>
    %144 = math.exp %143 : vector<2x16xf32>
    %cst_61 = arith.constant 1.000000e+00 : f32
    %145 = vector.broadcast %cst_61 : f32 to vector<2x16xf32>
    %146 = arith.addf %145, %144 : vector<2x16xf32>
    %147 = arith.divf %145, %146 : vector<2x16xf32>
    %c0_62 = arith.constant 0 : index
    %c0_63 = arith.constant 0 : index
    %148 = vector.load %arg8[%c0_62, %c0_63] : memref<2x16xf32, #tpu.memory_space<vmem>>, vector<2x16xf32>
    %149 = arith.mulf %137, %148 : vector<2x16xf32>
    %150 = arith.mulf %130, %140 : vector<2x16xf32>
    %151 = arith.addf %149, %150 : vector<2x16xf32>
    %152 = math.tanh %151 : vector<2x16xf32>
    %153 = arith.mulf %147, %152 : vector<2x16xf32>
    %c0_64 = arith.constant 0 : index
    %c0_65 = arith.constant 0 : index
    %154 = vector.load %arg7[%c0_64, %c0_65] : memref<2x16xf32, #tpu.memory_space<vmem>>, vector<2x16xf32>
    tpu.vector_store %arg7[%c0_64, %c0_65], %153 {strides = array<i32>} : memref<2x16xf32, #tpu.memory_space<vmem>>, vector<2x16xf32>,
    %c0_66 = arith.constant 0 : index
    %c0_67 = arith.constant 0 : index
    %155 = vector.load %arg8[%c0_66, %c0_67] : memref<2x16xf32, #tpu.memory_space<vmem>>, vector<2x16xf32>
    tpu.vector_store %arg8[%c0_66, %c0_67], %151 {strides = array<i32>} : memref<2x16xf32, #tpu.memory_space<vmem>>, vector<2x16xf32>,
    %c0_68 = arith.constant 0 : index
    %156 = arith.index_cast %111 : i32 to index
    %c0_69 = arith.constant 0 : index
    %c0_70 = arith.constant 0 : index
    %157 = vector.load %arg5[%c0_68, %156, %c0_69, %c0_70] : memref<1x8x2x16xf32, #tpu.memory_space<vmem>>, vector<1x1x2x16xf32>
    %158 = vector.shape_cast %157 : vector<1x1x2x16xf32> to vector<2x16xf32>
    %159 = vector.shape_cast %153 : vector<2x16xf32> to vector<1x1x2x16xf32>
    tpu.vector_store %arg5[%c0_68, %156, %c0_69, %c0_70], %159 {strides = array<i32>} : memref<1x8x2x16xf32, #tpu.memory_space<vmem>>, vector<1x1x2x16xf32>,
    %c4_i32 = arith.constant 4 : i32
    %c3_i32 = arith.constant 3 : i32
    %160 = arith.select %0, %c4_i32, %c3_i32 : i32
    %161 = arith.index_cast %160 : i32 to index
    %c0_71 = arith.constant 0 : index
    %c0_72 = arith.constant 0 : index
    %162 = vector.load %arg1[%161, %c0_71, %c0_72] : memref<8x2x32xf32, #tpu.memory_space<vmem>>, vector<1x2x32xf32>
    %163 = vector.shape_cast %162 : vector<1x2x32xf32> to vector<2x32xf32>
    %164 = vector.shape_cast %163 : vector<2x32xf32> to vector<1x2x32xf32>
    %165 = vector.broadcast %164 : vector<1x2x32xf32> to vector<4x2x32xf32>
    %c0_73 = arith.constant 0 : index
    %c0_74 = arith.constant 0 : index
    %166 = vector.load %arg7[%c0_73, %c0_74] : memref<2x16xf32, #tpu.memory_space<vmem>>, vector<2x16xf32>
    %167 = vector.shape_cast %166 : vector<2x16xf32> to vector<1x2x16xf32>
    %168 = vector.broadcast %167 : vector<1x2x16xf32> to vector<4x2x16xf32>
    %cst_75 = arith.constant dense<0.000000e+00> : vector<4x2x16xf32>
    %169 = tpu.matmul %165, %2, %cst_75 {dimension_numbers = #tpu.dot_dimension_numbers<[2], [1], [1], [2], [0, 0, 0, 1, 1, 2], [0], [0]>} : vector<4x2x32xf32>, vector<4x32x16xf32>, vector<4x2x16xf32> -> vector<4x2x16xf32>
    %cst_76 = arith.constant dense<0.000000e+00> : vector<4x2x16xf32>
    %170 = tpu.matmul %168, %4, %cst_76 {dimension_numbers = #tpu.dot_dimension_numbers<[2], [1], [1], [2], [0, 0, 0, 1, 1, 2], [0], [0]>} : vector<4x2x16xf32>, vector<4x16x16xf32>, vector<4x2x16xf32> -> vector<4x2x16xf32>
    %171 = arith.addf %169, %170 : vector<4x2x16xf32>
    %172 = arith.addf %171, %8 : vector<4x2x16xf32>
    %173 = vector.extract_strided_slice %172 {offsets = [0, 0, 0], sizes = [1, 2, 16], strides = [1, 1, 1]} : vector<4x2x16xf32> to vector<1x2x16xf32>
    %174 = vector.shape_cast %173 : vector<1x2x16xf32> to vector<2x16xf32>
    %175 = arith.negf %174 : vector<2x16xf32>
    %176 = math.exp %175 : vector<2x16xf32>
    %cst_77 = arith.constant 1.000000e+00 : f32
    %177 = vector.broadcast %cst_77 : f32 to vector<2x16xf32>
    %178 = arith.addf %177, %176 : vector<2x16xf32>
    %179 = arith.divf %177, %178 : vector<2x16xf32>
    %180 = vector.extract_strided_slice %172 {offsets = [1, 0, 0], sizes = [1, 2, 16], strides = [1, 1, 1]} : vector<4x2x16xf32> to vector<1x2x16xf32>
    %181 = vector.shape_cast %180 : vector<1x2x16xf32> to vector<2x16xf32>
    %182 = arith.negf %181 : vector<2x16xf32>
    %183 = math.exp %182 : vector<2x16xf32>
    %cst_78 = arith.constant 1.000000e+00 : f32
    %184 = vector.broadcast %cst_78 : f32 to vector<2x16xf32>
    %185 = arith.addf %184, %183 : vector<2x16xf32>
    %186 = arith.divf %184, %185 : vector<2x16xf32>
    %187 = vector.extract_strided_slice %172 {offsets = [2, 0, 0], sizes = [1, 2, 16], strides = [1, 1, 1]} : vector<4x2x16xf32> to vector<1x2x16xf32>
    %188 = vector.shape_cast %187 : vector<1x2x16xf32> to vector<2x16xf32>
    %189 = math.tanh %188 : vector<2x16xf32>
    %190 = vector.extract_strided_slice %172 {offsets = [3, 0, 0], sizes = [1, 2, 16], strides = [1, 1, 1]} : vector<4x2x16xf32> to vector<1x2x16xf32>
    %191 = vector.shape_cast %190 : vector<1x2x16xf32> to vector<2x16xf32>
    %192 = arith.negf %191 : vector<2x16xf32>
    %193 = math.exp %192 : vector<2x16xf32>
    %cst_79 = arith.constant 1.000000e+00 : f32
    %194 = vector.broadcast %cst_79 : f32 to vector<2x16xf32>
    %195 = arith.addf %194, %193 : vector<2x16xf32>
    %196 = arith.divf %194, %195 : vector<2x16xf32>
    %c0_80 = arith.constant 0 : index
    %c0_81 = arith.constant 0 : index
    %197 = vector.load %arg8[%c0_80, %c0_81] : memref<2x16xf32, #tpu.memory_space<vmem>>, vector<2x16xf32>
    %198 = arith.mulf %186, %197 : vector<2x16xf32>
    %199 = arith.mulf %179, %189 : vector<2x16xf32>
    %200 = arith.addf %198, %199 : vector<2x16xf32>
    %201 = math.tanh %200 : vector<2x16xf32>
    %202 = arith.mulf %196, %201 : vector<2x16xf32>
    %c0_82 = arith.constant 0 : index
    %c0_83 = arith.constant 0 : index
    %203 = vector.load %arg7[%c0_82, %c0_83] : memref<2x16xf32, #tpu.memory_space<vmem>>, vector<2x16xf32>
    tpu.vector_store %arg7[%c0_82, %c0_83], %202 {strides = array<i32>} : memref<2x16xf32, #tpu.memory_space<vmem>>, vector<2x16xf32>,
    %c0_84 = arith.constant 0 : index
    %c0_85 = arith.constant 0 : index
    %204 = vector.load %arg8[%c0_84, %c0_85] : memref<2x16xf32, #tpu.memory_space<vmem>>, vector<2x16xf32>
    tpu.vector_store %arg8[%c0_84, %c0_85], %200 {strides = array<i32>} : memref<2x16xf32, #tpu.memory_space<vmem>>, vector<2x16xf32>,
    %c0_86 = arith.constant 0 : index
    %205 = arith.index_cast %160 : i32 to index
    %c0_87 = arith.constant 0 : index
    %c0_88 = arith.constant 0 : index
    %206 = vector.load %arg5[%c0_86, %205, %c0_87, %c0_88] : memref<1x8x2x16xf32, #tpu.memory_space<vmem>>, vector<1x1x2x16xf32>
    %207 = vector.shape_cast %206 : vector<1x1x2x16xf32> to vector<2x16xf32>
    %208 = vector.shape_cast %202 : vector<2x16xf32> to vector<1x1x2x16xf32>
    tpu.vector_store %arg5[%c0_86, %205, %c0_87, %c0_88], %208 {strides = array<i32>} : memref<1x8x2x16xf32, #tpu.memory_space<vmem>>, vector<1x1x2x16xf32>,
    %c3_i32_89 = arith.constant 3 : i32
    %c4_i32_90 = arith.constant 4 : i32
    %209 = arith.select %0, %c3_i32_89, %c4_i32_90 : i32
    %210 = arith.index_cast %209 : i32 to index
    %c0_91 = arith.constant 0 : index
    %c0_92 = arith.constant 0 : index
    %211 = vector.load %arg1[%210, %c0_91, %c0_92] : memref<8x2x32xf32, #tpu.memory_space<vmem>>, vector<1x2x32xf32>
    %212 = vector.shape_cast %211 : vector<1x2x32xf32> to vector<2x32xf32>
    %213 = vector.shape_cast %212 : vector<2x32xf32> to vector<1x2x32xf32>
    %214 = vector.broadcast %213 : vector<1x2x32xf32> to vector<4x2x32xf32>
    %c0_93 = arith.constant 0 : index
    %c0_94 = arith.constant 0 : index
    %215 = vector.load %arg7[%c0_93, %c0_94] : memref<2x16xf32, #tpu.memory_space<vmem>>, vector<2x16xf32>
    %216 = vector.shape_cast %215 : vector<2x16xf32> to vector<1x2x16xf32>
    %217 = vector.broadcast %216 : vector<1x2x16xf32> to vector<4x2x16xf32>
    %cst_95 = arith.constant dense<0.000000e+00> : vector<4x2x16xf32>
    %218 = tpu.matmul %214, %2, %cst_95 {dimension_numbers = #tpu.dot_dimension_numbers<[2], [1], [1], [2], [0, 0, 0, 1, 1, 2], [0], [0]>} : vector<4x2x32xf32>, vector<4x32x16xf32>, vector<4x2x16xf32> -> vector<4x2x16xf32>
    %cst_96 = arith.constant dense<0.000000e+00> : vector<4x2x16xf32>
    %219 = tpu.matmul %217, %4, %cst_96 {dimension_numbers = #tpu.dot_dimension_numbers<[2], [1], [1], [2], [0, 0, 0, 1, 1, 2], [0], [0]>} : vector<4x2x16xf32>, vector<4x16x16xf32>, vector<4x2x16xf32> -> vector<4x2x16xf32>
    %220 = arith.addf %218, %219 : vector<4x2x16xf32>
    %221 = arith.addf %220, %8 : vector<4x2x16xf32>
    %222 = vector.extract_strided_slice %221 {offsets = [0, 0, 0], sizes = [1, 2, 16], strides = [1, 1, 1]} : vector<4x2x16xf32> to vector<1x2x16xf32>
    %223 = vector.shape_cast %222 : vector<1x2x16xf32> to vector<2x16xf32>
    %224 = arith.negf %223 : vector<2x16xf32>
    %225 = math.exp %224 : vector<2x16xf32>
    %cst_97 = arith.constant 1.000000e+00 : f32
    %226 = vector.broadcast %cst_97 : f32 to vector<2x16xf32>
    %227 = arith.addf %226, %225 : vector<2x16xf32>
    %228 = arith.divf %226, %227 : vector<2x16xf32>
    %229 = vector.extract_strided_slice %221 {offsets = [1, 0, 0], sizes = [1, 2, 16], strides = [1, 1, 1]} : vector<4x2x16xf32> to vector<1x2x16xf32>
    %230 = vector.shape_cast %229 : vector<1x2x16xf32> to vector<2x16xf32>
    %231 = arith.negf %230 : vector<2x16xf32>
    %232 = math.exp %231 : vector<2x16xf32>
    %cst_98 = arith.constant 1.000000e+00 : f32
    %233 = vector.broadcast %cst_98 : f32 to vector<2x16xf32>
    %234 = arith.addf %233, %232 : vector<2x16xf32>
    %235 = arith.divf %233, %234 : vector<2x16xf32>
    %236 = vector.extract_strided_slice %221 {offsets = [2, 0, 0], sizes = [1, 2, 16], strides = [1, 1, 1]} : vector<4x2x16xf32> to vector<1x2x16xf32>
    %237 = vector.shape_cast %236 : vector<1x2x16xf32> to vector<2x16xf32>
    %238 = math.tanh %237 : vector<2x16xf32>
    %239 = vector.extract_strided_slice %221 {offsets = [3, 0, 0], sizes = [1, 2, 16], strides = [1, 1, 1]} : vector<4x2x16xf32> to vector<1x2x16xf32>
    %240 = vector.shape_cast %239 : vector<1x2x16xf32> to vector<2x16xf32>
    %241 = arith.negf %240 : vector<2x16xf32>
    %242 = math.exp %241 : vector<2x16xf32>
    %cst_99 = arith.constant 1.000000e+00 : f32
    %243 = vector.broadcast %cst_99 : f32 to vector<2x16xf32>
    %244 = arith.addf %243, %242 : vector<2x16xf32>
    %245 = arith.divf %243, %244 : vector<2x16xf32>
    %c0_100 = arith.constant 0 : index
    %c0_101 = arith.constant 0 : index
    %246 = vector.load %arg8[%c0_100, %c0_101] : memref<2x16xf32, #tpu.memory_space<vmem>>, vector<2x16xf32>
    %247 = arith.mulf %235, %246 : vector<2x16xf32>
    %248 = arith.mulf %228, %238 : vector<2x16xf32>
    %249 = arith.addf %247, %248 : vector<2x16xf32>
    %250 = math.tanh %249 : vector<2x16xf32>
    %251 = arith.mulf %245, %250 : vector<2x16xf32>
    %c0_102 = arith.constant 0 : index
    %c0_103 = arith.constant 0 : index
    %252 = vector.load %arg7[%c0_102, %c0_103] : memref<2x16xf32, #tpu.memory_space<vmem>>, vector<2x16xf32>
    tpu.vector_store %arg7[%c0_102, %c0_103], %251 {strides = array<i32>} : memref<2x16xf32, #tpu.memory_space<vmem>>, vector<2x16xf32>,
    %c0_104 = arith.constant 0 : index
    %c0_105 = arith.constant 0 : index
    %253 = vector.load %arg8[%c0_104, %c0_105] : memref<2x16xf32, #tpu.memory_space<vmem>>, vector<2x16xf32>
    tpu.vector_store %arg8[%c0_104, %c0_105], %249 {strides = array<i32>} : memref<2x16xf32, #tpu.memory_space<vmem>>, vector<2x16xf32>,
    %c0_106 = arith.constant 0 : index
    %254 = arith.index_cast %209 : i32 to index
    %c0_107 = arith.constant 0 : index
    %c0_108 = arith.constant 0 : index
    %255 = vector.load %arg5[%c0_106, %254, %c0_107, %c0_108] : memref<1x8x2x16xf32, #tpu.memory_space<vmem>>, vector<1x1x2x16xf32>
    %256 = vector.shape_cast %255 : vector<1x1x2x16xf32> to vector<2x16xf32>
    %257 = vector.shape_cast %251 : vector<2x16xf32> to vector<1x1x2x16xf32>
    tpu.vector_store %arg5[%c0_106, %254, %c0_107, %c0_108], %257 {strides = array<i32>} : memref<1x8x2x16xf32, #tpu.memory_space<vmem>>, vector<1x1x2x16xf32>,
    %c2_i32_109 = arith.constant 2 : i32
    %c5_i32_110 = arith.constant 5 : i32
    %258 = arith.select %0, %c2_i32_109, %c5_i32_110 : i32
    %259 = arith.index_cast %258 : i32 to index
    %c0_111 = arith.constant 0 : index
    %c0_112 = arith.constant 0 : index
    %260 = vector.load %arg1[%259, %c0_111, %c0_112] : memref<8x2x32xf32, #tpu.memory_space<vmem>>, vector<1x2x32xf32>
    %261 = vector.shape_cast %260 : vector<1x2x32xf32> to vector<2x32xf32>
    %262 = vector.shape_cast %261 : vector<2x32xf32> to vector<1x2x32xf32>
    %263 = vector.broadcast %262 : vector<1x2x32xf32> to vector<4x2x32xf32>
    %c0_113 = arith.constant 0 : index
    %c0_114 = arith.constant 0 : index
    %264 = vector.load %arg7[%c0_113, %c0_114] : memref<2x16xf32, #tpu.memory_space<vmem>>, vector<2x16xf32>
    %265 = vector.shape_cast %264 : vector<2x16xf32> to vector<1x2x16xf32>
    %266 = vector.broadcast %265 : vector<1x2x16xf32> to vector<4x2x16xf32>
    %cst_115 = arith.constant dense<0.000000e+00> : vector<4x2x16xf32>
    %267 = tpu.matmul %263, %2, %cst_115 {dimension_numbers = #tpu.dot_dimension_numbers<[2], [1], [1], [2], [0, 0, 0, 1, 1, 2], [0], [0]>} : vector<4x2x32xf32>, vector<4x32x16xf32>, vector<4x2x16xf32> -> vector<4x2x16xf32>
    %cst_116 = arith.constant dense<0.000000e+00> : vector<4x2x16xf32>
    %268 = tpu.matmul %266, %4, %cst_116 {dimension_numbers = #tpu.dot_dimension_numbers<[2], [1], [1], [2], [0, 0, 0, 1, 1, 2], [0], [0]>} : vector<4x2x16xf32>, vector<4x16x16xf32>, vector<4x2x16xf32> -> vector<4x2x16xf32>
    %269 = arith.addf %267, %268 : vector<4x2x16xf32>
    %270 = arith.addf %269, %8 : vector<4x2x16xf32>
    %271 = vector.extract_strided_slice %270 {offsets = [0, 0, 0], sizes = [1, 2, 16], strides = [1, 1, 1]} : vector<4x2x16xf32> to vector<1x2x16xf32>
    %272 = vector.shape_cast %271 : vector<1x2x16xf32> to vector<2x16xf32>
    %273 = arith.negf %272 : vector<2x16xf32>
    %274 = math.exp %273 : vector<2x16xf32>
    %cst_117 = arith.constant 1.000000e+00 : f32
    %275 = vector.broadcast %cst_117 : f32 to vector<2x16xf32>
    %276 = arith.addf %275, %274 : vector<2x16xf32>
    %277 = arith.divf %275, %276 : vector<2x16xf32>
    %278 = vector.extract_strided_slice %270 {offsets = [1, 0, 0], sizes = [1, 2, 16], strides = [1, 1, 1]} : vector<4x2x16xf32> to vector<1x2x16xf32>
    %279 = vector.shape_cast %278 : vector<1x2x16xf32> to vector<2x16xf32>
    %280 = arith.negf %279 : vector<2x16xf32>
    %281 = math.exp %280 : vector<2x16xf32>
    %cst_118 = arith.constant 1.000000e+00 : f32
    %282 = vector.broadcast %cst_118 : f32 to vector<2x16xf32>
    %283 = arith.addf %282, %281 : vector<2x16xf32>
    %284 = arith.divf %282, %283 : vector<2x16xf32>
    %285 = vector.extract_strided_slice %270 {offsets = [2, 0, 0], sizes = [1, 2, 16], strides = [1, 1, 1]} : vector<4x2x16xf32> to vector<1x2x16xf32>
    %286 = vector.shape_cast %285 : vector<1x2x16xf32> to vector<2x16xf32>
    %287 = math.tanh %286 : vector<2x16xf32>
    %288 = vector.extract_strided_slice %270 {offsets = [3, 0, 0], sizes = [1, 2, 16], strides = [1, 1, 1]} : vector<4x2x16xf32> to vector<1x2x16xf32>
    %289 = vector.shape_cast %288 : vector<1x2x16xf32> to vector<2x16xf32>
    %290 = arith.negf %289 : vector<2x16xf32>
    %291 = math.exp %290 : vector<2x16xf32>
    %cst_119 = arith.constant 1.000000e+00 : f32
    %292 = vector.broadcast %cst_119 : f32 to vector<2x16xf32>
    %293 = arith.addf %292, %291 : vector<2x16xf32>
    %294 = arith.divf %292, %293 : vector<2x16xf32>
    %c0_120 = arith.constant 0 : index
    %c0_121 = arith.constant 0 : index
    %295 = vector.load %arg8[%c0_120, %c0_121] : memref<2x16xf32, #tpu.memory_space<vmem>>, vector<2x16xf32>
    %296 = arith.mulf %284, %295 : vector<2x16xf32>
    %297 = arith.mulf %277, %287 : vector<2x16xf32>
    %298 = arith.addf %296, %297 : vector<2x16xf32>
    %299 = math.tanh %298 : vector<2x16xf32>
    %300 = arith.mulf %294, %299 : vector<2x16xf32>
    %c0_122 = arith.constant 0 : index
    %c0_123 = arith.constant 0 : index
    %301 = vector.load %arg7[%c0_122, %c0_123] : memref<2x16xf32, #tpu.memory_space<vmem>>, vector<2x16xf32>
    tpu.vector_store %arg7[%c0_122, %c0_123], %300 {strides = array<i32>} : memref<2x16xf32, #tpu.memory_space<vmem>>, vector<2x16xf32>,
    %c0_124 = arith.constant 0 : index
    %c0_125 = arith.constant 0 : index
    %302 = vector.load %arg8[%c0_124, %c0_125] : memref<2x16xf32, #tpu.memory_space<vmem>>, vector<2x16xf32>
    tpu.vector_store %arg8[%c0_124, %c0_125], %298 {strides = array<i32>} : memref<2x16xf32, #tpu.memory_space<vmem>>, vector<2x16xf32>,
    %c0_126 = arith.constant 0 : index
    %303 = arith.index_cast %258 : i32 to index
    %c0_127 = arith.constant 0 : index
    %c0_128 = arith.constant 0 : index
    %304 = vector.load %arg5[%c0_126, %303, %c0_127, %c0_128] : memref<1x8x2x16xf32, #tpu.memory_space<vmem>>, vector<1x1x2x16xf32>
    %305 = vector.shape_cast %304 : vector<1x1x2x16xf32> to vector<2x16xf32>
    %306 = vector.shape_cast %300 : vector<2x16xf32> to vector<1x1x2x16xf32>
    tpu.vector_store %arg5[%c0_126, %303, %c0_127, %c0_128], %306 {strides = array<i32>} : memref<1x8x2x16xf32, #tpu.memory_space<vmem>>, vector<1x1x2x16xf32>,
    %c1_i32_129 = arith.constant 1 : i32
    %c6_i32_130 = arith.constant 6 : i32
    %307 = arith.select %0, %c1_i32_129, %c6_i32_130 : i32
    %308 = arith.index_cast %307 : i32 to index
    %c0_131 = arith.constant 0 : index
    %c0_132 = arith.constant 0 : index
    %309 = vector.load %arg1[%308, %c0_131, %c0_132] : memref<8x2x32xf32, #tpu.memory_space<vmem>>, vector<1x2x32xf32>
    %310 = vector.shape_cast %309 : vector<1x2x32xf32> to vector<2x32xf32>
    %311 = vector.shape_cast %310 : vector<2x32xf32> to vector<1x2x32xf32>
    %312 = vector.broadcast %311 : vector<1x2x32xf32> to vector<4x2x32xf32>
    %c0_133 = arith.constant 0 : index
    %c0_134 = arith.constant 0 : index
    %313 = vector.load %arg7[%c0_133, %c0_134] : memref<2x16xf32, #tpu.memory_space<vmem>>, vector<2x16xf32>
    %314 = vector.shape_cast %313 : vector<2x16xf32> to vector<1x2x16xf32>
    %315 = vector.broadcast %314 : vector<1x2x16xf32> to vector<4x2x16xf32>
    %cst_135 = arith.constant dense<0.000000e+00> : vector<4x2x16xf32>
    %316 = tpu.matmul %312, %2, %cst_135 {dimension_numbers = #tpu.dot_dimension_numbers<[2], [1], [1], [2], [0, 0, 0, 1, 1, 2], [0], [0]>} : vector<4x2x32xf32>, vector<4x32x16xf32>, vector<4x2x16xf32> -> vector<4x2x16xf32>
    %cst_136 = arith.constant dense<0.000000e+00> : vector<4x2x16xf32>
    %317 = tpu.matmul %315, %4, %cst_136 {dimension_numbers = #tpu.dot_dimension_numbers<[2], [1], [1], [2], [0, 0, 0, 1, 1, 2], [0], [0]>} : vector<4x2x16xf32>, vector<4x16x16xf32>, vector<4x2x16xf32> -> vector<4x2x16xf32>
    %318 = arith.addf %316, %317 : vector<4x2x16xf32>
    %319 = arith.addf %318, %8 : vector<4x2x16xf32>
    %320 = vector.extract_strided_slice %319 {offsets = [0, 0, 0], sizes = [1, 2, 16], strides = [1, 1, 1]} : vector<4x2x16xf32> to vector<1x2x16xf32>
    %321 = vector.shape_cast %320 : vector<1x2x16xf32> to vector<2x16xf32>
    %322 = arith.negf %321 : vector<2x16xf32>
    %323 = math.exp %322 : vector<2x16xf32>
    %cst_137 = arith.constant 1.000000e+00 : f32
    %324 = vector.broadcast %cst_137 : f32 to vector<2x16xf32>
    %325 = arith.addf %324, %323 : vector<2x16xf32>
    %326 = arith.divf %324, %325 : vector<2x16xf32>
    %327 = vector.extract_strided_slice %319 {offsets = [1, 0, 0], sizes = [1, 2, 16], strides = [1, 1, 1]} : vector<4x2x16xf32> to vector<1x2x16xf32>
    %328 = vector.shape_cast %327 : vector<1x2x16xf32> to vector<2x16xf32>
    %329 = arith.negf %328 : vector<2x16xf32>
    %330 = math.exp %329 : vector<2x16xf32>
    %cst_138 = arith.constant 1.000000e+00 : f32
    %331 = vector.broadcast %cst_138 : f32 to vector<2x16xf32>
    %332 = arith.addf %331, %330 : vector<2x16xf32>
    %333 = arith.divf %331, %332 : vector<2x16xf32>
    %334 = vector.extract_strided_slice %319 {offsets = [2, 0, 0], sizes = [1, 2, 16], strides = [1, 1, 1]} : vector<4x2x16xf32> to vector<1x2x16xf32>
    %335 = vector.shape_cast %334 : vector<1x2x16xf32> to vector<2x16xf32>
    %336 = math.tanh %335 : vector<2x16xf32>
    %337 = vector.extract_strided_slice %319 {offsets = [3, 0, 0], sizes = [1, 2, 16], strides = [1, 1, 1]} : vector<4x2x16xf32> to vector<1x2x16xf32>
    %338 = vector.shape_cast %337 : vector<1x2x16xf32> to vector<2x16xf32>
    %339 = arith.negf %338 : vector<2x16xf32>
    %340 = math.exp %339 : vector<2x16xf32>
    %cst_139 = arith.constant 1.000000e+00 : f32
    %341 = vector.broadcast %cst_139 : f32 to vector<2x16xf32>
    %342 = arith.addf %341, %340 : vector<2x16xf32>
    %343 = arith.divf %341, %342 : vector<2x16xf32>
    %c0_140 = arith.constant 0 : index
    %c0_141 = arith.constant 0 : index
    %344 = vector.load %arg8[%c0_140, %c0_141] : memref<2x16xf32, #tpu.memory_space<vmem>>, vector<2x16xf32>
    %345 = arith.mulf %333, %344 : vector<2x16xf32>
    %346 = arith.mulf %326, %336 : vector<2x16xf32>
    %347 = arith.addf %345, %346 : vector<2x16xf32>
    %348 = math.tanh %347 : vector<2x16xf32>
    %349 = arith.mulf %343, %348 : vector<2x16xf32>
    %c0_142 = arith.constant 0 : index
    %c0_143 = arith.constant 0 : index
    %350 = vector.load %arg7[%c0_142, %c0_143] : memref<2x16xf32, #tpu.memory_space<vmem>>, vector<2x16xf32>
    tpu.vector_store %arg7[%c0_142, %c0_143], %349 {strides = array<i32>} : memref<2x16xf32, #tpu.memory_space<vmem>>, vector<2x16xf32>,
    %c0_144 = arith.constant 0 : index
    %c0_145 = arith.constant 0 : index
    %351 = vector.load %arg8[%c0_144, %c0_145] : memref<2x16xf32, #tpu.memory_space<vmem>>, vector<2x16xf32>
    tpu.vector_store %arg8[%c0_144, %c0_145], %347 {strides = array<i32>} : memref<2x16xf32, #tpu.memory_space<vmem>>, vector<2x16xf32>,
    %c0_146 = arith.constant 0 : index
    %352 = arith.index_cast %307 : i32 to index
    %c0_147 = arith.constant 0 : index
    %c0_148 = arith.constant 0 : index
    %353 = vector.load %arg5[%c0_146, %352, %c0_147, %c0_148] : memref<1x8x2x16xf32, #tpu.memory_space<vmem>>, vector<1x1x2x16xf32>
    %354 = vector.shape_cast %353 : vector<1x1x2x16xf32> to vector<2x16xf32>
    %355 = vector.shape_cast %349 : vector<2x16xf32> to vector<1x1x2x16xf32>
    tpu.vector_store %arg5[%c0_146, %352, %c0_147, %c0_148], %355 {strides = array<i32>} : memref<1x8x2x16xf32, #tpu.memory_space<vmem>>, vector<1x1x2x16xf32>,
    %c0_i32_149 = arith.constant 0 : i32
    %c7_i32_150 = arith.constant 7 : i32
    %356 = arith.select %0, %c0_i32_149, %c7_i32_150 : i32
    %357 = arith.index_cast %356 : i32 to index
    %c0_151 = arith.constant 0 : index
    %c0_152 = arith.constant 0 : index
    %358 = vector.load %arg1[%357, %c0_151, %c0_152] : memref<8x2x32xf32, #tpu.memory_space<vmem>>, vector<1x2x32xf32>
    %359 = vector.shape_cast %358 : vector<1x2x32xf32> to vector<2x32xf32>
    %360 = vector.shape_cast %359 : vector<2x32xf32> to vector<1x2x32xf32>
    %361 = vector.broadcast %360 : vector<1x2x32xf32> to vector<4x2x32xf32>
    %c0_153 = arith.constant 0 : index
    %c0_154 = arith.constant 0 : index
    %362 = vector.load %arg7[%c0_153, %c0_154] : memref<2x16xf32, #tpu.memory_space<vmem>>, vector<2x16xf32>
    %363 = vector.shape_cast %362 : vector<2x16xf32> to vector<1x2x16xf32>
    %364 = vector.broadcast %363 : vector<1x2x16xf32> to vector<4x2x16xf32>
    %cst_155 = arith.constant dense<0.000000e+00> : vector<4x2x16xf32>
    %365 = tpu.matmul %361, %2, %cst_155 {dimension_numbers = #tpu.dot_dimension_numbers<[2], [1], [1], [2], [0, 0, 0, 1, 1, 2], [0], [0]>} : vector<4x2x32xf32>, vector<4x32x16xf32>, vector<4x2x16xf32> -> vector<4x2x16xf32>
    %cst_156 = arith.constant dense<0.000000e+00> : vector<4x2x16xf32>
    %366 = tpu.matmul %364, %4, %cst_156 {dimension_numbers = #tpu.dot_dimension_numbers<[2], [1], [1], [2], [0, 0, 0, 1, 1, 2], [0], [0]>} : vector<4x2x16xf32>, vector<4x16x16xf32>, vector<4x2x16xf32> -> vector<4x2x16xf32>
    %367 = arith.addf %365, %366 : vector<4x2x16xf32>
    %368 = arith.addf %367, %8 : vector<4x2x16xf32>
    %369 = vector.extract_strided_slice %368 {offsets = [0, 0, 0], sizes = [1, 2, 16], strides = [1, 1, 1]} : vector<4x2x16xf32> to vector<1x2x16xf32>
    %370 = vector.shape_cast %369 : vector<1x2x16xf32> to vector<2x16xf32>
    %371 = arith.negf %370 : vector<2x16xf32>
    %372 = math.exp %371 : vector<2x16xf32>
    %cst_157 = arith.constant 1.000000e+00 : f32
    %373 = vector.broadcast %cst_157 : f32 to vector<2x16xf32>
    %374 = arith.addf %373, %372 : vector<2x16xf32>
    %375 = arith.divf %373, %374 : vector<2x16xf32>
    %376 = vector.extract_strided_slice %368 {offsets = [1, 0, 0], sizes = [1, 2, 16], strides = [1, 1, 1]} : vector<4x2x16xf32> to vector<1x2x16xf32>
    %377 = vector.shape_cast %376 : vector<1x2x16xf32> to vector<2x16xf32>
    %378 = arith.negf %377 : vector<2x16xf32>
    %379 = math.exp %378 : vector<2x16xf32>
    %cst_158 = arith.constant 1.000000e+00 : f32
    %380 = vector.broadcast %cst_158 : f32 to vector<2x16xf32>
    %381 = arith.addf %380, %379 : vector<2x16xf32>
    %382 = arith.divf %380, %381 : vector<2x16xf32>
    %383 = vector.extract_strided_slice %368 {offsets = [2, 0, 0], sizes = [1, 2, 16], strides = [1, 1, 1]} : vector<4x2x16xf32> to vector<1x2x16xf32>
    %384 = vector.shape_cast %383 : vector<1x2x16xf32> to vector<2x16xf32>
    %385 = math.tanh %384 : vector<2x16xf32>
    %386 = vector.extract_strided_slice %368 {offsets = [3, 0, 0], sizes = [1, 2, 16], strides = [1, 1, 1]} : vector<4x2x16xf32> to vector<1x2x16xf32>
    %387 = vector.shape_cast %386 : vector<1x2x16xf32> to vector<2x16xf32>
    %388 = arith.negf %387 : vector<2x16xf32>
    %389 = math.exp %388 : vector<2x16xf32>
    %cst_159 = arith.constant 1.000000e+00 : f32
    %390 = vector.broadcast %cst_159 : f32 to vector<2x16xf32>
    %391 = arith.addf %390, %389 : vector<2x16xf32>
    %392 = arith.divf %390, %391 : vector<2x16xf32>
    %c0_160 = arith.constant 0 : index
    %c0_161 = arith.constant 0 : index
    %393 = vector.load %arg8[%c0_160, %c0_161] : memref<2x16xf32, #tpu.memory_space<vmem>>, vector<2x16xf32>
    %394 = arith.mulf %382, %393 : vector<2x16xf32>
    %395 = arith.mulf %375, %385 : vector<2x16xf32>
    %396 = arith.addf %394, %395 : vector<2x16xf32>
    %397 = math.tanh %396 : vector<2x16xf32>
    %398 = arith.mulf %392, %397 : vector<2x16xf32>
    %c0_162 = arith.constant 0 : index
    %c0_163 = arith.constant 0 : index
    %399 = vector.load %arg7[%c0_162, %c0_163] : memref<2x16xf32, #tpu.memory_space<vmem>>, vector<2x16xf32>
    tpu.vector_store %arg7[%c0_162, %c0_163], %398 {strides = array<i32>} : memref<2x16xf32, #tpu.memory_space<vmem>>, vector<2x16xf32>,
    %c0_164 = arith.constant 0 : index
    %c0_165 = arith.constant 0 : index
    %400 = vector.load %arg8[%c0_164, %c0_165] : memref<2x16xf32, #tpu.memory_space<vmem>>, vector<2x16xf32>
    tpu.vector_store %arg8[%c0_164, %c0_165], %396 {strides = array<i32>} : memref<2x16xf32, #tpu.memory_space<vmem>>, vector<2x16xf32>,
    %c0_166 = arith.constant 0 : index
    %401 = arith.index_cast %356 : i32 to index
    %c0_167 = arith.constant 0 : index
    %c0_168 = arith.constant 0 : index
    %402 = vector.load %arg5[%c0_166, %401, %c0_167, %c0_168] : memref<1x8x2x16xf32, #tpu.memory_space<vmem>>, vector<1x1x2x16xf32>
    %403 = vector.shape_cast %402 : vector<1x1x2x16xf32> to vector<2x16xf32>
    %404 = vector.shape_cast %398 : vector<2x16xf32> to vector<1x1x2x16xf32>
    tpu.vector_store %arg5[%c0_166, %401, %c0_167, %c0_168], %404 {strides = array<i32>} : memref<1x8x2x16xf32, #tpu.memory_space<vmem>>, vector<1x1x2x16xf32>,
    %c0_169 = arith.constant 0 : index
    %c0_170 = arith.constant 0 : index
    %405 = vector.load %arg7[%c0_169, %c0_170] : memref<2x16xf32, #tpu.memory_space<vmem>>, vector<2x16xf32>
    %c0_171 = arith.constant 0 : index
    %c0_172 = arith.constant 0 : index
    %c0_173 = arith.constant 0 : index
    %406 = vector.load %arg6[%c0_171, %c0_172, %c0_173] : memref<1x2x16xf32, #tpu.memory_space<vmem>>, vector<1x2x16xf32>
    %407 = vector.shape_cast %406 : vector<1x2x16xf32> to vector<2x16xf32>
    %408 = vector.shape_cast %405 : vector<2x16xf32> to vector<1x2x16xf32>
    tpu.vector_store %arg6[%c0_171, %c0_172, %c0_173], %408 {strides = array<i32>} : memref<1x2x16xf32, #tpu.memory_space<vmem>>, vector<1x2x16xf32>,
    return
  }
  func.func @transform_0(%arg0: i32) -> (i32, i32, i32) {
    %c0_i32 = arith.constant 0 : i32
    %c0_i32_0 = arith.constant 0 : i32
    %c0_i32_1 = arith.constant 0 : i32
    %c0_i32_2 = arith.constant 0 : i32
    return %c0_i32, %c0_i32_0, %c0_i32_1 : i32, i32, i32
  }
  func.func @transform_1(%arg0: i32) -> (i32, i32, i32, i32) {
    %c0_i32 = arith.constant 0 : i32
    %c0_i32_0 = arith.constant 0 : i32
    %c0_i32_1 = arith.constant 0 : i32
    %c0_i32_2 = arith.constant 0 : i32
    return %arg0, %c0_i32, %c0_i32_0, %c0_i32_1 : i32, i32, i32, i32
  }
  func.func @transform_2(%arg0: i32) -> (i32, i32, i32, i32) {
    %c0_i32 = arith.constant 0 : i32
    %c0_i32_0 = arith.constant 0 : i32
    %c0_i32_1 = arith.constant 0 : i32
    %c0_i32_2 = arith.constant 0 : i32
    return %arg0, %c0_i32, %c0_i32_0, %c0_i32_1 : i32, i32, i32, i32
  }
  func.func @transform_3(%arg0: i32) -> (i32, i32, i32, i32) {
    %c0_i32 = arith.constant 0 : i32
    %c0_i32_0 = arith.constant 0 : i32
    %c0_i32_1 = arith.constant 0 : i32
    %c0_i32_2 = arith.constant 0 : i32
    return %arg0, %c0_i32, %c0_i32_0, %c0_i32_1 : i32, i32, i32, i32
  }
  func.func @transform_4(%arg0: i32) -> (i32, i32, i32, i32) {
    %c0_i32 = arith.constant 0 : i32
    %c0_i32_0 = arith.constant 0 : i32
    %c0_i32_1 = arith.constant 0 : i32
    %c0_i32_2 = arith.constant 0 : i32
    return %arg0, %c0_i32, %c0_i32_0, %c0_i32_1 : i32, i32, i32, i32
  }
  func.func @transform_5(%arg0: i32) -> (i32, i32, i32) {
    %c0_i32 = arith.constant 0 : i32
    %c0_i32_0 = arith.constant 0 : i32
    %c0_i32_1 = arith.constant 0 : i32
    return %arg0, %c0_i32, %c0_i32_0 : i32, i32, i32
  }
}

module attributes {stable_mosaic.version = 11 : i64} {
  func.func @_bilstm_kernel(%arg0: i32, %arg1: memref<8x2x32xf32, #tpu.memory_space<vmem>>, %arg2: memref<1x4x32x16xf32, #tpu.memory_space<vmem>>, %arg3: memref<1x4x16x16xf32, #tpu.memory_space<vmem>>, %arg4: memref<1x4x1x16xf32, #tpu.memory_space<vmem>>, %arg5: memref<1x8x2x16xf32, #tpu.memory_space<vmem>>, %arg6: memref<1x2x16xf32, #tpu.memory_space<vmem>>, %arg7: memref<2x16xf32, #tpu.memory_space<vmem>>, %arg8: memref<2x16xf32, #tpu.memory_space<vmem>>) attributes {dimension_semantics = [#tpu.dimension_semantics<parallel>], iteration_bounds = array<i64: 2>, scalar_prefetch = 0 : i64, scratch_operands = 2 : i64, tpu.core_type = #tpu.core_type<tc>, window_params = [{pipeline_mode = #tpu.pipeline_mode<synchronous>, transform_indices = @transform_0, window_bounds = array<i64: 8, 2, 32>}, {transform_indices = @transform_1, window_bounds = array<i64: 1, 4, 32, 16>}, {transform_indices = @transform_2, window_bounds = array<i64: 1, 4, 16, 16>}, {transform_indices = @transform_3, window_bounds = array<i64: 1, 4, 1, 16>}, {transform_indices = @transform_4, window_bounds = array<i64: 1, 8, 2, 16>}, {transform_indices = @transform_5, window_bounds = array<i64: 1, 2, 16>}]} {
    %c1_i32 = arith.constant 1 : i32
    %0 = arith.cmpi eq, %arg0, %c1_i32 : i32
    %c0 = arith.constant 0 : index
    %c0_0 = arith.constant 0 : index
    %c0_1 = arith.constant 0 : index
    %c0_2 = arith.constant 0 : index
    %1 = vector.load %arg2[%c0, %c0_0, %c0_1, %c0_2] : memref<1x4x32x16xf32, #tpu.memory_space<vmem>>, vector<1x4x32x16xf32>
    %2 = vector.shape_cast %1 : vector<1x4x32x16xf32> to vector<4x32x16xf32>
    %c0_3 = arith.constant 0 : index
    %c0_4 = arith.constant 0 : index
    %c0_5 = arith.constant 0 : index
    %c0_6 = arith.constant 0 : index
    %3 = vector.load %arg3[%c0_3, %c0_4, %c0_5, %c0_6] : memref<1x4x16x16xf32, #tpu.memory_space<vmem>>, vector<1x4x16x16xf32>
    %4 = vector.shape_cast %3 : vector<1x4x16x16xf32> to vector<4x16x16xf32>
    %c0_7 = arith.constant 0 : index
    %c0_8 = arith.constant 0 : index
    %c0_9 = arith.constant 0 : index
    %c0_10 = arith.constant 0 : index
    %5 = vector.load %arg4[%c0_7, %c0_8, %c0_9, %c0_10] : memref<1x4x1x16xf32, #tpu.memory_space<vmem>>, vector<1x4x1x16xf32>
    %6 = vector.shape_cast %5 : vector<1x4x1x16xf32> to vector<4x1x16xf32>
    %7 = vector.shape_cast %6 : vector<4x1x16xf32> to vector<4x1x16xf32>
    %8 = vector.broadcast %7 : vector<4x1x16xf32> to vector<4x2x16xf32>
    %cst = arith.constant 0.000000e+00 : f32
    %9 = vector.broadcast %cst : f32 to vector<2x16xf32>
    %c0_11 = arith.constant 0 : index
    %c0_12 = arith.constant 0 : index
    %10 = vector.load %arg7[%c0_11, %c0_12] : memref<2x16xf32, #tpu.memory_space<vmem>>, vector<2x16xf32>
    tpu.vector_store %arg7[%c0_11, %c0_12], %9 {strides = array<i32>} : memref<2x16xf32, #tpu.memory_space<vmem>>, vector<2x16xf32>,
    %cst_13 = arith.constant 0.000000e+00 : f32
    %11 = vector.broadcast %cst_13 : f32 to vector<2x16xf32>
    %c0_14 = arith.constant 0 : index
    %c0_15 = arith.constant 0 : index
    %12 = vector.load %arg8[%c0_14, %c0_15] : memref<2x16xf32, #tpu.memory_space<vmem>>, vector<2x16xf32>
    tpu.vector_store %arg8[%c0_14, %c0_15], %11 {strides = array<i32>} : memref<2x16xf32, #tpu.memory_space<vmem>>, vector<2x16xf32>,
    %c7_i32 = arith.constant 7 : i32
    %c0_i32 = arith.constant 0 : i32
    %13 = arith.select %0, %c7_i32, %c0_i32 : i32
    %14 = arith.index_cast %13 : i32 to index
    %c0_16 = arith.constant 0 : index
    %c0_17 = arith.constant 0 : index
    %15 = vector.load %arg1[%14, %c0_16, %c0_17] : memref<8x2x32xf32, #tpu.memory_space<vmem>>, vector<1x2x32xf32>
    %16 = vector.shape_cast %15 : vector<1x2x32xf32> to vector<2x32xf32>
    %17 = vector.shape_cast %16 : vector<2x32xf32> to vector<1x2x32xf32>
    %18 = vector.broadcast %17 : vector<1x2x32xf32> to vector<4x2x32xf32>
    %c0_18 = arith.constant 0 : index
    %c0_19 = arith.constant 0 : index
    %19 = vector.load %arg7[%c0_18, %c0_19] : memref<2x16xf32, #tpu.memory_space<vmem>>, vector<2x16xf32>
    %20 = vector.shape_cast %19 : vector<2x16xf32> to vector<1x2x16xf32>
    %21 = vector.broadcast %20 : vector<1x2x16xf32> to vector<4x2x16xf32>
    %cst_20 = arith.constant dense<0.000000e+00> : vector<4x2x16xf32>
    %22 = tpu.matmul %18, %2, %cst_20 {dimension_numbers = #tpu.dot_dimension_numbers<[2], [1], [1], [2], [0, 0, 0, 1, 1, 2], [0], [0]>} : vector<4x2x32xf32>, vector<4x32x16xf32>, vector<4x2x16xf32> -> vector<4x2x16xf32>
    %cst_21 = arith.constant dense<0.000000e+00> : vector<4x2x16xf32>
    %23 = tpu.matmul %21, %4, %cst_21 {dimension_numbers = #tpu.dot_dimension_numbers<[2], [1], [1], [2], [0, 0, 0, 1, 1, 2], [0], [0]>} : vector<4x2x16xf32>, vector<4x16x16xf32>, vector<4x2x16xf32> -> vector<4x2x16xf32>
    %24 = arith.addf %22, %23 : vector<4x2x16xf32>
    %25 = arith.addf %24, %8 : vector<4x2x16xf32>
    %26 = vector.extract_strided_slice %25 {offsets = [0, 0, 0], sizes = [1, 2, 16], strides = [1, 1, 1]} : vector<4x2x16xf32> to vector<1x2x16xf32>
    %27 = vector.shape_cast %26 : vector<1x2x16xf32> to vector<2x16xf32>
    %28 = arith.negf %27 : vector<2x16xf32>
    %29 = math.exp %28 : vector<2x16xf32>
    %cst_22 = arith.constant 1.000000e+00 : f32
    %30 = vector.broadcast %cst_22 : f32 to vector<2x16xf32>
    %31 = arith.addf %30, %29 : vector<2x16xf32>
    %32 = arith.divf %30, %31 : vector<2x16xf32>
    %33 = vector.extract_strided_slice %25 {offsets = [1, 0, 0], sizes = [1, 2, 16], strides = [1, 1, 1]} : vector<4x2x16xf32> to vector<1x2x16xf32>
    %34 = vector.shape_cast %33 : vector<1x2x16xf32> to vector<2x16xf32>
    %35 = arith.negf %34 : vector<2x16xf32>
    %36 = math.exp %35 : vector<2x16xf32>
    %cst_23 = arith.constant 1.000000e+00 : f32
    %37 = vector.broadcast %cst_23 : f32 to vector<2x16xf32>
    %38 = arith.addf %37, %36 : vector<2x16xf32>
    %39 = arith.divf %37, %38 : vector<2x16xf32>
    %40 = vector.extract_strided_slice %25 {offsets = [2, 0, 0], sizes = [1, 2, 16], strides = [1, 1, 1]} : vector<4x2x16xf32> to vector<1x2x16xf32>
    %41 = vector.shape_cast %40 : vector<1x2x16xf32> to vector<2x16xf32>
    %42 = math.tanh %41 : vector<2x16xf32>
    %43 = vector.extract_strided_slice %25 {offsets = [3, 0, 0], sizes = [1, 2, 16], strides = [1, 1, 1]} : vector<4x2x16xf32> to vector<1x2x16xf32>
    %44 = vector.shape_cast %43 : vector<1x2x16xf32> to vector<2x16xf32>
    %45 = arith.negf %44 : vector<2x16xf32>
    %46 = math.exp %45 : vector<2x16xf32>
    %cst_24 = arith.constant 1.000000e+00 : f32
    %47 = vector.broadcast %cst_24 : f32 to vector<2x16xf32>
    %48 = arith.addf %47, %46 : vector<2x16xf32>
    %49 = arith.divf %47, %48 : vector<2x16xf32>
    %c0_25 = arith.constant 0 : index
    %c0_26 = arith.constant 0 : index
    %50 = vector.load %arg8[%c0_25, %c0_26] : memref<2x16xf32, #tpu.memory_space<vmem>>, vector<2x16xf32>
    %51 = arith.mulf %39, %50 : vector<2x16xf32>
    %52 = arith.mulf %32, %42 : vector<2x16xf32>
    %53 = arith.addf %51, %52 : vector<2x16xf32>
    %54 = math.tanh %53 : vector<2x16xf32>
    %55 = arith.mulf %49, %54 : vector<2x16xf32>
    %c0_27 = arith.constant 0 : index
    %c0_28 = arith.constant 0 : index
    %56 = vector.load %arg7[%c0_27, %c0_28] : memref<2x16xf32, #tpu.memory_space<vmem>>, vector<2x16xf32>
    tpu.vector_store %arg7[%c0_27, %c0_28], %55 {strides = array<i32>} : memref<2x16xf32, #tpu.memory_space<vmem>>, vector<2x16xf32>,
    %c0_29 = arith.constant 0 : index
    %c0_30 = arith.constant 0 : index
    %57 = vector.load %arg8[%c0_29, %c0_30] : memref<2x16xf32, #tpu.memory_space<vmem>>, vector<2x16xf32>
    tpu.vector_store %arg8[%c0_29, %c0_30], %53 {strides = array<i32>} : memref<2x16xf32, #tpu.memory_space<vmem>>, vector<2x16xf32>,
    %c0_31 = arith.constant 0 : index
    %58 = arith.index_cast %13 : i32 to index
    %c0_32 = arith.constant 0 : index
    %c0_33 = arith.constant 0 : index
    %59 = vector.load %arg5[%c0_31, %58, %c0_32, %c0_33] : memref<1x8x2x16xf32, #tpu.memory_space<vmem>>, vector<1x1x2x16xf32>
    %60 = vector.shape_cast %59 : vector<1x1x2x16xf32> to vector<2x16xf32>
    %61 = vector.shape_cast %55 : vector<2x16xf32> to vector<1x1x2x16xf32>
    tpu.vector_store %arg5[%c0_31, %58, %c0_32, %c0_33], %61 {strides = array<i32>} : memref<1x8x2x16xf32, #tpu.memory_space<vmem>>, vector<1x1x2x16xf32>,
    %c6_i32 = arith.constant 6 : i32
    %c1_i32_34 = arith.constant 1 : i32
    %62 = arith.select %0, %c6_i32, %c1_i32_34 : i32
    %63 = arith.index_cast %62 : i32 to index
    %c0_35 = arith.constant 0 : index
    %c0_36 = arith.constant 0 : index
    %64 = vector.load %arg1[%63, %c0_35, %c0_36] : memref<8x2x32xf32, #tpu.memory_space<vmem>>, vector<1x2x32xf32>
    %65 = vector.shape_cast %64 : vector<1x2x32xf32> to vector<2x32xf32>
    %66 = vector.shape_cast %65 : vector<2x32xf32> to vector<1x2x32xf32>
    %67 = vector.broadcast %66 : vector<1x2x32xf32> to vector<4x2x32xf32>
    %c0_37 = arith.constant 0 : index
    %c0_38 = arith.constant 0 : index
    %68 = vector.load %arg7[%c0_37, %c0_38] : memref<2x16xf32, #tpu.memory_space<vmem>>, vector<2x16xf32>
    %69 = vector.shape_cast %68 : vector<2x16xf32> to vector<1x2x16xf32>
    %70 = vector.broadcast %69 : vector<1x2x16xf32> to vector<4x2x16xf32>
    %cst_39 = arith.constant dense<0.000000e+00> : vector<4x2x16xf32>
    %71 = tpu.matmul %67, %2, %cst_39 {dimension_numbers = #tpu.dot_dimension_numbers<[2], [1], [1], [2], [0, 0, 0, 1, 1, 2], [0], [0]>} : vector<4x2x32xf32>, vector<4x32x16xf32>, vector<4x2x16xf32> -> vector<4x2x16xf32>
    %cst_40 = arith.constant dense<0.000000e+00> : vector<4x2x16xf32>
    %72 = tpu.matmul %70, %4, %cst_40 {dimension_numbers = #tpu.dot_dimension_numbers<[2], [1], [1], [2], [0, 0, 0, 1, 1, 2], [0], [0]>} : vector<4x2x16xf32>, vector<4x16x16xf32>, vector<4x2x16xf32> -> vector<4x2x16xf32>
    %73 = arith.addf %71, %72 : vector<4x2x16xf32>
    %74 = arith.addf %73, %8 : vector<4x2x16xf32>
    %75 = vector.extract_strided_slice %74 {offsets = [0, 0, 0], sizes = [1, 2, 16], strides = [1, 1, 1]} : vector<4x2x16xf32> to vector<1x2x16xf32>
    %76 = vector.shape_cast %75 : vector<1x2x16xf32> to vector<2x16xf32>
    %77 = arith.negf %76 : vector<2x16xf32>
    %78 = math.exp %77 : vector<2x16xf32>
    %cst_41 = arith.constant 1.000000e+00 : f32
    %79 = vector.broadcast %cst_41 : f32 to vector<2x16xf32>
    %80 = arith.addf %79, %78 : vector<2x16xf32>
    %81 = arith.divf %79, %80 : vector<2x16xf32>
    %82 = vector.extract_strided_slice %74 {offsets = [1, 0, 0], sizes = [1, 2, 16], strides = [1, 1, 1]} : vector<4x2x16xf32> to vector<1x2x16xf32>
    %83 = vector.shape_cast %82 : vector<1x2x16xf32> to vector<2x16xf32>
    %84 = arith.negf %83 : vector<2x16xf32>
    %85 = math.exp %84 : vector<2x16xf32>
    %cst_42 = arith.constant 1.000000e+00 : f32
    %86 = vector.broadcast %cst_42 : f32 to vector<2x16xf32>
    %87 = arith.addf %86, %85 : vector<2x16xf32>
    %88 = arith.divf %86, %87 : vector<2x16xf32>
    %89 = vector.extract_strided_slice %74 {offsets = [2, 0, 0], sizes = [1, 2, 16], strides = [1, 1, 1]} : vector<4x2x16xf32> to vector<1x2x16xf32>
    %90 = vector.shape_cast %89 : vector<1x2x16xf32> to vector<2x16xf32>
    %91 = math.tanh %90 : vector<2x16xf32>
    %92 = vector.extract_strided_slice %74 {offsets = [3, 0, 0], sizes = [1, 2, 16], strides = [1, 1, 1]} : vector<4x2x16xf32> to vector<1x2x16xf32>
    %93 = vector.shape_cast %92 : vector<1x2x16xf32> to vector<2x16xf32>
    %94 = arith.negf %93 : vector<2x16xf32>
    %95 = math.exp %94 : vector<2x16xf32>
    %cst_43 = arith.constant 1.000000e+00 : f32
    %96 = vector.broadcast %cst_43 : f32 to vector<2x16xf32>
    %97 = arith.addf %96, %95 : vector<2x16xf32>
    %98 = arith.divf %96, %97 : vector<2x16xf32>
    %c0_44 = arith.constant 0 : index
    %c0_45 = arith.constant 0 : index
    %99 = vector.load %arg8[%c0_44, %c0_45] : memref<2x16xf32, #tpu.memory_space<vmem>>, vector<2x16xf32>
    %100 = arith.mulf %88, %99 : vector<2x16xf32>
    %101 = arith.mulf %81, %91 : vector<2x16xf32>
    %102 = arith.addf %100, %101 : vector<2x16xf32>
    %103 = math.tanh %102 : vector<2x16xf32>
    %104 = arith.mulf %98, %103 : vector<2x16xf32>
    %c0_46 = arith.constant 0 : index
    %c0_47 = arith.constant 0 : index
    %105 = vector.load %arg7[%c0_46, %c0_47] : memref<2x16xf32, #tpu.memory_space<vmem>>, vector<2x16xf32>
    tpu.vector_store %arg7[%c0_46, %c0_47], %104 {strides = array<i32>} : memref<2x16xf32, #tpu.memory_space<vmem>>, vector<2x16xf32>,
    %c0_48 = arith.constant 0 : index
    %c0_49 = arith.constant 0 : index
    %106 = vector.load %arg8[%c0_48, %c0_49] : memref<2x16xf32, #tpu.memory_space<vmem>>, vector<2x16xf32>
    tpu.vector_store %arg8[%c0_48, %c0_49], %102 {strides = array<i32>} : memref<2x16xf32, #tpu.memory_space<vmem>>, vector<2x16xf32>,
    %c0_50 = arith.constant 0 : index
    %107 = arith.index_cast %62 : i32 to index
    %c0_51 = arith.constant 0 : index
    %c0_52 = arith.constant 0 : index
    %108 = vector.load %arg5[%c0_50, %107, %c0_51, %c0_52] : memref<1x8x2x16xf32, #tpu.memory_space<vmem>>, vector<1x1x2x16xf32>
    %109 = vector.shape_cast %108 : vector<1x1x2x16xf32> to vector<2x16xf32>
    %110 = vector.shape_cast %104 : vector<2x16xf32> to vector<1x1x2x16xf32>
    tpu.vector_store %arg5[%c0_50, %107, %c0_51, %c0_52], %110 {strides = array<i32>} : memref<1x8x2x16xf32, #tpu.memory_space<vmem>>, vector<1x1x2x16xf32>,
    %c5_i32 = arith.constant 5 : i32
    %c2_i32 = arith.constant 2 : i32
    %111 = arith.select %0, %c5_i32, %c2_i32 : i32
    %112 = arith.index_cast %111 : i32 to index
    %c0_53 = arith.constant 0 : index
    %c0_54 = arith.constant 0 : index
    %113 = vector.load %arg1[%112, %c0_53, %c0_54] : memref<8x2x32xf32, #tpu.memory_space<vmem>>, vector<1x2x32xf32>
    %114 = vector.shape_cast %113 : vector<1x2x32xf32> to vector<2x32xf32>
    %115 = vector.shape_cast %114 : vector<2x32xf32> to vector<1x2x32xf32>
    %116 = vector.broadcast %115 : vector<1x2x32xf32> to vector<4x2x32xf32>
    %c0_55 = arith.constant 0 : index
    %c0_56 = arith.constant 0 : index
    %117 = vector.load %arg7[%c0_55, %c0_56] : memref<2x16xf32, #tpu.memory_space<vmem>>, vector<2x16xf32>
    %118 = vector.shape_cast %117 : vector<2x16xf32> to vector<1x2x16xf32>
    %119 = vector.broadcast %118 : vector<1x2x16xf32> to vector<4x2x16xf32>
    %cst_57 = arith.constant dense<0.000000e+00> : vector<4x2x16xf32>
    %120 = tpu.matmul %116, %2, %cst_57 {dimension_numbers = #tpu.dot_dimension_numbers<[2], [1], [1], [2], [0, 0, 0, 1, 1, 2], [0], [0]>} : vector<4x2x32xf32>, vector<4x32x16xf32>, vector<4x2x16xf32> -> vector<4x2x16xf32>
    %cst_58 = arith.constant dense<0.000000e+00> : vector<4x2x16xf32>
    %121 = tpu.matmul %119, %4, %cst_58 {dimension_numbers = #tpu.dot_dimension_numbers<[2], [1], [1], [2], [0, 0, 0, 1, 1, 2], [0], [0]>} : vector<4x2x16xf32>, vector<4x16x16xf32>, vector<4x2x16xf32> -> vector<4x2x16xf32>
    %122 = arith.addf %120, %121 : vector<4x2x16xf32>
    %123 = arith.addf %122, %8 : vector<4x2x16xf32>
    %124 = vector.extract_strided_slice %123 {offsets = [0, 0, 0], sizes = [1, 2, 16], strides = [1, 1, 1]} : vector<4x2x16xf32> to vector<1x2x16xf32>
    %125 = vector.shape_cast %124 : vector<1x2x16xf32> to vector<2x16xf32>
    %126 = arith.negf %125 : vector<2x16xf32>
    %127 = math.exp %126 : vector<2x16xf32>
    %cst_59 = arith.constant 1.000000e+00 : f32
    %128 = vector.broadcast %cst_59 : f32 to vector<2x16xf32>
    %129 = arith.addf %128, %127 : vector<2x16xf32>
    %130 = arith.divf %128, %129 : vector<2x16xf32>
    %131 = vector.extract_strided_slice %123 {offsets = [1, 0, 0], sizes = [1, 2, 16], strides = [1, 1, 1]} : vector<4x2x16xf32> to vector<1x2x16xf32>
    %132 = vector.shape_cast %131 : vector<1x2x16xf32> to vector<2x16xf32>
    %133 = arith.negf %132 : vector<2x16xf32>
    %134 = math.exp %133 : vector<2x16xf32>
    %cst_60 = arith.constant 1.000000e+00 : f32
    %135 = vector.broadcast %cst_60 : f32 to vector<2x16xf32>
    %136 = arith.addf %135, %134 : vector<2x16xf32>
    %137 = arith.divf %135, %136 : vector<2x16xf32>
    %138 = vector.extract_strided_slice %123 {offsets = [2, 0, 0], sizes = [1, 2, 16], strides = [1, 1, 1]} : vector<4x2x16xf32> to vector<1x2x16xf32>
    %139 = vector.shape_cast %138 : vector<1x2x16xf32> to vector<2x16xf32>
    %140 = math.tanh %139 : vector<2x16xf32>
    %141 = vector.extract_strided_slice %123 {offsets = [3, 0, 0], sizes = [1, 2, 16], strides = [1, 1, 1]} : vector<4x2x16xf32> to vector<1x2x16xf32>
    %142 = vector.shape_cast %141 : vector<1x2x16xf32> to vector<2x16xf32>
    %143 = arith.negf %142 : vector<2x16xf32>
    %144 = math.exp %143 : vector<2x16xf32>
    %cst_61 = arith.constant 1.000000e+00 : f32
    %145 = vector.broadcast %cst_61 : f32 to vector<2x16xf32>
    %146 = arith.addf %145, %144 : vector<2x16xf32>
    %147 = arith.divf %145, %146 : vector<2x16xf32>
    %c0_62 = arith.constant 0 : index
    %c0_63 = arith.constant 0 : index
    %148 = vector.load %arg8[%c0_62, %c0_63] : memref<2x16xf32, #tpu.memory_space<vmem>>, vector<2x16xf32>
    %149 = arith.mulf %137, %148 : vector<2x16xf32>
    %150 = arith.mulf %130, %140 : vector<2x16xf32>
    %151 = arith.addf %149, %150 : vector<2x16xf32>
    %152 = math.tanh %151 : vector<2x16xf32>
    %153 = arith.mulf %147, %152 : vector<2x16xf32>
    %c0_64 = arith.constant 0 : index
    %c0_65 = arith.constant 0 : index
    %154 = vector.load %arg7[%c0_64, %c0_65] : memref<2x16xf32, #tpu.memory_space<vmem>>, vector<2x16xf32>
    tpu.vector_store %arg7[%c0_64, %c0_65], %153 {strides = array<i32>} : memref<2x16xf32, #tpu.memory_space<vmem>>, vector<2x16xf32>,
    %c0_66 = arith.constant 0 : index
    %c0_67 = arith.constant 0 : index
    %155 = vector.load %arg8[%c0_66, %c0_67] : memref<2x16xf32, #tpu.memory_space<vmem>>, vector<2x16xf32>
    tpu.vector_store %arg8[%c0_66, %c0_67], %151 {strides = array<i32>} : memref<2x16xf32, #tpu.memory_space<vmem>>, vector<2x16xf32>,
    %c0_68 = arith.constant 0 : index
    %156 = arith.index_cast %111 : i32 to index
    %c0_69 = arith.constant 0 : index
    %c0_70 = arith.constant 0 : index
    %157 = vector.load %arg5[%c0_68, %156, %c0_69, %c0_70] : memref<1x8x2x16xf32, #tpu.memory_space<vmem>>, vector<1x1x2x16xf32>
    %158 = vector.shape_cast %157 : vector<1x1x2x16xf32> to vector<2x16xf32>
    %159 = vector.shape_cast %153 : vector<2x16xf32> to vector<1x1x2x16xf32>
    tpu.vector_store %arg5[%c0_68, %156, %c0_69, %c0_70], %159 {strides = array<i32>} : memref<1x8x2x16xf32, #tpu.memory_space<vmem>>, vector<1x1x2x16xf32>,
    %c4_i32 = arith.constant 4 : i32
    %c3_i32 = arith.constant 3 : i32
    %160 = arith.select %0, %c4_i32, %c3_i32 : i32
    %161 = arith.index_cast %160 : i32 to index
    %c0_71 = arith.constant 0 : index
    %c0_72 = arith.constant 0 : index
    %162 = vector.load %arg1[%161, %c0_71, %c0_72] : memref<8x2x32xf32, #tpu.memory_space<vmem>>, vector<1x2x32xf32>
    %163 = vector.shape_cast %162 : vector<1x2x32xf32> to vector<2x32xf32>
    %164 = vector.shape_cast %163 : vector<2x32xf32> to vector<1x2x32xf32>
    %165 = vector.broadcast %164 : vector<1x2x32xf32> to vector<4x2x32xf32>
    %c0_73 = arith.constant 0 : index
    %c0_74 = arith.constant 0 : index
    %166 = vector.load %arg7[%c0_73, %c0_74] : memref<2x16xf32, #tpu.memory_space<vmem>>, vector<2x16xf32>
    %167 = vector.shape_cast %166 : vector<2x16xf32> to vector<1x2x16xf32>
    %168 = vector.broadcast %167 : vector<1x2x16xf32> to vector<4x2x16xf32>
    %cst_75 = arith.constant dense<0.000000e+00> : vector<4x2x16xf32>
    %169 = tpu.matmul %165, %2, %cst_75 {dimension_numbers = #tpu.dot_dimension_numbers<[2], [1], [1], [2], [0, 0, 0, 1, 1, 2], [0], [0]>} : vector<4x2x32xf32>, vector<4x32x16xf32>, vector<4x2x16xf32> -> vector<4x2x16xf32>
    %cst_76 = arith.constant dense<0.000000e+00> : vector<4x2x16xf32>
    %170 = tpu.matmul %168, %4, %cst_76 {dimension_numbers = #tpu.dot_dimension_numbers<[2], [1], [1], [2], [0, 0, 0, 1, 1, 2], [0], [0]>} : vector<4x2x16xf32>, vector<4x16x16xf32>, vector<4x2x16xf32> -> vector<4x2x16xf32>
    %171 = arith.addf %169, %170 : vector<4x2x16xf32>
    %172 = arith.addf %171, %8 : vector<4x2x16xf32>
    %173 = vector.extract_strided_slice %172 {offsets = [0, 0, 0], sizes = [1, 2, 16], strides = [1, 1, 1]} : vector<4x2x16xf32> to vector<1x2x16xf32>
    %174 = vector.shape_cast %173 : vector<1x2x16xf32> to vector<2x16xf32>
    %175 = arith.negf %174 : vector<2x16xf32>
    %176 = math.exp %175 : vector<2x16xf32>
    %cst_77 = arith.constant 1.000000e+00 : f32
    %177 = vector.broadcast %cst_77 : f32 to vector<2x16xf32>
    %178 = arith.addf %177, %176 : vector<2x16xf32>
    %179 = arith.divf %177, %178 : vector<2x16xf32>
    %180 = vector.extract_strided_slice %172 {offsets = [1, 0, 0], sizes = [1, 2, 16], strides = [1, 1, 1]} : vector<4x2x16xf32> to vector<1x2x16xf32>
    %181 = vector.shape_cast %180 : vector<1x2x16xf32> to vector<2x16xf32>
    %182 = arith.negf %181 : vector<2x16xf32>
    %183 = math.exp %182 : vector<2x16xf32>
    %cst_78 = arith.constant 1.000000e+00 : f32
    %184 = vector.broadcast %cst_78 : f32 to vector<2x16xf32>
    %185 = arith.addf %184, %183 : vector<2x16xf32>
    %186 = arith.divf %184, %185 : vector<2x16xf32>
    %187 = vector.extract_strided_slice %172 {offsets = [2, 0, 0], sizes = [1, 2, 16], strides = [1, 1, 1]} : vector<4x2x16xf32> to vector<1x2x16xf32>
    %188 = vector.shape_cast %187 : vector<1x2x16xf32> to vector<2x16xf32>
    %189 = math.tanh %188 : vector<2x16xf32>
    %190 = vector.extract_strided_slice %172 {offsets = [3, 0, 0], sizes = [1, 2, 16], strides = [1, 1, 1]} : vector<4x2x16xf32> to vector<1x2x16xf32>
    %191 = vector.shape_cast %190 : vector<1x2x16xf32> to vector<2x16xf32>
    %192 = arith.negf %191 : vector<2x16xf32>
    %193 = math.exp %192 : vector<2x16xf32>
    %cst_79 = arith.constant 1.000000e+00 : f32
    %194 = vector.broadcast %cst_79 : f32 to vector<2x16xf32>
    %195 = arith.addf %194, %193 : vector<2x16xf32>
    %196 = arith.divf %194, %195 : vector<2x16xf32>
    %c0_80 = arith.constant 0 : index
    %c0_81 = arith.constant 0 : index
    %197 = vector.load %arg8[%c0_80, %c0_81] : memref<2x16xf32, #tpu.memory_space<vmem>>, vector<2x16xf32>
    %198 = arith.mulf %186, %197 : vector<2x16xf32>
    %199 = arith.mulf %179, %189 : vector<2x16xf32>
    %200 = arith.addf %198, %199 : vector<2x16xf32>
    %201 = math.tanh %200 : vector<2x16xf32>
    %202 = arith.mulf %196, %201 : vector<2x16xf32>
    %c0_82 = arith.constant 0 : index
    %c0_83 = arith.constant 0 : index
    %203 = vector.load %arg7[%c0_82, %c0_83] : memref<2x16xf32, #tpu.memory_space<vmem>>, vector<2x16xf32>
    tpu.vector_store %arg7[%c0_82, %c0_83], %202 {strides = array<i32>} : memref<2x16xf32, #tpu.memory_space<vmem>>, vector<2x16xf32>,
    %c0_84 = arith.constant 0 : index
    %c0_85 = arith.constant 0 : index
    %204 = vector.load %arg8[%c0_84, %c0_85] : memref<2x16xf32, #tpu.memory_space<vmem>>, vector<2x16xf32>
    tpu.vector_store %arg8[%c0_84, %c0_85], %200 {strides = array<i32>} : memref<2x16xf32, #tpu.memory_space<vmem>>, vector<2x16xf32>,
    %c0_86 = arith.constant 0 : index
    %205 = arith.index_cast %160 : i32 to index
    %c0_87 = arith.constant 0 : index
    %c0_88 = arith.constant 0 : index
    %206 = vector.load %arg5[%c0_86, %205, %c0_87, %c0_88] : memref<1x8x2x16xf32, #tpu.memory_space<vmem>>, vector<1x1x2x16xf32>
    %207 = vector.shape_cast %206 : vector<1x1x2x16xf32> to vector<2x16xf32>
    %208 = vector.shape_cast %202 : vector<2x16xf32> to vector<1x1x2x16xf32>
    tpu.vector_store %arg5[%c0_86, %205, %c0_87, %c0_88], %208 {strides = array<i32>} : memref<1x8x2x16xf32, #tpu.memory_space<vmem>>, vector<1x1x2x16xf32>,
    %c3_i32_89 = arith.constant 3 : i32
    %c4_i32_90 = arith.constant 4 : i32
    %209 = arith.select %0, %c3_i32_89, %c4_i32_90 : i32
    %210 = arith.index_cast %209 : i32 to index
    %c0_91 = arith.constant 0 : index
    %c0_92 = arith.constant 0 : index
    %211 = vector.load %arg1[%210, %c0_91, %c0_92] : memref<8x2x32xf32, #tpu.memory_space<vmem>>, vector<1x2x32xf32>
    %212 = vector.shape_cast %211 : vector<1x2x32xf32> to vector<2x32xf32>
    %213 = vector.shape_cast %212 : vector<2x32xf32> to vector<1x2x32xf32>
    %214 = vector.broadcast %213 : vector<1x2x32xf32> to vector<4x2x32xf32>
    %c0_93 = arith.constant 0 : index
    %c0_94 = arith.constant 0 : index
    %215 = vector.load %arg7[%c0_93, %c0_94] : memref<2x16xf32, #tpu.memory_space<vmem>>, vector<2x16xf32>
    %216 = vector.shape_cast %215 : vector<2x16xf32> to vector<1x2x16xf32>
    %217 = vector.broadcast %216 : vector<1x2x16xf32> to vector<4x2x16xf32>
    %cst_95 = arith.constant dense<0.000000e+00> : vector<4x2x16xf32>
    %218 = tpu.matmul %214, %2, %cst_95 {dimension_numbers = #tpu.dot_dimension_numbers<[2], [1], [1], [2], [0, 0, 0, 1, 1, 2], [0], [0]>} : vector<4x2x32xf32>, vector<4x32x16xf32>, vector<4x2x16xf32> -> vector<4x2x16xf32>
    %cst_96 = arith.constant dense<0.000000e+00> : vector<4x2x16xf32>
    %219 = tpu.matmul %217, %4, %cst_96 {dimension_numbers = #tpu.dot_dimension_numbers<[2], [1], [1], [2], [0, 0, 0, 1, 1, 2], [0], [0]>} : vector<4x2x16xf32>, vector<4x16x16xf32>, vector<4x2x16xf32> -> vector<4x2x16xf32>
    %220 = arith.addf %218, %219 : vector<4x2x16xf32>
    %221 = arith.addf %220, %8 : vector<4x2x16xf32>
    %222 = vector.extract_strided_slice %221 {offsets = [0, 0, 0], sizes = [1, 2, 16], strides = [1, 1, 1]} : vector<4x2x16xf32> to vector<1x2x16xf32>
    %223 = vector.shape_cast %222 : vector<1x2x16xf32> to vector<2x16xf32>
    %224 = arith.negf %223 : vector<2x16xf32>
    %225 = math.exp %224 : vector<2x16xf32>
    %cst_97 = arith.constant 1.000000e+00 : f32
    %226 = vector.broadcast %cst_97 : f32 to vector<2x16xf32>
    %227 = arith.addf %226, %225 : vector<2x16xf32>
    %228 = arith.divf %226, %227 : vector<2x16xf32>
    %229 = vector.extract_strided_slice %221 {offsets = [1, 0, 0], sizes = [1, 2, 16], strides = [1, 1, 1]} : vector<4x2x16xf32> to vector<1x2x16xf32>
    %230 = vector.shape_cast %229 : vector<1x2x16xf32> to vector<2x16xf32>
    %231 = arith.negf %230 : vector<2x16xf32>
    %232 = math.exp %231 : vector<2x16xf32>
    %cst_98 = arith.constant 1.000000e+00 : f32
    %233 = vector.broadcast %cst_98 : f32 to vector<2x16xf32>
    %234 = arith.addf %233, %232 : vector<2x16xf32>
    %235 = arith.divf %233, %234 : vector<2x16xf32>
    %236 = vector.extract_strided_slice %221 {offsets = [2, 0, 0], sizes = [1, 2, 16], strides = [1, 1, 1]} : vector<4x2x16xf32> to vector<1x2x16xf32>
    %237 = vector.shape_cast %236 : vector<1x2x16xf32> to vector<2x16xf32>
    %238 = math.tanh %237 : vector<2x16xf32>
    %239 = vector.extract_strided_slice %221 {offsets = [3, 0, 0], sizes = [1, 2, 16], strides = [1, 1, 1]} : vector<4x2x16xf32> to vector<1x2x16xf32>
    %240 = vector.shape_cast %239 : vector<1x2x16xf32> to vector<2x16xf32>
    %241 = arith.negf %240 : vector<2x16xf32>
    %242 = math.exp %241 : vector<2x16xf32>
    %cst_99 = arith.constant 1.000000e+00 : f32
    %243 = vector.broadcast %cst_99 : f32 to vector<2x16xf32>
    %244 = arith.addf %243, %242 : vector<2x16xf32>
    %245 = arith.divf %243, %244 : vector<2x16xf32>
    %c0_100 = arith.constant 0 : index
    %c0_101 = arith.constant 0 : index
    %246 = vector.load %arg8[%c0_100, %c0_101] : memref<2x16xf32, #tpu.memory_space<vmem>>, vector<2x16xf32>
    %247 = arith.mulf %235, %246 : vector<2x16xf32>
    %248 = arith.mulf %228, %238 : vector<2x16xf32>
    %249 = arith.addf %247, %248 : vector<2x16xf32>
    %250 = math.tanh %249 : vector<2x16xf32>
    %251 = arith.mulf %245, %250 : vector<2x16xf32>
    %c0_102 = arith.constant 0 : index
    %c0_103 = arith.constant 0 : index
    %252 = vector.load %arg7[%c0_102, %c0_103] : memref<2x16xf32, #tpu.memory_space<vmem>>, vector<2x16xf32>
    tpu.vector_store %arg7[%c0_102, %c0_103], %251 {strides = array<i32>} : memref<2x16xf32, #tpu.memory_space<vmem>>, vector<2x16xf32>,
    %c0_104 = arith.constant 0 : index
    %c0_105 = arith.constant 0 : index
    %253 = vector.load %arg8[%c0_104, %c0_105] : memref<2x16xf32, #tpu.memory_space<vmem>>, vector<2x16xf32>
    tpu.vector_store %arg8[%c0_104, %c0_105], %249 {strides = array<i32>} : memref<2x16xf32, #tpu.memory_space<vmem>>, vector<2x16xf32>,
    %c0_106 = arith.constant 0 : index
    %254 = arith.index_cast %209 : i32 to index
    %c0_107 = arith.constant 0 : index
    %c0_108 = arith.constant 0 : index
    %255 = vector.load %arg5[%c0_106, %254, %c0_107, %c0_108] : memref<1x8x2x16xf32, #tpu.memory_space<vmem>>, vector<1x1x2x16xf32>
    %256 = vector.shape_cast %255 : vector<1x1x2x16xf32> to vector<2x16xf32>
    %257 = vector.shape_cast %251 : vector<2x16xf32> to vector<1x1x2x16xf32>
    tpu.vector_store %arg5[%c0_106, %254, %c0_107, %c0_108], %257 {strides = array<i32>} : memref<1x8x2x16xf32, #tpu.memory_space<vmem>>, vector<1x1x2x16xf32>,
    %c2_i32_109 = arith.constant 2 : i32
    %c5_i32_110 = arith.constant 5 : i32
    %258 = arith.select %0, %c2_i32_109, %c5_i32_110 : i32
    %259 = arith.index_cast %258 : i32 to index
    %c0_111 = arith.constant 0 : index
    %c0_112 = arith.constant 0 : index
    %260 = vector.load %arg1[%259, %c0_111, %c0_112] : memref<8x2x32xf32, #tpu.memory_space<vmem>>, vector<1x2x32xf32>
    %261 = vector.shape_cast %260 : vector<1x2x32xf32> to vector<2x32xf32>
    %262 = vector.shape_cast %261 : vector<2x32xf32> to vector<1x2x32xf32>
    %263 = vector.broadcast %262 : vector<1x2x32xf32> to vector<4x2x32xf32>
    %c0_113 = arith.constant 0 : index
    %c0_114 = arith.constant 0 : index
    %264 = vector.load %arg7[%c0_113, %c0_114] : memref<2x16xf32, #tpu.memory_space<vmem>>, vector<2x16xf32>
    %265 = vector.shape_cast %264 : vector<2x16xf32> to vector<1x2x16xf32>
    %266 = vector.broadcast %265 : vector<1x2x16xf32> to vector<4x2x16xf32>
    %cst_115 = arith.constant dense<0.000000e+00> : vector<4x2x16xf32>
    %267 = tpu.matmul %263, %2, %cst_115 {dimension_numbers = #tpu.dot_dimension_numbers<[2], [1], [1], [2], [0, 0, 0, 1, 1, 2], [0], [0]>} : vector<4x2x32xf32>, vector<4x32x16xf32>, vector<4x2x16xf32> -> vector<4x2x16xf32>
    %cst_116 = arith.constant dense<0.000000e+00> : vector<4x2x16xf32>
    %268 = tpu.matmul %266, %4, %cst_116 {dimension_numbers = #tpu.dot_dimension_numbers<[2], [1], [1], [2], [0, 0, 0, 1, 1, 2], [0], [0]>} : vector<4x2x16xf32>, vector<4x16x16xf32>, vector<4x2x16xf32> -> vector<4x2x16xf32>
    %269 = arith.addf %267, %268 : vector<4x2x16xf32>
    %270 = arith.addf %269, %8 : vector<4x2x16xf32>
    %271 = vector.extract_strided_slice %270 {offsets = [0, 0, 0], sizes = [1, 2, 16], strides = [1, 1, 1]} : vector<4x2x16xf32> to vector<1x2x16xf32>
    %272 = vector.shape_cast %271 : vector<1x2x16xf32> to vector<2x16xf32>
    %273 = arith.negf %272 : vector<2x16xf32>
    %274 = math.exp %273 : vector<2x16xf32>
    %cst_117 = arith.constant 1.000000e+00 : f32
    %275 = vector.broadcast %cst_117 : f32 to vector<2x16xf32>
    %276 = arith.addf %275, %274 : vector<2x16xf32>
    %277 = arith.divf %275, %276 : vector<2x16xf32>
    %278 = vector.extract_strided_slice %270 {offsets = [1, 0, 0], sizes = [1, 2, 16], strides = [1, 1, 1]} : vector<4x2x16xf32> to vector<1x2x16xf32>
    %279 = vector.shape_cast %278 : vector<1x2x16xf32> to vector<2x16xf32>
    %280 = arith.negf %279 : vector<2x16xf32>
    %281 = math.exp %280 : vector<2x16xf32>
    %cst_118 = arith.constant 1.000000e+00 : f32
    %282 = vector.broadcast %cst_118 : f32 to vector<2x16xf32>
    %283 = arith.addf %282, %281 : vector<2x16xf32>
    %284 = arith.divf %282, %283 : vector<2x16xf32>
    %285 = vector.extract_strided_slice %270 {offsets = [2, 0, 0], sizes = [1, 2, 16], strides = [1, 1, 1]} : vector<4x2x16xf32> to vector<1x2x16xf32>
    %286 = vector.shape_cast %285 : vector<1x2x16xf32> to vector<2x16xf32>
    %287 = math.tanh %286 : vector<2x16xf32>
    %288 = vector.extract_strided_slice %270 {offsets = [3, 0, 0], sizes = [1, 2, 16], strides = [1, 1, 1]} : vector<4x2x16xf32> to vector<1x2x16xf32>
    %289 = vector.shape_cast %288 : vector<1x2x16xf32> to vector<2x16xf32>
    %290 = arith.negf %289 : vector<2x16xf32>
    %291 = math.exp %290 : vector<2x16xf32>
    %cst_119 = arith.constant 1.000000e+00 : f32
    %292 = vector.broadcast %cst_119 : f32 to vector<2x16xf32>
    %293 = arith.addf %292, %291 : vector<2x16xf32>
    %294 = arith.divf %292, %293 : vector<2x16xf32>
    %c0_120 = arith.constant 0 : index
    %c0_121 = arith.constant 0 : index
    %295 = vector.load %arg8[%c0_120, %c0_121] : memref<2x16xf32, #tpu.memory_space<vmem>>, vector<2x16xf32>
    %296 = arith.mulf %284, %295 : vector<2x16xf32>
    %297 = arith.mulf %277, %287 : vector<2x16xf32>
    %298 = arith.addf %296, %297 : vector<2x16xf32>
    %299 = math.tanh %298 : vector<2x16xf32>
    %300 = arith.mulf %294, %299 : vector<2x16xf32>
    %c0_122 = arith.constant 0 : index
    %c0_123 = arith.constant 0 : index
    %301 = vector.load %arg7[%c0_122, %c0_123] : memref<2x16xf32, #tpu.memory_space<vmem>>, vector<2x16xf32>
    tpu.vector_store %arg7[%c0_122, %c0_123], %300 {strides = array<i32>} : memref<2x16xf32, #tpu.memory_space<vmem>>, vector<2x16xf32>,
    %c0_124 = arith.constant 0 : index
    %c0_125 = arith.constant 0 : index
    %302 = vector.load %arg8[%c0_124, %c0_125] : memref<2x16xf32, #tpu.memory_space<vmem>>, vector<2x16xf32>
    tpu.vector_store %arg8[%c0_124, %c0_125], %298 {strides = array<i32>} : memref<2x16xf32, #tpu.memory_space<vmem>>, vector<2x16xf32>,
    %c0_126 = arith.constant 0 : index
    %303 = arith.index_cast %258 : i32 to index
    %c0_127 = arith.constant 0 : index
    %c0_128 = arith.constant 0 : index
    %304 = vector.load %arg5[%c0_126, %303, %c0_127, %c0_128] : memref<1x8x2x16xf32, #tpu.memory_space<vmem>>, vector<1x1x2x16xf32>
    %305 = vector.shape_cast %304 : vector<1x1x2x16xf32> to vector<2x16xf32>
    %306 = vector.shape_cast %300 : vector<2x16xf32> to vector<1x1x2x16xf32>
    tpu.vector_store %arg5[%c0_126, %303, %c0_127, %c0_128], %306 {strides = array<i32>} : memref<1x8x2x16xf32, #tpu.memory_space<vmem>>, vector<1x1x2x16xf32>,
    %c1_i32_129 = arith.constant 1 : i32
    %c6_i32_130 = arith.constant 6 : i32
    %307 = arith.select %0, %c1_i32_129, %c6_i32_130 : i32
    %308 = arith.index_cast %307 : i32 to index
    %c0_131 = arith.constant 0 : index
    %c0_132 = arith.constant 0 : index
    %309 = vector.load %arg1[%308, %c0_131, %c0_132] : memref<8x2x32xf32, #tpu.memory_space<vmem>>, vector<1x2x32xf32>
    %310 = vector.shape_cast %309 : vector<1x2x32xf32> to vector<2x32xf32>
    %311 = vector.shape_cast %310 : vector<2x32xf32> to vector<1x2x32xf32>
    %312 = vector.broadcast %311 : vector<1x2x32xf32> to vector<4x2x32xf32>
    %c0_133 = arith.constant 0 : index
    %c0_134 = arith.constant 0 : index
    %313 = vector.load %arg7[%c0_133, %c0_134] : memref<2x16xf32, #tpu.memory_space<vmem>>, vector<2x16xf32>
    %314 = vector.shape_cast %313 : vector<2x16xf32> to vector<1x2x16xf32>
    %315 = vector.broadcast %314 : vector<1x2x16xf32> to vector<4x2x16xf32>
    %cst_135 = arith.constant dense<0.000000e+00> : vector<4x2x16xf32>
    %316 = tpu.matmul %312, %2, %cst_135 {dimension_numbers = #tpu.dot_dimension_numbers<[2], [1], [1], [2], [0, 0, 0, 1, 1, 2], [0], [0]>} : vector<4x2x32xf32>, vector<4x32x16xf32>, vector<4x2x16xf32> -> vector<4x2x16xf32>
    %cst_136 = arith.constant dense<0.000000e+00> : vector<4x2x16xf32>
    %317 = tpu.matmul %315, %4, %cst_136 {dimension_numbers = #tpu.dot_dimension_numbers<[2], [1], [1], [2], [0, 0, 0, 1, 1, 2], [0], [0]>} : vector<4x2x16xf32>, vector<4x16x16xf32>, vector<4x2x16xf32> -> vector<4x2x16xf32>
    %318 = arith.addf %316, %317 : vector<4x2x16xf32>
    %319 = arith.addf %318, %8 : vector<4x2x16xf32>
    %320 = vector.extract_strided_slice %319 {offsets = [0, 0, 0], sizes = [1, 2, 16], strides = [1, 1, 1]} : vector<4x2x16xf32> to vector<1x2x16xf32>
    %321 = vector.shape_cast %320 : vector<1x2x16xf32> to vector<2x16xf32>
    %322 = arith.negf %321 : vector<2x16xf32>
    %323 = math.exp %322 : vector<2x16xf32>
    %cst_137 = arith.constant 1.000000e+00 : f32
    %324 = vector.broadcast %cst_137 : f32 to vector<2x16xf32>
    %325 = arith.addf %324, %323 : vector<2x16xf32>
    %326 = arith.divf %324, %325 : vector<2x16xf32>
    %327 = vector.extract_strided_slice %319 {offsets = [1, 0, 0], sizes = [1, 2, 16], strides = [1, 1, 1]} : vector<4x2x16xf32> to vector<1x2x16xf32>
    %328 = vector.shape_cast %327 : vector<1x2x16xf32> to vector<2x16xf32>
    %329 = arith.negf %328 : vector<2x16xf32>
    %330 = math.exp %329 : vector<2x16xf32>
    %cst_138 = arith.constant 1.000000e+00 : f32
    %331 = vector.broadcast %cst_138 : f32 to vector<2x16xf32>
    %332 = arith.addf %331, %330 : vector<2x16xf32>
    %333 = arith.divf %331, %332 : vector<2x16xf32>
    %334 = vector.extract_strided_slice %319 {offsets = [2, 0, 0], sizes = [1, 2, 16], strides = [1, 1, 1]} : vector<4x2x16xf32> to vector<1x2x16xf32>
    %335 = vector.shape_cast %334 : vector<1x2x16xf32> to vector<2x16xf32>
    %336 = math.tanh %335 : vector<2x16xf32>
    %337 = vector.extract_strided_slice %319 {offsets = [3, 0, 0], sizes = [1, 2, 16], strides = [1, 1, 1]} : vector<4x2x16xf32> to vector<1x2x16xf32>
    %338 = vector.shape_cast %337 : vector<1x2x16xf32> to vector<2x16xf32>
    %339 = arith.negf %338 : vector<2x16xf32>
    %340 = math.exp %339 : vector<2x16xf32>
    %cst_139 = arith.constant 1.000000e+00 : f32
    %341 = vector.broadcast %cst_139 : f32 to vector<2x16xf32>
    %342 = arith.addf %341, %340 : vector<2x16xf32>
    %343 = arith.divf %341, %342 : vector<2x16xf32>
    %c0_140 = arith.constant 0 : index
    %c0_141 = arith.constant 0 : index
    %344 = vector.load %arg8[%c0_140, %c0_141] : memref<2x16xf32, #tpu.memory_space<vmem>>, vector<2x16xf32>
    %345 = arith.mulf %333, %344 : vector<2x16xf32>
    %346 = arith.mulf %326, %336 : vector<2x16xf32>
    %347 = arith.addf %345, %346 : vector<2x16xf32>
    %348 = math.tanh %347 : vector<2x16xf32>
    %349 = arith.mulf %343, %348 : vector<2x16xf32>
    %c0_142 = arith.constant 0 : index
    %c0_143 = arith.constant 0 : index
    %350 = vector.load %arg7[%c0_142, %c0_143] : memref<2x16xf32, #tpu.memory_space<vmem>>, vector<2x16xf32>
    tpu.vector_store %arg7[%c0_142, %c0_143], %349 {strides = array<i32>} : memref<2x16xf32, #tpu.memory_space<vmem>>, vector<2x16xf32>,
    %c0_144 = arith.constant 0 : index
    %c0_145 = arith.constant 0 : index
    %351 = vector.load %arg8[%c0_144, %c0_145] : memref<2x16xf32, #tpu.memory_space<vmem>>, vector<2x16xf32>
    tpu.vector_store %arg8[%c0_144, %c0_145], %347 {strides = array<i32>} : memref<2x16xf32, #tpu.memory_space<vmem>>, vector<2x16xf32>,
    %c0_146 = arith.constant 0 : index
    %352 = arith.index_cast %307 : i32 to index
    %c0_147 = arith.constant 0 : index
    %c0_148 = arith.constant 0 : index
    %353 = vector.load %arg5[%c0_146, %352, %c0_147, %c0_148] : memref<1x8x2x16xf32, #tpu.memory_space<vmem>>, vector<1x1x2x16xf32>
    %354 = vector.shape_cast %353 : vector<1x1x2x16xf32> to vector<2x16xf32>
    %355 = vector.shape_cast %349 : vector<2x16xf32> to vector<1x1x2x16xf32>
    tpu.vector_store %arg5[%c0_146, %352, %c0_147, %c0_148], %355 {strides = array<i32>} : memref<1x8x2x16xf32, #tpu.memory_space<vmem>>, vector<1x1x2x16xf32>,
    %c0_i32_149 = arith.constant 0 : i32
    %c7_i32_150 = arith.constant 7 : i32
    %356 = arith.select %0, %c0_i32_149, %c7_i32_150 : i32
    %357 = arith.index_cast %356 : i32 to index
    %c0_151 = arith.constant 0 : index
    %c0_152 = arith.constant 0 : index
    %358 = vector.load %arg1[%357, %c0_151, %c0_152] : memref<8x2x32xf32, #tpu.memory_space<vmem>>, vector<1x2x32xf32>
    %359 = vector.shape_cast %358 : vector<1x2x32xf32> to vector<2x32xf32>
    %360 = vector.shape_cast %359 : vector<2x32xf32> to vector<1x2x32xf32>
    %361 = vector.broadcast %360 : vector<1x2x32xf32> to vector<4x2x32xf32>
    %c0_153 = arith.constant 0 : index
    %c0_154 = arith.constant 0 : index
    %362 = vector.load %arg7[%c0_153, %c0_154] : memref<2x16xf32, #tpu.memory_space<vmem>>, vector<2x16xf32>
    %363 = vector.shape_cast %362 : vector<2x16xf32> to vector<1x2x16xf32>
    %364 = vector.broadcast %363 : vector<1x2x16xf32> to vector<4x2x16xf32>
    %cst_155 = arith.constant dense<0.000000e+00> : vector<4x2x16xf32>
    %365 = tpu.matmul %361, %2, %cst_155 {dimension_numbers = #tpu.dot_dimension_numbers<[2], [1], [1], [2], [0, 0, 0, 1, 1, 2], [0], [0]>} : vector<4x2x32xf32>, vector<4x32x16xf32>, vector<4x2x16xf32> -> vector<4x2x16xf32>
    %cst_156 = arith.constant dense<0.000000e+00> : vector<4x2x16xf32>
    %366 = tpu.matmul %364, %4, %cst_156 {dimension_numbers = #tpu.dot_dimension_numbers<[2], [1], [1], [2], [0, 0, 0, 1, 1, 2], [0], [0]>} : vector<4x2x16xf32>, vector<4x16x16xf32>, vector<4x2x16xf32> -> vector<4x2x16xf32>
    %367 = arith.addf %365, %366 : vector<4x2x16xf32>
    %368 = arith.addf %367, %8 : vector<4x2x16xf32>
    %369 = vector.extract_strided_slice %368 {offsets = [0, 0, 0], sizes = [1, 2, 16], strides = [1, 1, 1]} : vector<4x2x16xf32> to vector<1x2x16xf32>
    %370 = vector.shape_cast %369 : vector<1x2x16xf32> to vector<2x16xf32>
    %371 = arith.negf %370 : vector<2x16xf32>
    %372 = math.exp %371 : vector<2x16xf32>
    %cst_157 = arith.constant 1.000000e+00 : f32
    %373 = vector.broadcast %cst_157 : f32 to vector<2x16xf32>
    %374 = arith.addf %373, %372 : vector<2x16xf32>
    %375 = arith.divf %373, %374 : vector<2x16xf32>
    %376 = vector.extract_strided_slice %368 {offsets = [1, 0, 0], sizes = [1, 2, 16], strides = [1, 1, 1]} : vector<4x2x16xf32> to vector<1x2x16xf32>
    %377 = vector.shape_cast %376 : vector<1x2x16xf32> to vector<2x16xf32>
    %378 = arith.negf %377 : vector<2x16xf32>
    %379 = math.exp %378 : vector<2x16xf32>
    %cst_158 = arith.constant 1.000000e+00 : f32
    %380 = vector.broadcast %cst_158 : f32 to vector<2x16xf32>
    %381 = arith.addf %380, %379 : vector<2x16xf32>
    %382 = arith.divf %380, %381 : vector<2x16xf32>
    %383 = vector.extract_strided_slice %368 {offsets = [2, 0, 0], sizes = [1, 2, 16], strides = [1, 1, 1]} : vector<4x2x16xf32> to vector<1x2x16xf32>
    %384 = vector.shape_cast %383 : vector<1x2x16xf32> to vector<2x16xf32>
    %385 = math.tanh %384 : vector<2x16xf32>
    %386 = vector.extract_strided_slice %368 {offsets = [3, 0, 0], sizes = [1, 2, 16], strides = [1, 1, 1]} : vector<4x2x16xf32> to vector<1x2x16xf32>
    %387 = vector.shape_cast %386 : vector<1x2x16xf32> to vector<2x16xf32>
    %388 = arith.negf %387 : vector<2x16xf32>
    %389 = math.exp %388 : vector<2x16xf32>
    %cst_159 = arith.constant 1.000000e+00 : f32
    %390 = vector.broadcast %cst_159 : f32 to vector<2x16xf32>
    %391 = arith.addf %390, %389 : vector<2x16xf32>
    %392 = arith.divf %390, %391 : vector<2x16xf32>
    %c0_160 = arith.constant 0 : index
    %c0_161 = arith.constant 0 : index
    %393 = vector.load %arg8[%c0_160, %c0_161] : memref<2x16xf32, #tpu.memory_space<vmem>>, vector<2x16xf32>
    %394 = arith.mulf %382, %393 : vector<2x16xf32>
    %395 = arith.mulf %375, %385 : vector<2x16xf32>
    %396 = arith.addf %394, %395 : vector<2x16xf32>
    %397 = math.tanh %396 : vector<2x16xf32>
    %398 = arith.mulf %392, %397 : vector<2x16xf32>
    %c0_162 = arith.constant 0 : index
    %c0_163 = arith.constant 0 : index
    %399 = vector.load %arg7[%c0_162, %c0_163] : memref<2x16xf32, #tpu.memory_space<vmem>>, vector<2x16xf32>
    tpu.vector_store %arg7[%c0_162, %c0_163], %398 {strides = array<i32>} : memref<2x16xf32, #tpu.memory_space<vmem>>, vector<2x16xf32>,
    %c0_164 = arith.constant 0 : index
    %c0_165 = arith.constant 0 : index
    %400 = vector.load %arg8[%c0_164, %c0_165] : memref<2x16xf32, #tpu.memory_space<vmem>>, vector<2x16xf32>
    tpu.vector_store %arg8[%c0_164, %c0_165], %396 {strides = array<i32>} : memref<2x16xf32, #tpu.memory_space<vmem>>, vector<2x16xf32>,
    %c0_166 = arith.constant 0 : index
    %401 = arith.index_cast %356 : i32 to index
    %c0_167 = arith.constant 0 : index
    %c0_168 = arith.constant 0 : index
    %402 = vector.load %arg5[%c0_166, %401, %c0_167, %c0_168] : memref<1x8x2x16xf32, #tpu.memory_space<vmem>>, vector<1x1x2x16xf32>
    %403 = vector.shape_cast %402 : vector<1x1x2x16xf32> to vector<2x16xf32>
    %404 = vector.shape_cast %398 : vector<2x16xf32> to vector<1x1x2x16xf32>
    tpu.vector_store %arg5[%c0_166, %401, %c0_167, %c0_168], %404 {strides = array<i32>} : memref<1x8x2x16xf32, #tpu.memory_space<vmem>>, vector<1x1x2x16xf32>,
    %c0_169 = arith.constant 0 : index
    %c0_170 = arith.constant 0 : index
    %405 = vector.load %arg7[%c0_169, %c0_170] : memref<2x16xf32, #tpu.memory_space<vmem>>, vector<2x16xf32>
    %c0_171 = arith.constant 0 : index
    %c0_172 = arith.constant 0 : index
    %c0_173 = arith.constant 0 : index
    %406 = vector.load %arg6[%c0_171, %c0_172, %c0_173] : memref<1x2x16xf32, #tpu.memory_space<vmem>>, vector<1x2x16xf32>
    %407 = vector.shape_cast %406 : vector<1x2x16xf32> to vector<2x16xf32>
    %408 = vector.shape_cast %405 : vector<2x16xf32> to vector<1x2x16xf32>
    tpu.vector_store %arg6[%c0_171, %c0_172, %c0_173], %408 {strides = array<i32>} : memref<1x2x16xf32, #tpu.memory_space<vmem>>, vector<1x2x16xf32>,
    return
  }
  func.func @transform_0(%arg0: i32) -> (i32, i32, i32) {
    %c0_i32 = arith.constant 0 : i32
    %c0_i32_0 = arith.constant 0 : i32
    %c0_i32_1 = arith.constant 0 : i32
    %c0_i32_2 = arith.constant 0 : i32
    return %c0_i32, %c0_i32_0, %c0_i32_1 : i32, i32, i32
  }
  func.func @transform_1(%arg0: i32) -> (i32, i32, i32, i32) {
    %c0_i32 = arith.constant 0 : i32
    %c0_i32_0 = arith.constant 0 : i32
    %c0_i32_1 = arith.constant 0 : i32
    %c0_i32_2 = arith.constant 0 : i32
    return %arg0, %c0_i32, %c0_i32_0, %c0_i32_1 : i32, i32, i32, i32
  }
  func.func @transform_2(%arg0: i32) -> (i32, i32, i32, i32) {
    %c0_i32 = arith.constant 0 : i32
    %c0_i32_0 = arith.constant 0 : i32
    %c0_i32_1 = arith.constant 0 : i32
    %c0_i32_2 = arith.constant 0 : i32
    return %arg0, %c0_i32, %c0_i32_0, %c0_i32_1 : i32, i32, i32, i32
  }
  func.func @transform_3(%arg0: i32) -> (i32, i32, i32, i32) {
    %c0_i32 = arith.constant 0 : i32
    %c0_i32_0 = arith.constant 0 : i32
    %c0_i32_1 = arith.constant 0 : i32
    %c0_i32_2 = arith.constant 0 : i32
    return %arg0, %c0_i32, %c0_i32_0, %c0_i32_1 : i32, i32, i32, i32
  }
  func.func @transform_4(%arg0: i32) -> (i32, i32, i32, i32) {
    %c0_i32 = arith.constant 0 : i32
    %c0_i32_0 = arith.constant 0 : i32
    %c0_i32_1 = arith.constant 0 : i32
    %c0_i32_2 = arith.constant 0 : i32
    return %arg0, %c0_i32, %c0_i32_0, %c0_i32_1 : i32, i32, i32, i32
  }
  func.func @transform_5(%arg0: i32) -> (i32, i32, i32) {
    %c0_i32 = arith.constant 0 : i32
    %c0_i32_0 = arith.constant 0 : i32
    %c0_i32_1 = arith.constant 0 : i32
    return %arg0, %c0_i32, %c0_i32_0 : i32, i32, i32
  }
}

module attributes {stable_mosaic.version = 11 : i64} {
  func.func @_linear_kernel(%arg0: memref<2x32xf32, #tpu.memory_space<vmem>>, %arg1: memref<32x3xf32, #tpu.memory_space<vmem>>, %arg2: memref<1x3xf32, #tpu.memory_space<vmem>>, %arg3: memref<2x3xf32, #tpu.memory_space<vmem>>) attributes {dimension_semantics = [], scalar_prefetch = 0 : i64, scratch_operands = 0 : i64, tpu.core_type = #tpu.core_type<tc>} {
    %c0 = arith.constant 0 : index
    %c0_0 = arith.constant 0 : index
    %0 = vector.load %arg0[%c0, %c0_0] : memref<2x32xf32, #tpu.memory_space<vmem>>, vector<2x32xf32>
    %c0_1 = arith.constant 0 : index
    %c0_2 = arith.constant 0 : index
    %1 = vector.load %arg1[%c0_1, %c0_2] : memref<32x3xf32, #tpu.memory_space<vmem>>, vector<32x3xf32>
    %cst = arith.constant dense<0.000000e+00> : vector<2x3xf32>
    %2 = tpu.matmul %0, %1, %cst {dimension_numbers = #tpu.dot_dimension_numbers<[1], [0], [0], [1], [0, 0, 1, 1], [], []>} : vector<2x32xf32>, vector<32x3xf32>, vector<2x3xf32> -> vector<2x3xf32>
    %c0_3 = arith.constant 0 : index
    %c0_4 = arith.constant 0 : index
    %3 = vector.load %arg2[%c0_3, %c0_4] : memref<1x3xf32, #tpu.memory_space<vmem>>, vector<1x3xf32>
    %4 = vector.broadcast %3 : vector<1x3xf32> to vector<2x3xf32>
    %5 = arith.addf %2, %4 : vector<2x3xf32>
    %c0_5 = arith.constant 0 : index
    %c0_6 = arith.constant 0 : index
    %6 = vector.load %arg3[%c0_5, %c0_6] : memref<2x3xf32, #tpu.memory_space<vmem>>, vector<2x3xf32>
    tpu.vector_store %arg3[%c0_5, %c0_6], %5 {strides = array<i32>} : memref<2x3xf32, #tpu.memory_space<vmem>>, vector<2x3xf32>,
    return
  }
}

</mosaic_0001>

<bundles_post_ra>
// kernel: bert_sentiment_forward.6
= control target key start
LH: loop header
LB: loop body
LE: loop exit
PB: predicated region body
PF: predicated region fallthrough
CT: control target
= control target key end

     0   :  { %s301_s12 = smov 0   ;;  %s327_s0 = inlined_call_operand.vmem [shape: f32[2,8,32], index: 0, kind: input, shape index: {}]   ;;  %s328_s1 = inlined_call_operand.vmem [shape: f32[1,32], index: 1, kind: input, shape index: {}]   ;;  %s329_s2 = inlined_call_operand.vmem [shape: f32[1,32], index: 2, kind: input, shape index: {}]   ;;  %s330_s3 = inlined_call_operand.vmem [shape: f32[2,8,32], index: 3, kind: output, shape index: {}]  }
   0x1 LB: > { %s252_s13 = sadd.s32 4294967295, %s279_s12   ;;  %p256_p0 = scmp.ge.s32.totalorder %s279_s12, 1  ;;  %s279_s12 = sphi %s301_s12, %s13_s12  }
   0x2   : > { %p136_p1 = scmp.lt.s32.totalorder %s279_s12, 3 }
   0x4   : > { %p137_p2 = pnand %p256_p0, %p136_p1 }
   0x5   : > { %p158_p3 = scmp.lt.s32.totalorder (!%p137_p2), %s252_s13, 1  ;;  %vm169_vm0 = vcmask (!%p137_p2), 261120   ;;  %v259_v11 = vld [vmem:[%s328_s1] ss:$0 sm:$0xff] (!%p137_p2) }
   0x6   : > { %140 = sbr.rel (%p137_p2) target bundleno = 331 (0x14b), region = 32  ;;  %v260_v13 = vld [vmem:[%s329_s2] ss:$0 sm:$0xff] (!%p137_p2) }
   0xd   : > { %s332_s13 = smov (!%p158_p3, %s252_s13), 1 }
   0xe   : > { %s257_s14 = sshll.u32 %s332_s13, 3 }
   0xf   : > { %s161_s17 = scalar_lea.vmem %s327_s0, %s257_s14  ;;  %s165_s24 = scalar_lea.vmem %s330_s3, %s257_s14 }
  0x10   : > { %v166_v0 = vld [vmem:[%s161_s17] sm:$0xff] }
  0x11   : > { %v170_v1 = vsel %vm169_vm0, %v166_v0, 0.0 }
  0x12   : > { %171 = vadd.xlane.f32.xlu0 %v170_v1 }
  0x9f   : > { %v172_v2 = vpop.xlane.xlu0 %171 }
  0xa0   : > { %v174_v3 = vmul.f32 0.03125, %v172_v2 }
  0xa2   : > { %v175_v4 = vsub.f32 %v166_v0, %v174_v3 }
  0xa4   : > { %v176_v5 = vmul.f32 %v175_v4, %v175_v4 }
  0xa6   : > { %v177_v6 = vsel %vm169_vm0, %v176_v5, 0.0 }
  0xa7   : > { %178 = vadd.xlane.f32.xlu0 %v177_v6 }
 0x134   : > { %v179_v7 = vpop.xlane.xlu0 %178 }
 0x135   : > { %v180_v8 = vmul.f32 0.03125, %v179_v7 }
 0x137   : > { %v181_v9 = vadd.f32 1e-12, %v180_v8 }
 0x139   : > { %271 = vrsqrt.f32 %v181_v9 }
 0x143   : > { %v272_v10 = vpop.eup %271 }
 0x144   : > { %v183_v12 = vmul.f32 %v272_v10, %v175_v4 }
 0x146   : > { %v190_v14 = vmul.f32 %v259_v11, %v183_v12 }
 0x148   : > { %v197_v15 = vadd.f32 %v260_v13, %v190_v14 }
 0x14a   : > { %198 = vst.msk [vmem:[%s165_s24] sm:$0xff] %vm169_vm0, %v197_v15 }
 0x14b PF: > { %s13_s12 = sadd.s32 1, %s279_s12  }
 0x14c   : > { %p10_p4 = scmp.ge.s32.totalorder %s13_s12, 4  }
 0x14e   :  { %12 = sbr.rel (!%p10_p4) target bundleno = 1 (0x1), region = 62 }

// kernel: bert_sentiment_forward.11
= control target key start
LH: loop header
LB: loop body
LE: loop exit
PB: predicated region body
PF: predicated region fallthrough
CT: control target
= control target key end

     0   :  { %v169_v3 = vmov 0.0|0.0   ;;  %vm170_vm0 = vmmov 0   ;;  %v171_v6 = vmov 0.0   ;;  %s223_s0 = inlined_call_operand.vmem [shape: f32[2,32], index: 0, kind: input, shape index: {}]   ;;  %s224_s1 = inlined_call_operand.vmem [shape: f32[32,3], index: 1, kind: input, shape index: {}]   ;;  %s225_s2 = inlined_call_operand.vmem [shape: f32[1,3], index: 2, kind: input, shape index: {}]   ;;  %s226_s3 = inlined_call_operand.hbm [shape: f32[2,3], index: 3, kind: output, shape index: {}]  }
   0x1   :  { %v16_v0 = vld [vmem:[%s224_s1] sm:$0xff]  ;;  %v17_v1 = vld [vmem:[%s224_s1 + $0x8] sm:$0xff]  ;;  %v18_v2 = vld [vmem:[%s224_s1 + $0x10] sm:$0xff]  ;;  %135 = vmatprep.subr.bf16.mxu0 %v169_v3  ;;  %132 = vmatprep.mubr.msk.f32.mxu0 %vm170_vm0, %v171_v6 }
   0x2   :  { %v136_v4 = vpack.c.bf16 %v17_v1, %v16_v0  ;;  %v19_v5 = vld [vmem:[%s224_s1 + $0x18] sm:$0xff] }
   0x3   :  { %8 = vsyncpa [#allocation3], 0  ;;  %v139_v7 = vpack.c.bf16 %v19_v5, %v18_v2  ;;  %v15_v8 = vld [vmem:[%s223_s0] sm:$0x3]  ;;  %vm27_vm1 = vcmask 261120   ;;  %s172_s24 = smov [#allocation2]  }
   0x4   :  { %137 = vmatpush3.bf16.msra.mxu0 %v136_v4  ;;  %v117_v9 = vld [vmem:[%s225_s2] ss:$0 sm:$0xff]  ;;  %s109_s1 = sshll.u32 %s172_s24, 4  ;;  %vm101_vm2 = vcmask 17408   ;;  %s110_s1 = int_to_ptr.vmem [resolvable:$true] %s109_s1 }
   0x5   :  { %138 = vmatprep.subr.bf16.mxu0 %v169_v3  ;;  %s145_s25 = scalar_lea.vmem %s110_s1, 32  ;;  %p150_p1 = scmp.lt.s32.totalorder %s110_s1, %s110_s1 }
   0x6   :  { %p146_p0 = scmp.ne.s32.totalorder %s110_s1, %s145_s25  ;;  %p151_p2 = scmp.lt.s32.totalorder %s145_s25, %s145_s25 }
   0x8   :  { %140 = vmatpush3.bf16.msra.mxu0 %v139_v7  ;;  %p152_p3 = por %p151_p2, %p150_p1 }
   0xa   :  { %p153_p4 = pnand %p152_p3, %p146_p0 }
   0xb   :  { %133 = vmatmul.mubr.msk.f32.vlgmr.msra.gmra.mrb[0].mxu0 %vm27_vm1, %v15_v8 }
  0xde   :  { %v97_v10 = vpop.f32.mrb[0].mxu0 }
  0xdf   :  { %v98_v11 = vadd.f32 %v117_v9, %v97_v10  ;;  %v134_v12 = vpop.f32.mrb[1].mxu0 }
  0xe1   :  { %102 = vst.msk [vmem:[#allocation2] sm:$0x3] %vm101_vm2, %v98_v11 }
  0xe2   :  { %156 = shalt.err (!%p153_p4)
}
  0xe3   :  { %s157_s27 = scalar_lea.hbm %s226_s3, 32 }
  0xe4   :  { %p158_p5 = scmp.ne.s32.totalorder %s226_s3, %s157_s27  ;;  %p161_p6 = scmp.lt.u32.totalorder %s157_s27, %s226_s3 }
  0xe6   :  { %p163_p7 = pnand %p161_p6, %p158_p5 }
  0xe8   :  { %166 = shalt.err (!%p163_p7)
}
  0xe9   :  { %112 = dma.vmem_to_hbm [thread:$0]  %s110_s1, 32, %s226_s3, [#allocation3]  }
  0xea   :  { %167 = dma.done.wait [#allocation3], 32  }
  0xeb   :  { %168 = vsyncadd [#allocation3], 4294967264 }
  0xec   :  { %116 = vsyncpa [#allocation3], 1 }

// kernel: bert_sentiment_forward.7
= control target key start
LH: loop header
LB: loop body
LE: loop exit
PB: predicated region body
PF: predicated region fallthrough
CT: control target
= control target key end

     0   :  { %s3359_s29 = smov 0   ;;  %s3797_s0 = inlined_call_operand.vmem [shape: f32[2,8,32], index: 0, kind: input, shape index: {}]   ;;  %s3798_s1 = inlined_call_operand.vmem [shape: f32[2,1,8], index: 1, kind: input, shape index: {}]   ;;  %s3799_s2 = inlined_call_operand.vmem [shape: f32[3,4,32,8], index: 2, kind: input, shape index: {}]   ;;  %s3800_s3 = inlined_call_operand.vmem [shape: f32[3,4,1,8], index: 3, kind: input, shape index: {}]   ;;  %s3801_s4 = inlined_call_operand.vmem [shape: f32[4,8,32], index: 4, kind: input, shape index: {}]   ;;  %s3802_s5 = inlined_call_operand.vmem [shape: f32[1,32], index: 5, kind: input, shape index: {}]   ;;  %s3803_s6 = inlined_call_operand.vmem [shape: f32[1,32], index: 6, kind: input, shape index: {}]   ;;  %s3804_s7 = inlined_call_operand.vmem [shape: f32[1,32], index: 7, kind: input, shape index: {}]   ;;  %s3805_s8 = inlined_call_operand.vmem [shape: f32[32,64], index: 8, kind: input, shape index: {}]   ;;  %s3806_s9 = inlined_call_operand.vmem [shape: f32[1,64], index: 9, kind: input, shape index: {}]   ;;  %s3807_s10 = inlined_call_operand.vmem [shape: f32[64,32], index: 10, kind: input, shape index: {}]   ;;  %s3808_s11 = inlined_call_operand.vmem [shape: f32[1,32], index: 11, kind: input, shape index: {}]   ;;  %s3809_s12 = inlined_call_operand.vmem [shape: f32[1,32], index: 12, kind: input, shape index: {}]   ;;  %s3810_s13 = inlined_call_operand.vmem [shape: f32[1,32], index: 13, kind: input, shape index: {}]   ;;  %s3811_s14 = inlined_call_operand.vmem [shape: f32[2,8,32], index: 14, kind: output, shape index: {}]  }
   0x1 LB: > { %s2731_s30 = sadd.s32 4294967295, %s3279_s29   ;;  %p2735_p0 = scmp.ge.s32.totalorder %s3279_s29, 1  ;;  %s3279_s29 = sphi %s3359_s29, %s24_s29  }
   0x2   : > { %p419_p1 = scmp.lt.s32.totalorder %s3279_s29, 3 }
   0x4   : > { %p420_p2 = pnand %p2735_p0, %p419_p1 }
   0x5   : > { %v479_v0 = vld [vmem:[%s3799_s2] sm:$0xff] (!%p420_p2)  ;;  %v480_v1 = vld [vmem:[%s3799_s2 + $0x8] sm:$0xff] (!%p420_p2)  ;;  %v3281_v3 = vmov (!%p420_p2), 0.0|0.0   ;;  %v481_v6 = vld [vmem:[%s3799_s2 + $0x10] sm:$0xff] (!%p420_p2)  ;;  %p466_p3 = scmp.lt.s32.totalorder (!%p420_p2), %s2731_s30, 1  ;;  %vm3282_vm0 = vmmov (!%p420_p2), 0  }
   0x6   : > { %423 = sbr.rel (%p420_p2) target bundleno = 2305 (0x901), region = 76  ;;  %v483_v2 = vld [vmem:[%s3799_s2 + $0x20] sm:$0xff] (!%p420_p2)  ;;  %3150 = vmatprep.subr.bf16.mxu0 (!%p420_p2), %v3281_v3  ;;  %3156 = vmatprep.subr.bf16.mxu1 (!%p420_p2), %v3281_v3  ;;  %v3151_v4 = vpack.c.bf16 (!%p420_p2), %v480_v1, %v479_v0  ;;  %v484_v5 = vld [vmem:[%s3799_s2 + $0x28] sm:$0xff] (!%p420_p2)  ;;  %v482_v7 = vld [vmem:[%s3799_s2 + $0x18] sm:$0xff] (!%p420_p2)  ;;  %v3283_v11 = vmov (!%p420_p2), 0.0   ;;  %vm523_vm1 = vcmask (!%p420_p2), 261120  }
   0x7   : > { %v3157_v8 = vpack.c.bf16 (!%p420_p2), %v484_v5, %v483_v2  ;;  %v485_v9 = vld [vmem:[%s3799_s2 + $0x30] sm:$0xff] (!%p420_p2)  ;;  %v486_v10 = vld [vmem:[%s3799_s2 + $0x38] sm:$0xff] (!%p420_p2)  ;;  %2936 = vmatprep.mubr.msk.f32.mxu0 (!%p420_p2), %vm3282_vm0, %v3283_v11  ;;  %2947 = vmatprep.mubr.msk.f32.mxu1 (!%p420_p2), %vm3282_vm0, %v3283_v11  ;;  %v3154_v12 = vpack.c.bf16 (!%p420_p2), %v482_v7, %v481_v6  ;;  %v487_v14 = vld [vmem:[%s3799_s2 + $0x40] sm:$0xff] (!%p420_p2)  ;;  %vm1459_vm2 = vcmask (!%p420_p2), 64512   ;;  %vm2564_vm3 = vcmask (!%p420_p2), 523264  }
   0x8   : > { %3152 = vmatpush3.bf16.msra.mxu0 (!%p420_p2), %v3151_v4  ;;  %v3160_v13 = vpack.c.bf16 (!%p420_p2), %v486_v10, %v485_v9  ;;  %v488_v15 = vld [vmem:[%s3799_s2 + $0x48] sm:$0xff] (!%p420_p2)  ;;  %v491_v16 = vld [vmem:[%s3799_s2 + $0x60] sm:$0xff] (!%p420_p2)  ;;  %v489_v21 = vld [vmem:[%s3799_s2 + $0x50] sm:$0xff] (!%p420_p2) }
   0x9   : > { %3158 = vmatpush3.bf16.msra.mxu1 (!%p420_p2), %v3157_v8  ;;  %3153 = vmatprep.subr.bf16.mxu0 (!%p420_p2), %v3281_v3  ;;  %v492_v17 = vld [vmem:[%s3799_s2 + $0x68] sm:$0xff] (!%p420_p2)  ;;  %v3163_v19 = vpack.c.bf16 (!%p420_p2), %v488_v15, %v487_v14  ;;  %v490_v22 = vld [vmem:[%s3799_s2 + $0x58] sm:$0xff] (!%p420_p2)  ;;  %v493_v23 = vld [vmem:[%s3799_s2 + $0x70] sm:$0xff] (!%p420_p2) }
   0xa   : > { %3159 = vmatprep.subr.bf16.mxu1 (!%p420_p2), %v3281_v3  ;;  %v3169_v20 = vpack.c.bf16 (!%p420_p2), %v492_v17, %v491_v16  ;;  %v494_v24 = vld [vmem:[%s3799_s2 + $0x78] sm:$0xff] (!%p420_p2)  ;;  %v3166_v25 = vpack.c.bf16 (!%p420_p2), %v490_v22, %v489_v21  ;;  %v2746_v27 = vld [vmem:[%s3799_s2 + $0x80] sm:$0xff] (!%p420_p2)  ;;  %v2747_v28 = vld [vmem:[%s3799_s2 + $0x88] sm:$0xff] (!%p420_p2) }
   0xb   : > { %v3172_v26 = vpack.c.bf16 (!%p420_p2), %v494_v24, %v493_v23  ;;  %v2750_v29 = vld [vmem:[%s3799_s2 + $0xa0] sm:$0xff] (!%p420_p2)  ;;  %v2751_v30 = vld [vmem:[%s3799_s2 + $0xa8] sm:$0xff] (!%p420_p2)  ;;  %v3175_v31 = vpack.c.bf16 (!%p420_p2), %v2747_v28, %v2746_v27  ;;  %v2748_v33 = vld [vmem:[%s3799_s2 + $0x90] sm:$0xff] (!%p420_p2) }
   0xc   : > { %3155 = vmatpush3.bf16.msra.mxu0 (!%p420_p2), %v3154_v12  ;;  %v3181_v32 = vpack.c.bf16 (!%p420_p2), %v2751_v30, %v2750_v29  ;;  %v2749_v34 = vld [vmem:[%s3799_s2 + $0x98] sm:$0xff] (!%p420_p2)  ;;  %v2752_v35 = vld [vmem:[%s3799_s2 + $0xb0] sm:$0xff] (!%p420_p2)  ;;  %v2754_v39 = vld [vmem:[%s3799_s2 + $0xc0] sm:$0xff] (!%p420_p2) }
   0xd   : > { %s3813_s30 = smov (!%p466_p3, %s2731_s30), 1  ;;  %3161 = vmatpush3.bf16.msra.mxu1 %v3160_v13  ;;  %3162 = vmatprep.subr.bf16.mxu0 %v3281_v3  ;;  %v2753_v36 = vld [vmem:[%s3799_s2 + $0xb8] sm:$0xff]  ;;  %v3178_v37 = vpack.c.bf16 %v2749_v34, %v2748_v33  ;;  %v2755_v40 = vld [vmem:[%s3799_s2 + $0xc8] sm:$0xff]  ;;  %v2758_v41 = vld [vmem:[%s3799_s2 + $0xe0] sm:$0xff] }
   0xe   : > { %s2736_s21 = sshll.u32 %s3813_s30, 3  ;;  %3168 = vmatprep.subr.bf16.mxu1 %v3281_v3  ;;  %v3184_v38 = vpack.c.bf16 %v2753_v36, %v2752_v35  ;;  %v2759_v42 = vld [vmem:[%s3799_s2 + $0xe8] sm:$0xff]  ;;  %v3187_v43 = vpack.c.bf16 %v2755_v40, %v2754_v39  ;;  %v2756_v45 = vld [vmem:[%s3799_s2 + $0xd0] sm:$0xff]  ;;  %v2757_v46 = vld [vmem:[%s3799_s2 + $0xd8] sm:$0xff]  ;;  %s472_s18 = scalar_lea.vmem %s3798_s1, %s3813_s30 }
   0xf   : > { %s469_s28 = scalar_lea.vmem %s3797_s0, %s2736_s21  ;;  %v3193_v44 = vpack.c.bf16 %v2759_v42, %v2758_v41  ;;  %v2760_v47 = vld [vmem:[%s3799_s2 + $0xf0] sm:$0xff]  ;;  %v2761_v48 = vld [vmem:[%s3799_s2 + $0xf8] sm:$0xff]  ;;  %v3190_v49 = vpack.c.bf16 %v2757_v46, %v2756_v45  ;;  %v2774_v51 = vld [vmem:[%s3799_s2 + $0x100] sm:$0xff]  ;;  %s476_s19 = scalar_lea.vmem %s3811_s14, %s2736_s21 }
  0x10   : > { %v3419_v18 = vld [vmem:[%s469_s28] sm:$0xff]  ;;  %v3196_v50 = vpack.c.bf16 %v2761_v48, %v2760_v47  ;;  %v2775_v52 = vld [vmem:[%s3799_s2 + $0x108] sm:$0xff]  ;;  %v2776_v54 = vld [vmem:[%s3799_s2 + $0x110] sm:$0xff] }
  0x11   : > { %2937 = vmatmul.mubr.msk.f32.vlgmr.msra.gmra.mrb[0].mxu0 %vm523_vm1, %v3419_v18  ;;  %2948 = vmatmul.mubr.msk.f32.vlgmr.msra.gmra.mrb[0].mxu1 %vm523_vm1, %v3419_v18  ;;  %v3199_v53 = vpack.c.bf16 %v2775_v52, %v2774_v51  ;;  %v2777_v55 = vld [vmem:[%s3799_s2 + $0x118] sm:$0xff]  ;;  %v2778_v57 = vld [vmem:[%s3799_s2 + $0x120] sm:$0xff]  ;;  %v2779_v58 = vld [vmem:[%s3799_s2 + $0x128] sm:$0xff] }
  0x12   : > { %3164 = vmatpush3.bf16.msra.mxu0 %v3163_v19  ;;  %3170 = vmatpush3.bf16.msra.mxu1 %v3169_v20  ;;  %v3202_v56 = vpack.c.bf16 %v2777_v55, %v2776_v54  ;;  %v2782_v59 = vld [vmem:[%s3799_s2 + $0x140] sm:$0xff]  ;;  %v3205_v60 = vpack.c.bf16 %v2779_v58, %v2778_v57  ;;  %v2783_v61 = vld [vmem:[%s3799_s2 + $0x148] sm:$0xff]  ;;  %v2780_v63 = vld [vmem:[%s3799_s2 + $0x130] sm:$0xff] }
  0x13   : > { %3165 = vmatprep.subr.bf16.mxu0 %v3281_v3  ;;  %3171 = vmatprep.subr.bf16.mxu1 %v3281_v3  ;;  %v3211_v62 = vpack.c.bf16 %v2783_v61, %v2782_v59  ;;  %v2781_v0 = vld [vmem:[%s3799_s2 + $0x138] sm:$0xff]  ;;  %v2784_v1 = vld [vmem:[%s3799_s2 + $0x150] sm:$0xff]  ;;  %v2786_v6 = vld [vmem:[%s3799_s2 + $0x160] sm:$0xff] }
  0x14   : > { %2958 = vmatprep.mubr.msk.f32.mxu0 %vm3282_vm0, %v3283_v11  ;;  %2969 = vmatprep.mubr.msk.f32.mxu1 %vm3282_vm0, %v3283_v11  ;;  %v3208_v2 = vpack.c.bf16 %v2781_v0, %v2780_v63  ;;  %v2785_v4 = vld [vmem:[%s3799_s2 + $0x158] sm:$0xff]  ;;  %v2787_v7 = vld [vmem:[%s3799_s2 + $0x168] sm:$0xff]  ;;  %v2788_v9 = vld [vmem:[%s3799_s2 + $0x170] sm:$0xff] }
  0x15   : > { %v3214_v5 = vpack.c.bf16 %v2785_v4, %v2784_v1  ;;  %v3217_v8 = vpack.c.bf16 %v2787_v7, %v2786_v6  ;;  %v2789_v10 = vld [vmem:[%s3799_s2 + $0x178] sm:$0xff]  ;;  %v2766_v22 = vld [vmem:[%s3800_s3 + $0x4] ss:$0 sm:$0xff]  ;;  %v2767_v24 = vld [vmem:[%s3800_s3 + $0x5] ss:$0 sm:$0xff] }
  0x16   : > { %3167 = vmatpush3.bf16.msra.mxu0 %v3166_v25  ;;  %3173 = vmatpush3.bf16.msra.mxu1 %v3172_v26  ;;  %v3220_v12 = vpack.c.bf16 %v2789_v10, %v2788_v9  ;;  %v2738_v25 = vld [vmem:[%s3800_s3] ss:$0 sm:$0xff]  ;;  %v2768_v33 = vld [vmem:[%s3800_s3 + $0x6] ss:$0 sm:$0xff]  ;;  %v2769_v34 = vld [vmem:[%s3800_s3 + $0x7] ss:$0 sm:$0xff] }
  0x17   : > { %3174 = vmatprep.subr.bf16.mxu0 %v3281_v3  ;;  %3180 = vmatprep.subr.bf16.mxu1 %v3281_v3  ;;  %v2741_v41 = vld [vmem:[%s3800_s3 + $0x3] ss:$0 sm:$0xff]  ;;  %v2794_v46 = vld [vmem:[%s3800_s3 + $0x8] ss:$0 sm:$0xff]  ;;  %v2810_v59 = vld [vmem:[%s472_s18] ss:$0 sm:$0xff] }
  0x19   : > { %2959 = vmatmul.mubr.msk.f32.vlgmr.msra.gmra.mrb[2].mxu0 %vm523_vm1, %v3419_v18  ;;  %2970 = vmatmul.mubr.msk.f32.vlgmr.msra.gmra.mrb[2].mxu1 %vm523_vm1, %v3419_v18 }
  0x1a   : > { %3176 = vmatpush3.bf16.msra.mxu0 %v3175_v31  ;;  %3182 = vmatpush3.bf16.msra.mxu1 %v3181_v32  ;;  %v2739_v32 = vld [vmem:[%s3800_s3 + $0x1] ss:$0 sm:$0xff] }
  0x1b   : > { %3177 = vmatprep.subr.bf16.mxu0 %v3281_v3  ;;  %3183 = vmatprep.subr.bf16.mxu1 %v3281_v3 }
  0x1c   : > { %2980 = vmatprep.mubr.msk.f32.mxu0 %vm3282_vm0, %v3283_v11  ;;  %2991 = vmatprep.mubr.msk.f32.mxu1 %vm3282_vm0, %v3283_v11 }
  0x1e   : > { %3179 = vmatpush3.bf16.msra.mxu0 %v3178_v37  ;;  %3185 = vmatpush3.bf16.msra.mxu1 %v3184_v38  ;;  %v2740_v37 = vld [vmem:[%s3800_s3 + $0x2] ss:$0 sm:$0xff] }
  0x1f   : > { %3186 = vmatprep.subr.bf16.mxu0 %v3281_v3  ;;  %3192 = vmatprep.subr.bf16.mxu1 %v3281_v3 }
  0x21   : > { %2981 = vmatmul.mubr.msk.f32.vlgmr.msra.gmra.mrb[4].mxu0 %vm523_vm1, %v3419_v18  ;;  %2992 = vmatmul.mubr.msk.f32.vlgmr.msra.gmra.mrb[4].mxu1 %vm523_vm1, %v3419_v18 }
  0x22   : > { %3188 = vmatpush3.bf16.msra.mxu0 %v3187_v43  ;;  %3194 = vmatpush3.bf16.msra.mxu1 %v3193_v44 }
  0x23   : > { %3189 = vmatprep.subr.bf16.mxu0 %v3281_v3  ;;  %3195 = vmatprep.subr.bf16.mxu1 %v3281_v3 }
  0x24   : > { %3002 = vmatprep.mubr.msk.f32.mxu0 %vm3282_vm0, %v3283_v11  ;;  %3013 = vmatprep.mubr.msk.f32.mxu1 %vm3282_vm0, %v3283_v11 }
  0x26   : > { %3191 = vmatpush3.bf16.msra.mxu0 %v3190_v49  ;;  %3197 = vmatpush3.bf16.msra.mxu1 %v3196_v50  ;;  %v2795_v50 = vld [vmem:[%s3800_s3 + $0x9] ss:$0 sm:$0xff] }
  0x27   : > { %3198 = vmatprep.subr.bf16.mxu0 %v3281_v3  ;;  %3204 = vmatprep.subr.bf16.mxu1 %v3281_v3 }
  0x29   : > { %3003 = vmatmul.mubr.msk.f32.vlgmr.msra.gmra.mrb[6].mxu0 %vm523_vm1, %v3419_v18  ;;  %3014 = vmatmul.mubr.msk.f32.vlgmr.msra.gmra.mrb[6].mxu1 %vm523_vm1, %v3419_v18 }
  0x2a   : > { %3200 = vmatpush3.bf16.msra.mxu0 %v3199_v53  ;;  %3024 = vmatprep.mubr.msk.f32.mxu0 %vm3282_vm0, %v3283_v11 }
  0x2b   : > { %3201 = vmatprep.subr.bf16.mxu0 %v3281_v3  ;;  %3035 = vmatprep.mubr.msk.f32.mxu1 %vm3282_vm0, %v3283_v11 }
  0x2c   : > { %3206 = vmatpush3.bf16.msra.mxu1 %v3205_v60 }
  0x2d   : > { %3207 = vmatprep.subr.bf16.mxu1 %v3281_v3 }
  0x2e   : > { %3203 = vmatpush3.bf16.msra.mxu0 %v3202_v56 }
  0x2f   : > { %3210 = vmatprep.subr.bf16.mxu0 %v3281_v3 }
  0x30   : > { %3209 = vmatpush3.bf16.msra.mxu1 %v3208_v2 }
  0x31   : > { %3025 = vmatmul.mubr.msk.f32.vlgmr.msra.gmra.mrb[8].mxu0 %vm523_vm1, %v3419_v18  ;;  %3216 = vmatprep.subr.bf16.mxu1 %v3281_v3 }
  0x32   : > { %3212 = vmatpush3.bf16.msra.mxu0 %v3211_v62  ;;  %3046 = vmatprep.mubr.msk.f32.mxu0 %vm3282_vm0, %v3283_v11 }
  0x33   : > { %3213 = vmatprep.subr.bf16.mxu0 %v3281_v3  ;;  %3036 = vmatmul.mubr.msk.f32.vlgmr.msra.gmra.mrb[8].mxu1 %vm523_vm1, %v3419_v18 }
  0x34   : > { %3218 = vmatpush3.bf16.msra.mxu1 %v3217_v8  ;;  %3057 = vmatprep.mubr.msk.f32.mxu1 %vm3282_vm0, %v3283_v11 }
  0x35   : > { %3219 = vmatprep.subr.bf16.mxu1 %v3281_v3 }
  0x36   : > { %3215 = vmatpush3.bf16.msra.mxu0 %v3214_v5 }
  0x37   : > { %3060 = vmatprep.subr.mxu0 %v3283_v11 }
  0x38   : > { %3221 = vmatpush3.bf16.msra.mxu1 %v3220_v12 }
  0x39   : > { %3047 = vmatmul.mubr.msk.f32.vlgmr.msra.gmra.mrb[10].mxu0 %vm523_vm1, %v3419_v18  ;;  %3075 = vmatprep.subr.mxu1 %v3283_v11 }
  0x3a   : > { %3062 = vmatprep.mubr.msk.f32.mxu0 %vm3282_vm0, %v3283_v11 }
  0x3b   : > { %3058 = vmatmul.mubr.msk.f32.vlgmr.msra.gmra.mrb[10].mxu1 %vm523_vm1, %v3419_v18 }
  0x3c   : > { %3077 = vmatprep.mubr.msk.f32.mxu1 %vm3282_vm0, %v3283_v11 }
  0xe4   : > { %v593_v13 = vpop.f32.mrb[0].mxu0  ;;  %v663_v15 = vpop.f32.mrb[0].mxu1 }
  0xe5   : > { %v2938_v14 = vpop.f32.mrb[1].mxu0  ;;  %v2949_v16 = vpop.f32.mrb[1].mxu1  ;;  %v594_v31 = vadd.f32 %v2738_v25, %v593_v13  ;;  %v664_v35 = vadd.f32 %v2739_v32, %v663_v15 }
  0xec   : > { %v733_v17 = vpop.f32.mrb[2].mxu0  ;;  %v803_v20 = vpop.f32.mrb[2].mxu1 }
  0xed   : > { %v2960_v19 = vpop.f32.mrb[3].mxu0  ;;  %v2971_v21 = vpop.f32.mrb[3].mxu1  ;;  %v734_v44 = vadd.f32 %v2740_v37, %v733_v17  ;;  %v804_v45 = vadd.f32 %v2741_v41, %v803_v20  ;;  %v2796_v41 = vld [vmem:[%s3800_s3 + $0xa] ss:$0 sm:$0xff] }
  0xf4   : > { %v919_v23 = vpop.f32.mrb[4].mxu0  ;;  %v989_v28 = vpop.f32.mrb[4].mxu1 }
  0xf5   : > { %v920_v26 = vadd.f32 %v2766_v22, %v919_v23  ;;  %v2982_v27 = vpop.f32.mrb[5].mxu0  ;;  %v2993_v29 = vpop.f32.mrb[5].mxu1  ;;  %v990_v30 = vadd.f32 %v2767_v24, %v989_v28 }
  0xf7   : > { %3061 = vmatpush3.xpose.msk.msra.mxu0 %vm1459_vm2, %v920_v26 }
  0xf8   : > { %3065 = vmatprep.subr.mxu0 %v3283_v11 }
  0xfa   : > { %3063 = vmatmul.mubr.msk.f32.vlgmr.msra.gmra.mrb[12].mxu0 %vm1459_vm2, %v594_v31 }
  0xfb   : > { %3066 = vmatpush3.xpose.msk.msra.mxu0 %vm1459_vm2, %v990_v30  ;;  %3067 = vmatprep.mubr.msk.f32.mxu0 %vm3282_vm0, %v3283_v11 }
  0xfc   : > { %v1059_v36 = vpop.f32.mrb[6].mxu0  ;;  %3070 = vmatprep.subr.mxu0 %v3283_v11  ;;  %v1129_v39 = vpop.f32.mrb[6].mxu1 }
  0xfd   : > { %v1060_v38 = vadd.f32 %v2768_v33, %v1059_v36  ;;  %v3004_v40 = vpop.f32.mrb[7].mxu0  ;;  %v1130_v42 = vadd.f32 %v2769_v34, %v1129_v39  ;;  %v3015_v43 = vpop.f32.mrb[7].mxu1 }
  0xfe   : > { %3068 = vmatmul.mubr.msk.f32.vlgmr.msra.gmra.mrb[14].mxu0 %vm1459_vm2, %v664_v35 }
  0xff   : > { %3071 = vmatpush3.xpose.msk.msra.mxu0 %vm1459_vm2, %v1060_v38  ;;  %3072 = vmatprep.mubr.msk.f32.mxu0 %vm3282_vm0, %v3283_v11 }
 0x100   : > { %3076 = vmatpush3.xpose.msk.msra.mxu1 %vm1459_vm2, %v1130_v42  ;;  %3080 = vmatprep.subr.mxu0 %v3283_v11 }
 0x101   : > { %3085 = vmatprep.subr.mxu1 %v3283_v11 }
 0x102   : > { %3073 = vmatmul.mubr.msk.f32.vlgmr.msra.gmra.mrb[16].mxu0 %vm1459_vm2, %v734_v44 }
 0x103   : > { %3078 = vmatmul.mubr.msk.f32.vlgmr.msra.gmra.mrb[12].mxu1 %vm1459_vm2, %v804_v45  ;;  %3082 = vmatprep.mubr.msk.f32.mxu0 %vm3282_vm0, %v3283_v11 }
 0x104   : > { %3087 = vmatprep.mubr.msk.f32.mxu1 %vm3282_vm0, %v3283_v11  ;;  %v1245_v47 = vpop.f32.mrb[8].mxu0 }
 0x105   : > { %v1246_v48 = vadd.f32 %v2794_v46, %v1245_v47  ;;  %v3026_v49 = vpop.f32.mrb[9].mxu0  ;;  %v2797_v46 = vld [vmem:[%s3800_s3 + $0xb] ss:$0 sm:$0xff] }
 0x106   : > { %v1315_v51 = vpop.f32.mrb[8].mxu1 }
 0x107   : > { %3081 = vmatpush3.msra.mxu0 %v1246_v48  ;;  %v1316_v52 = vadd.f32 %v2795_v50, %v1315_v51  ;;  %v3037_v53 = vpop.f32.mrb[9].mxu1 }
 0x108   : > { %3090 = vmatprep.subr.mxu0 %v3283_v11 }
 0x109   : > { %3086 = vmatpush3.msra.mxu1 %v1316_v52 }
 0x10a   : > { %3095 = vmatprep.subr.mxu1 %v3283_v11 }
 0x10c   : > { %v3650_v54 = vpop.f32.mrb[10].mxu0 }
 0x10d   : > { %v3048_v55 = vpop.f32.mrb[11].mxu0  ;;  %v1386_v45 = vadd.f32 %v2796_v41, %v3650_v54  ;;  %v2114_v54 = vld [vmem:[%s3801_s4] sm:$0xff] }
 0x10e   : > { %v3653_v56 = vpop.f32.mrb[10].mxu1  ;;  %v2115_v55 = vld [vmem:[%s3801_s4 + $0x8] sm:$0xff] }
 0x10f   : > { %v3059_v57 = vpop.f32.mrb[11].mxu1  ;;  %v1456_v49 = vadd.f32 %v2797_v46, %v3653_v56  ;;  %v2116_v56 = vld [vmem:[%s3801_s4 + $0x10] sm:$0xff]  ;;  %v2552_v46 = vld [vmem:[%s3807_s10 + $0x18] sm:$0xff] }
 0x1cd   : > { %v1532_v58 = vpop.f32.mrb[12].mxu0 }
 0x1ce   : > { %v1764_v60 = vmul.f32 0.35355338, %v1532_v58  ;;  %v3064_v61 = vpop.f32.mrb[13].mxu0 }
 0x1d0   : > { %v1774_v62 = vadd.f32 %v2810_v59, %v1764_v60 }
 0x1d1   : > { %v1608_v63 = vpop.f32.mrb[14].mxu0 }
 0x1d2   : > { %v1765_v0 = vmul.f32 0.35355338, %v1608_v63  ;;  %v3069_v1 = vpop.f32.mrb[15].mxu0  ;;  %v1778_v2 = vsel %vm1459_vm2, %v1774_v62, -inf }
 0x1d3   : > { %1779 = vmax.xlane.f32.xlu0 %v1778_v2 }
 0x1d4   : > { %v1775_v4 = vadd.f32 %v2810_v59, %v1765_v0 }
 0x1d5   : > { %v1684_v5 = vpop.f32.mrb[16].mxu0 }
 0x1d6   : > { %v1766_v6 = vmul.f32 0.35355338, %v1684_v5  ;;  %v1760_v7 = vpop.f32.mrb[12].mxu1  ;;  %v3074_v8 = vpop.f32.mrb[17].mxu0  ;;  %v1781_v9 = vsel %vm1459_vm2, %v1775_v4, -inf }
 0x1d7   : > { %v1767_v10 = vmul.f32 0.35355338, %v1760_v7  ;;  %v3079_v12 = vpop.f32.mrb[13].mxu1  ;;  %1782 = vmax.xlane.f32.xlu0 %v1781_v9 }
 0x1d8   : > { %v1776_v13 = vadd.f32 %v2810_v59, %v1766_v6 }
 0x1d9   : > { %v1777_v15 = vadd.f32 %v2810_v59, %v1767_v10  ;;  %v2117_v59 = vld [vmem:[%s3801_s4 + $0x18] sm:$0xff] }
 0x1da   : > { %v1784_v14 = vsel %vm1459_vm2, %v1776_v13, -inf }
 0x1db   : > { %1785 = vmax.xlane.f32.xlu1 %v1784_v14  ;;  %v1787_v16 = vsel %vm1459_vm2, %v1777_v15, -inf }
 0x1df   : > { %1788 = vmax.xlane.f32.xlu1 %v1787_v16 }
 0x260   : > { %v1780_v17 = vpop.xlane.xlu0 %1779 }
 0x261   : > { %v1790_v19 = vsub.f32 %v1774_v62, %v1780_v17 }
 0x263   : > { %v1794_v20 = vmul.f32 1.442695, %v1790_v19 }
 0x264   : > { %v1783_v21 = vpop.xlane.xlu0 %1782 }
 0x265   : > { %3251 = vpow2.f32 %v1794_v20  ;;  %v1791_v22 = vsub.f32 %v1775_v4, %v1783_v21 }
 0x267   : > { %v1796_v23 = vmul.f32 1.442695, %v1791_v22 }
 0x268   : > { %v1786_v24 = vpop.xlane.xlu1 %1785 }
 0x269   : > { %3253 = vpow2.f32 %v1796_v23  ;;  %v1792_v25 = vsub.f32 %v1776_v13, %v1786_v24 }
 0x26b   : > { %v1798_v26 = vmul.f32 1.442695, %v1792_v25 }
 0x26c   : > { %v1789_v27 = vpop.xlane.xlu1 %1788 }
 0x26d   : > { %3255 = vpow2.f32 %v1798_v26  ;;  %v1793_v28 = vsub.f32 %v1777_v15, %v1789_v27 }
 0x26f   : > { %v3252_v29 = vpop.eup %3251  ;;  %v1800_v30 = vmul.f32 1.442695, %v1793_v28  ;;  %v2456_v28 = vld [vmem:[%s3805_s8] sm:$0xff] }
 0x270   : > { %v1802_v31 = vsel %vm1459_vm2, %v3252_v29, 0.0 }
 0x271   : > { %3257 = vpow2.f32 %v1800_v30  ;;  %1803 = vadd.xlane.f32.xlu0 %v1802_v31  ;;  %v2459_v31 = vld [vmem:[%s3805_s8 + $0x18] sm:$0xff] }
 0x273   : > { %v3254_v32 = vpop.eup %3253 }
 0x274   : > { %v1805_v33 = vsel %vm1459_vm2, %v3254_v32, 0.0 }
 0x275   : > { %1806 = vadd.xlane.f32.xlu1 %v1805_v33 }
 0x277   : > { %v3256_v34 = vpop.eup %3255 }
 0x278   : > { %v1808_v35 = vsel %vm1459_vm2, %v3256_v34, 0.0 }
 0x279   : > { %1809 = vadd.xlane.f32.xlu0 %v1808_v35 }
 0x27b   : > { %v3258_v36 = vpop.eup %3257 }
 0x27c   : > { %v1811_v37 = vsel %vm1459_vm2, %v3258_v36, 0.0 }
 0x27d   : > { %1812 = vadd.xlane.f32.xlu1 %v1811_v37  ;;  %v2820_v37 = vld [vmem:[%s3803_s6] ss:$0 sm:$0xff] }
 0x2fe   : > { %v1804_v38 = vpop.xlane.xlu0 %1803 }
 0x2ff   : > { %3259 = vrcp.f32 %v1804_v38 }
 0x302   : > { %v1807_v39 = vpop.xlane.xlu1 %1806 }
 0x303   : > { %3261 = vrcp.f32 %v1807_v39  ;;  %v2821_v39 = vld [vmem:[%s3804_s7] ss:$0 sm:$0xff] }
 0x306   : > { %v1810_v40 = vpop.xlane.xlu0 %1809 }
 0x307   : > { %3263 = vrcp.f32 %v1810_v40 }
 0x309   : > { %v3260_v42 = vpop.eup %3259 }
 0x30a   : > { %v1818_v43 = vmul.f32 %v3260_v42, %v3252_v29  ;;  %v1813_v44 = vpop.xlane.xlu1 %1812  ;;  %v2457_v29 = vld [vmem:[%s3805_s8 + $0x8] sm:$0xff]  ;;  %v2549_v42 = vld [vmem:[%s3807_s10] sm:$0xff] }
 0x30b   : > { %3265 = vrcp.f32 %v1813_v44  ;;  %v3223_v30 = vpack.c.bf16 %v2457_v29, %v2456_v28 }
 0x30c   : > { %3083 = vmatmul.mubr.msk.f32.vlgmr.msra.gmra.mrb[18].mxu0 %vm1459_vm2, %v1818_v43  ;;  %v2550_v43 = vld [vmem:[%s3807_s10 + $0x8] sm:$0xff] }
 0x30d   : > { %v3262_v47 = vpop.eup %3261  ;;  %3091 = vmatpush3.msra.mxu0 %v1386_v45  ;;  %3092 = vmatprep.mubr.msk.f32.mxu0 %vm3282_vm0, %v3283_v11  ;;  %v3229_v44 = vpack.c.bf16 %v2550_v43, %v2549_v42  ;;  %v2551_v45 = vld [vmem:[%s3807_s10 + $0x10] sm:$0xff] }
 0x30e   : > { %v1819_v48 = vmul.f32 %v3262_v47, %v3254_v32  ;;  %3100 = vmatprep.subr.mxu0 %v3283_v11  ;;  %v3232_v47 = vpack.c.bf16 %v2552_v46, %v2551_v45 }
 0x310   : > { %3088 = vmatmul.mubr.msk.f32.vlgmr.msra.gmra.mrb[14].mxu1 %vm1459_vm2, %v1819_v48  ;;  %v2553_v48 = vld [vmem:[%s3807_s10 + $0x20] sm:$0xff] }
 0x311   : > { %v3264_v50 = vpop.eup %3263  ;;  %3096 = vmatpush3.msra.mxu1 %v1456_v49  ;;  %3097 = vmatprep.mubr.msk.f32.mxu1 %vm3282_vm0, %v3283_v11  ;;  %v2554_v49 = vld [vmem:[%s3807_s10 + $0x28] sm:$0xff] }
 0x312   : > { %v1820_v51 = vmul.f32 %v3264_v50, %v3256_v34  ;;  %3105 = vmatprep.subr.mxu1 %v3283_v11  ;;  %v3235_v50 = vpack.c.bf16 %v2554_v49, %v2553_v48 }
 0x314   : > { %3093 = vmatmul.mubr.msk.f32.vlgmr.msra.gmra.mrb[20].mxu0 %vm1459_vm2, %v1820_v51  ;;  %v2555_v51 = vld [vmem:[%s3807_s10 + $0x30] sm:$0xff] }
 0x315   : > { %v3266_v52 = vpop.eup %3265  ;;  %3102 = vmatprep.mubr.msk.f32.mxu0 %vm3282_vm0, %v3283_v11  ;;  %3101 = vmatpush3.msra.mxu0 %v2114_v54  ;;  %v2822_v54 = vld [vmem:[%s3806_s9] ss:$0 sm:$0xff] }
 0x316   : > { %v1821_v53 = vmul.f32 %v3266_v52, %v3258_v36  ;;  %3110 = vmatprep.subr.mxu0 %v3283_v11  ;;  %v2556_v52 = vld [vmem:[%s3807_s10 + $0x38] sm:$0xff] }
 0x318   : > { %3098 = vmatmul.mubr.msk.f32.vlgmr.msra.gmra.mrb[16].mxu1 %vm1459_vm2, %v1821_v53  ;;  %v3238_v53 = vpack.c.bf16 %v2556_v52, %v2555_v51 }
 0x319   : > { %3107 = vmatprep.mubr.msk.f32.mxu1 %vm3282_vm0, %v3283_v11  ;;  %3106 = vmatpush3.msra.mxu1 %v2115_v55 }
 0x31a   : > { %3115 = vmatprep.subr.mxu1 %v3283_v11 }
 0x3df   : > { %v1891_v57 = vpop.f32.mrb[18].mxu0 }
 0x3e0   : > { %v3084_v58 = vpop.f32.mrb[19].mxu0  ;;  %3103 = vmatmul.mubr.msk.f32.vlgmr.msra.gmra.mrb[22].mxu0 %vm1459_vm2, %v1891_v57 }
 0x3e1   : > { %3111 = vmatpush3.msra.mxu0 %v2116_v56  ;;  %3112 = vmatprep.mubr.msk.f32.mxu0 %vm3282_vm0, %v3283_v11 }
 0x3e2   : > { %3222 = vmatprep.subr.bf16.mxu0 %v3281_v3 }
 0x3e3   : > { %v1964_v60 = vpop.f32.mrb[14].mxu1 }
 0x3e4   : > { %v3089_v61 = vpop.f32.mrb[15].mxu1  ;;  %3108 = vmatmul.mubr.msk.f32.vlgmr.msra.gmra.mrb[18].mxu1 %vm1459_vm2, %v1964_v60 }
 0x3e5   : > { %3116 = vmatpush3.msra.mxu1 %v2117_v59  ;;  %3117 = vmatprep.mubr.msk.f32.mxu1 %vm3282_vm0, %v3283_v11 }
 0x3e6   : > { %3228 = vmatprep.subr.bf16.mxu1 %v3281_v3 }
 0x3e7   : > { %v2037_v62 = vpop.f32.mrb[20].mxu0 }
 0x3e8   : > { %v3094_v63 = vpop.f32.mrb[21].mxu0  ;;  %3113 = vmatmul.mubr.msk.f32.vlgmr.msra.gmra.mrb[24].mxu0 %vm1459_vm2, %v2037_v62 }
 0x3e9   : > { %3128 = vmatprep.mubr.msk.f32.mxu0 %vm3282_vm0, %v3283_v11  ;;  %3224 = vmatpush3.bf16.msra.mxu0 %v3223_v30 }
 0x3ea   : > { %3225 = vmatprep.subr.bf16.mxu0 %v3281_v3 }
 0x3eb   : > { %v2110_v0 = vpop.f32.mrb[16].mxu1 }
 0x3ec   : > { %v3099_v1 = vpop.f32.mrb[17].mxu1  ;;  %3118 = vmatmul.mubr.msk.f32.vlgmr.msra.gmra.mrb[20].mxu1 %vm1459_vm2, %v2110_v0 }
 0x3ed   : > { %3147 = vmatprep.mubr.msk.f32.mxu1 %vm3282_vm0, %v3283_v11  ;;  %v2819_v11 = vld [vmem:[%s3802_s5] ss:$0 sm:$0xff]  ;;  %3230 = vmatpush3.bf16.msra.mxu1 %v3229_v44 }
 0x3ee   : > { %3231 = vmatprep.subr.bf16.mxu1 %v3281_v3 }
 0x3f1   : > { %3233 = vmatpush3.bf16.msra.mxu1 %v3232_v47 }
 0x3f2   : > { %3234 = vmatprep.subr.bf16.mxu1 %v3281_v3 }
 0x3f5   : > { %3236 = vmatpush3.bf16.msra.mxu1 %v3235_v50 }
 0x3f6   : > { %3237 = vmatprep.subr.bf16.mxu1 %v3281_v3  ;;  %v2824_v3 = vld [vmem:[%s3808_s11] ss:$0 sm:$0xff] }
 0x3f9   : > { %3239 = vmatpush3.bf16.msra.mxu1 %v3238_v53 }
 0x4b3   : > { %v2187_v2 = vpop.f32.mrb[22].mxu0 }
 0x4b4   : > { %v3104_v4 = vpop.f32.mrb[23].mxu0  ;;  %v2410_v6 = vsel %vm523_vm1, %v2187_v2, 0.0 }
 0x4b7   : > { %v2260_v5 = vpop.f32.mrb[18].mxu1 }
 0x4b8   : > { %v2411_v7 = vsel %vm523_vm1, %v2260_v5, 0.0  ;;  %v3109_v8 = vpop.f32.mrb[19].mxu1 }
 0x4b9   : > { %v2412_v9 = vadd.f32 %v2411_v7, %v2410_v6 }
 0x4bb   : > { %v2333_v10 = vpop.f32.mrb[24].mxu0 }
 0x4bc   : > { %v2413_v12 = vsel %vm523_vm1, %v2333_v10, 0.0  ;;  %v3114_v13 = vpop.f32.mrb[25].mxu0 }
 0x4bd   : > { %v2414_v14 = vadd.f32 %v2413_v12, %v2412_v9 }
 0x4bf   : > { %v2406_v15 = vpop.f32.mrb[20].mxu1 }
 0x4c0   : > { %v2415_v16 = vsel %vm523_vm1, %v2406_v15, 0.0  ;;  %v3119_v17 = vpop.f32.mrb[21].mxu1 }
 0x4c1   : > { %v2416_v19 = vadd.f32 %v2415_v16, %v2414_v14 }
 0x4c3   : > { %v2424_v20 = vadd.f32 %v2819_v11, %v2416_v19  ;;  %v2826_v19 = vld [vmem:[%s3809_s12] ss:$0 sm:$0xff] }
 0x4c5   : > { %v2425_v21 = vadd.f32 %v2424_v20, %v3419_v18  ;;  %v2458_v18 = vld [vmem:[%s3805_s8 + $0x10] sm:$0xff] }
 0x4c6   : > { %v3226_v32 = vpack.c.bf16 %v2459_v31, %v2458_v18 }
 0x4c7   : > { %v2428_v22 = vsel %vm523_vm1, %v2425_v21, 0.0 }
 0x4c8   : > { %2429 = vadd.xlane.f32.xlu0 %v2428_v22  ;;  %3227 = vmatpush3.bf16.msra.mxu0 %v3226_v32 }
 0x555   : > { %v2430_v23 = vpop.xlane.xlu0 %2429 }
 0x556   : > { %v2432_v24 = vmul.f32 0.03125, %v2430_v23 }
 0x558   : > { %v2433_v25 = vsub.f32 %v2425_v21, %v2432_v24  ;;  %v2827_v21 = vld [vmem:[%s3810_s13] ss:$0 sm:$0xff] }
 0x55a   : > { %v2434_v26 = vmul.f32 %v2433_v25, %v2433_v25 }
 0x55c   : > { %v2435_v27 = vsel %vm523_vm1, %v2434_v26, 0.0 }
 0x55d   : > { %2436 = vadd.xlane.f32.xlu1 %v2435_v27 }
 0x5ea   : > { %v2437_v33 = vpop.xlane.xlu1 %2436 }
 0x5eb   : > { %v2438_v34 = vmul.f32 0.03125, %v2437_v33 }
 0x5ed   : > { %v2439_v35 = vadd.f32 1e-12, %v2438_v34 }
 0x5ef   : > { %3267 = vrsqrt.f32 %v2439_v35 }
 0x5f9   : > { %v3268_v36 = vpop.eup %3267 }
 0x5fa   : > { %v2441_v38 = vmul.f32 %v3268_v36, %v2433_v25 }
 0x5fc   : > { %v2448_v40 = vmul.f32 %v2820_v37, %v2441_v38 }
 0x5fe   : > { %v2455_v41 = vadd.f32 %v2821_v39, %v2448_v40 }
 0x600   : > { %3129 = vmatmul.mubr.msk.f32.vlgmr.msra.gmra.mrb[26].mxu0 %vm523_vm1, %v2455_v41 }
 0x6d3   : > { %v2536_v55 = vpop.f32.mrb[26].mxu0 }
 0x6d4   : > { %v2537_v56 = vadd.f32 %v2822_v54, %v2536_v55  ;;  %v3130_v57 = vpop.f32.mrb[27].mxu0 }
 0x6d6   : > { %v2541_v58 = vmul.f32 0.044715, %v2537_v56  ;;  %v2540_v0 = vmul.f32 0.5, %v2537_v56 }
 0x6d8   : > { %v2542_v59 = vmul.f32 %v2541_v58, %v2537_v56 }
 0x6da   : > { %v2543_v60 = vmul.f32 %v2542_v59, %v2537_v56 }
 0x6dc   : > { %v2544_v61 = vadd.f32 %v2543_v60, %v2537_v56 }
 0x6de   : > { %v2545_v62 = vmul.f32 0.7978846, %v2544_v61 }
 0x6e0   : > { %3269 = vtanh.f32 %v2545_v62 }
 0x6ea   : > { %v3270_v63 = vpop.eup %3269 }
 0x6eb   : > { %v2547_v1 = vadd.f32 1.0, %v3270_v63 }
 0x6ed   : > { %v2548_v2 = vmul.f32 %v2547_v1, %v2540_v0 }
 0x6ef   : > { %3148 = vmatmul.mubr.msk.f32.vlgmr.msra.gmra.mrb[22].mxu1 %vm2564_vm3, %v2548_v2 }
 0x7c2   : > { %v2634_v4 = vpop.f32.mrb[22].mxu1 }
 0x7c3   : > { %v2635_v5 = vadd.f32 %v2824_v3, %v2634_v4  ;;  %v3149_v6 = vpop.f32.mrb[23].mxu1 }
 0x7c5   : > { %v2638_v7 = vadd.f32 %v2635_v5, %v2455_v41 }
 0x7c7   : > { %v2641_v8 = vsel %vm523_vm1, %v2638_v7, 0.0 }
 0x7c8   : > { %2642 = vadd.xlane.f32.xlu0 %v2641_v8 }
 0x855   : > { %v2643_v9 = vpop.xlane.xlu0 %2642 }
 0x856   : > { %v2644_v10 = vmul.f32 0.03125, %v2643_v9 }
 0x858   : > { %v2645_v12 = vsub.f32 %v2638_v7, %v2644_v10 }
 0x85a   : > { %v2646_v13 = vmul.f32 %v2645_v12, %v2645_v12 }
 0x85c   : > { %v2647_v14 = vsel %vm523_vm1, %v2646_v13, 0.0 }
 0x85d   : > { %2648 = vadd.xlane.f32.xlu1 %v2647_v14 }
 0x8ea   : > { %v2649_v15 = vpop.xlane.xlu1 %2648 }
 0x8eb   : > { %v2650_v16 = vmul.f32 0.03125, %v2649_v15 }
 0x8ed   : > { %v2651_v11 = vadd.f32 1e-12, %v2650_v16 }
 0x8ef   : > { %3271 = vrsqrt.f32 %v2651_v11 }
 0x8f9   : > { %v3272_v17 = vpop.eup %3271 }
 0x8fa   : > { %v2653_v20 = vmul.f32 %v3272_v17, %v2645_v12 }
 0x8fc   : > { %v2660_v22 = vmul.f32 %v2826_v19, %v2653_v20 }
 0x8fe   : > { %v2667_v23 = vadd.f32 %v2827_v21, %v2660_v22 }
 0x900   : > { %2668 = vst.msk [vmem:[%s476_s19] sm:$0xff] %vm523_vm1, %v2667_v23 }
 0x901 PF: > { %s24_s29 = sadd.s32 1, %s3279_s29  }
 0x902   : > { %p21_p4 = scmp.ge.s32.totalorder %s24_s29, 4  }
 0x904   :  { %23 = sbr.rel (!%p21_p4) target bundleno = 1 (0x1), region = 113 }

// kernel: bert_sentiment_forward.9
= control target key start
LH: loop header
LB: loop body
LE: loop exit
PB: predicated region body
PF: predicated region fallthrough
CT: control target
= control target key end

     0   :  { %11 = vsyncpa [#allocation5], 0  ;;  %s7574_s0 = inlined_call_operand.vmem [shape: f32[8,2,32], index: 0, kind: input, shape index: {}]   ;;  %s7575_s1 = inlined_call_operand.vmem [shape: f32[2,4,32,16], index: 1, kind: input, shape index: {}]   ;;  %s7576_s2 = inlined_call_operand.vmem [shape: f32[2,4,16,16], index: 2, kind: input, shape index: {}]   ;;  %s7577_s3 = inlined_call_operand.vmem [shape: f32[2,4,1,16], index: 3, kind: input, shape index: {}]   ;;  %s7578_s4 = inlined_call_operand.vmem [shape: f32[2,8,2,16], index: 4, kind: output, shape index: {0}]   ;;  %s7579_s5 = inlined_call_operand.hbm [shape: f32[2,2,16], index: 5, kind: output, shape index: {1}]  }
   0x1   :  { %13 = vsyncpa [#allocation5 + $0x1], 0  ;;  %s6838_s18 = smov 0   ;;  %s6840_s19 = smov 0  }
   0x2   :  { %s6842_s20 = smov 0   ;;  %s6844_s21 = smov 0  }
   0x3 LB: > { %s6859_s22 = sadd.s32 4294967295, %s6802_s21   ;;  %s5327_s23 = sadd.s32 4294967294, %s6802_s21   ;;  %s6802_s21 = sphi %s6844_s21, %s7585_s21   ;;  %s6798_s20 = sphi %s6842_s20, %s7584_s20   ;;  %s6794_s19 = sphi %s6840_s19, %s7583_s19   ;;  %s6790_s18 = sphi %s6838_s18, %s7582_s18  }
   0x4   : > { %s6863_s24 = sadd.s32 1, %s6802_s21   ;;  %s151_s25 = sadd.s32 1, %s6798_s20 }
   0x5   : > { %s148_s26 = ssub.s32 %s6802_s21, %s6863_s24  ;;  %p161_p0 = scmp.ne.s32.totalorder %s6798_s20, %s6794_s19 }
   0x6   : > { %p149_p1 = scmp.eq.s32.totalorder %s148_s26, 0  ;;  %p162_p2 = scmp.eq.s32.totalorder %s6859_s22, 1 }
   0x7   : > { %p167_p3 = scmp.ne.s32.totalorder %s6794_s19, %s6790_s18  ;;  %p168_p4 = scmp.eq.s32.totalorder %s5327_s23, 1 }
   0x8   : > { %s6874_s27 = scalar_select %p149_p1, %s6798_s20, %s151_s25  }
   0x9   : > { %p6878_p5 = por %p162_p2, %p161_p0  ;;  %p6882_p6 = por %p168_p4, %p167_p3 }
   0xa   : > { %p5330_p7 = scmp.ge.s32.totalorder %s6802_s21, 1  ;;  %p212_p8 = scmp.lt.s32.totalorder %s6802_s21, 3 }
   0xc   : > { %p213_p9 = pnand %p5330_p7, %p212_p8 }
   0xd   : > { %p254_p10 = scmp.lt.s32.totalorder (!%p213_p9), %s6859_s22, 1  ;;  %vm326_vm0 = vcmask (!%p213_p9), 123904   ;;  %v6804_v0 = vmov (!%p213_p9), 0.0|0.0   ;;  %v6805_v1 = vmov (!%p213_p9), 0.0   ;;  %vm6806_vm1 = vmmov (!%p213_p9), 0  }
   0xe   : > { %216 = sbr.rel (%p213_p9) target bundleno = 2285 (0x8ed), region = 36  ;;  %6278 = vmatprep.subr.bf16.mxu0 (!%p213_p9), %v6804_v0  ;;  %6281 = vmatprep.subr.bf16.mxu1 (!%p213_p9), %v6804_v0  ;;  %327 = vst.msk [vmem:[#allocation2] sm:$0x3] (!%p213_p9), %vm326_vm0, %v6805_v1  ;;  %328 = vst.msk [vmem:[#allocation3] sm:$0x3] (!%p213_p9), %vm326_vm0, %v6805_v1  ;;  %vm334_vm2 = vcmask (!%p213_p9), 130048  }
   0xf   : > { %5706 = vmatprep.mubr.msk.f32.mxu0 (!%p213_p9), %vm6806_vm1, %v6805_v1  ;;  %5713 = vmatprep.mubr.msk.f32.mxu1 (!%p213_p9), %vm6806_vm1, %v6805_v1  ;;  %vm618_vm3 = vcmask (!%p213_p9), 261120  }
  0x15   : > { %s6896_s30 = scalar_select %p254_p10, %s6859_s22, 1  ;;  %v333_v12 = vld [vmem:[#allocation2] sm:$0x3] }
  0x16   : > { %s6930_s14 = scalar_select %p162_p2, 7, 0 }
  0x17   : > { %s5443_s6 = sshll.u32 %s6896_s30, 7  ;;  %s5444_s7 = sshll.u32 %s6896_s30, 6 }
  0x18   : > { %s263_s10 = scalar_lea.vmem %s7576_s2, %s5444_s7  ;;  %s6910_s13 = scalar_lea.vmem %s7575_s1, %s5443_s6 }
  0x19   : > { %v290_v2 = vld [vmem:[%s263_s10] sm:$0xff]  ;;  %v291_v3 = vld [vmem:[%s263_s10 + $0x8] sm:$0xff]  ;;  %v292_v4 = vld [vmem:[%s263_s10 + $0x10] sm:$0xff]  ;;  %s5343_s15 = sshll.u32 %s6930_s14, 1  ;;  %s5336_s25 = sshll.u32 %s6896_s30, 2 }
  0x1a   : > { %v6912_v5 = vpack.c.bf16 %v291_v3, %v290_v2  ;;  %v293_v6 = vld [vmem:[%s263_s10 + $0x18] sm:$0xff]  ;;  %v294_v7 = vld [vmem:[%s263_s10 + $0x20] sm:$0xff]  ;;  %v295_v8 = vld [vmem:[%s263_s10 + $0x28] sm:$0xff]  ;;  %s331_s23 = scalar_lea.vmem %s7574_s0, %s5343_s15  ;;  %s7018_s7 = scalar_lea.vmem %s7577_s3, %s5336_s25 }
  0x1b   : > { %v6914_v9 = vpack.c.bf16 %v293_v6, %v292_v4  ;;  %v296_v10 = vld [vmem:[%s263_s10 + $0x30] sm:$0xff]  ;;  %v297_v11 = vld [vmem:[%s263_s10 + $0x38] sm:$0xff]  ;;  %v6917_v13 = vpack.c.bf16 %v295_v8, %v294_v7  ;;  %v274_v15 = vld [vmem:[%s6910_s13] sm:$0xff]  ;;  %s5445_s8 = sshll.u32 %s6896_s30, 4 }
  0x1c   : > { %6280 = vmatpush3.bf16.msra.mxu0 %v6912_v5  ;;  %v6921_v14 = vpack.c.bf16 %v297_v11, %v296_v10  ;;  %v275_v16 = vld [vmem:[%s6910_s13 + $0x8] sm:$0xff]  ;;  %v278_v17 = vld [vmem:[%s6910_s13 + $0x20] sm:$0xff]  ;;  %v276_v21 = vld [vmem:[%s6910_s13 + $0x10] sm:$0xff]  ;;  %s7041_s11 = scalar_lea.vmem %s7578_s4, %s5445_s8 }
  0x1d   : > { %6283 = vmatpush3.bf16.msra.mxu1 %v6914_v9  ;;  %6284 = vmatprep.subr.bf16.mxu0 %v6804_v0  ;;  %v279_v18 = vld [vmem:[%s6910_s13 + $0x28] sm:$0xff]  ;;  %v6935_v19 = vpack.c.bf16 %v275_v16, %v274_v15  ;;  %v277_v22 = vld [vmem:[%s6910_s13 + $0x18] sm:$0xff]  ;;  %v280_v23 = vld [vmem:[%s6910_s13 + $0x30] sm:$0xff]  ;;  %s933_s12 = scalar_lea.vmem %s7041_s11, %s5343_s15 }
  0x1e   : > { %6287 = vmatprep.subr.bf16.mxu1 %v6804_v0  ;;  %v6940_v20 = vpack.c.bf16 %v279_v18, %v278_v17  ;;  %v281_v24 = vld [vmem:[%s6910_s13 + $0x38] sm:$0xff]  ;;  %v6954_v25 = vpack.c.bf16 %v277_v22, %v276_v21  ;;  %v282_v27 = vld [vmem:[%s6910_s13 + $0x40] sm:$0xff]  ;;  %v283_v28 = vld [vmem:[%s6910_s13 + $0x48] sm:$0xff]  ;;  %s7186_s10 = scalar_select %p162_p2, 4, 3 }
  0x1f   : > { %5707 = vmatmul.mubr.msk.f32.vlgmr.msra.gmra.mrb[0].mxu0 %vm334_vm2, %v333_v12  ;;  %v6958_v26 = vpack.c.bf16 %v281_v24, %v280_v23  ;;  %v286_v29 = vld [vmem:[%s6910_s13 + $0x60] sm:$0xff]  ;;  %v287_v30 = vld [vmem:[%s6910_s13 + $0x68] sm:$0xff]  ;;  %v6975_v32 = vpack.c.bf16 %v283_v28, %v282_v27  ;;  %v284_v34 = vld [vmem:[%s6910_s13 + $0x50] sm:$0xff] }
  0x20   : > { %5714 = vmatmul.mubr.msk.f32.vlgmr.msra.gmra.mrb[0].mxu1 %vm334_vm2, %v333_v12  ;;  %6286 = vmatpush3.bf16.msra.mxu0 %v6917_v13  ;;  %v332_v31 = vld [vmem:[%s331_s23] sm:$0x3]  ;;  %v6979_v33 = vpack.c.bf16 %v287_v30, %v286_v29  ;;  %v285_v35 = vld [vmem:[%s6910_s13 + $0x58] sm:$0xff]  ;;  %v288_v36 = vld [vmem:[%s6910_s13 + $0x70] sm:$0xff]  ;;  %s7118_s23 = scalar_select %p162_p2, 5, 2 }
  0x21   : > { %6289 = vmatpush3.bf16.msra.mxu1 %v6921_v14  ;;  %5720 = vmatprep.mubr.msk.f32.mxu0 %vm6806_vm1, %v6805_v1  ;;  %v289_v37 = vld [vmem:[%s6910_s13 + $0x78] sm:$0xff]  ;;  %v6989_v38 = vpack.c.bf16 %v285_v35, %v284_v34  ;;  %v7021_v48 = vld [vmem:[%s7018_s7] ss:$0 sm:$0xff]  ;;  %v7024_v51 = vld [vmem:[%s7018_s7 + $0x1] ss:$0 sm:$0xff] }
  0x22   : > { %5727 = vmatprep.mubr.msk.f32.mxu1 %vm6806_vm1, %v6805_v1  ;;  %6290 = vmatprep.subr.bf16.mxu0 %v6804_v0  ;;  %v6993_v39 = vpack.c.bf16 %v289_v37, %v288_v36  ;;  %v7029_v62 = vld [vmem:[%s7018_s7 + $0x3] ss:$0 sm:$0xff]  ;;  %v7032_v6 = vld [vmem:[%s7018_s7 + $0x2] ss:$0 sm:$0xff]  ;;  %s7050_s13 = scalar_select %p162_p2, 6, 1 }
  0x23   : > { %5721 = vmatmul.mubr.msk.f32.vlgmr.msra.gmra.mrb[2].mxu0 %vm334_vm2, %v333_v12  ;;  %6296 = vmatprep.subr.bf16.mxu1 %v6804_v0  ;;  %v925_v21 = vld [vmem:[#allocation3] sm:$0x3]  ;;  %s5367_s25 = sshll.u32 %s7118_s23, 1 }
  0x24   : > { %5728 = vmatmul.mubr.msk.f32.vlgmr.msra.gmra.mrb[2].mxu1 %vm334_vm2, %v333_v12  ;;  %6292 = vmatpush3.bf16.msra.mxu0 %v6935_v19  ;;  %s5355_s30 = sshll.u32 %s7050_s13, 1  ;;  %s1541_s8 = scalar_lea.vmem %s7574_s0, %s5367_s25 }
  0x25   : > { %6298 = vmatpush3.bf16.msra.mxu1 %v6940_v20  ;;  %6293 = vmatprep.subr.bf16.mxu0 %v6804_v0  ;;  %s937_s16 = scalar_lea.vmem %s7574_s0, %s5355_s30  ;;  %s1537_s17 = scalar_lea.vmem %s7041_s11, %s5355_s30 }
  0x26   : > { %6299 = vmatprep.subr.bf16.mxu1 %v6804_v0  ;;  %5738 = vmatprep.mubr.msk.f32.mxu0 %vm6806_vm1, %v6805_v1  ;;  %v938_v36 = vld [vmem:[%s937_s16] sm:$0x3]  ;;  %s2141_s9 = scalar_lea.vmem %s7041_s11, %s5367_s25 }
  0x27   : > { %5749 = vmatprep.mubr.msk.f32.mxu1 %vm6806_vm1, %v6805_v1  ;;  %s7254_s16 = scalar_select %p162_p2, 3, 4 }
  0x28   : > { %6295 = vmatpush3.bf16.msra.mxu0 %v6954_v25  ;;  %s7470_s25 = scalar_select %p162_p2, 0, 7 }
  0x29   : > { %6301 = vmatpush3.bf16.msra.mxu1 %v6958_v26  ;;  %6302 = vmatprep.subr.bf16.mxu0 %v6804_v0 }
  0x2a   : > { %6308 = vmatprep.subr.bf16.mxu1 %v6804_v0 }
  0x2b   : > { %5739 = vmatmul.mubr.msk.f32.vlgmr.msra.gmra.mrb[4].mxu0 %vm618_vm3, %v332_v31 }
  0x2c   : > { %5750 = vmatmul.mubr.msk.f32.vlgmr.msra.gmra.mrb[4].mxu1 %vm618_vm3, %v332_v31  ;;  %6304 = vmatpush3.bf16.msra.mxu0 %v6975_v32 }
  0x2d   : > { %6310 = vmatpush3.bf16.msra.mxu1 %v6979_v33  ;;  %6305 = vmatprep.subr.bf16.mxu0 %v6804_v0 }
  0x2e   : > { %6311 = vmatprep.subr.bf16.mxu1 %v6804_v0  ;;  %5760 = vmatprep.mubr.msk.f32.mxu0 %vm6806_vm1, %v6805_v1 }
  0x2f   : > { %5771 = vmatprep.mubr.msk.f32.mxu1 %vm6806_vm1, %v6805_v1 }
  0x30   : > { %6307 = vmatpush3.bf16.msra.mxu0 %v6989_v38 }
  0x31   : > { %6313 = vmatpush3.bf16.msra.mxu1 %v6993_v39  ;;  %6314 = vmatprep.subr.bf16.mxu0 %v6804_v0 }
  0x32   : > { %6317 = vmatprep.subr.bf16.mxu1 %v6804_v0 }
  0x33   : > { %5761 = vmatmul.mubr.msk.f32.vlgmr.msra.gmra.mrb[6].mxu0 %vm618_vm3, %v332_v31 }
  0x34   : > { %5772 = vmatmul.mubr.msk.f32.vlgmr.msra.gmra.mrb[6].mxu1 %vm618_vm3, %v332_v31  ;;  %6316 = vmatpush3.bf16.msra.mxu0 %v6912_v5 }
  0x35   : > { %6319 = vmatpush3.bf16.msra.mxu1 %v6914_v9  ;;  %5778 = vmatprep.mubr.msk.f32.mxu0 %vm6806_vm1, %v6805_v1 }
  0x36   : > { %5785 = vmatprep.mubr.msk.f32.mxu1 %vm6806_vm1, %v6805_v1  ;;  %6320 = vmatprep.subr.bf16.mxu0 %v6804_v0 }
  0x37   : > { %6323 = vmatprep.subr.bf16.mxu1 %v6804_v0 }
  0xf2   : > { %v404_v40 = vpop.f32.mrb[0].mxu0 }
  0xf3   : > { %v474_v41 = vpop.f32.mrb[0].mxu1  ;;  %v5708_v42 = vpop.f32.mrb[1].mxu0 }
  0xf4   : > { %v5715_v43 = vpop.f32.mrb[1].mxu1 }
  0xf6   : > { %v544_v44 = vpop.f32.mrb[2].mxu0 }
  0xf7   : > { %v614_v45 = vpop.f32.mrb[2].mxu1  ;;  %v5722_v46 = vpop.f32.mrb[3].mxu0 }
  0xf8   : > { %v5729_v47 = vpop.f32.mrb[3].mxu1 }
  0xfe   : > { %v688_v49 = vpop.f32.mrb[4].mxu0 }
  0xff   : > { %v689_v50 = vadd.f32 %v688_v49, %v404_v40  ;;  %v758_v52 = vpop.f32.mrb[4].mxu1  ;;  %v5740_v53 = vpop.f32.mrb[5].mxu0 }
 0x100   : > { %v759_v54 = vadd.f32 %v758_v52, %v474_v41  ;;  %v5751_v55 = vpop.f32.mrb[5].mxu1 }
 0x101   : > { %v902_v56 = vadd.f32 %v7021_v48, %v689_v50 }
 0x102   : > { %v903_v57 = vadd.f32 %v7024_v51, %v759_v54 }
 0x103   : > { %v5352_v58 = vmul.f32 -1.442695, %v902_v56 }
 0x104   : > { %v5353_v59 = vmul.f32 -1.442695, %v903_v57 }
 0x105   : > { %6608 = vpow2.f32 %v5352_v58 }
 0x106   : > { %6610 = vpow2.f32 %v5353_v59  ;;  %v828_v60 = vpop.f32.mrb[6].mxu0 }
 0x107   : > { %v829_v61 = vadd.f32 %v828_v60, %v544_v44  ;;  %v898_v63 = vpop.f32.mrb[6].mxu1  ;;  %v5762_v2 = vpop.f32.mrb[7].mxu0 }
 0x108   : > { %v899_v3 = vadd.f32 %v898_v63, %v614_v45  ;;  %v5773_v4 = vpop.f32.mrb[7].mxu1 }
 0x109   : > { %v904_v10 = vadd.f32 %v7032_v6, %v829_v61 }
 0x10a   : > { %v905_v7 = vadd.f32 %v7029_v62, %v899_v3 }
 0x10c   : > { %v5354_v8 = vmul.f32 -1.442695, %v905_v7 }
 0x10e   : > { %6612 = vpow2.f32 %v5354_v8 }
 0x10f   : > { %v6609_v11 = vpop.eup %6608  ;;  %6614 = vtanh.f32 %v904_v10 }
 0x110   : > { %v6611_v12 = vpop.eup %6610  ;;  %v909_v15 = vadd.f32 1.0, %v6609_v11 }
 0x111   : > { %v915_v16 = vadd.f32 1.0, %v6611_v12 }
 0x112   : > { %6616 = vrcp.f32 %v909_v15 }
 0x113   : > { %6618 = vrcp.f32 %v915_v16 }
 0x118   : > { %v6613_v17 = vpop.eup %6612 }
 0x119   : > { %v6615_v18 = vpop.eup %6614  ;;  %v922_v27 = vadd.f32 1.0, %v6613_v17 }
 0x11b   : > { %6620 = vrcp.f32 %v922_v27 }
 0x11c   : > { %v6617_v22 = vpop.eup %6616 }
 0x11d   : > { %v6619_v23 = vpop.eup %6618  ;;  %v927_v24 = vmul.f32 %v6617_v22, %v6615_v18 }
 0x11e   : > { %v926_v28 = vmul.f32 %v6619_v23, %v925_v21 }
 0x120   : > { %v928_v29 = vadd.f32 %v927_v24, %v926_v28 }
 0x122   : > { %6622 = vtanh.f32 %v928_v29  ;;  %932 = vst.msk [vmem:[#allocation3] sm:$0x3] %vm326_vm0, %v928_v29 }
 0x125   : > { %v6621_v30 = vpop.eup %6620 }
 0x129   : > { %v1529_v22 = vld [vmem:[#allocation3] sm:$0x3] }
 0x12c   : > { %v6623_v31 = vpop.eup %6622 }
 0x12d   : > { %v930_v34 = vmul.f32 %v6623_v31, %v6621_v30 }
 0x12f   : > { %931 = vst.msk [vmem:[#allocation2] sm:$0x3] %vm326_vm0, %v930_v34  ;;  %934 = vst.msk [vmem:[%s933_s12] sm:$0x3] %vm326_vm0, %v930_v34  ;;  %s5379_s12 = sshll.u32 %s7186_s10, 1  ;;  %s251_s10 = sand.u32 1, %s6794_s19  }
 0x130   : > { %s2145_s14 = scalar_lea.vmem %s7574_s0, %s5379_s12  ;;  %s2745_s15 = scalar_lea.vmem %s7041_s11, %s5379_s12 }
 0x136   : > { %v939_v35 = vld [vmem:[#allocation2] sm:$0x3] }
 0x137   : > { %5779 = vmatmul.mubr.msk.f32.vlgmr.msra.gmra.mrb[8].mxu0 %vm334_vm2, %v939_v35  ;;  %5786 = vmatmul.mubr.msk.f32.vlgmr.msra.gmra.mrb[8].mxu1 %vm334_vm2, %v939_v35 }
 0x138   : > { %6322 = vmatpush3.bf16.msra.mxu0 %v6917_v13  ;;  %6325 = vmatpush3.bf16.msra.mxu1 %v6921_v14 }
 0x139   : > { %5792 = vmatprep.mubr.msk.f32.mxu0 %vm6806_vm1, %v6805_v1  ;;  %5799 = vmatprep.mubr.msk.f32.mxu1 %vm6806_vm1, %v6805_v1 }
 0x13a   : > { %6326 = vmatprep.subr.bf16.mxu0 %v6804_v0  ;;  %6332 = vmatprep.subr.bf16.mxu1 %v6804_v0 }
 0x13b   : > { %5793 = vmatmul.mubr.msk.f32.vlgmr.msra.gmra.mrb[10].mxu0 %vm334_vm2, %v939_v35  ;;  %5800 = vmatmul.mubr.msk.f32.vlgmr.msra.gmra.mrb[10].mxu1 %vm334_vm2, %v939_v35  ;;  %v1542_v35 = vld [vmem:[%s1541_s8] sm:$0x3]  ;;  %s7322_s8 = scalar_select %p162_p2, 2, 5 }
 0x13c   : > { %6328 = vmatpush3.bf16.msra.mxu0 %v6935_v19  ;;  %6334 = vmatpush3.bf16.msra.mxu1 %v6940_v20 }
 0x13d   : > { %6329 = vmatprep.subr.bf16.mxu0 %v6804_v0  ;;  %6335 = vmatprep.subr.bf16.mxu1 %v6804_v0 }
 0x13e   : > { %5810 = vmatprep.mubr.msk.f32.mxu0 %vm6806_vm1, %v6805_v1  ;;  %5821 = vmatprep.mubr.msk.f32.mxu1 %vm6806_vm1, %v6805_v1 }
 0x140   : > { %6331 = vmatpush3.bf16.msra.mxu0 %v6954_v25  ;;  %6337 = vmatpush3.bf16.msra.mxu1 %v6958_v26 }
 0x141   : > { %6338 = vmatprep.subr.bf16.mxu0 %v6804_v0  ;;  %6344 = vmatprep.subr.bf16.mxu1 %v6804_v0 }
 0x143   : > { %5811 = vmatmul.mubr.msk.f32.vlgmr.msra.gmra.mrb[12].mxu0 %vm618_vm3, %v938_v36  ;;  %5822 = vmatmul.mubr.msk.f32.vlgmr.msra.gmra.mrb[12].mxu1 %vm618_vm3, %v938_v36 }
 0x144   : > { %6340 = vmatpush3.bf16.msra.mxu0 %v6975_v32  ;;  %6346 = vmatpush3.bf16.msra.mxu1 %v6979_v33 }
 0x145   : > { %6341 = vmatprep.subr.bf16.mxu0 %v6804_v0  ;;  %6347 = vmatprep.subr.bf16.mxu1 %v6804_v0 }
 0x146   : > { %5832 = vmatprep.mubr.msk.f32.mxu0 %vm6806_vm1, %v6805_v1  ;;  %5843 = vmatprep.mubr.msk.f32.mxu1 %vm6806_vm1, %v6805_v1 }
 0x148   : > { %6343 = vmatpush3.bf16.msra.mxu0 %v6989_v38  ;;  %6349 = vmatpush3.bf16.msra.mxu1 %v6993_v39 }
 0x149   : > { %6350 = vmatprep.subr.bf16.mxu0 %v6804_v0  ;;  %6353 = vmatprep.subr.bf16.mxu1 %v6804_v0 }
 0x14b   : > { %5833 = vmatmul.mubr.msk.f32.vlgmr.msra.gmra.mrb[14].mxu0 %vm618_vm3, %v938_v36  ;;  %5844 = vmatmul.mubr.msk.f32.vlgmr.msra.gmra.mrb[14].mxu1 %vm618_vm3, %v938_v36 }
 0x14c   : > { %6352 = vmatpush3.bf16.msra.mxu0 %v6912_v5  ;;  %6355 = vmatpush3.bf16.msra.mxu1 %v6914_v9 }
 0x14d   : > { %5850 = vmatprep.mubr.msk.f32.mxu0 %vm6806_vm1, %v6805_v1  ;;  %5857 = vmatprep.mubr.msk.f32.mxu1 %vm6806_vm1, %v6805_v1 }
 0x14e   : > { %6356 = vmatprep.subr.bf16.mxu0 %v6804_v0  ;;  %6359 = vmatprep.subr.bf16.mxu1 %v6804_v0 }
 0x20a   : > { %v1009_v37 = vpop.f32.mrb[8].mxu0  ;;  %v1079_v40 = vpop.f32.mrb[8].mxu1 }
 0x20b   : > { %v5780_v41 = vpop.f32.mrb[9].mxu0  ;;  %v5787_v42 = vpop.f32.mrb[9].mxu1 }
 0x20e   : > { %v1149_v43 = vpop.f32.mrb[10].mxu0  ;;  %v1219_v44 = vpop.f32.mrb[10].mxu1 }
 0x20f   : > { %v5794_v45 = vpop.f32.mrb[11].mxu0  ;;  %v5801_v46 = vpop.f32.mrb[11].mxu1 }
 0x216   : > { %v1292_v47 = vpop.f32.mrb[12].mxu0  ;;  %v1362_v49 = vpop.f32.mrb[12].mxu1 }
 0x217   : > { %v1293_v50 = vadd.f32 %v1292_v47, %v1009_v37  ;;  %v1363_v52 = vadd.f32 %v1362_v49, %v1079_v40  ;;  %v5812_v53 = vpop.f32.mrb[13].mxu0  ;;  %v5823_v54 = vpop.f32.mrb[13].mxu1 }
 0x219   : > { %v1506_v55 = vadd.f32 %v7021_v48, %v1293_v50  ;;  %v1507_v56 = vadd.f32 %v7024_v51, %v1363_v52 }
 0x21b   : > { %v5364_v57 = vmul.f32 -1.442695, %v1506_v55  ;;  %v5365_v58 = vmul.f32 -1.442695, %v1507_v56 }
 0x21d   : > { %6624 = vpow2.f32 %v5364_v57 }
 0x21e   : > { %6626 = vpow2.f32 %v5365_v58  ;;  %v1432_v59 = vpop.f32.mrb[14].mxu0  ;;  %v1502_v60 = vpop.f32.mrb[14].mxu1 }
 0x21f   : > { %v1433_v61 = vadd.f32 %v1432_v59, %v1149_v43  ;;  %v1503_v63 = vadd.f32 %v1502_v60, %v1219_v44  ;;  %v5834_v2 = vpop.f32.mrb[15].mxu0  ;;  %v5845_v3 = vpop.f32.mrb[15].mxu1 }
 0x221   : > { %v1509_v4 = vadd.f32 %v7029_v62, %v1503_v63  ;;  %v1508_v8 = vadd.f32 %v7032_v6, %v1433_v61 }
 0x223   : > { %v5366_v7 = vmul.f32 -1.442695, %v1509_v4 }
 0x225   : > { %6628 = vpow2.f32 %v5366_v7 }
 0x226   : > { %6630 = vtanh.f32 %v1508_v8 }
 0x227   : > { %v6625_v10 = vpop.eup %6624 }
 0x228   : > { %v6627_v11 = vpop.eup %6626  ;;  %v1513_v12 = vadd.f32 1.0, %v6625_v10 }
 0x229   : > { %v1519_v15 = vadd.f32 1.0, %v6627_v11 }
 0x22a   : > { %6632 = vrcp.f32 %v1513_v12 }
 0x22b   : > { %6634 = vrcp.f32 %v1519_v15 }
 0x22f   : > { %v6629_v16 = vpop.eup %6628 }
 0x230   : > { %v6631_v17 = vpop.eup %6630  ;;  %v1526_v24 = vadd.f32 1.0, %v6629_v16 }
 0x232   : > { %6636 = vrcp.f32 %v1526_v24 }
 0x234   : > { %v6633_v18 = vpop.eup %6632 }
 0x235   : > { %v6635_v21 = vpop.eup %6634  ;;  %v1531_v23 = vmul.f32 %v6633_v18, %v6631_v17 }
 0x236   : > { %v1530_v27 = vmul.f32 %v6635_v21, %v1529_v22 }
 0x238   : > { %v1532_v28 = vadd.f32 %v1531_v23, %v1530_v27 }
 0x23a   : > { %6638 = vtanh.f32 %v1532_v28  ;;  %1536 = vst.msk [vmem:[#allocation3] sm:$0x3] %vm326_vm0, %v1532_v28 }
 0x23c   : > { %v6637_v29 = vpop.eup %6636 }
 0x241   : > { %v2133_v21 = vld [vmem:[#allocation3] sm:$0x3] }
 0x244   : > { %v6639_v30 = vpop.eup %6638 }
 0x245   : > { %v1534_v31 = vmul.f32 %v6639_v30, %v6637_v29 }
 0x247   : > { %1535 = vst.msk [vmem:[#allocation2] sm:$0x3] %vm326_vm0, %v1534_v31  ;;  %1538 = vst.msk [vmem:[%s1537_s17] sm:$0x3] %vm326_vm0, %v1534_v31  ;;  %s5391_s17 = sshll.u32 %s7254_s16, 1 }
 0x248   : > { %s2749_s26 = scalar_lea.vmem %s7574_s0, %s5391_s17  ;;  %s3349_s6 = scalar_lea.vmem %s7041_s11, %s5391_s17 }
 0x24e   : > { %v1543_v34 = vld [vmem:[#allocation2] sm:$0x3] }
 0x24f   : > { %5851 = vmatmul.mubr.msk.f32.vlgmr.msra.gmra.mrb[16].mxu0 %vm334_vm2, %v1543_v34  ;;  %5858 = vmatmul.mubr.msk.f32.vlgmr.msra.gmra.mrb[16].mxu1 %vm334_vm2, %v1543_v34 }
 0x250   : > { %6358 = vmatpush3.bf16.msra.mxu0 %v6917_v13  ;;  %6361 = vmatpush3.bf16.msra.mxu1 %v6921_v14 }
 0x251   : > { %5864 = vmatprep.mubr.msk.f32.mxu0 %vm6806_vm1, %v6805_v1  ;;  %5871 = vmatprep.mubr.msk.f32.mxu1 %vm6806_vm1, %v6805_v1 }
 0x252   : > { %6362 = vmatprep.subr.bf16.mxu0 %v6804_v0  ;;  %6368 = vmatprep.subr.bf16.mxu1 %v6804_v0 }
 0x253   : > { %5865 = vmatmul.mubr.msk.f32.vlgmr.msra.gmra.mrb[18].mxu0 %vm334_vm2, %v1543_v34  ;;  %5872 = vmatmul.mubr.msk.f32.vlgmr.msra.gmra.mrb[18].mxu1 %vm334_vm2, %v1543_v34  ;;  %v2146_v34 = vld [vmem:[%s2145_s14] sm:$0x3]  ;;  %s7393_s14 = scalar_select %p162_p2, 1, 6 }
 0x254   : > { %6364 = vmatpush3.bf16.msra.mxu0 %v6935_v19  ;;  %6370 = vmatpush3.bf16.msra.mxu1 %v6940_v20 }
 0x255   : > { %6365 = vmatprep.subr.bf16.mxu0 %v6804_v0  ;;  %6371 = vmatprep.subr.bf16.mxu1 %v6804_v0 }
 0x256   : > { %5882 = vmatprep.mubr.msk.f32.mxu0 %vm6806_vm1, %v6805_v1  ;;  %5893 = vmatprep.mubr.msk.f32.mxu1 %vm6806_vm1, %v6805_v1 }
 0x258   : > { %6367 = vmatpush3.bf16.msra.mxu0 %v6954_v25  ;;  %6373 = vmatpush3.bf16.msra.mxu1 %v6958_v26 }
 0x259   : > { %6374 = vmatprep.subr.bf16.mxu0 %v6804_v0  ;;  %6380 = vmatprep.subr.bf16.mxu1 %v6804_v0 }
 0x25b   : > { %5883 = vmatmul.mubr.msk.f32.vlgmr.msra.gmra.mrb[20].mxu0 %vm618_vm3, %v1542_v35  ;;  %5894 = vmatmul.mubr.msk.f32.vlgmr.msra.gmra.mrb[20].mxu1 %vm618_vm3, %v1542_v35 }
 0x25c   : > { %6376 = vmatpush3.bf16.msra.mxu0 %v6975_v32  ;;  %6382 = vmatpush3.bf16.msra.mxu1 %v6979_v33 }
 0x25d   : > { %6377 = vmatprep.subr.bf16.mxu0 %v6804_v0  ;;  %6383 = vmatprep.subr.bf16.mxu1 %v6804_v0 }
 0x25e   : > { %5904 = vmatprep.mubr.msk.f32.mxu0 %vm6806_vm1, %v6805_v1  ;;  %5915 = vmatprep.mubr.msk.f32.mxu1 %vm6806_vm1, %v6805_v1 }
 0x260   : > { %6379 = vmatpush3.bf16.msra.mxu0 %v6989_v38  ;;  %6385 = vmatpush3.bf16.msra.mxu1 %v6993_v39 }
 0x261   : > { %6386 = vmatprep.subr.bf16.mxu0 %v6804_v0  ;;  %6389 = vmatprep.subr.bf16.mxu1 %v6804_v0 }
 0x263   : > { %5905 = vmatmul.mubr.msk.f32.vlgmr.msra.gmra.mrb[22].mxu0 %vm618_vm3, %v1542_v35  ;;  %5916 = vmatmul.mubr.msk.f32.vlgmr.msra.gmra.mrb[22].mxu1 %vm618_vm3, %v1542_v35 }
 0x264   : > { %6388 = vmatpush3.bf16.msra.mxu0 %v6912_v5  ;;  %6391 = vmatpush3.bf16.msra.mxu1 %v6914_v9 }
 0x265   : > { %5922 = vmatprep.mubr.msk.f32.mxu0 %vm6806_vm1, %v6805_v1  ;;  %5929 = vmatprep.mubr.msk.f32.mxu1 %vm6806_vm1, %v6805_v1 }
 0x266   : > { %6392 = vmatprep.subr.bf16.mxu0 %v6804_v0  ;;  %6395 = vmatprep.subr.bf16.mxu1 %v6804_v0 }
 0x322   : > { %v1613_v36 = vpop.f32.mrb[16].mxu0  ;;  %v1683_v37 = vpop.f32.mrb[16].mxu1 }
 0x323   : > { %v5852_v40 = vpop.f32.mrb[17].mxu0  ;;  %v5859_v41 = vpop.f32.mrb[17].mxu1 }
 0x326   : > { %v1753_v42 = vpop.f32.mrb[18].mxu0  ;;  %v1823_v43 = vpop.f32.mrb[18].mxu1 }
 0x327   : > { %v5866_v44 = vpop.f32.mrb[19].mxu0  ;;  %v5873_v45 = vpop.f32.mrb[19].mxu1 }
 0x32e   : > { %v1896_v46 = vpop.f32.mrb[20].mxu0  ;;  %v1966_v47 = vpop.f32.mrb[20].mxu1 }
 0x32f   : > { %v1897_v49 = vadd.f32 %v1896_v46, %v1613_v36  ;;  %v1967_v50 = vadd.f32 %v1966_v47, %v1683_v37  ;;  %v5884_v52 = vpop.f32.mrb[21].mxu0  ;;  %v5895_v53 = vpop.f32.mrb[21].mxu1 }
 0x331   : > { %v2110_v54 = vadd.f32 %v7021_v48, %v1897_v49  ;;  %v2111_v55 = vadd.f32 %v7024_v51, %v1967_v50 }
 0x333   : > { %v5376_v56 = vmul.f32 -1.442695, %v2110_v54  ;;  %v5377_v57 = vmul.f32 -1.442695, %v2111_v55 }
 0x335   : > { %6640 = vpow2.f32 %v5376_v56 }
 0x336   : > { %6642 = vpow2.f32 %v5377_v57  ;;  %v2036_v58 = vpop.f32.mrb[22].mxu0  ;;  %v2106_v59 = vpop.f32.mrb[22].mxu1 }
 0x337   : > { %v2037_v60 = vadd.f32 %v2036_v58, %v1753_v42  ;;  %v2107_v61 = vadd.f32 %v2106_v59, %v1823_v43  ;;  %v5906_v63 = vpop.f32.mrb[23].mxu0  ;;  %v5917_v2 = vpop.f32.mrb[23].mxu1 }
 0x339   : > { %v2113_v3 = vadd.f32 %v7029_v62, %v2107_v61  ;;  %v2112_v7 = vadd.f32 %v7032_v6, %v2037_v60 }
 0x33b   : > { %v5378_v4 = vmul.f32 -1.442695, %v2113_v3 }
 0x33d   : > { %6644 = vpow2.f32 %v5378_v4 }
 0x33e   : > { %6646 = vtanh.f32 %v2112_v7 }
 0x33f   : > { %v6641_v8 = vpop.eup %6640 }
 0x340   : > { %v6643_v10 = vpop.eup %6642  ;;  %v2117_v11 = vadd.f32 1.0, %v6641_v8 }
 0x341   : > { %v2123_v12 = vadd.f32 1.0, %v6643_v10 }
 0x342   : > { %6648 = vrcp.f32 %v2117_v11 }
 0x343   : > { %6650 = vrcp.f32 %v2123_v12 }
 0x347   : > { %v6645_v15 = vpop.eup %6644 }
 0x348   : > { %v6647_v16 = vpop.eup %6646  ;;  %v2130_v23 = vadd.f32 1.0, %v6645_v15 }
 0x34a   : > { %6652 = vrcp.f32 %v2130_v23 }
 0x34c   : > { %v6649_v17 = vpop.eup %6648 }
 0x34d   : > { %v6651_v18 = vpop.eup %6650  ;;  %v2135_v22 = vmul.f32 %v6649_v17, %v6647_v16 }
 0x34e   : > { %v2134_v24 = vmul.f32 %v6651_v18, %v2133_v21 }
 0x350   : > { %v2136_v27 = vadd.f32 %v2135_v22, %v2134_v24 }
 0x352   : > { %6654 = vtanh.f32 %v2136_v27  ;;  %2140 = vst.msk [vmem:[#allocation3] sm:$0x3] %vm326_vm0, %v2136_v27 }
 0x354   : > { %v6653_v28 = vpop.eup %6652 }
 0x359   : > { %v2737_v18 = vld [vmem:[#allocation3] sm:$0x3] }
 0x35c   : > { %v6655_v29 = vpop.eup %6654 }
 0x35d   : > { %v2138_v30 = vmul.f32 %v6655_v29, %v6653_v28 }
 0x35f   : > { %2139 = vst.msk [vmem:[#allocation2] sm:$0x3] %vm326_vm0, %v2138_v30  ;;  %2142 = vst.msk [vmem:[%s2141_s9] sm:$0x3] %vm326_vm0, %v2138_v30  ;;  %s5403_s9 = sshll.u32 %s7322_s8, 1 }
 0x360   : > { %s3353_s13 = scalar_lea.vmem %s7574_s0, %s5403_s9  ;;  %s3953_s30 = scalar_lea.vmem %s7041_s11, %s5403_s9 }
 0x366   : > { %v2147_v31 = vld [vmem:[#allocation2] sm:$0x3] }
 0x367   : > { %5923 = vmatmul.mubr.msk.f32.vlgmr.msra.gmra.mrb[24].mxu0 %vm334_vm2, %v2147_v31  ;;  %5930 = vmatmul.mubr.msk.f32.vlgmr.msra.gmra.mrb[24].mxu1 %vm334_vm2, %v2147_v31 }
 0x368   : > { %6394 = vmatpush3.bf16.msra.mxu0 %v6917_v13  ;;  %6397 = vmatpush3.bf16.msra.mxu1 %v6921_v14 }
 0x369   : > { %5936 = vmatprep.mubr.msk.f32.mxu0 %vm6806_vm1, %v6805_v1  ;;  %5943 = vmatprep.mubr.msk.f32.mxu1 %vm6806_vm1, %v6805_v1 }
 0x36a   : > { %6398 = vmatprep.subr.bf16.mxu0 %v6804_v0  ;;  %6404 = vmatprep.subr.bf16.mxu1 %v6804_v0 }
 0x36b   : > { %5937 = vmatmul.mubr.msk.f32.vlgmr.msra.gmra.mrb[26].mxu0 %vm334_vm2, %v2147_v31  ;;  %5944 = vmatmul.mubr.msk.f32.vlgmr.msra.gmra.mrb[26].mxu1 %vm334_vm2, %v2147_v31  ;;  %v2750_v31 = vld [vmem:[%s2749_s26] sm:$0x3]  ;;  %s5427_s26 = sshll.u32 %s7470_s25, 1 }
 0x36c   : > { %6400 = vmatpush3.bf16.msra.mxu0 %v6935_v19  ;;  %6406 = vmatpush3.bf16.msra.mxu1 %v6940_v20  ;;  %s4561_s9 = scalar_lea.vmem %s7574_s0, %s5427_s26  ;;  %s5161_s12 = scalar_lea.vmem %s7041_s11, %s5427_s26 }
 0x36d   : > { %6401 = vmatprep.subr.bf16.mxu0 %v6804_v0  ;;  %6407 = vmatprep.subr.bf16.mxu1 %v6804_v0 }
 0x36e   : > { %5954 = vmatprep.mubr.msk.f32.mxu0 %vm6806_vm1, %v6805_v1  ;;  %5965 = vmatprep.mubr.msk.f32.mxu1 %vm6806_vm1, %v6805_v1 }
 0x370   : > { %6403 = vmatpush3.bf16.msra.mxu0 %v6954_v25  ;;  %6409 = vmatpush3.bf16.msra.mxu1 %v6958_v26 }
 0x371   : > { %6410 = vmatprep.subr.bf16.mxu0 %v6804_v0  ;;  %6416 = vmatprep.subr.bf16.mxu1 %v6804_v0 }
 0x373   : > { %5955 = vmatmul.mubr.msk.f32.vlgmr.msra.gmra.mrb[28].mxu0 %vm618_vm3, %v2146_v34  ;;  %5966 = vmatmul.mubr.msk.f32.vlgmr.msra.gmra.mrb[28].mxu1 %vm618_vm3, %v2146_v34 }
 0x374   : > { %6412 = vmatpush3.bf16.msra.mxu0 %v6975_v32  ;;  %6418 = vmatpush3.bf16.msra.mxu1 %v6979_v33 }
 0x375   : > { %6413 = vmatprep.subr.bf16.mxu0 %v6804_v0  ;;  %6419 = vmatprep.subr.bf16.mxu1 %v6804_v0 }
 0x376   : > { %5976 = vmatprep.mubr.msk.f32.mxu0 %vm6806_vm1, %v6805_v1  ;;  %5987 = vmatprep.mubr.msk.f32.mxu1 %vm6806_vm1, %v6805_v1 }
 0x378   : > { %6415 = vmatpush3.bf16.msra.mxu0 %v6989_v38  ;;  %6421 = vmatpush3.bf16.msra.mxu1 %v6993_v39 }
 0x379   : > { %6422 = vmatprep.subr.bf16.mxu0 %v6804_v0  ;;  %6425 = vmatprep.subr.bf16.mxu1 %v6804_v0 }
 0x37b   : > { %5977 = vmatmul.mubr.msk.f32.vlgmr.msra.gmra.mrb[30].mxu0 %vm618_vm3, %v2146_v34  ;;  %5988 = vmatmul.mubr.msk.f32.vlgmr.msra.gmra.mrb[30].mxu1 %vm618_vm3, %v2146_v34 }
 0x37c   : > { %6424 = vmatpush3.bf16.msra.mxu0 %v6912_v5  ;;  %6427 = vmatpush3.bf16.msra.mxu1 %v6914_v9 }
 0x37d   : > { %5994 = vmatprep.mubr.msk.f32.mxu0 %vm6806_vm1, %v6805_v1  ;;  %6001 = vmatprep.mubr.msk.f32.mxu1 %vm6806_vm1, %v6805_v1 }
 0x37e   : > { %6428 = vmatprep.subr.bf16.mxu0 %v6804_v0  ;;  %6431 = vmatprep.subr.bf16.mxu1 %v6804_v0 }
 0x43a   : > { %v2217_v35 = vpop.f32.mrb[24].mxu0  ;;  %v2287_v36 = vpop.f32.mrb[24].mxu1 }
 0x43b   : > { %v5924_v37 = vpop.f32.mrb[25].mxu0  ;;  %v5931_v40 = vpop.f32.mrb[25].mxu1 }
 0x43e   : > { %v2357_v41 = vpop.f32.mrb[26].mxu0  ;;  %v2427_v42 = vpop.f32.mrb[26].mxu1 }
 0x43f   : > { %v5938_v43 = vpop.f32.mrb[27].mxu0  ;;  %v5945_v44 = vpop.f32.mrb[27].mxu1 }
 0x446   : > { %v2500_v45 = vpop.f32.mrb[28].mxu0  ;;  %v2570_v46 = vpop.f32.mrb[28].mxu1 }
 0x447   : > { %v2501_v47 = vadd.f32 %v2500_v45, %v2217_v35  ;;  %v2571_v49 = vadd.f32 %v2570_v46, %v2287_v36  ;;  %v5956_v50 = vpop.f32.mrb[29].mxu0  ;;  %v5967_v52 = vpop.f32.mrb[29].mxu1 }
 0x449   : > { %v2714_v53 = vadd.f32 %v7021_v48, %v2501_v47  ;;  %v2715_v54 = vadd.f32 %v7024_v51, %v2571_v49 }
 0x44b   : > { %v5388_v55 = vmul.f32 -1.442695, %v2714_v53  ;;  %v5389_v56 = vmul.f32 -1.442695, %v2715_v54 }
 0x44d   : > { %6656 = vpow2.f32 %v5388_v55 }
 0x44e   : > { %6658 = vpow2.f32 %v5389_v56  ;;  %v2640_v57 = vpop.f32.mrb[30].mxu0  ;;  %v2710_v58 = vpop.f32.mrb[30].mxu1 }
 0x44f   : > { %v2641_v59 = vadd.f32 %v2640_v57, %v2357_v41  ;;  %v2711_v60 = vadd.f32 %v2710_v58, %v2427_v42  ;;  %v5978_v61 = vpop.f32.mrb[31].mxu0  ;;  %v5989_v63 = vpop.f32.mrb[31].mxu1 }
 0x451   : > { %v2717_v2 = vadd.f32 %v7029_v62, %v2711_v60  ;;  %v2716_v4 = vadd.f32 %v7032_v6, %v2641_v59 }
 0x453   : > { %v5390_v3 = vmul.f32 -1.442695, %v2717_v2 }
 0x455   : > { %6660 = vpow2.f32 %v5390_v3 }
 0x456   : > { %6662 = vtanh.f32 %v2716_v4 }
 0x457   : > { %v6657_v7 = vpop.eup %6656 }
 0x458   : > { %v6659_v8 = vpop.eup %6658  ;;  %v2721_v10 = vadd.f32 1.0, %v6657_v7 }
 0x459   : > { %v2727_v11 = vadd.f32 1.0, %v6659_v8 }
 0x45a   : > { %6664 = vrcp.f32 %v2721_v10 }
 0x45b   : > { %6666 = vrcp.f32 %v2727_v11 }
 0x45f   : > { %v6661_v12 = vpop.eup %6660 }
 0x460   : > { %v6663_v15 = vpop.eup %6662  ;;  %v2734_v22 = vadd.f32 1.0, %v6661_v12 }
 0x462   : > { %6668 = vrcp.f32 %v2734_v22 }
 0x464   : > { %v6665_v16 = vpop.eup %6664 }
 0x465   : > { %v6667_v17 = vpop.eup %6666  ;;  %v2739_v21 = vmul.f32 %v6665_v16, %v6663_v15 }
 0x466   : > { %v2738_v23 = vmul.f32 %v6667_v17, %v2737_v18 }
 0x468   : > { %v2740_v24 = vadd.f32 %v2739_v21, %v2738_v23 }
 0x46a   : > { %6670 = vtanh.f32 %v2740_v24  ;;  %2744 = vst.msk [vmem:[#allocation3] sm:$0x3] %vm326_vm0, %v2740_v24 }
 0x46c   : > { %v6669_v27 = vpop.eup %6668 }
 0x471   : > { %v3341_v16 = vld [vmem:[#allocation3] sm:$0x3] }
 0x474   : > { %v6671_v28 = vpop.eup %6670 }
 0x475   : > { %v2742_v29 = vmul.f32 %v6671_v28, %v6669_v27 }
 0x477   : > { %2743 = vst.msk [vmem:[#allocation2] sm:$0x3] %vm326_vm0, %v2742_v29  ;;  %2746 = vst.msk [vmem:[%s2745_s15] sm:$0x3] %vm326_vm0, %v2742_v29  ;;  %v3354_v29 = vld [vmem:[%s3353_s13] sm:$0x3] }
 0x478   : > { %s5415_s15 = sshll.u32 %s7393_s14, 1  ;;  %s5331_s13 = sshll.u32 %s251_s10, 1 }
 0x479   : > { %s3957_s23 = scalar_lea.vmem %s7574_s0, %s5415_s15  ;;  %s253_s14 = scalar_lea.vmem [#allocation4], %s5331_s13 }
 0x47e   : > { %v2751_v30 = vld [vmem:[#allocation2] sm:$0x3] }
 0x47f   : > { %5995 = vmatmul.mubr.msk.f32.vlgmr.msra.gmra.mrb[32].mxu0 %vm334_vm2, %v2751_v30  ;;  %6002 = vmatmul.mubr.msk.f32.vlgmr.msra.gmra.mrb[32].mxu1 %vm334_vm2, %v2751_v30 }
 0x480   : > { %6430 = vmatpush3.bf16.msra.mxu0 %v6917_v13  ;;  %6433 = vmatpush3.bf16.msra.mxu1 %v6921_v14 }
 0x481   : > { %6008 = vmatprep.mubr.msk.f32.mxu0 %vm6806_vm1, %v6805_v1  ;;  %6015 = vmatprep.mubr.msk.f32.mxu1 %vm6806_vm1, %v6805_v1 }
 0x482   : > { %6434 = vmatprep.subr.bf16.mxu0 %v6804_v0  ;;  %6440 = vmatprep.subr.bf16.mxu1 %v6804_v0 }
 0x483   : > { %6009 = vmatmul.mubr.msk.f32.vlgmr.msra.gmra.mrb[34].mxu0 %vm334_vm2, %v2751_v30  ;;  %6016 = vmatmul.mubr.msk.f32.vlgmr.msra.gmra.mrb[34].mxu1 %vm334_vm2, %v2751_v30 }
 0x484   : > { %6436 = vmatpush3.bf16.msra.mxu0 %v6935_v19  ;;  %6442 = vmatpush3.bf16.msra.mxu1 %v6940_v20 }
 0x485   : > { %6437 = vmatprep.subr.bf16.mxu0 %v6804_v0  ;;  %6443 = vmatprep.subr.bf16.mxu1 %v6804_v0 }
 0x486   : > { %6026 = vmatprep.mubr.msk.f32.mxu0 %vm6806_vm1, %v6805_v1  ;;  %6037 = vmatprep.mubr.msk.f32.mxu1 %vm6806_vm1, %v6805_v1 }
 0x488   : > { %6439 = vmatpush3.bf16.msra.mxu0 %v6954_v25  ;;  %6445 = vmatpush3.bf16.msra.mxu1 %v6958_v26 }
 0x489   : > { %6446 = vmatprep.subr.bf16.mxu0 %v6804_v0  ;;  %6452 = vmatprep.subr.bf16.mxu1 %v6804_v0 }
 0x48b   : > { %6027 = vmatmul.mubr.msk.f32.vlgmr.msra.gmra.mrb[36].mxu0 %vm618_vm3, %v2750_v31  ;;  %6038 = vmatmul.mubr.msk.f32.vlgmr.msra.gmra.mrb[36].mxu1 %vm618_vm3, %v2750_v31 }
 0x48c   : > { %6448 = vmatpush3.bf16.msra.mxu0 %v6975_v32  ;;  %6454 = vmatpush3.bf16.msra.mxu1 %v6979_v33 }
 0x48d   : > { %6449 = vmatprep.subr.bf16.mxu0 %v6804_v0  ;;  %6455 = vmatprep.subr.bf16.mxu1 %v6804_v0 }
 0x48e   : > { %6048 = vmatprep.mubr.msk.f32.mxu0 %vm6806_vm1, %v6805_v1  ;;  %6059 = vmatprep.mubr.msk.f32.mxu1 %vm6806_vm1, %v6805_v1 }
 0x490   : > { %6451 = vmatpush3.bf16.msra.mxu0 %v6989_v38  ;;  %6457 = vmatpush3.bf16.msra.mxu1 %v6993_v39 }
 0x491   : > { %6458 = vmatprep.subr.bf16.mxu0 %v6804_v0  ;;  %6461 = vmatprep.subr.bf16.mxu1 %v6804_v0 }
 0x493   : > { %6049 = vmatmul.mubr.msk.f32.vlgmr.msra.gmra.mrb[38].mxu0 %vm618_vm3, %v2750_v31  ;;  %6060 = vmatmul.mubr.msk.f32.vlgmr.msra.gmra.mrb[38].mxu1 %vm618_vm3, %v2750_v31 }
 0x494   : > { %6460 = vmatpush3.bf16.msra.mxu0 %v6912_v5  ;;  %6463 = vmatpush3.bf16.msra.mxu1 %v6914_v9 }
 0x495   : > { %6066 = vmatprep.mubr.msk.f32.mxu0 %vm6806_vm1, %v6805_v1  ;;  %6073 = vmatprep.mubr.msk.f32.mxu1 %vm6806_vm1, %v6805_v1 }
 0x496   : > { %6464 = vmatprep.subr.bf16.mxu0 %v6804_v0  ;;  %6467 = vmatprep.subr.bf16.mxu1 %v6804_v0 }
 0x552   : > { %v2821_v34 = vpop.f32.mrb[32].mxu0  ;;  %v2891_v35 = vpop.f32.mrb[32].mxu1 }
 0x553   : > { %v5996_v36 = vpop.f32.mrb[33].mxu0  ;;  %v6003_v37 = vpop.f32.mrb[33].mxu1 }
 0x556   : > { %v2961_v40 = vpop.f32.mrb[34].mxu0  ;;  %v3031_v41 = vpop.f32.mrb[34].mxu1 }
 0x557   : > { %v6010_v42 = vpop.f32.mrb[35].mxu0  ;;  %v6017_v43 = vpop.f32.mrb[35].mxu1 }
 0x55e   : > { %v3104_v44 = vpop.f32.mrb[36].mxu0  ;;  %v3174_v45 = vpop.f32.mrb[36].mxu1 }
 0x55f   : > { %v3105_v46 = vadd.f32 %v3104_v44, %v2821_v34  ;;  %v3175_v47 = vadd.f32 %v3174_v45, %v2891_v35  ;;  %v6028_v49 = vpop.f32.mrb[37].mxu0  ;;  %v6039_v50 = vpop.f32.mrb[37].mxu1 }
 0x560   : > { %v7379_v49 = vld [vmem:[%s7018_s7] ss:$0 sm:$0xff] }
 0x561   : > { %v3318_v52 = vadd.f32 %v7021_v48, %v3105_v46  ;;  %v3319_v53 = vadd.f32 %v7024_v51, %v3175_v47 }
 0x563   : > { %v5400_v54 = vmul.f32 -1.442695, %v3318_v52  ;;  %v5401_v55 = vmul.f32 -1.442695, %v3319_v53 }
 0x565   : > { %6672 = vpow2.f32 %v5400_v54 }
 0x566   : > { %6674 = vpow2.f32 %v5401_v55  ;;  %v3244_v56 = vpop.f32.mrb[38].mxu0  ;;  %v3314_v57 = vpop.f32.mrb[38].mxu1 }
 0x567   : > { %v3245_v58 = vadd.f32 %v3244_v56, %v2961_v40  ;;  %v3315_v59 = vadd.f32 %v3314_v57, %v3031_v41  ;;  %v6050_v60 = vpop.f32.mrb[39].mxu0  ;;  %v6061_v61 = vpop.f32.mrb[39].mxu1 }
 0x569   : > { %v3321_v63 = vadd.f32 %v7029_v62, %v3315_v59  ;;  %v3320_v3 = vadd.f32 %v7032_v6, %v3245_v58 }
 0x56b   : > { %v5402_v2 = vmul.f32 -1.442695, %v3321_v63 }
 0x56d   : > { %6676 = vpow2.f32 %v5402_v2 }
 0x56e   : > { %6678 = vtanh.f32 %v3320_v3 }
 0x56f   : > { %v6673_v4 = vpop.eup %6672 }
 0x570   : > { %v6675_v7 = vpop.eup %6674  ;;  %v3325_v48 = vadd.f32 1.0, %v6673_v4 }
 0x571   : > { %v3331_v8 = vadd.f32 1.0, %v6675_v7 }
 0x572   : > { %6680 = vrcp.f32 %v3325_v48 }
 0x573   : > { %6682 = vrcp.f32 %v3331_v8 }
 0x577   : > { %v6677_v10 = vpop.eup %6676 }
 0x578   : > { %v6679_v11 = vpop.eup %6678  ;;  %v3338_v18 = vadd.f32 1.0, %v6677_v10 }
 0x57a   : > { %6684 = vrcp.f32 %v3338_v18 }
 0x57c   : > { %v6681_v12 = vpop.eup %6680 }
 0x57d   : > { %v6683_v15 = vpop.eup %6682  ;;  %v3343_v17 = vmul.f32 %v6681_v12, %v6679_v11 }
 0x57e   : > { %v3342_v21 = vmul.f32 %v6683_v15, %v3341_v16 }
 0x580   : > { %v3344_v22 = vadd.f32 %v3343_v17, %v3342_v21 }
 0x582   : > { %6686 = vtanh.f32 %v3344_v22  ;;  %3348 = vst.msk [vmem:[#allocation3] sm:$0x3] %vm326_vm0, %v3344_v22 }
 0x584   : > { %v6685_v23 = vpop.eup %6684 }
 0x589   : > { %v3945_v12 = vld [vmem:[#allocation3] sm:$0x3] }
 0x58c   : > { %v6687_v24 = vpop.eup %6686 }
 0x58d   : > { %v3346_v27 = vmul.f32 %v6687_v24, %v6685_v23  ;;  %v3958_v23 = vld [vmem:[%s3957_s23] sm:$0x3] }
 0x58f   : > { %3350 = vst.msk [vmem:[%s3349_s6] sm:$0x3] %vm326_vm0, %v3346_v27  ;;  %3347 = vst.msk [vmem:[#allocation2] sm:$0x3] %vm326_vm0, %v3346_v27 }
 0x596   : > { %v3355_v28 = vld [vmem:[#allocation2] sm:$0x3] }
 0x597   : > { %6067 = vmatmul.mubr.msk.f32.vlgmr.msra.gmra.mrb[40].mxu0 %vm334_vm2, %v3355_v28  ;;  %6074 = vmatmul.mubr.msk.f32.vlgmr.msra.gmra.mrb[40].mxu1 %vm334_vm2, %v3355_v28 }
 0x598   : > { %6466 = vmatpush3.bf16.msra.mxu0 %v6917_v13  ;;  %6469 = vmatpush3.bf16.msra.mxu1 %v6921_v14 }
 0x599   : > { %6080 = vmatprep.mubr.msk.f32.mxu0 %vm6806_vm1, %v6805_v1  ;;  %6087 = vmatprep.mubr.msk.f32.mxu1 %vm6806_vm1, %v6805_v1 }
 0x59a   : > { %6470 = vmatprep.subr.bf16.mxu0 %v6804_v0  ;;  %6476 = vmatprep.subr.bf16.mxu1 %v6804_v0 }
 0x59b   : > { %6081 = vmatmul.mubr.msk.f32.vlgmr.msra.gmra.mrb[42].mxu0 %vm334_vm2, %v3355_v28  ;;  %6088 = vmatmul.mubr.msk.f32.vlgmr.msra.gmra.mrb[42].mxu1 %vm334_vm2, %v3355_v28 }
 0x59c   : > { %6472 = vmatpush3.bf16.msra.mxu0 %v6935_v19  ;;  %6478 = vmatpush3.bf16.msra.mxu1 %v6940_v20 }
 0x59d   : > { %6473 = vmatprep.subr.bf16.mxu0 %v6804_v0  ;;  %6479 = vmatprep.subr.bf16.mxu1 %v6804_v0 }
 0x59e   : > { %6098 = vmatprep.mubr.msk.f32.mxu0 %vm6806_vm1, %v6805_v1  ;;  %6109 = vmatprep.mubr.msk.f32.mxu1 %vm6806_vm1, %v6805_v1 }
 0x5a0   : > { %6475 = vmatpush3.bf16.msra.mxu0 %v6954_v25  ;;  %6481 = vmatpush3.bf16.msra.mxu1 %v6958_v26 }
 0x5a1   : > { %6482 = vmatprep.subr.bf16.mxu0 %v6804_v0  ;;  %6488 = vmatprep.subr.bf16.mxu1 %v6804_v0 }
 0x5a3   : > { %6099 = vmatmul.mubr.msk.f32.vlgmr.msra.gmra.mrb[44].mxu0 %vm618_vm3, %v3354_v29  ;;  %6110 = vmatmul.mubr.msk.f32.vlgmr.msra.gmra.mrb[44].mxu1 %vm618_vm3, %v3354_v29 }
 0x5a4   : > { %6484 = vmatpush3.bf16.msra.mxu0 %v6975_v32  ;;  %6490 = vmatpush3.bf16.msra.mxu1 %v6979_v33 }
 0x5a5   : > { %6485 = vmatprep.subr.bf16.mxu0 %v6804_v0  ;;  %6491 = vmatprep.subr.bf16.mxu1 %v6804_v0 }
 0x5a6   : > { %6120 = vmatprep.mubr.msk.f32.mxu0 %vm6806_vm1, %v6805_v1  ;;  %6131 = vmatprep.mubr.msk.f32.mxu1 %vm6806_vm1, %v6805_v1 }
 0x5a8   : > { %6487 = vmatpush3.bf16.msra.mxu0 %v6989_v38  ;;  %6493 = vmatpush3.bf16.msra.mxu1 %v6993_v39 }
 0x5a9   : > { %6494 = vmatprep.subr.bf16.mxu0 %v6804_v0  ;;  %6497 = vmatprep.subr.bf16.mxu1 %v6804_v0 }
 0x5ab   : > { %6121 = vmatmul.mubr.msk.f32.vlgmr.msra.gmra.mrb[46].mxu0 %vm618_vm3, %v3354_v29  ;;  %6132 = vmatmul.mubr.msk.f32.vlgmr.msra.gmra.mrb[46].mxu1 %vm618_vm3, %v3354_v29 }
 0x5ac   : > { %6496 = vmatpush3.bf16.msra.mxu0 %v6912_v5  ;;  %6499 = vmatpush3.bf16.msra.mxu1 %v6914_v9 }
 0x5ad   : > { %6138 = vmatprep.mubr.msk.f32.mxu0 %vm6806_vm1, %v6805_v1  ;;  %6145 = vmatprep.mubr.msk.f32.mxu1 %vm6806_vm1, %v6805_v1 }
 0x5ae   : > { %6500 = vmatprep.subr.bf16.mxu0 %v6804_v0  ;;  %6503 = vmatprep.subr.bf16.mxu1 %v6804_v0 }
 0x66a   : > { %v3425_v30 = vpop.f32.mrb[40].mxu0  ;;  %v3495_v31 = vpop.f32.mrb[40].mxu1 }
 0x66b   : > { %v6068_v34 = vpop.f32.mrb[41].mxu0  ;;  %v6075_v35 = vpop.f32.mrb[41].mxu1 }
 0x66e   : > { %v3565_v36 = vpop.f32.mrb[42].mxu0  ;;  %v3635_v37 = vpop.f32.mrb[42].mxu1 }
 0x66f   : > { %v6082_v40 = vpop.f32.mrb[43].mxu0  ;;  %v6089_v41 = vpop.f32.mrb[43].mxu1 }
 0x676   : > { %v3708_v42 = vpop.f32.mrb[44].mxu0  ;;  %v3778_v43 = vpop.f32.mrb[44].mxu1 }
 0x677   : > { %v3709_v44 = vadd.f32 %v3708_v42, %v3425_v30  ;;  %v3779_v45 = vadd.f32 %v3778_v43, %v3495_v31  ;;  %v6100_v46 = vpop.f32.mrb[45].mxu0  ;;  %v6111_v47 = vpop.f32.mrb[45].mxu1  ;;  %v7451_v43 = vld [vmem:[%s7018_s7 + $0x1] ss:$0 sm:$0xff] }
 0x679   : > { %v3922_v50 = vadd.f32 %v7379_v49, %v3709_v44  ;;  %v3923_v52 = vadd.f32 %v7024_v51, %v3779_v45 }
 0x67b   : > { %v5412_v53 = vmul.f32 -1.442695, %v3922_v50  ;;  %v5413_v54 = vmul.f32 -1.442695, %v3923_v52 }
 0x67d   : > { %6688 = vpow2.f32 %v5412_v53 }
 0x67e   : > { %6690 = vpow2.f32 %v5413_v54  ;;  %v3848_v55 = vpop.f32.mrb[46].mxu0  ;;  %v3918_v56 = vpop.f32.mrb[46].mxu1 }
 0x67f   : > { %v3849_v57 = vadd.f32 %v3848_v55, %v3565_v36  ;;  %v3919_v58 = vadd.f32 %v3918_v56, %v3635_v37  ;;  %v6122_v59 = vpop.f32.mrb[47].mxu0  ;;  %v6133_v60 = vpop.f32.mrb[47].mxu1  ;;  %v7455_v56 = vld [vmem:[%s7018_s7 + $0x3] ss:$0 sm:$0xff] }
 0x680   : > { %v7459_v59 = vld [vmem:[%s7018_s7 + $0x2] ss:$0 sm:$0xff]  ;;  %s4557_s7 = scalar_lea.vmem %s7041_s11, %s5415_s15  ;;  %s5187_s15 = sshll.u32 %s253_s14, 4  ;;  %s7533_s15 = int_to_ptr.vmem [resolvable:$true] %s5187_s15 }
 0x681   : > { %v3925_v61 = vadd.f32 %v7029_v62, %v3919_v58  ;;  %v3924_v2 = vadd.f32 %v7032_v6, %v3849_v57  ;;  %s5171_s11 = scalar_lea.sflag [#allocation5], %s251_s10 }
 0x683   : > { %v5414_v63 = vmul.f32 -1.442695, %v3925_v61 }
 0x685   : > { %6692 = vpow2.f32 %v5414_v63 }
 0x686   : > { %6694 = vtanh.f32 %v3924_v2 }
 0x687   : > { %v6689_v3 = vpop.eup %6688 }
 0x688   : > { %v6691_v4 = vpop.eup %6690  ;;  %v3929_v7 = vadd.f32 1.0, %v6689_v3 }
 0x689   : > { %v3935_v51 = vadd.f32 1.0, %v6691_v4 }
 0x68a   : > { %6696 = vrcp.f32 %v3929_v7 }
 0x68b   : > { %6698 = vrcp.f32 %v3935_v51 }
 0x68f   : > { %v6693_v48 = vpop.eup %6692 }
 0x690   : > { %v6695_v8 = vpop.eup %6694  ;;  %v3942_v15 = vadd.f32 1.0, %v6693_v48 }
 0x692   : > { %6700 = vrcp.f32 %v3942_v15 }
 0x694   : > { %v6697_v10 = vpop.eup %6696 }
 0x695   : > { %v6699_v11 = vpop.eup %6698  ;;  %v3947_v62 = vmul.f32 %v6697_v10, %v6695_v8 }
 0x696   : > { %v3946_v16 = vmul.f32 %v6699_v11, %v3945_v12 }
 0x698   : > { %v3948_v6 = vadd.f32 %v3947_v62, %v3946_v16 }
 0x69a   : > { %6702 = vtanh.f32 %v3948_v6  ;;  %3952 = vst.msk [vmem:[#allocation3] sm:$0x3] %vm326_vm0, %v3948_v6 }
 0x69c   : > { %v6701_v17 = vpop.eup %6700 }
 0x6a1   : > { %v4549_v8 = vld [vmem:[#allocation3] sm:$0x3] }
 0x6a4   : > { %v6703_v18 = vpop.eup %6702 }
 0x6a5   : > { %v3950_v21 = vmul.f32 %v6703_v18, %v6701_v17 }
 0x6a7   : > { %3954 = vst.msk [vmem:[%s3953_s30] sm:$0x3] %vm326_vm0, %v3950_v21  ;;  %3951 = vst.msk [vmem:[#allocation2] sm:$0x3] %vm326_vm0, %v3950_v21  ;;  %s5440_s30 = sshll.u32 %s6859_s22, 5  ;;  %s6807_s22 = smov [#allocation4]  }
 0x6a8   : > { %s7531_s23 = scalar_lea.hbm %s7579_s5, %s5440_s30  ;;  %s6744_s25 = sshll.u32 %s6807_s22, 4  ;;  %s6745_s25 = int_to_ptr.vmem [resolvable:$false] %s6744_s25 }
 0x6a9   : > { %s6746_s26 = scalar_lea.vmem %s6745_s25, 64  ;;  %p6747_p0 = scmp.lt.s32.totalorder %s7533_s15, %s6745_s25 }
 0x6ae   : > { %v3959_v22 = vld [vmem:[#allocation2] sm:$0x3] }
 0x6af   : > { %6139 = vmatmul.mubr.msk.f32.vlgmr.msra.gmra.mrb[48].mxu0 %vm334_vm2, %v3959_v22  ;;  %6146 = vmatmul.mubr.msk.f32.vlgmr.msra.gmra.mrb[48].mxu1 %vm334_vm2, %v3959_v22 }
 0x6b0   : > { %6502 = vmatpush3.bf16.msra.mxu0 %v6917_v13  ;;  %6505 = vmatpush3.bf16.msra.mxu1 %v6921_v14 }
 0x6b1   : > { %6152 = vmatprep.mubr.msk.f32.mxu0 %vm6806_vm1, %v6805_v1  ;;  %6159 = vmatprep.mubr.msk.f32.mxu1 %vm6806_vm1, %v6805_v1 }
 0x6b2   : > { %6506 = vmatprep.subr.bf16.mxu0 %v6804_v0  ;;  %6512 = vmatprep.subr.bf16.mxu1 %v6804_v0 }
 0x6b3   : > { %6153 = vmatmul.mubr.msk.f32.vlgmr.msra.gmra.mrb[50].mxu0 %vm334_vm2, %v3959_v22  ;;  %6160 = vmatmul.mubr.msk.f32.vlgmr.msra.gmra.mrb[50].mxu1 %vm334_vm2, %v3959_v22 }
 0x6b4   : > { %6508 = vmatpush3.bf16.msra.mxu0 %v6935_v19  ;;  %6514 = vmatpush3.bf16.msra.mxu1 %v6940_v20 }
 0x6b5   : > { %6509 = vmatprep.subr.bf16.mxu0 %v6804_v0  ;;  %6515 = vmatprep.subr.bf16.mxu1 %v6804_v0 }
 0x6b6   : > { %6170 = vmatprep.mubr.msk.f32.mxu0 %vm6806_vm1, %v6805_v1  ;;  %6181 = vmatprep.mubr.msk.f32.mxu1 %vm6806_vm1, %v6805_v1 }
 0x6b8   : > { %6511 = vmatpush3.bf16.msra.mxu0 %v6954_v25  ;;  %6517 = vmatpush3.bf16.msra.mxu1 %v6958_v26 }
 0x6b9   : > { %6518 = vmatprep.subr.bf16.mxu0 %v6804_v0  ;;  %6524 = vmatprep.subr.bf16.mxu1 %v6804_v0 }
 0x6bb   : > { %6171 = vmatmul.mubr.msk.f32.vlgmr.msra.gmra.mrb[52].mxu0 %vm618_vm3, %v3958_v23  ;;  %6182 = vmatmul.mubr.msk.f32.vlgmr.msra.gmra.mrb[52].mxu1 %vm618_vm3, %v3958_v23 }
 0x6bc   : > { %6520 = vmatpush3.bf16.msra.mxu0 %v6975_v32  ;;  %6526 = vmatpush3.bf16.msra.mxu1 %v6979_v33 }
 0x6bd   : > { %6521 = vmatprep.subr.bf16.mxu0 %v6804_v0  ;;  %6527 = vmatprep.subr.bf16.mxu1 %v6804_v0 }
 0x6be   : > { %6192 = vmatprep.mubr.msk.f32.mxu0 %vm6806_vm1, %v6805_v1  ;;  %6203 = vmatprep.mubr.msk.f32.mxu1 %vm6806_vm1, %v6805_v1 }
 0x6c0   : > { %6523 = vmatpush3.bf16.msra.mxu0 %v6989_v38  ;;  %6529 = vmatpush3.bf16.msra.mxu1 %v6993_v39 }
 0x6c1   : > { %6530 = vmatprep.subr.bf16.mxu0 %v6804_v0  ;;  %6533 = vmatprep.subr.bf16.mxu1 %v6804_v0 }
 0x6c3   : > { %6193 = vmatmul.mubr.msk.f32.vlgmr.msra.gmra.mrb[54].mxu0 %vm618_vm3, %v3958_v23  ;;  %6204 = vmatmul.mubr.msk.f32.vlgmr.msra.gmra.mrb[54].mxu1 %vm618_vm3, %v3958_v23 }
 0x6c4   : > { %6532 = vmatpush3.bf16.msra.mxu0 %v6912_v5  ;;  %6535 = vmatpush3.bf16.msra.mxu1 %v6914_v9 }
 0x6c5   : > { %6210 = vmatprep.mubr.msk.f32.mxu0 %vm6806_vm1, %v6805_v1  ;;  %6217 = vmatprep.mubr.msk.f32.mxu1 %vm6806_vm1, %v6805_v1 }
 0x6c6   : > { %6536 = vmatprep.subr.bf16.mxu0 %v6804_v0  ;;  %6539 = vmatprep.subr.bf16.mxu1 %v6804_v0 }
 0x782   : > { %v4029_v24 = vpop.f32.mrb[48].mxu0  ;;  %v4099_v27 = vpop.f32.mrb[48].mxu1 }
 0x783   : > { %v6140_v28 = vpop.f32.mrb[49].mxu0  ;;  %v6147_v29 = vpop.f32.mrb[49].mxu1 }
 0x786   : > { %v4169_v30 = vpop.f32.mrb[50].mxu0  ;;  %v4239_v31 = vpop.f32.mrb[50].mxu1 }
 0x787   : > { %v6154_v5 = vpop.f32.mrb[51].mxu0  ;;  %v6161_v34 = vpop.f32.mrb[51].mxu1 }
 0x78e   : > { %v4312_v9 = vpop.f32.mrb[52].mxu0  ;;  %v4382_v35 = vpop.f32.mrb[52].mxu1 }
 0x78f   : > { %v4313_v36 = vadd.f32 %v4312_v9, %v4029_v24  ;;  %v4383_v37 = vadd.f32 %v4382_v35, %v4099_v27  ;;  %v6172_v40 = vpop.f32.mrb[53].mxu0  ;;  %v6183_v41 = vpop.f32.mrb[53].mxu1 }
 0x791   : > { %v4526_v42 = vadd.f32 %v7379_v49, %v4313_v36  ;;  %v4527_v44 = vadd.f32 %v7451_v43, %v4383_v37 }
 0x793   : > { %v5424_v45 = vmul.f32 -1.442695, %v4526_v42  ;;  %v5425_v46 = vmul.f32 -1.442695, %v4527_v44 }
 0x795   : > { %6704 = vpow2.f32 %v5424_v45 }
 0x796   : > { %6706 = vpow2.f32 %v5425_v46  ;;  %v4452_v47 = vpop.f32.mrb[54].mxu0  ;;  %v4522_v50 = vpop.f32.mrb[54].mxu1 }
 0x797   : > { %v4453_v52 = vadd.f32 %v4452_v47, %v4169_v30  ;;  %v4523_v53 = vadd.f32 %v4522_v50, %v4239_v31  ;;  %v6194_v54 = vpop.f32.mrb[55].mxu0  ;;  %v6205_v55 = vpop.f32.mrb[55].mxu1 }
 0x799   : > { %v4529_v57 = vadd.f32 %v7455_v56, %v4523_v53  ;;  %v4528_v60 = vadd.f32 %v7459_v59, %v4453_v52 }
 0x79b   : > { %v5426_v58 = vmul.f32 -1.442695, %v4529_v57 }
 0x79d   : > { %6708 = vpow2.f32 %v5426_v58 }
 0x79e   : > { %6710 = vtanh.f32 %v4528_v60 }
 0x79f   : > { %v6705_v61 = vpop.eup %6704 }
 0x7a0   : > { %v6707_v63 = vpop.eup %6706  ;;  %v4533_v2 = vadd.f32 1.0, %v6705_v61 }
 0x7a1   : > { %v4539_v3 = vadd.f32 1.0, %v6707_v63 }
 0x7a2   : > { %6712 = vrcp.f32 %v4533_v2 }
 0x7a3   : > { %6714 = vrcp.f32 %v4539_v3 }
 0x7a7   : > { %v6709_v4 = vpop.eup %6708 }
 0x7a8   : > { %v6711_v7 = vpop.eup %6710  ;;  %v4546_v11 = vadd.f32 1.0, %v6709_v4 }
 0x7aa   : > { %6716 = vrcp.f32 %v4546_v11 }
 0x7ac   : > { %v6713_v51 = vpop.eup %6712 }
 0x7ad   : > { %v6715_v48 = vpop.eup %6714  ;;  %v4551_v10 = vmul.f32 %v6713_v51, %v6711_v7 }
 0x7ae   : > { %v4550_v12 = vmul.f32 %v6715_v48, %v4549_v8 }
 0x7b0   : > { %v4552_v62 = vadd.f32 %v4551_v10, %v4550_v12 }
 0x7b2   : > { %6718 = vtanh.f32 %v4552_v62  ;;  %4556 = vst.msk [vmem:[#allocation3] sm:$0x3] %vm326_vm0, %v4552_v62 }
 0x7b4   : > { %v6717_v15 = vpop.eup %6716 }
 0x7b9   : > { %v5153_v47 = vld [vmem:[#allocation3] sm:$0x3] }
 0x7bc   : > { %v6719_v16 = vpop.eup %6718 }
 0x7bd   : > { %v4554_v6 = vmul.f32 %v6719_v16, %v6717_v15 }
 0x7bf   : > { %4558 = vst.msk [vmem:[%s4557_s7] sm:$0x3] %vm326_vm0, %v4554_v6  ;;  %4555 = vst.msk [vmem:[#allocation2] sm:$0x3] %vm326_vm0, %v4554_v6  ;;  %s6740_s7 = scalar_lea.vmem %s7533_s15, 32 }
 0x7c0   : > { %p6741_p11 = scmp.ne.s32.totalorder %s7533_s15, %s6740_s7  ;;  %p6748_p1 = scmp.lt.s32.totalorder %s6746_s26, %s6740_s7 }
 0x7c2   : > { %p6742_p12 = pnand %p6741_p11, %p6878_p5  ;;  %p6749_p2 = por %p6748_p1, %p6747_p0 }
 0x7c4   : > { %p6743_p13 = pneg %p6742_p12 }
 0x7c6   : > { %v4563_v17 = vld [vmem:[#allocation2] sm:$0x3]  ;;  %p6750_p3 = pnand %p6749_p2, %p6743_p13 }
 0x7c7   : > { %6211 = vmatmul.mubr.msk.f32.vlgmr.msra.gmra.mrb[56].mxu0 %vm334_vm2, %v4563_v17  ;;  %6218 = vmatmul.mubr.msk.f32.vlgmr.msra.gmra.mrb[56].mxu1 %vm334_vm2, %v4563_v17 }
 0x7c8   : > { %6538 = vmatpush3.bf16.msra.mxu0 %v6917_v13  ;;  %6541 = vmatpush3.bf16.msra.mxu1 %v6921_v14  ;;  %v4562_v13 = vld [vmem:[%s4561_s9] sm:$0x3] }
 0x7c9   : > { %6224 = vmatprep.mubr.msk.f32.mxu0 %vm6806_vm1, %v6805_v1  ;;  %6231 = vmatprep.mubr.msk.f32.mxu1 %vm6806_vm1, %v6805_v1 }
 0x7ca   : > { %6542 = vmatprep.subr.bf16.mxu0 %v6804_v0  ;;  %6548 = vmatprep.subr.bf16.mxu1 %v6804_v0 }
 0x7cb   : > { %6225 = vmatmul.mubr.msk.f32.vlgmr.msra.gmra.mrb[58].mxu0 %vm334_vm2, %v4563_v17  ;;  %6232 = vmatmul.mubr.msk.f32.vlgmr.msra.gmra.mrb[58].mxu1 %vm334_vm2, %v4563_v17 }
 0x7cc   : > { %6544 = vmatpush3.bf16.msra.mxu0 %v6935_v19  ;;  %6550 = vmatpush3.bf16.msra.mxu1 %v6940_v20 }
 0x7cd   : > { %6545 = vmatprep.subr.bf16.mxu0 %v6804_v0  ;;  %6551 = vmatprep.subr.bf16.mxu1 %v6804_v0 }
 0x7ce   : > { %6242 = vmatprep.mubr.msk.f32.mxu0 %vm6806_vm1, %v6805_v1  ;;  %6253 = vmatprep.mubr.msk.f32.mxu1 %vm6806_vm1, %v6805_v1 }
 0x7d0   : > { %6547 = vmatpush3.bf16.msra.mxu0 %v6954_v25  ;;  %6553 = vmatpush3.bf16.msra.mxu1 %v6958_v26 }
 0x7d1   : > { %6554 = vmatprep.subr.bf16.mxu0 %v6804_v0  ;;  %6560 = vmatprep.subr.bf16.mxu1 %v6804_v0 }
 0x7d3   : > { %6243 = vmatmul.mubr.msk.f32.vlgmr.msra.gmra.mrb[60].mxu0 %vm618_vm3, %v4562_v13  ;;  %6254 = vmatmul.mubr.msk.f32.vlgmr.msra.gmra.mrb[60].mxu1 %vm618_vm3, %v4562_v13 }
 0x7d4   : > { %6556 = vmatpush3.bf16.msra.mxu0 %v6975_v32  ;;  %6562 = vmatpush3.bf16.msra.mxu1 %v6979_v33 }
 0x7d5   : > { %6557 = vmatprep.subr.bf16.mxu0 %v6804_v0  ;;  %6563 = vmatprep.subr.bf16.mxu1 %v6804_v0 }
 0x7d6   : > { %6264 = vmatprep.mubr.msk.f32.mxu0 %vm6806_vm1, %v6805_v1  ;;  %6275 = vmatprep.mubr.msk.f32.mxu1 %vm6806_vm1, %v6805_v1 }
 0x7d8   : > { %6559 = vmatpush3.bf16.msra.mxu0 %v6989_v38  ;;  %6565 = vmatpush3.bf16.msra.mxu1 %v6993_v39 }
 0x7db   : > { %6265 = vmatmul.mubr.msk.f32.vlgmr.msra.gmra.mrb[62].mxu0 %vm618_vm3, %v4562_v13  ;;  %6276 = vmatmul.mubr.msk.f32.vlgmr.msra.gmra.mrb[62].mxu1 %vm618_vm3, %v4562_v13 }
 0x89a   : > { %v4633_v14 = vpop.f32.mrb[56].mxu0  ;;  %v4703_v19 = vpop.f32.mrb[56].mxu1 }
 0x89b   : > { %v6212_v20 = vpop.f32.mrb[57].mxu0  ;;  %v6219_v25 = vpop.f32.mrb[57].mxu1 }
 0x89e   : > { %v4773_v26 = vpop.f32.mrb[58].mxu0  ;;  %v4843_v0 = vpop.f32.mrb[58].mxu1 }
 0x89f   : > { %v6226_v32 = vpop.f32.mrb[59].mxu0  ;;  %v6233_v33 = vpop.f32.mrb[59].mxu1 }
 0x8a6   : > { %v4916_v18 = vpop.f32.mrb[60].mxu0  ;;  %v4986_v21 = vpop.f32.mrb[60].mxu1 }
 0x8a7   : > { %v4917_v22 = vadd.f32 %v4916_v18, %v4633_v14  ;;  %v4987_v1 = vadd.f32 %v4986_v21, %v4703_v19  ;;  %v6244_v23 = vpop.f32.mrb[61].mxu0  ;;  %v6255_v38 = vpop.f32.mrb[61].mxu1 }
 0x8a9   : > { %v5130_v39 = vadd.f32 %v7379_v49, %v4917_v22  ;;  %v5131_v24 = vadd.f32 %v7451_v43, %v4987_v1 }
 0x8ab   : > { %v5436_v27 = vmul.f32 -1.442695, %v5130_v39  ;;  %v5437_v28 = vmul.f32 -1.442695, %v5131_v24 }
 0x8ad   : > { %6720 = vpow2.f32 %v5436_v27 }
 0x8ae   : > { %6722 = vpow2.f32 %v5437_v28  ;;  %v5056_v29 = vpop.f32.mrb[62].mxu0  ;;  %v5126_v30 = vpop.f32.mrb[62].mxu1 }
 0x8af   : > { %v5057_v31 = vadd.f32 %v5056_v29, %v4773_v26  ;;  %v5127_v5 = vadd.f32 %v5126_v30, %v4843_v0  ;;  %v6266_v34 = vpop.f32.mrb[63].mxu0  ;;  %v6277_v9 = vpop.f32.mrb[63].mxu1 }
 0x8b1   : > { %v5133_v35 = vadd.f32 %v7455_v56, %v5127_v5  ;;  %v5132_v37 = vadd.f32 %v7459_v59, %v5057_v31 }
 0x8b3   : > { %v5438_v36 = vmul.f32 -1.442695, %v5133_v35 }
 0x8b5   : > { %6724 = vpow2.f32 %v5438_v36 }
 0x8b6   : > { %6726 = vtanh.f32 %v5132_v37 }
 0x8b7   : > { %v6721_v40 = vpop.eup %6720 }
 0x8b8   : > { %v6723_v41 = vpop.eup %6722  ;;  %v5137_v49 = vadd.f32 1.0, %v6721_v40 }
 0x8b9   : > { %v5143_v42 = vadd.f32 1.0, %v6723_v41 }
 0x8ba   : > { %6728 = vrcp.f32 %v5137_v49 }
 0x8bb   : > { %6730 = vrcp.f32 %v5143_v42 }
 0x8bf   : > { %v6725_v43 = vpop.eup %6724 }
 0x8c0   : > { %v6727_v44 = vpop.eup %6726  ;;  %v5150_v52 = vadd.f32 1.0, %v6725_v43 }
 0x8c2   : > { %6732 = vrcp.f32 %v5150_v52 }
 0x8c4   : > { %v6729_v45 = vpop.eup %6728 }
 0x8c5   : > { %v6731_v46 = vpop.eup %6730  ;;  %v5155_v50 = vmul.f32 %v6729_v45, %v6727_v44 }
 0x8c6   : > { %v5154_v53 = vmul.f32 %v6731_v46, %v5153_v47 }
 0x8c8   : > { %v5156_v54 = vadd.f32 %v5155_v50, %v5154_v53 }
 0x8ca   : > { %6734 = vtanh.f32 %v5156_v54  ;;  %5160 = vst.msk [vmem:[#allocation3] sm:$0x3] %vm326_vm0, %v5156_v54 }
 0x8cc   : > { %v6733_v55 = vpop.eup %6732 }
 0x8d4   : > { %v6735_v56 = vpop.eup %6734 }
 0x8d5   : > { %v5158_v57 = vmul.f32 %v6735_v56, %v6733_v55 }
 0x8d7   : > { %5162 = vst.msk [vmem:[%s5161_s12] sm:$0x3] %vm326_vm0, %v5158_v57  ;;  %5159 = vst.msk [vmem:[#allocation2] sm:$0x3] %vm326_vm0, %v5158_v57 }
 0x8de   : > { %v5163_v58 = vld [vmem:[#allocation2] sm:$0x3] }
 0x8df   : > { %5164 = vst.msk [vmem:[%s253_s14] sm:$0x3] %vm326_vm0, %v5163_v58 }
 0x8e0   : > { %6753 = shalt.err (!%p6750_p3)
}
 0x8e1   : > { %s6754_s6 = scalar_lea.hbm %s7531_s23, 32  ;;  %s6758_s10 = scalar_lea.hbm %s7579_s5, 64 }
 0x8e2   : > { %p6755_p4 = scmp.ne.s32.totalorder %s7531_s23, %s6754_s6  ;;  %p6759_p9 = scmp.lt.u32.totalorder %s7531_s23, %s7579_s5 }
 0x8e3   : > { %p6760_p10 = scmp.lt.u32.totalorder %s6758_s10, %s6754_s6  ;;  %p6762_p12 = scmp.lt.u32.totalorder %s6754_s6, %s7531_s23 }
 0x8e4   : > { %p6756_p7 = pnand %p6755_p4, %p6878_p5 }
 0x8e5   : > { %p6761_p11 = por %p6760_p10, %p6759_p9 }
 0x8e6   : > { %p6757_p8 = pneg %p6756_p7 }
 0x8e7   : > { %p6763_p13 = por %p6762_p12, %p6761_p11 }
 0x8e9   : > { %p6764_p0 = pnand %p6763_p13, %p6757_p8 }
 0x8eb   : > { %6767 = shalt.err (!%p6764_p0)
}
 0x8ec   : > { %6566 = dma.vmem_to_hbm [thread:$0]  (%p6878_p5), %s7533_s15, 32, %s7531_s23, %s5171_s11  }
 0x8ed PF: > { %p6572_p1 = scmp.ge.s32.totalorder %s6802_s21, 2  ;;  %s5207_s30 = sand.u32 1, %s6790_s18  }
 0x8ee   : > { %s5208_s14 = scalar_lea.sflag [#allocation5], %s5207_s30 }
 0x8ef   : > { %p6569_p2 = pnand %p6572_p1, %p6882_p6 }
 0x8f1   : > { %6785 = dma.done.wait (!%p6569_p2), %s5208_s14, 32  }
 0x8f2   : > { %6787 = vsyncadd (!%p6569_p2), %s5208_s14, 4294967264  ;;  %p16_p3 = scmp.ge.s32.totalorder %s6863_s24, 4   ;;  %s7582_s18 = smov %s6794_s19 }
 0x8f3   : > { %s7583_s19 = smov %s6798_s20  ;;  %s7584_s20 = smov %s6874_s27 }
 0x8f4   : > { %s7585_s21 = smov %s6863_s24  ;;  %18 = sbr.rel (!%p16_p3) target bundleno = 3 (0x3), region = 105 }
 0x8fb   :  { %5213 = vsyncpa [#allocation5], 1 }
 0x8fc   :  { %5215 = vsyncpa [#allocation5 + $0x1], 1 }

// kernel: bert_sentiment_forward.10
= control target key start
LH: loop header
LB: loop body
LE: loop exit
PB: predicated region body
PF: predicated region fallthrough
CT: control target
= control target key end

     0   :  { %11 = vsyncpa [#allocation5], 0  ;;  %s7585_s0 = inlined_call_operand.vmem [shape: f32[8,2,32], index: 0, kind: input, shape index: {}]   ;;  %s7586_s1 = inlined_call_operand.vmem [shape: f32[2,4,32,16], index: 1, kind: input, shape index: {}]   ;;  %s7587_s2 = inlined_call_operand.vmem [shape: f32[2,4,16,16], index: 2, kind: input, shape index: {}]   ;;  %s7588_s3 = inlined_call_operand.vmem [shape: f32[2,4,1,16], index: 3, kind: input, shape index: {}]   ;;  %s7589_s4 = inlined_call_operand.hbm [shape: f32[2,8,2,16], index: 4, kind: output, shape index: {0}]   ;;  %s7590_s5 = inlined_call_operand.vmem [shape: f32[2,2,16], index: 5, kind: output, shape index: {1}]  }
   0x1   :  { %13 = vsyncpa [#allocation5 + $0x1], 0  ;;  %s6841_s18 = smov 0   ;;  %s6843_s19 = smov 0  }
   0x2   :  { %s6845_s20 = smov 0   ;;  %s6847_s21 = smov 0  }
   0x3 LB: > { %s6862_s22 = sadd.s32 4294967295, %s6803_s21   ;;  %s5326_s23 = sadd.s32 4294967294, %s6803_s21   ;;  %s6803_s21 = sphi %s6847_s21, %s7596_s21   ;;  %s6799_s20 = sphi %s6845_s20, %s7595_s20   ;;  %s6795_s19 = sphi %s6843_s19, %s7594_s19   ;;  %s6791_s18 = sphi %s6841_s18, %s7593_s18  }
   0x4   : > { %s6866_s24 = sadd.s32 1, %s6803_s21   ;;  %s125_s25 = sadd.s32 1, %s6799_s20 }
   0x5   : > { %s122_s26 = ssub.s32 %s6803_s21, %s6866_s24  ;;  %p135_p0 = scmp.ne.s32.totalorder %s6799_s20, %s6795_s19 }
   0x6   : > { %p123_p1 = scmp.eq.s32.totalorder %s122_s26, 0  ;;  %p136_p2 = scmp.eq.s32.totalorder %s6862_s22, 1 }
   0x7   : > { %p141_p3 = scmp.ne.s32.totalorder %s6795_s19, %s6791_s18  ;;  %p142_p4 = scmp.eq.s32.totalorder %s5326_s23, 1 }
   0x8   : > { %s6877_s27 = scalar_select %p123_p1, %s6799_s20, %s125_s25  }
   0x9   : > { %p6881_p5 = por %p136_p2, %p135_p0  ;;  %p6885_p6 = por %p142_p4, %p141_p3 }
   0xa   : > { %p5329_p7 = scmp.ge.s32.totalorder %s6803_s21, 1  ;;  %p212_p8 = scmp.lt.s32.totalorder %s6803_s21, 3 }
   0xc   : > { %p213_p9 = pnand %p5329_p7, %p212_p8 }
   0xd   : > { %p253_p10 = scmp.lt.s32.totalorder (!%p213_p9), %s6862_s22, 1  ;;  %vm324_vm0 = vcmask (!%p213_p9), 123904   ;;  %v6805_v0 = vmov (!%p213_p9), 0.0|0.0   ;;  %v6806_v1 = vmov (!%p213_p9), 0.0   ;;  %vm6807_vm1 = vmmov (!%p213_p9), 0   ;;  %s244_s8 = sand.u32 (!%p213_p9), 1, %s6795_s19  }
   0xe   : > { %216 = sbr.rel (%p213_p9) target bundleno = 2281 (0x8e9), region = 36  ;;  %6277 = vmatprep.subr.bf16.mxu0 (!%p213_p9), %v6805_v0  ;;  %6280 = vmatprep.subr.bf16.mxu1 (!%p213_p9), %v6805_v0  ;;  %325 = vst.msk [vmem:[#allocation2] sm:$0x3] (!%p213_p9), %vm324_vm0, %v6806_v1  ;;  %326 = vst.msk [vmem:[#allocation3] sm:$0x3] (!%p213_p9), %vm324_vm0, %v6806_v1  ;;  %vm332_vm2 = vcmask (!%p213_p9), 130048  }
   0xf   : > { %5705 = vmatprep.mubr.msk.f32.mxu0 (!%p213_p9), %vm6807_vm1, %v6806_v1  ;;  %5712 = vmatprep.mubr.msk.f32.mxu1 (!%p213_p9), %vm6807_vm1, %v6806_v1  ;;  %vm616_vm3 = vcmask (!%p213_p9), 261120   ;;  %s5330_s9 = sshll.u32 (!%p213_p9), %s244_s8, 4 }
  0x15   : > { %s6899_s30 = scalar_select %p253_p10, %s6862_s22, 1  ;;  %v331_v12 = vld [vmem:[#allocation2] sm:$0x3] }
  0x16   : > { %s6933_s14 = scalar_select %p136_p2, 7, 0 }
  0x17   : > { %s5442_s6 = sshll.u32 %s6899_s30, 7  ;;  %s5443_s7 = sshll.u32 %s6899_s30, 6 }
  0x18   : > { %s262_s10 = scalar_lea.vmem %s7587_s2, %s5443_s7  ;;  %s6913_s13 = scalar_lea.vmem %s7586_s1, %s5442_s6 }
  0x19   : > { %v288_v2 = vld [vmem:[%s262_s10] sm:$0xff]  ;;  %v289_v3 = vld [vmem:[%s262_s10 + $0x8] sm:$0xff]  ;;  %v290_v4 = vld [vmem:[%s262_s10 + $0x10] sm:$0xff]  ;;  %s5341_s15 = sshll.u32 %s6933_s14, 1  ;;  %s5335_s25 = sshll.u32 %s6899_s30, 2 }
  0x1a   : > { %v6915_v5 = vpack.c.bf16 %v289_v3, %v288_v2  ;;  %v291_v6 = vld [vmem:[%s262_s10 + $0x18] sm:$0xff]  ;;  %v292_v7 = vld [vmem:[%s262_s10 + $0x20] sm:$0xff]  ;;  %v293_v8 = vld [vmem:[%s262_s10 + $0x28] sm:$0xff]  ;;  %s329_s23 = scalar_lea.vmem %s7585_s0, %s5341_s15  ;;  %s7021_s7 = scalar_lea.vmem %s7588_s3, %s5335_s25 }
  0x1b   : > { %v6917_v9 = vpack.c.bf16 %v291_v6, %v290_v4  ;;  %v294_v10 = vld [vmem:[%s262_s10 + $0x30] sm:$0xff]  ;;  %v295_v11 = vld [vmem:[%s262_s10 + $0x38] sm:$0xff]  ;;  %v6920_v13 = vpack.c.bf16 %v293_v8, %v292_v7  ;;  %v272_v15 = vld [vmem:[%s6913_s13] sm:$0xff]  ;;  %s7043_s10 = scalar_lea.vmem [#allocation4], %s5330_s9 }
  0x1c   : > { %6279 = vmatpush3.bf16.msra.mxu0 %v6915_v5  ;;  %v6924_v14 = vpack.c.bf16 %v295_v11, %v294_v10  ;;  %v273_v16 = vld [vmem:[%s6913_s13 + $0x8] sm:$0xff]  ;;  %v276_v17 = vld [vmem:[%s6913_s13 + $0x20] sm:$0xff]  ;;  %v274_v21 = vld [vmem:[%s6913_s13 + $0x10] sm:$0xff]  ;;  %s931_s11 = scalar_lea.vmem %s7043_s10, %s5341_s15 [#allocation4] }
  0x1d   : > { %6282 = vmatpush3.bf16.msra.mxu1 %v6917_v9  ;;  %6283 = vmatprep.subr.bf16.mxu0 %v6805_v0  ;;  %v277_v18 = vld [vmem:[%s6913_s13 + $0x28] sm:$0xff]  ;;  %v6938_v19 = vpack.c.bf16 %v273_v16, %v272_v15  ;;  %v275_v22 = vld [vmem:[%s6913_s13 + $0x18] sm:$0xff]  ;;  %v278_v23 = vld [vmem:[%s6913_s13 + $0x30] sm:$0xff]  ;;  %s7052_s12 = scalar_select %p136_p2, 6, 1 }
  0x1e   : > { %6286 = vmatprep.subr.bf16.mxu1 %v6805_v0  ;;  %v6943_v20 = vpack.c.bf16 %v277_v18, %v276_v17  ;;  %v279_v24 = vld [vmem:[%s6913_s13 + $0x38] sm:$0xff]  ;;  %v6957_v25 = vpack.c.bf16 %v275_v22, %v274_v21  ;;  %v280_v27 = vld [vmem:[%s6913_s13 + $0x40] sm:$0xff]  ;;  %v281_v28 = vld [vmem:[%s6913_s13 + $0x48] sm:$0xff] }
  0x1f   : > { %5706 = vmatmul.mubr.msk.f32.vlgmr.msra.gmra.mrb[0].mxu0 %vm332_vm2, %v331_v12  ;;  %v6961_v26 = vpack.c.bf16 %v279_v24, %v278_v23  ;;  %v284_v29 = vld [vmem:[%s6913_s13 + $0x60] sm:$0xff]  ;;  %v285_v30 = vld [vmem:[%s6913_s13 + $0x68] sm:$0xff]  ;;  %v6978_v32 = vpack.c.bf16 %v281_v28, %v280_v27  ;;  %v282_v34 = vld [vmem:[%s6913_s13 + $0x50] sm:$0xff] }
  0x20   : > { %5713 = vmatmul.mubr.msk.f32.vlgmr.msra.gmra.mrb[0].mxu1 %vm332_vm2, %v331_v12  ;;  %6285 = vmatpush3.bf16.msra.mxu0 %v6920_v13  ;;  %v330_v31 = vld [vmem:[%s329_s23] sm:$0x3]  ;;  %v6982_v33 = vpack.c.bf16 %v285_v30, %v284_v29  ;;  %v283_v35 = vld [vmem:[%s6913_s13 + $0x58] sm:$0xff]  ;;  %v286_v36 = vld [vmem:[%s6913_s13 + $0x70] sm:$0xff]  ;;  %s7120_s23 = scalar_select %p136_p2, 5, 2 }
  0x21   : > { %6288 = vmatpush3.bf16.msra.mxu1 %v6924_v14  ;;  %5719 = vmatprep.mubr.msk.f32.mxu0 %vm6807_vm1, %v6806_v1  ;;  %v287_v37 = vld [vmem:[%s6913_s13 + $0x78] sm:$0xff]  ;;  %v6992_v38 = vpack.c.bf16 %v283_v35, %v282_v34  ;;  %v7024_v48 = vld [vmem:[%s7021_s7] ss:$0 sm:$0xff]  ;;  %v7027_v51 = vld [vmem:[%s7021_s7 + $0x1] ss:$0 sm:$0xff]  ;;  %s5353_s13 = sshll.u32 %s7052_s12, 1 }
  0x22   : > { %5726 = vmatprep.mubr.msk.f32.mxu1 %vm6807_vm1, %v6806_v1  ;;  %6289 = vmatprep.subr.bf16.mxu0 %v6805_v0  ;;  %v6996_v39 = vpack.c.bf16 %v287_v37, %v286_v36  ;;  %v7032_v62 = vld [vmem:[%s7021_s7 + $0x3] ss:$0 sm:$0xff]  ;;  %v7035_v6 = vld [vmem:[%s7021_s7 + $0x2] ss:$0 sm:$0xff]  ;;  %s935_s16 = scalar_lea.vmem %s7585_s0, %s5353_s13  ;;  %s1535_s17 = scalar_lea.vmem %s7043_s10, %s5353_s13 [#allocation4] }
  0x23   : > { %5720 = vmatmul.mubr.msk.f32.vlgmr.msra.gmra.mrb[2].mxu0 %vm332_vm2, %v331_v12  ;;  %6295 = vmatprep.subr.bf16.mxu1 %v6805_v0  ;;  %v923_v21 = vld [vmem:[#allocation3] sm:$0x3]  ;;  %v936_v36 = vld [vmem:[%s935_s16] sm:$0x3]  ;;  %s5365_s25 = sshll.u32 %s7120_s23, 1 }
  0x24   : > { %5727 = vmatmul.mubr.msk.f32.vlgmr.msra.gmra.mrb[2].mxu1 %vm332_vm2, %v331_v12  ;;  %6291 = vmatpush3.bf16.msra.mxu0 %v6938_v19  ;;  %s1539_s9 = scalar_lea.vmem %s7585_s0, %s5365_s25 }
  0x25   : > { %6297 = vmatpush3.bf16.msra.mxu1 %v6943_v20  ;;  %6292 = vmatprep.subr.bf16.mxu0 %v6805_v0  ;;  %s7188_s12 = scalar_select %p136_p2, 4, 3 }
  0x26   : > { %6298 = vmatprep.subr.bf16.mxu1 %v6805_v0  ;;  %5737 = vmatprep.mubr.msk.f32.mxu0 %vm6807_vm1, %v6806_v1  ;;  %s7256_s23 = scalar_select %p136_p2, 3, 4 }
  0x27   : > { %5748 = vmatprep.mubr.msk.f32.mxu1 %vm6807_vm1, %v6806_v1  ;;  %s5377_s13 = sshll.u32 %s7188_s12, 1 }
  0x28   : > { %6294 = vmatpush3.bf16.msra.mxu0 %v6957_v25  ;;  %s2143_s16 = scalar_lea.vmem %s7585_s0, %s5377_s13 }
  0x29   : > { %6300 = vmatpush3.bf16.msra.mxu1 %v6961_v26  ;;  %6301 = vmatprep.subr.bf16.mxu0 %v6805_v0  ;;  %s7324_s12 = scalar_select %p136_p2, 2, 5 }
  0x2a   : > { %6307 = vmatprep.subr.bf16.mxu1 %v6805_v0 }
  0x2b   : > { %5738 = vmatmul.mubr.msk.f32.vlgmr.msra.gmra.mrb[4].mxu0 %vm616_vm3, %v330_v31 }
  0x2c   : > { %5749 = vmatmul.mubr.msk.f32.vlgmr.msra.gmra.mrb[4].mxu1 %vm616_vm3, %v330_v31  ;;  %6303 = vmatpush3.bf16.msra.mxu0 %v6978_v32 }
  0x2d   : > { %6309 = vmatpush3.bf16.msra.mxu1 %v6982_v33  ;;  %6304 = vmatprep.subr.bf16.mxu0 %v6805_v0 }
  0x2e   : > { %6310 = vmatprep.subr.bf16.mxu1 %v6805_v0  ;;  %5759 = vmatprep.mubr.msk.f32.mxu0 %vm6807_vm1, %v6806_v1 }
  0x2f   : > { %5770 = vmatprep.mubr.msk.f32.mxu1 %vm6807_vm1, %v6806_v1 }
  0x30   : > { %6306 = vmatpush3.bf16.msra.mxu0 %v6992_v38 }
  0x31   : > { %6312 = vmatpush3.bf16.msra.mxu1 %v6996_v39  ;;  %6313 = vmatprep.subr.bf16.mxu0 %v6805_v0 }
  0x32   : > { %6316 = vmatprep.subr.bf16.mxu1 %v6805_v0 }
  0x33   : > { %5760 = vmatmul.mubr.msk.f32.vlgmr.msra.gmra.mrb[6].mxu0 %vm616_vm3, %v330_v31 }
  0x34   : > { %5771 = vmatmul.mubr.msk.f32.vlgmr.msra.gmra.mrb[6].mxu1 %vm616_vm3, %v330_v31  ;;  %6315 = vmatpush3.bf16.msra.mxu0 %v6915_v5 }
  0x35   : > { %6318 = vmatpush3.bf16.msra.mxu1 %v6917_v9  ;;  %5777 = vmatprep.mubr.msk.f32.mxu0 %vm6807_vm1, %v6806_v1 }
  0x36   : > { %5784 = vmatprep.mubr.msk.f32.mxu1 %vm6807_vm1, %v6806_v1  ;;  %6319 = vmatprep.subr.bf16.mxu0 %v6805_v0 }
  0x37   : > { %6322 = vmatprep.subr.bf16.mxu1 %v6805_v0 }
  0xf2   : > { %v402_v40 = vpop.f32.mrb[0].mxu0 }
  0xf3   : > { %v472_v41 = vpop.f32.mrb[0].mxu1  ;;  %v5707_v42 = vpop.f32.mrb[1].mxu0 }
  0xf4   : > { %v5714_v43 = vpop.f32.mrb[1].mxu1 }
  0xf6   : > { %v542_v44 = vpop.f32.mrb[2].mxu0 }
  0xf7   : > { %v612_v45 = vpop.f32.mrb[2].mxu1  ;;  %v5721_v46 = vpop.f32.mrb[3].mxu0 }
  0xf8   : > { %v5728_v47 = vpop.f32.mrb[3].mxu1 }
  0xfe   : > { %v686_v49 = vpop.f32.mrb[4].mxu0 }
  0xff   : > { %v687_v50 = vadd.f32 %v686_v49, %v402_v40  ;;  %v756_v52 = vpop.f32.mrb[4].mxu1  ;;  %v5739_v53 = vpop.f32.mrb[5].mxu0 }
 0x100   : > { %v757_v54 = vadd.f32 %v756_v52, %v472_v41  ;;  %v5750_v55 = vpop.f32.mrb[5].mxu1 }
 0x101   : > { %v900_v56 = vadd.f32 %v7024_v48, %v687_v50 }
 0x102   : > { %v901_v57 = vadd.f32 %v7027_v51, %v757_v54 }
 0x103   : > { %v5350_v58 = vmul.f32 -1.442695, %v900_v56 }
 0x104   : > { %v5351_v59 = vmul.f32 -1.442695, %v901_v57 }
 0x105   : > { %6609 = vpow2.f32 %v5350_v58 }
 0x106   : > { %6611 = vpow2.f32 %v5351_v59  ;;  %v826_v60 = vpop.f32.mrb[6].mxu0 }
 0x107   : > { %v827_v61 = vadd.f32 %v826_v60, %v542_v44  ;;  %v896_v63 = vpop.f32.mrb[6].mxu1  ;;  %v5761_v2 = vpop.f32.mrb[7].mxu0 }
 0x108   : > { %v897_v3 = vadd.f32 %v896_v63, %v612_v45  ;;  %v5772_v4 = vpop.f32.mrb[7].mxu1 }
 0x109   : > { %v902_v10 = vadd.f32 %v7035_v6, %v827_v61 }
 0x10a   : > { %v903_v7 = vadd.f32 %v7032_v62, %v897_v3 }
 0x10c   : > { %v5352_v8 = vmul.f32 -1.442695, %v903_v7 }
 0x10e   : > { %6613 = vpow2.f32 %v5352_v8 }
 0x10f   : > { %v6610_v11 = vpop.eup %6609  ;;  %6615 = vtanh.f32 %v902_v10 }
 0x110   : > { %v6612_v12 = vpop.eup %6611  ;;  %v907_v15 = vadd.f32 1.0, %v6610_v11 }
 0x111   : > { %v913_v16 = vadd.f32 1.0, %v6612_v12 }
 0x112   : > { %6617 = vrcp.f32 %v907_v15 }
 0x113   : > { %6619 = vrcp.f32 %v913_v16 }
 0x118   : > { %v6614_v17 = vpop.eup %6613 }
 0x119   : > { %v6616_v18 = vpop.eup %6615  ;;  %v920_v27 = vadd.f32 1.0, %v6614_v17 }
 0x11b   : > { %6621 = vrcp.f32 %v920_v27 }
 0x11c   : > { %v6618_v22 = vpop.eup %6617 }
 0x11d   : > { %v6620_v23 = vpop.eup %6619  ;;  %v925_v24 = vmul.f32 %v6618_v22, %v6616_v18 }
 0x11e   : > { %v924_v28 = vmul.f32 %v6620_v23, %v923_v21 }
 0x120   : > { %v926_v29 = vadd.f32 %v925_v24, %v924_v28 }
 0x122   : > { %6623 = vtanh.f32 %v926_v29  ;;  %930 = vst.msk [vmem:[#allocation3] sm:$0x3] %vm324_vm0, %v926_v29 }
 0x125   : > { %v6622_v30 = vpop.eup %6621 }
 0x129   : > { %v1527_v22 = vld [vmem:[#allocation3] sm:$0x3] }
 0x12c   : > { %v6624_v31 = vpop.eup %6623 }
 0x12d   : > { %v928_v34 = vmul.f32 %v6624_v31, %v6622_v30 }
 0x12f   : > { %929 = vst.msk [vmem:[#allocation2] sm:$0x3] %vm324_vm0, %v928_v34  ;;  %932 = vst.msk [vmem:[%s931_s11] sm:$0x3] %vm324_vm0, %v928_v34  ;;  %s2139_s11 = scalar_lea.vmem %s7043_s10, %s5365_s25 [#allocation4]  ;;  %s5389_s25 = sshll.u32 %s7256_s23, 1 }
 0x130   : > { %s7395_s23 = scalar_select %p136_p2, 1, 6 }
 0x136   : > { %v937_v35 = vld [vmem:[#allocation2] sm:$0x3] }
 0x137   : > { %5778 = vmatmul.mubr.msk.f32.vlgmr.msra.gmra.mrb[8].mxu0 %vm332_vm2, %v937_v35  ;;  %5785 = vmatmul.mubr.msk.f32.vlgmr.msra.gmra.mrb[8].mxu1 %vm332_vm2, %v937_v35 }
 0x138   : > { %6321 = vmatpush3.bf16.msra.mxu0 %v6920_v13  ;;  %6324 = vmatpush3.bf16.msra.mxu1 %v6924_v14 }
 0x139   : > { %5791 = vmatprep.mubr.msk.f32.mxu0 %vm6807_vm1, %v6806_v1  ;;  %5798 = vmatprep.mubr.msk.f32.mxu1 %vm6807_vm1, %v6806_v1 }
 0x13a   : > { %6325 = vmatprep.subr.bf16.mxu0 %v6805_v0  ;;  %6331 = vmatprep.subr.bf16.mxu1 %v6805_v0 }
 0x13b   : > { %5792 = vmatmul.mubr.msk.f32.vlgmr.msra.gmra.mrb[10].mxu0 %vm332_vm2, %v937_v35  ;;  %5799 = vmatmul.mubr.msk.f32.vlgmr.msra.gmra.mrb[10].mxu1 %vm332_vm2, %v937_v35  ;;  %v1540_v35 = vld [vmem:[%s1539_s9] sm:$0x3]  ;;  %s2747_s9 = scalar_lea.vmem %s7585_s0, %s5389_s25 }
 0x13c   : > { %6327 = vmatpush3.bf16.msra.mxu0 %v6938_v19  ;;  %6333 = vmatpush3.bf16.msra.mxu1 %v6943_v20 }
 0x13d   : > { %6328 = vmatprep.subr.bf16.mxu0 %v6805_v0  ;;  %6334 = vmatprep.subr.bf16.mxu1 %v6805_v0 }
 0x13e   : > { %5809 = vmatprep.mubr.msk.f32.mxu0 %vm6807_vm1, %v6806_v1  ;;  %5820 = vmatprep.mubr.msk.f32.mxu1 %vm6807_vm1, %v6806_v1 }
 0x140   : > { %6330 = vmatpush3.bf16.msra.mxu0 %v6957_v25  ;;  %6336 = vmatpush3.bf16.msra.mxu1 %v6961_v26 }
 0x141   : > { %6337 = vmatprep.subr.bf16.mxu0 %v6805_v0  ;;  %6343 = vmatprep.subr.bf16.mxu1 %v6805_v0 }
 0x143   : > { %5810 = vmatmul.mubr.msk.f32.vlgmr.msra.gmra.mrb[12].mxu0 %vm616_vm3, %v936_v36  ;;  %5821 = vmatmul.mubr.msk.f32.vlgmr.msra.gmra.mrb[12].mxu1 %vm616_vm3, %v936_v36 }
 0x144   : > { %6339 = vmatpush3.bf16.msra.mxu0 %v6978_v32  ;;  %6345 = vmatpush3.bf16.msra.mxu1 %v6982_v33 }
 0x145   : > { %6340 = vmatprep.subr.bf16.mxu0 %v6805_v0  ;;  %6346 = vmatprep.subr.bf16.mxu1 %v6805_v0 }
 0x146   : > { %5831 = vmatprep.mubr.msk.f32.mxu0 %vm6807_vm1, %v6806_v1  ;;  %5842 = vmatprep.mubr.msk.f32.mxu1 %vm6807_vm1, %v6806_v1 }
 0x148   : > { %6342 = vmatpush3.bf16.msra.mxu0 %v6992_v38  ;;  %6348 = vmatpush3.bf16.msra.mxu1 %v6996_v39 }
 0x149   : > { %6349 = vmatprep.subr.bf16.mxu0 %v6805_v0  ;;  %6352 = vmatprep.subr.bf16.mxu1 %v6805_v0 }
 0x14b   : > { %5832 = vmatmul.mubr.msk.f32.vlgmr.msra.gmra.mrb[14].mxu0 %vm616_vm3, %v936_v36  ;;  %5843 = vmatmul.mubr.msk.f32.vlgmr.msra.gmra.mrb[14].mxu1 %vm616_vm3, %v936_v36 }
 0x14c   : > { %6351 = vmatpush3.bf16.msra.mxu0 %v6915_v5  ;;  %6354 = vmatpush3.bf16.msra.mxu1 %v6917_v9 }
 0x14d   : > { %5849 = vmatprep.mubr.msk.f32.mxu0 %vm6807_vm1, %v6806_v1  ;;  %5856 = vmatprep.mubr.msk.f32.mxu1 %vm6807_vm1, %v6806_v1 }
 0x14e   : > { %6355 = vmatprep.subr.bf16.mxu0 %v6805_v0  ;;  %6358 = vmatprep.subr.bf16.mxu1 %v6805_v0 }
 0x20a   : > { %v1007_v37 = vpop.f32.mrb[8].mxu0  ;;  %v1077_v40 = vpop.f32.mrb[8].mxu1 }
 0x20b   : > { %v5779_v41 = vpop.f32.mrb[9].mxu0  ;;  %v5786_v42 = vpop.f32.mrb[9].mxu1 }
 0x20e   : > { %v1147_v43 = vpop.f32.mrb[10].mxu0  ;;  %v1217_v44 = vpop.f32.mrb[10].mxu1 }
 0x20f   : > { %v5793_v45 = vpop.f32.mrb[11].mxu0  ;;  %v5800_v46 = vpop.f32.mrb[11].mxu1 }
 0x216   : > { %v1290_v47 = vpop.f32.mrb[12].mxu0  ;;  %v1360_v49 = vpop.f32.mrb[12].mxu1 }
 0x217   : > { %v1291_v50 = vadd.f32 %v1290_v47, %v1007_v37  ;;  %v1361_v52 = vadd.f32 %v1360_v49, %v1077_v40  ;;  %v5811_v53 = vpop.f32.mrb[13].mxu0  ;;  %v5822_v54 = vpop.f32.mrb[13].mxu1 }
 0x219   : > { %v1504_v55 = vadd.f32 %v7024_v48, %v1291_v50  ;;  %v1505_v56 = vadd.f32 %v7027_v51, %v1361_v52 }
 0x21b   : > { %v5362_v57 = vmul.f32 -1.442695, %v1504_v55  ;;  %v5363_v58 = vmul.f32 -1.442695, %v1505_v56 }
 0x21d   : > { %6625 = vpow2.f32 %v5362_v57 }
 0x21e   : > { %6627 = vpow2.f32 %v5363_v58  ;;  %v1430_v59 = vpop.f32.mrb[14].mxu0  ;;  %v1500_v60 = vpop.f32.mrb[14].mxu1 }
 0x21f   : > { %v1431_v61 = vadd.f32 %v1430_v59, %v1147_v43  ;;  %v1501_v63 = vadd.f32 %v1500_v60, %v1217_v44  ;;  %v5833_v2 = vpop.f32.mrb[15].mxu0  ;;  %v5844_v3 = vpop.f32.mrb[15].mxu1 }
 0x221   : > { %v1507_v4 = vadd.f32 %v7032_v62, %v1501_v63  ;;  %v1506_v8 = vadd.f32 %v7035_v6, %v1431_v61 }
 0x223   : > { %v5364_v7 = vmul.f32 -1.442695, %v1507_v4 }
 0x225   : > { %6629 = vpow2.f32 %v5364_v7 }
 0x226   : > { %6631 = vtanh.f32 %v1506_v8 }
 0x227   : > { %v6626_v10 = vpop.eup %6625 }
 0x228   : > { %v6628_v11 = vpop.eup %6627  ;;  %v1511_v12 = vadd.f32 1.0, %v6626_v10 }
 0x229   : > { %v1517_v15 = vadd.f32 1.0, %v6628_v11 }
 0x22a   : > { %6633 = vrcp.f32 %v1511_v12 }
 0x22b   : > { %6635 = vrcp.f32 %v1517_v15 }
 0x22f   : > { %v6630_v16 = vpop.eup %6629 }
 0x230   : > { %v6632_v17 = vpop.eup %6631  ;;  %v1524_v24 = vadd.f32 1.0, %v6630_v16 }
 0x232   : > { %6637 = vrcp.f32 %v1524_v24 }
 0x234   : > { %v6634_v18 = vpop.eup %6633 }
 0x235   : > { %v6636_v21 = vpop.eup %6635  ;;  %v1529_v23 = vmul.f32 %v6634_v18, %v6632_v17 }
 0x236   : > { %v1528_v27 = vmul.f32 %v6636_v21, %v1527_v22 }
 0x238   : > { %v1530_v28 = vadd.f32 %v1529_v23, %v1528_v27 }
 0x23a   : > { %6639 = vtanh.f32 %v1530_v28  ;;  %1534 = vst.msk [vmem:[#allocation3] sm:$0x3] %vm324_vm0, %v1530_v28 }
 0x23c   : > { %v6638_v29 = vpop.eup %6637 }
 0x241   : > { %v2131_v21 = vld [vmem:[#allocation3] sm:$0x3] }
 0x244   : > { %v6640_v30 = vpop.eup %6639 }
 0x245   : > { %v1532_v31 = vmul.f32 %v6640_v30, %v6638_v29 }
 0x247   : > { %1533 = vst.msk [vmem:[#allocation2] sm:$0x3] %vm324_vm0, %v1532_v31  ;;  %1536 = vst.msk [vmem:[%s1535_s17] sm:$0x3] %vm324_vm0, %v1532_v31  ;;  %s2743_s17 = scalar_lea.vmem %s7043_s10, %s5377_s13 [#allocation4]  ;;  %s5401_s13 = sshll.u32 %s7324_s12, 1 }
 0x24e   : > { %v1541_v34 = vld [vmem:[#allocation2] sm:$0x3] }
 0x24f   : > { %5850 = vmatmul.mubr.msk.f32.vlgmr.msra.gmra.mrb[16].mxu0 %vm332_vm2, %v1541_v34  ;;  %5857 = vmatmul.mubr.msk.f32.vlgmr.msra.gmra.mrb[16].mxu1 %vm332_vm2, %v1541_v34 }
 0x250   : > { %6357 = vmatpush3.bf16.msra.mxu0 %v6920_v13  ;;  %6360 = vmatpush3.bf16.msra.mxu1 %v6924_v14 }
 0x251   : > { %5863 = vmatprep.mubr.msk.f32.mxu0 %vm6807_vm1, %v6806_v1  ;;  %5870 = vmatprep.mubr.msk.f32.mxu1 %vm6807_vm1, %v6806_v1 }
 0x252   : > { %6361 = vmatprep.subr.bf16.mxu0 %v6805_v0  ;;  %6367 = vmatprep.subr.bf16.mxu1 %v6805_v0 }
 0x253   : > { %5864 = vmatmul.mubr.msk.f32.vlgmr.msra.gmra.mrb[18].mxu0 %vm332_vm2, %v1541_v34  ;;  %5871 = vmatmul.mubr.msk.f32.vlgmr.msra.gmra.mrb[18].mxu1 %vm332_vm2, %v1541_v34  ;;  %v2144_v34 = vld [vmem:[%s2143_s16] sm:$0x3]  ;;  %s3351_s16 = scalar_lea.vmem %s7585_s0, %s5401_s13 }
 0x254   : > { %6363 = vmatpush3.bf16.msra.mxu0 %v6938_v19  ;;  %6369 = vmatpush3.bf16.msra.mxu1 %v6943_v20 }
 0x255   : > { %6364 = vmatprep.subr.bf16.mxu0 %v6805_v0  ;;  %6370 = vmatprep.subr.bf16.mxu1 %v6805_v0 }
 0x256   : > { %5881 = vmatprep.mubr.msk.f32.mxu0 %vm6807_vm1, %v6806_v1  ;;  %5892 = vmatprep.mubr.msk.f32.mxu1 %vm6807_vm1, %v6806_v1 }
 0x258   : > { %6366 = vmatpush3.bf16.msra.mxu0 %v6957_v25  ;;  %6372 = vmatpush3.bf16.msra.mxu1 %v6961_v26 }
 0x259   : > { %6373 = vmatprep.subr.bf16.mxu0 %v6805_v0  ;;  %6379 = vmatprep.subr.bf16.mxu1 %v6805_v0 }
 0x25b   : > { %5882 = vmatmul.mubr.msk.f32.vlgmr.msra.gmra.mrb[20].mxu0 %vm616_vm3, %v1540_v35  ;;  %5893 = vmatmul.mubr.msk.f32.vlgmr.msra.gmra.mrb[20].mxu1 %vm616_vm3, %v1540_v35 }
 0x25c   : > { %6375 = vmatpush3.bf16.msra.mxu0 %v6978_v32  ;;  %6381 = vmatpush3.bf16.msra.mxu1 %v6982_v33 }
 0x25d   : > { %6376 = vmatprep.subr.bf16.mxu0 %v6805_v0  ;;  %6382 = vmatprep.subr.bf16.mxu1 %v6805_v0 }
 0x25e   : > { %5903 = vmatprep.mubr.msk.f32.mxu0 %vm6807_vm1, %v6806_v1  ;;  %5914 = vmatprep.mubr.msk.f32.mxu1 %vm6807_vm1, %v6806_v1 }
 0x260   : > { %6378 = vmatpush3.bf16.msra.mxu0 %v6992_v38  ;;  %6384 = vmatpush3.bf16.msra.mxu1 %v6996_v39 }
 0x261   : > { %6385 = vmatprep.subr.bf16.mxu0 %v6805_v0  ;;  %6388 = vmatprep.subr.bf16.mxu1 %v6805_v0 }
 0x263   : > { %5904 = vmatmul.mubr.msk.f32.vlgmr.msra.gmra.mrb[22].mxu0 %vm616_vm3, %v1540_v35  ;;  %5915 = vmatmul.mubr.msk.f32.vlgmr.msra.gmra.mrb[22].mxu1 %vm616_vm3, %v1540_v35 }
 0x264   : > { %6387 = vmatpush3.bf16.msra.mxu0 %v6915_v5  ;;  %6390 = vmatpush3.bf16.msra.mxu1 %v6917_v9 }
 0x265   : > { %5921 = vmatprep.mubr.msk.f32.mxu0 %vm6807_vm1, %v6806_v1  ;;  %5928 = vmatprep.mubr.msk.f32.mxu1 %vm6807_vm1, %v6806_v1 }
 0x266   : > { %6391 = vmatprep.subr.bf16.mxu0 %v6805_v0  ;;  %6394 = vmatprep.subr.bf16.mxu1 %v6805_v0 }
 0x322   : > { %v1611_v36 = vpop.f32.mrb[16].mxu0  ;;  %v1681_v37 = vpop.f32.mrb[16].mxu1 }
 0x323   : > { %v5851_v40 = vpop.f32.mrb[17].mxu0  ;;  %v5858_v41 = vpop.f32.mrb[17].mxu1 }
 0x326   : > { %v1751_v42 = vpop.f32.mrb[18].mxu0  ;;  %v1821_v43 = vpop.f32.mrb[18].mxu1 }
 0x327   : > { %v5865_v44 = vpop.f32.mrb[19].mxu0  ;;  %v5872_v45 = vpop.f32.mrb[19].mxu1 }
 0x32e   : > { %v1894_v46 = vpop.f32.mrb[20].mxu0  ;;  %v1964_v47 = vpop.f32.mrb[20].mxu1 }
 0x32f   : > { %v1895_v49 = vadd.f32 %v1894_v46, %v1611_v36  ;;  %v1965_v50 = vadd.f32 %v1964_v47, %v1681_v37  ;;  %v5883_v52 = vpop.f32.mrb[21].mxu0  ;;  %v5894_v53 = vpop.f32.mrb[21].mxu1 }
 0x331   : > { %v2108_v54 = vadd.f32 %v7024_v48, %v1895_v49  ;;  %v2109_v55 = vadd.f32 %v7027_v51, %v1965_v50 }
 0x333   : > { %v5374_v56 = vmul.f32 -1.442695, %v2108_v54  ;;  %v5375_v57 = vmul.f32 -1.442695, %v2109_v55 }
 0x335   : > { %6641 = vpow2.f32 %v5374_v56 }
 0x336   : > { %6643 = vpow2.f32 %v5375_v57  ;;  %v2034_v58 = vpop.f32.mrb[22].mxu0  ;;  %v2104_v59 = vpop.f32.mrb[22].mxu1 }
 0x337   : > { %v2035_v60 = vadd.f32 %v2034_v58, %v1751_v42  ;;  %v2105_v61 = vadd.f32 %v2104_v59, %v1821_v43  ;;  %v5905_v63 = vpop.f32.mrb[23].mxu0  ;;  %v5916_v2 = vpop.f32.mrb[23].mxu1 }
 0x339   : > { %v2111_v3 = vadd.f32 %v7032_v62, %v2105_v61  ;;  %v2110_v7 = vadd.f32 %v7035_v6, %v2035_v60 }
 0x33b   : > { %v5376_v4 = vmul.f32 -1.442695, %v2111_v3 }
 0x33d   : > { %6645 = vpow2.f32 %v5376_v4 }
 0x33e   : > { %6647 = vtanh.f32 %v2110_v7 }
 0x33f   : > { %v6642_v8 = vpop.eup %6641 }
 0x340   : > { %v6644_v10 = vpop.eup %6643  ;;  %v2115_v11 = vadd.f32 1.0, %v6642_v8 }
 0x341   : > { %v2121_v12 = vadd.f32 1.0, %v6644_v10 }
 0x342   : > { %6649 = vrcp.f32 %v2115_v11 }
 0x343   : > { %6651 = vrcp.f32 %v2121_v12 }
 0x347   : > { %v6646_v15 = vpop.eup %6645 }
 0x348   : > { %v6648_v16 = vpop.eup %6647  ;;  %v2128_v23 = vadd.f32 1.0, %v6646_v15 }
 0x34a   : > { %6653 = vrcp.f32 %v2128_v23 }
 0x34c   : > { %v6650_v17 = vpop.eup %6649 }
 0x34d   : > { %v6652_v18 = vpop.eup %6651  ;;  %v2133_v22 = vmul.f32 %v6650_v17, %v6648_v16 }
 0x34e   : > { %v2132_v24 = vmul.f32 %v6652_v18, %v2131_v21 }
 0x350   : > { %v2134_v27 = vadd.f32 %v2133_v22, %v2132_v24 }
 0x352   : > { %6655 = vtanh.f32 %v2134_v27  ;;  %2138 = vst.msk [vmem:[#allocation3] sm:$0x3] %vm324_vm0, %v2134_v27 }
 0x354   : > { %v6654_v28 = vpop.eup %6653 }
 0x359   : > { %v2735_v18 = vld [vmem:[#allocation3] sm:$0x3] }
 0x35c   : > { %v6656_v29 = vpop.eup %6655 }
 0x35d   : > { %v2136_v30 = vmul.f32 %v6656_v29, %v6654_v28 }
 0x35f   : > { %2137 = vst.msk [vmem:[#allocation2] sm:$0x3] %vm324_vm0, %v2136_v30  ;;  %2140 = vst.msk [vmem:[%s2139_s11] sm:$0x3] %vm324_vm0, %v2136_v30  ;;  %s3347_s11 = scalar_lea.vmem %s7043_s10, %s5389_s25 [#allocation4]  ;;  %s5413_s25 = sshll.u32 %s7395_s23, 1 }
 0x366   : > { %v2145_v31 = vld [vmem:[#allocation2] sm:$0x3] }
 0x367   : > { %5922 = vmatmul.mubr.msk.f32.vlgmr.msra.gmra.mrb[24].mxu0 %vm332_vm2, %v2145_v31  ;;  %5929 = vmatmul.mubr.msk.f32.vlgmr.msra.gmra.mrb[24].mxu1 %vm332_vm2, %v2145_v31 }
 0x368   : > { %6393 = vmatpush3.bf16.msra.mxu0 %v6920_v13  ;;  %6396 = vmatpush3.bf16.msra.mxu1 %v6924_v14 }
 0x369   : > { %5935 = vmatprep.mubr.msk.f32.mxu0 %vm6807_vm1, %v6806_v1  ;;  %5942 = vmatprep.mubr.msk.f32.mxu1 %vm6807_vm1, %v6806_v1 }
 0x36a   : > { %6397 = vmatprep.subr.bf16.mxu0 %v6805_v0  ;;  %6403 = vmatprep.subr.bf16.mxu1 %v6805_v0 }
 0x36b   : > { %5936 = vmatmul.mubr.msk.f32.vlgmr.msra.gmra.mrb[26].mxu0 %vm332_vm2, %v2145_v31  ;;  %5943 = vmatmul.mubr.msk.f32.vlgmr.msra.gmra.mrb[26].mxu1 %vm332_vm2, %v2145_v31  ;;  %v2748_v31 = vld [vmem:[%s2747_s9] sm:$0x3]  ;;  %s3955_s9 = scalar_lea.vmem %s7585_s0, %s5413_s25 }
 0x36c   : > { %6399 = vmatpush3.bf16.msra.mxu0 %v6938_v19  ;;  %6405 = vmatpush3.bf16.msra.mxu1 %v6943_v20 }
 0x36d   : > { %6400 = vmatprep.subr.bf16.mxu0 %v6805_v0  ;;  %6406 = vmatprep.subr.bf16.mxu1 %v6805_v0 }
 0x36e   : > { %5953 = vmatprep.mubr.msk.f32.mxu0 %vm6807_vm1, %v6806_v1  ;;  %5964 = vmatprep.mubr.msk.f32.mxu1 %vm6807_vm1, %v6806_v1 }
 0x370   : > { %6402 = vmatpush3.bf16.msra.mxu0 %v6957_v25  ;;  %6408 = vmatpush3.bf16.msra.mxu1 %v6961_v26 }
 0x371   : > { %6409 = vmatprep.subr.bf16.mxu0 %v6805_v0  ;;  %6415 = vmatprep.subr.bf16.mxu1 %v6805_v0 }
 0x373   : > { %5954 = vmatmul.mubr.msk.f32.vlgmr.msra.gmra.mrb[28].mxu0 %vm616_vm3, %v2144_v34  ;;  %5965 = vmatmul.mubr.msk.f32.vlgmr.msra.gmra.mrb[28].mxu1 %vm616_vm3, %v2144_v34 }
 0x374   : > { %6411 = vmatpush3.bf16.msra.mxu0 %v6978_v32  ;;  %6417 = vmatpush3.bf16.msra.mxu1 %v6982_v33 }
 0x375   : > { %6412 = vmatprep.subr.bf16.mxu0 %v6805_v0  ;;  %6418 = vmatprep.subr.bf16.mxu1 %v6805_v0 }
 0x376   : > { %5975 = vmatprep.mubr.msk.f32.mxu0 %vm6807_vm1, %v6806_v1  ;;  %5986 = vmatprep.mubr.msk.f32.mxu1 %vm6807_vm1, %v6806_v1 }
 0x378   : > { %6414 = vmatpush3.bf16.msra.mxu0 %v6992_v38  ;;  %6420 = vmatpush3.bf16.msra.mxu1 %v6996_v39 }
 0x379   : > { %6421 = vmatprep.subr.bf16.mxu0 %v6805_v0  ;;  %6424 = vmatprep.subr.bf16.mxu1 %v6805_v0 }
 0x37b   : > { %5976 = vmatmul.mubr.msk.f32.vlgmr.msra.gmra.mrb[30].mxu0 %vm616_vm3, %v2144_v34  ;;  %5987 = vmatmul.mubr.msk.f32.vlgmr.msra.gmra.mrb[30].mxu1 %vm616_vm3, %v2144_v34 }
 0x37c   : > { %6423 = vmatpush3.bf16.msra.mxu0 %v6915_v5  ;;  %6426 = vmatpush3.bf16.msra.mxu1 %v6917_v9 }
 0x37d   : > { %5993 = vmatprep.mubr.msk.f32.mxu0 %vm6807_vm1, %v6806_v1  ;;  %6000 = vmatprep.mubr.msk.f32.mxu1 %vm6807_vm1, %v6806_v1 }
 0x37e   : > { %6427 = vmatprep.subr.bf16.mxu0 %v6805_v0  ;;  %6430 = vmatprep.subr.bf16.mxu1 %v6805_v0 }
 0x43a   : > { %v2215_v35 = vpop.f32.mrb[24].mxu0  ;;  %v2285_v36 = vpop.f32.mrb[24].mxu1 }
 0x43b   : > { %v5923_v37 = vpop.f32.mrb[25].mxu0  ;;  %v5930_v40 = vpop.f32.mrb[25].mxu1 }
 0x43e   : > { %v2355_v41 = vpop.f32.mrb[26].mxu0  ;;  %v2425_v42 = vpop.f32.mrb[26].mxu1 }
 0x43f   : > { %v5937_v43 = vpop.f32.mrb[27].mxu0  ;;  %v5944_v44 = vpop.f32.mrb[27].mxu1 }
 0x446   : > { %v2498_v45 = vpop.f32.mrb[28].mxu0  ;;  %v2568_v46 = vpop.f32.mrb[28].mxu1 }
 0x447   : > { %v2499_v47 = vadd.f32 %v2498_v45, %v2215_v35  ;;  %v2569_v49 = vadd.f32 %v2568_v46, %v2285_v36  ;;  %v5955_v50 = vpop.f32.mrb[29].mxu0  ;;  %v5966_v52 = vpop.f32.mrb[29].mxu1 }
 0x449   : > { %v2712_v53 = vadd.f32 %v7024_v48, %v2499_v47  ;;  %v2713_v54 = vadd.f32 %v7027_v51, %v2569_v49 }
 0x44b   : > { %v5386_v55 = vmul.f32 -1.442695, %v2712_v53  ;;  %v5387_v56 = vmul.f32 -1.442695, %v2713_v54 }
 0x44d   : > { %6657 = vpow2.f32 %v5386_v55 }
 0x44e   : > { %6659 = vpow2.f32 %v5387_v56  ;;  %v2638_v57 = vpop.f32.mrb[30].mxu0  ;;  %v2708_v58 = vpop.f32.mrb[30].mxu1 }
 0x44f   : > { %v2639_v59 = vadd.f32 %v2638_v57, %v2355_v41  ;;  %v2709_v60 = vadd.f32 %v2708_v58, %v2425_v42  ;;  %v5977_v61 = vpop.f32.mrb[31].mxu0  ;;  %v5988_v63 = vpop.f32.mrb[31].mxu1 }
 0x451   : > { %v2715_v2 = vadd.f32 %v7032_v62, %v2709_v60  ;;  %v2714_v4 = vadd.f32 %v7035_v6, %v2639_v59 }
 0x453   : > { %v5388_v3 = vmul.f32 -1.442695, %v2715_v2 }
 0x455   : > { %6661 = vpow2.f32 %v5388_v3 }
 0x456   : > { %6663 = vtanh.f32 %v2714_v4 }
 0x457   : > { %v6658_v7 = vpop.eup %6657 }
 0x458   : > { %v6660_v8 = vpop.eup %6659  ;;  %v2719_v10 = vadd.f32 1.0, %v6658_v7 }
 0x459   : > { %v2725_v11 = vadd.f32 1.0, %v6660_v8 }
 0x45a   : > { %6665 = vrcp.f32 %v2719_v10 }
 0x45b   : > { %6667 = vrcp.f32 %v2725_v11 }
 0x45f   : > { %v6662_v12 = vpop.eup %6661 }
 0x460   : > { %v6664_v15 = vpop.eup %6663  ;;  %v2732_v22 = vadd.f32 1.0, %v6662_v12 }
 0x462   : > { %6669 = vrcp.f32 %v2732_v22 }
 0x464   : > { %v6666_v16 = vpop.eup %6665 }
 0x465   : > { %v6668_v17 = vpop.eup %6667  ;;  %v2737_v21 = vmul.f32 %v6666_v16, %v6664_v15 }
 0x466   : > { %v2736_v23 = vmul.f32 %v6668_v17, %v2735_v18 }
 0x468   : > { %v2738_v24 = vadd.f32 %v2737_v21, %v2736_v23 }
 0x46a   : > { %6671 = vtanh.f32 %v2738_v24  ;;  %2742 = vst.msk [vmem:[#allocation3] sm:$0x3] %vm324_vm0, %v2738_v24 }
 0x46c   : > { %v6670_v27 = vpop.eup %6669 }
 0x471   : > { %v3339_v16 = vld [vmem:[#allocation3] sm:$0x3] }
 0x474   : > { %v6672_v28 = vpop.eup %6671 }
 0x475   : > { %v2740_v29 = vmul.f32 %v6672_v28, %v6670_v27 }
 0x477   : > { %2741 = vst.msk [vmem:[#allocation2] sm:$0x3] %vm324_vm0, %v2740_v29  ;;  %2744 = vst.msk [vmem:[%s2743_s17] sm:$0x3] %vm324_vm0, %v2740_v29  ;;  %v3352_v29 = vld [vmem:[%s3351_s16] sm:$0x3]  ;;  %s3951_s17 = scalar_lea.vmem %s7043_s10, %s5401_s13 [#allocation4] }
 0x478   : > { %s5444_s16 = sshll.u32 %s6862_s22, 8  ;;  %s7539_s22 = scalar_lea.sflag [#allocation5], %s244_s8 }
 0x479   : > { %s7531_s6 = scalar_lea.hbm %s7589_s4, %s5444_s16 }
 0x47e   : > { %v2749_v30 = vld [vmem:[#allocation2] sm:$0x3] }
 0x47f   : > { %5994 = vmatmul.mubr.msk.f32.vlgmr.msra.gmra.mrb[32].mxu0 %vm332_vm2, %v2749_v30  ;;  %6001 = vmatmul.mubr.msk.f32.vlgmr.msra.gmra.mrb[32].mxu1 %vm332_vm2, %v2749_v30 }
 0x480   : > { %6429 = vmatpush3.bf16.msra.mxu0 %v6920_v13  ;;  %6432 = vmatpush3.bf16.msra.mxu1 %v6924_v14 }
 0x481   : > { %6007 = vmatprep.mubr.msk.f32.mxu0 %vm6807_vm1, %v6806_v1  ;;  %6014 = vmatprep.mubr.msk.f32.mxu1 %vm6807_vm1, %v6806_v1 }
 0x482   : > { %6433 = vmatprep.subr.bf16.mxu0 %v6805_v0  ;;  %6439 = vmatprep.subr.bf16.mxu1 %v6805_v0 }
 0x483   : > { %6008 = vmatmul.mubr.msk.f32.vlgmr.msra.gmra.mrb[34].mxu0 %vm332_vm2, %v2749_v30  ;;  %6015 = vmatmul.mubr.msk.f32.vlgmr.msra.gmra.mrb[34].mxu1 %vm332_vm2, %v2749_v30 }
 0x484   : > { %6435 = vmatpush3.bf16.msra.mxu0 %v6938_v19  ;;  %6441 = vmatpush3.bf16.msra.mxu1 %v6943_v20 }
 0x485   : > { %6436 = vmatprep.subr.bf16.mxu0 %v6805_v0  ;;  %6442 = vmatprep.subr.bf16.mxu1 %v6805_v0 }
 0x486   : > { %6025 = vmatprep.mubr.msk.f32.mxu0 %vm6807_vm1, %v6806_v1  ;;  %6036 = vmatprep.mubr.msk.f32.mxu1 %vm6807_vm1, %v6806_v1 }
 0x488   : > { %6438 = vmatpush3.bf16.msra.mxu0 %v6957_v25  ;;  %6444 = vmatpush3.bf16.msra.mxu1 %v6961_v26 }
 0x489   : > { %6445 = vmatprep.subr.bf16.mxu0 %v6805_v0  ;;  %6451 = vmatprep.subr.bf16.mxu1 %v6805_v0 }
 0x48b   : > { %6026 = vmatmul.mubr.msk.f32.vlgmr.msra.gmra.mrb[36].mxu0 %vm616_vm3, %v2748_v31  ;;  %6037 = vmatmul.mubr.msk.f32.vlgmr.msra.gmra.mrb[36].mxu1 %vm616_vm3, %v2748_v31 }
 0x48c   : > { %6447 = vmatpush3.bf16.msra.mxu0 %v6978_v32  ;;  %6453 = vmatpush3.bf16.msra.mxu1 %v6982_v33 }
 0x48d   : > { %6448 = vmatprep.subr.bf16.mxu0 %v6805_v0  ;;  %6454 = vmatprep.subr.bf16.mxu1 %v6805_v0 }
 0x48e   : > { %6047 = vmatprep.mubr.msk.f32.mxu0 %vm6807_vm1, %v6806_v1  ;;  %6058 = vmatprep.mubr.msk.f32.mxu1 %vm6807_vm1, %v6806_v1 }
 0x490   : > { %6450 = vmatpush3.bf16.msra.mxu0 %v6992_v38  ;;  %6456 = vmatpush3.bf16.msra.mxu1 %v6996_v39 }
 0x491   : > { %6457 = vmatprep.subr.bf16.mxu0 %v6805_v0  ;;  %6460 = vmatprep.subr.bf16.mxu1 %v6805_v0 }
 0x493   : > { %6048 = vmatmul.mubr.msk.f32.vlgmr.msra.gmra.mrb[38].mxu0 %vm616_vm3, %v2748_v31  ;;  %6059 = vmatmul.mubr.msk.f32.vlgmr.msra.gmra.mrb[38].mxu1 %vm616_vm3, %v2748_v31 }
 0x494   : > { %6459 = vmatpush3.bf16.msra.mxu0 %v6915_v5  ;;  %6462 = vmatpush3.bf16.msra.mxu1 %v6917_v9 }
 0x495   : > { %6065 = vmatprep.mubr.msk.f32.mxu0 %vm6807_vm1, %v6806_v1  ;;  %6072 = vmatprep.mubr.msk.f32.mxu1 %vm6807_vm1, %v6806_v1 }
 0x496   : > { %6463 = vmatprep.subr.bf16.mxu0 %v6805_v0  ;;  %6466 = vmatprep.subr.bf16.mxu1 %v6805_v0 }
 0x552   : > { %v2819_v34 = vpop.f32.mrb[32].mxu0  ;;  %v2889_v35 = vpop.f32.mrb[32].mxu1 }
 0x553   : > { %v5995_v36 = vpop.f32.mrb[33].mxu0  ;;  %v6002_v37 = vpop.f32.mrb[33].mxu1 }
 0x556   : > { %v2959_v40 = vpop.f32.mrb[34].mxu0  ;;  %v3029_v41 = vpop.f32.mrb[34].mxu1 }
 0x557   : > { %v6009_v42 = vpop.f32.mrb[35].mxu0  ;;  %v6016_v43 = vpop.f32.mrb[35].mxu1 }
 0x55e   : > { %v3102_v44 = vpop.f32.mrb[36].mxu0  ;;  %v3172_v45 = vpop.f32.mrb[36].mxu1 }
 0x55f   : > { %v3103_v46 = vadd.f32 %v3102_v44, %v2819_v34  ;;  %v3173_v47 = vadd.f32 %v3172_v45, %v2889_v35  ;;  %v6027_v49 = vpop.f32.mrb[37].mxu0  ;;  %v6038_v50 = vpop.f32.mrb[37].mxu1 }
 0x560   : > { %v7381_v49 = vld [vmem:[%s7021_s7] ss:$0 sm:$0xff] }
 0x561   : > { %v3316_v52 = vadd.f32 %v7024_v48, %v3103_v46  ;;  %v3317_v53 = vadd.f32 %v7027_v51, %v3173_v47 }
 0x563   : > { %v5398_v54 = vmul.f32 -1.442695, %v3316_v52  ;;  %v5399_v55 = vmul.f32 -1.442695, %v3317_v53 }
 0x565   : > { %6673 = vpow2.f32 %v5398_v54 }
 0x566   : > { %6675 = vpow2.f32 %v5399_v55  ;;  %v3242_v56 = vpop.f32.mrb[38].mxu0  ;;  %v3312_v57 = vpop.f32.mrb[38].mxu1 }
 0x567   : > { %v3243_v58 = vadd.f32 %v3242_v56, %v2959_v40  ;;  %v3313_v59 = vadd.f32 %v3312_v57, %v3029_v41  ;;  %v6049_v60 = vpop.f32.mrb[39].mxu0  ;;  %v6060_v61 = vpop.f32.mrb[39].mxu1 }
 0x569   : > { %v3319_v63 = vadd.f32 %v7032_v62, %v3313_v59  ;;  %v3318_v3 = vadd.f32 %v7035_v6, %v3243_v58 }
 0x56b   : > { %v5400_v2 = vmul.f32 -1.442695, %v3319_v63 }
 0x56d   : > { %6677 = vpow2.f32 %v5400_v2 }
 0x56e   : > { %6679 = vtanh.f32 %v3318_v3 }
 0x56f   : > { %v6674_v4 = vpop.eup %6673 }
 0x570   : > { %v6676_v7 = vpop.eup %6675  ;;  %v3323_v48 = vadd.f32 1.0, %v6674_v4 }
 0x571   : > { %v3329_v8 = vadd.f32 1.0, %v6676_v7 }
 0x572   : > { %6681 = vrcp.f32 %v3323_v48 }
 0x573   : > { %6683 = vrcp.f32 %v3329_v8 }
 0x577   : > { %v6678_v10 = vpop.eup %6677 }
 0x578   : > { %v6680_v11 = vpop.eup %6679  ;;  %v3336_v18 = vadd.f32 1.0, %v6678_v10 }
 0x57a   : > { %6685 = vrcp.f32 %v3336_v18 }
 0x57c   : > { %v6682_v12 = vpop.eup %6681 }
 0x57d   : > { %v6684_v15 = vpop.eup %6683  ;;  %v3341_v17 = vmul.f32 %v6682_v12, %v6680_v11 }
 0x57e   : > { %v3340_v21 = vmul.f32 %v6684_v15, %v3339_v16 }
 0x580   : > { %v3342_v22 = vadd.f32 %v3341_v17, %v3340_v21 }
 0x582   : > { %6687 = vtanh.f32 %v3342_v22  ;;  %3346 = vst.msk [vmem:[#allocation3] sm:$0x3] %vm324_vm0, %v3342_v22 }
 0x584   : > { %v6686_v23 = vpop.eup %6685 }
 0x589   : > { %v3943_v12 = vld [vmem:[#allocation3] sm:$0x3] }
 0x58c   : > { %v6688_v24 = vpop.eup %6687 }
 0x58d   : > { %v3344_v27 = vmul.f32 %v6688_v24, %v6686_v23  ;;  %v3956_v23 = vld [vmem:[%s3955_s9] sm:$0x3]  ;;  %s6808_s9 = smov [#allocation4]  }
 0x58f   : > { %3345 = vst.msk [vmem:[#allocation2] sm:$0x3] %vm324_vm0, %v3344_v27  ;;  %3348 = vst.msk [vmem:[%s3347_s11] sm:$0x3] %vm324_vm0, %v3344_v27  ;;  %s7472_s11 = scalar_select %p136_p2, 0, 7 }
 0x591   : > { %s5425_s12 = sshll.u32 %s7472_s11, 1 }
 0x592   : > { %s4559_s15 = scalar_lea.vmem %s7585_s0, %s5425_s12  ;;  %s5159_s23 = scalar_lea.vmem %s7043_s10, %s5425_s12 [#allocation4] }
 0x596   : > { %v3353_v28 = vld [vmem:[#allocation2] sm:$0x3] }
 0x597   : > { %6066 = vmatmul.mubr.msk.f32.vlgmr.msra.gmra.mrb[40].mxu0 %vm332_vm2, %v3353_v28  ;;  %6073 = vmatmul.mubr.msk.f32.vlgmr.msra.gmra.mrb[40].mxu1 %vm332_vm2, %v3353_v28 }
 0x598   : > { %6465 = vmatpush3.bf16.msra.mxu0 %v6920_v13  ;;  %6468 = vmatpush3.bf16.msra.mxu1 %v6924_v14 }
 0x599   : > { %6079 = vmatprep.mubr.msk.f32.mxu0 %vm6807_vm1, %v6806_v1  ;;  %6086 = vmatprep.mubr.msk.f32.mxu1 %vm6807_vm1, %v6806_v1 }
 0x59a   : > { %6469 = vmatprep.subr.bf16.mxu0 %v6805_v0  ;;  %6475 = vmatprep.subr.bf16.mxu1 %v6805_v0 }
 0x59b   : > { %6080 = vmatmul.mubr.msk.f32.vlgmr.msra.gmra.mrb[42].mxu0 %vm332_vm2, %v3353_v28  ;;  %6087 = vmatmul.mubr.msk.f32.vlgmr.msra.gmra.mrb[42].mxu1 %vm332_vm2, %v3353_v28 }
 0x59c   : > { %6471 = vmatpush3.bf16.msra.mxu0 %v6938_v19  ;;  %6477 = vmatpush3.bf16.msra.mxu1 %v6943_v20 }
 0x59d   : > { %6472 = vmatprep.subr.bf16.mxu0 %v6805_v0  ;;  %6478 = vmatprep.subr.bf16.mxu1 %v6805_v0 }
 0x59e   : > { %6097 = vmatprep.mubr.msk.f32.mxu0 %vm6807_vm1, %v6806_v1  ;;  %6108 = vmatprep.mubr.msk.f32.mxu1 %vm6807_vm1, %v6806_v1 }
 0x5a0   : > { %6474 = vmatpush3.bf16.msra.mxu0 %v6957_v25  ;;  %6480 = vmatpush3.bf16.msra.mxu1 %v6961_v26 }
 0x5a1   : > { %6481 = vmatprep.subr.bf16.mxu0 %v6805_v0  ;;  %6487 = vmatprep.subr.bf16.mxu1 %v6805_v0 }
 0x5a3   : > { %6098 = vmatmul.mubr.msk.f32.vlgmr.msra.gmra.mrb[44].mxu0 %vm616_vm3, %v3352_v29  ;;  %6109 = vmatmul.mubr.msk.f32.vlgmr.msra.gmra.mrb[44].mxu1 %vm616_vm3, %v3352_v29 }
 0x5a4   : > { %6483 = vmatpush3.bf16.msra.mxu0 %v6978_v32  ;;  %6489 = vmatpush3.bf16.msra.mxu1 %v6982_v33 }
 0x5a5   : > { %6484 = vmatprep.subr.bf16.mxu0 %v6805_v0  ;;  %6490 = vmatprep.subr.bf16.mxu1 %v6805_v0 }
 0x5a6   : > { %6119 = vmatprep.mubr.msk.f32.mxu0 %vm6807_vm1, %v6806_v1  ;;  %6130 = vmatprep.mubr.msk.f32.mxu1 %vm6807_vm1, %v6806_v1 }
 0x5a8   : > { %6486 = vmatpush3.bf16.msra.mxu0 %v6992_v38  ;;  %6492 = vmatpush3.bf16.msra.mxu1 %v6996_v39 }
 0x5a9   : > { %6493 = vmatprep.subr.bf16.mxu0 %v6805_v0  ;;  %6496 = vmatprep.subr.bf16.mxu1 %v6805_v0 }
 0x5ab   : > { %6120 = vmatmul.mubr.msk.f32.vlgmr.msra.gmra.mrb[46].mxu0 %vm616_vm3, %v3352_v29  ;;  %6131 = vmatmul.mubr.msk.f32.vlgmr.msra.gmra.mrb[46].mxu1 %vm616_vm3, %v3352_v29 }
 0x5ac   : > { %6495 = vmatpush3.bf16.msra.mxu0 %v6915_v5  ;;  %6498 = vmatpush3.bf16.msra.mxu1 %v6917_v9 }
 0x5ad   : > { %6137 = vmatprep.mubr.msk.f32.mxu0 %vm6807_vm1, %v6806_v1  ;;  %6144 = vmatprep.mubr.msk.f32.mxu1 %vm6807_vm1, %v6806_v1 }
 0x5ae   : > { %6499 = vmatprep.subr.bf16.mxu0 %v6805_v0  ;;  %6502 = vmatprep.subr.bf16.mxu1 %v6805_v0 }
 0x66a   : > { %v3423_v30 = vpop.f32.mrb[40].mxu0  ;;  %v3493_v31 = vpop.f32.mrb[40].mxu1 }
 0x66b   : > { %v6067_v34 = vpop.f32.mrb[41].mxu0  ;;  %v6074_v35 = vpop.f32.mrb[41].mxu1 }
 0x66e   : > { %v3563_v36 = vpop.f32.mrb[42].mxu0  ;;  %v3633_v37 = vpop.f32.mrb[42].mxu1 }
 0x66f   : > { %v6081_v40 = vpop.f32.mrb[43].mxu0  ;;  %v6088_v41 = vpop.f32.mrb[43].mxu1 }
 0x676   : > { %v3706_v42 = vpop.f32.mrb[44].mxu0  ;;  %v3776_v43 = vpop.f32.mrb[44].mxu1 }
 0x677   : > { %v3707_v44 = vadd.f32 %v3706_v42, %v3423_v30  ;;  %v3777_v45 = vadd.f32 %v3776_v43, %v3493_v31  ;;  %v6099_v46 = vpop.f32.mrb[45].mxu0  ;;  %v6110_v47 = vpop.f32.mrb[45].mxu1  ;;  %v7453_v43 = vld [vmem:[%s7021_s7 + $0x1] ss:$0 sm:$0xff] }
 0x679   : > { %v3920_v50 = vadd.f32 %v7381_v49, %v3707_v44  ;;  %v3921_v52 = vadd.f32 %v7027_v51, %v3777_v45 }
 0x67b   : > { %v5410_v53 = vmul.f32 -1.442695, %v3920_v50  ;;  %v5411_v54 = vmul.f32 -1.442695, %v3921_v52 }
 0x67d   : > { %6689 = vpow2.f32 %v5410_v53 }
 0x67e   : > { %6691 = vpow2.f32 %v5411_v54  ;;  %v3846_v55 = vpop.f32.mrb[46].mxu0  ;;  %v3916_v56 = vpop.f32.mrb[46].mxu1 }
 0x67f   : > { %v3847_v57 = vadd.f32 %v3846_v55, %v3563_v36  ;;  %v3917_v58 = vadd.f32 %v3916_v56, %v3633_v37  ;;  %v6121_v59 = vpop.f32.mrb[47].mxu0  ;;  %v6132_v60 = vpop.f32.mrb[47].mxu1  ;;  %v7457_v56 = vld [vmem:[%s7021_s7 + $0x3] ss:$0 sm:$0xff] }
 0x680   : > { %v7461_v59 = vld [vmem:[%s7021_s7 + $0x2] ss:$0 sm:$0xff]  ;;  %s4555_s7 = scalar_lea.vmem %s7043_s10, %s5413_s25 [#allocation4] }
 0x681   : > { %v3923_v61 = vadd.f32 %v7032_v62, %v3917_v58  ;;  %v3922_v2 = vadd.f32 %v7035_v6, %v3847_v57 }
 0x683   : > { %v5412_v63 = vmul.f32 -1.442695, %v3923_v61 }
 0x685   : > { %6693 = vpow2.f32 %v5412_v63 }
 0x686   : > { %6695 = vtanh.f32 %v3922_v2 }
 0x687   : > { %v6690_v3 = vpop.eup %6689 }
 0x688   : > { %v6692_v4 = vpop.eup %6691  ;;  %v3927_v7 = vadd.f32 1.0, %v6690_v3 }
 0x689   : > { %v3933_v51 = vadd.f32 1.0, %v6692_v4 }
 0x68a   : > { %6697 = vrcp.f32 %v3927_v7 }
 0x68b   : > { %6699 = vrcp.f32 %v3933_v51 }
 0x68f   : > { %v6694_v48 = vpop.eup %6693 }
 0x690   : > { %v6696_v8 = vpop.eup %6695  ;;  %v3940_v15 = vadd.f32 1.0, %v6694_v48 }
 0x692   : > { %6701 = vrcp.f32 %v3940_v15 }
 0x694   : > { %v6698_v10 = vpop.eup %6697 }
 0x695   : > { %v6700_v11 = vpop.eup %6699  ;;  %v3945_v62 = vmul.f32 %v6698_v10, %v6696_v8 }
 0x696   : > { %v3944_v16 = vmul.f32 %v6700_v11, %v3943_v12 }
 0x698   : > { %v3946_v6 = vadd.f32 %v3945_v62, %v3944_v16 }
 0x69a   : > { %6703 = vtanh.f32 %v3946_v6  ;;  %3950 = vst.msk [vmem:[#allocation3] sm:$0x3] %vm324_vm0, %v3946_v6 }
 0x69c   : > { %v6702_v17 = vpop.eup %6701 }
 0x6a1   : > { %v4547_v8 = vld [vmem:[#allocation3] sm:$0x3] }
 0x6a4   : > { %v6704_v18 = vpop.eup %6703 }
 0x6a5   : > { %v3948_v21 = vmul.f32 %v6704_v18, %v6702_v17 }
 0x6a7   : > { %3949 = vst.msk [vmem:[#allocation2] sm:$0x3] %vm324_vm0, %v3948_v21  ;;  %3952 = vst.msk [vmem:[%s3951_s17] sm:$0x3] %vm324_vm0, %v3948_v21  ;;  %s5181_s17 = sshll.u32 %s7043_s10, 4  ;;  %s7533_s17 = int_to_ptr.vmem [resolvable:$true] %s5181_s17 }
 0x6a8   : > { %s6741_s10 = scalar_lea.vmem %s7533_s17, 256 }
 0x6a9   : > { %p6742_p11 = scmp.ne.s32.totalorder %s7533_s17, %s6741_s10 }
 0x6ab   : > { %p6743_p12 = pnand %p6742_p11, %p6881_p5 }
 0x6ad   : > { %p6744_p13 = pneg %p6743_p12 }
 0x6ae   : > { %v3957_v22 = vld [vmem:[#allocation2] sm:$0x3] }
 0x6af   : > { %6138 = vmatmul.mubr.msk.f32.vlgmr.msra.gmra.mrb[48].mxu0 %vm332_vm2, %v3957_v22  ;;  %6145 = vmatmul.mubr.msk.f32.vlgmr.msra.gmra.mrb[48].mxu1 %vm332_vm2, %v3957_v22 }
 0x6b0   : > { %6501 = vmatpush3.bf16.msra.mxu0 %v6920_v13  ;;  %6504 = vmatpush3.bf16.msra.mxu1 %v6924_v14 }
 0x6b1   : > { %6151 = vmatprep.mubr.msk.f32.mxu0 %vm6807_vm1, %v6806_v1  ;;  %6158 = vmatprep.mubr.msk.f32.mxu1 %vm6807_vm1, %v6806_v1 }
 0x6b2   : > { %6505 = vmatprep.subr.bf16.mxu0 %v6805_v0  ;;  %6511 = vmatprep.subr.bf16.mxu1 %v6805_v0 }
 0x6b3   : > { %6152 = vmatmul.mubr.msk.f32.vlgmr.msra.gmra.mrb[50].mxu0 %vm332_vm2, %v3957_v22  ;;  %6159 = vmatmul.mubr.msk.f32.vlgmr.msra.gmra.mrb[50].mxu1 %vm332_vm2, %v3957_v22 }
 0x6b4   : > { %6507 = vmatpush3.bf16.msra.mxu0 %v6938_v19  ;;  %6513 = vmatpush3.bf16.msra.mxu1 %v6943_v20 }
 0x6b5   : > { %6508 = vmatprep.subr.bf16.mxu0 %v6805_v0  ;;  %6514 = vmatprep.subr.bf16.mxu1 %v6805_v0 }
 0x6b6   : > { %6169 = vmatprep.mubr.msk.f32.mxu0 %vm6807_vm1, %v6806_v1  ;;  %6180 = vmatprep.mubr.msk.f32.mxu1 %vm6807_vm1, %v6806_v1 }
 0x6b8   : > { %6510 = vmatpush3.bf16.msra.mxu0 %v6957_v25  ;;  %6516 = vmatpush3.bf16.msra.mxu1 %v6961_v26 }
 0x6b9   : > { %6517 = vmatprep.subr.bf16.mxu0 %v6805_v0  ;;  %6523 = vmatprep.subr.bf16.mxu1 %v6805_v0 }
 0x6bb   : > { %6170 = vmatmul.mubr.msk.f32.vlgmr.msra.gmra.mrb[52].mxu0 %vm616_vm3, %v3956_v23  ;;  %6181 = vmatmul.mubr.msk.f32.vlgmr.msra.gmra.mrb[52].mxu1 %vm616_vm3, %v3956_v23 }
 0x6bc   : > { %6519 = vmatpush3.bf16.msra.mxu0 %v6978_v32  ;;  %6525 = vmatpush3.bf16.msra.mxu1 %v6982_v33 }
 0x6bd   : > { %6520 = vmatprep.subr.bf16.mxu0 %v6805_v0  ;;  %6526 = vmatprep.subr.bf16.mxu1 %v6805_v0 }
 0x6be   : > { %6191 = vmatprep.mubr.msk.f32.mxu0 %vm6807_vm1, %v6806_v1  ;;  %6202 = vmatprep.mubr.msk.f32.mxu1 %vm6807_vm1, %v6806_v1 }
 0x6c0   : > { %6522 = vmatpush3.bf16.msra.mxu0 %v6992_v38  ;;  %6528 = vmatpush3.bf16.msra.mxu1 %v6996_v39 }
 0x6c1   : > { %6529 = vmatprep.subr.bf16.mxu0 %v6805_v0  ;;  %6532 = vmatprep.subr.bf16.mxu1 %v6805_v0 }
 0x6c3   : > { %6192 = vmatmul.mubr.msk.f32.vlgmr.msra.gmra.mrb[54].mxu0 %vm616_vm3, %v3956_v23  ;;  %6203 = vmatmul.mubr.msk.f32.vlgmr.msra.gmra.mrb[54].mxu1 %vm616_vm3, %v3956_v23 }
 0x6c4   : > { %6531 = vmatpush3.bf16.msra.mxu0 %v6915_v5  ;;  %6534 = vmatpush3.bf16.msra.mxu1 %v6917_v9 }
 0x6c5   : > { %6209 = vmatprep.mubr.msk.f32.mxu0 %vm6807_vm1, %v6806_v1  ;;  %6216 = vmatprep.mubr.msk.f32.mxu1 %vm6807_vm1, %v6806_v1 }
 0x6c6   : > { %6535 = vmatprep.subr.bf16.mxu0 %v6805_v0  ;;  %6538 = vmatprep.subr.bf16.mxu1 %v6805_v0 }
 0x782   : > { %v4027_v24 = vpop.f32.mrb[48].mxu0  ;;  %v4097_v27 = vpop.f32.mrb[48].mxu1 }
 0x783   : > { %v6139_v28 = vpop.f32.mrb[49].mxu0  ;;  %v6146_v29 = vpop.f32.mrb[49].mxu1 }
 0x786   : > { %v4167_v30 = vpop.f32.mrb[50].mxu0  ;;  %v4237_v31 = vpop.f32.mrb[50].mxu1 }
 0x787   : > { %v6153_v5 = vpop.f32.mrb[51].mxu0  ;;  %v6160_v34 = vpop.f32.mrb[51].mxu1 }
 0x78e   : > { %v4310_v9 = vpop.f32.mrb[52].mxu0  ;;  %v4380_v35 = vpop.f32.mrb[52].mxu1 }
 0x78f   : > { %v4311_v36 = vadd.f32 %v4310_v9, %v4027_v24  ;;  %v4381_v37 = vadd.f32 %v4380_v35, %v4097_v27  ;;  %v6171_v40 = vpop.f32.mrb[53].mxu0  ;;  %v6182_v41 = vpop.f32.mrb[53].mxu1 }
 0x791   : > { %v4524_v42 = vadd.f32 %v7381_v49, %v4311_v36  ;;  %v4525_v44 = vadd.f32 %v7453_v43, %v4381_v37 }
 0x793   : > { %v5422_v45 = vmul.f32 -1.442695, %v4524_v42  ;;  %v5423_v46 = vmul.f32 -1.442695, %v4525_v44 }
 0x795   : > { %6705 = vpow2.f32 %v5422_v45 }
 0x796   : > { %6707 = vpow2.f32 %v5423_v46  ;;  %v4450_v47 = vpop.f32.mrb[54].mxu0  ;;  %v4520_v50 = vpop.f32.mrb[54].mxu1 }
 0x797   : > { %v4451_v52 = vadd.f32 %v4450_v47, %v4167_v30  ;;  %v4521_v53 = vadd.f32 %v4520_v50, %v4237_v31  ;;  %v6193_v54 = vpop.f32.mrb[55].mxu0  ;;  %v6204_v55 = vpop.f32.mrb[55].mxu1 }
 0x799   : > { %v4527_v57 = vadd.f32 %v7457_v56, %v4521_v53  ;;  %v4526_v60 = vadd.f32 %v7461_v59, %v4451_v52 }
 0x79b   : > { %v5424_v58 = vmul.f32 -1.442695, %v4527_v57 }
 0x79d   : > { %6709 = vpow2.f32 %v5424_v58 }
 0x79e   : > { %6711 = vtanh.f32 %v4526_v60 }
 0x79f   : > { %v6706_v61 = vpop.eup %6705 }
 0x7a0   : > { %v6708_v63 = vpop.eup %6707  ;;  %v4531_v2 = vadd.f32 1.0, %v6706_v61 }
 0x7a1   : > { %v4537_v3 = vadd.f32 1.0, %v6708_v63 }
 0x7a2   : > { %6713 = vrcp.f32 %v4531_v2 }
 0x7a3   : > { %6715 = vrcp.f32 %v4537_v3 }
 0x7a7   : > { %v6710_v4 = vpop.eup %6709 }
 0x7a8   : > { %v6712_v7 = vpop.eup %6711  ;;  %v4544_v11 = vadd.f32 1.0, %v6710_v4 }
 0x7aa   : > { %6717 = vrcp.f32 %v4544_v11 }
 0x7ac   : > { %v6714_v51 = vpop.eup %6713 }
 0x7ad   : > { %v6716_v48 = vpop.eup %6715  ;;  %v4549_v10 = vmul.f32 %v6714_v51, %v6712_v7 }
 0x7ae   : > { %v4548_v12 = vmul.f32 %v6716_v48, %v4547_v8 }
 0x7b0   : > { %v4550_v62 = vadd.f32 %v4549_v10, %v4548_v12 }
 0x7b2   : > { %6719 = vtanh.f32 %v4550_v62  ;;  %4554 = vst.msk [vmem:[#allocation3] sm:$0x3] %vm324_vm0, %v4550_v62 }
 0x7b4   : > { %v6718_v15 = vpop.eup %6717 }
 0x7b9   : > { %v5151_v47 = vld [vmem:[#allocation3] sm:$0x3] }
 0x7bc   : > { %v6720_v16 = vpop.eup %6719 }
 0x7bd   : > { %v4552_v6 = vmul.f32 %v6720_v16, %v6718_v15 }
 0x7bf   : > { %4553 = vst.msk [vmem:[#allocation2] sm:$0x3] %vm324_vm0, %v4552_v6  ;;  %4556 = vst.msk [vmem:[%s4555_s7] sm:$0x3] %vm324_vm0, %v4552_v6  ;;  %s6745_s7 = sshll.u32 %s6808_s9, 4  ;;  %s6746_s7 = int_to_ptr.vmem [resolvable:$false] %s6745_s7 }
 0x7c0   : > { %s6747_s11 = scalar_lea.vmem %s6746_s7, 512  ;;  %p6748_p0 = scmp.lt.s32.totalorder %s7533_s17, %s6746_s7 }
 0x7c1   : > { %p6749_p1 = scmp.lt.s32.totalorder %s6747_s11, %s6741_s10 }
 0x7c3   : > { %p6750_p2 = por %p6749_p1, %p6748_p0 }
 0x7c5   : > { %p6751_p3 = pnand %p6750_p2, %p6744_p13 }
 0x7c6   : > { %v4561_v17 = vld [vmem:[#allocation2] sm:$0x3] }
 0x7c7   : > { %6210 = vmatmul.mubr.msk.f32.vlgmr.msra.gmra.mrb[56].mxu0 %vm332_vm2, %v4561_v17  ;;  %6217 = vmatmul.mubr.msk.f32.vlgmr.msra.gmra.mrb[56].mxu1 %vm332_vm2, %v4561_v17 }
 0x7c8   : > { %6537 = vmatpush3.bf16.msra.mxu0 %v6920_v13  ;;  %6540 = vmatpush3.bf16.msra.mxu1 %v6924_v14  ;;  %v4560_v13 = vld [vmem:[%s4559_s15] sm:$0x3] }
 0x7c9   : > { %6223 = vmatprep.mubr.msk.f32.mxu0 %vm6807_vm1, %v6806_v1  ;;  %6230 = vmatprep.mubr.msk.f32.mxu1 %vm6807_vm1, %v6806_v1 }
 0x7ca   : > { %6541 = vmatprep.subr.bf16.mxu0 %v6805_v0  ;;  %6547 = vmatprep.subr.bf16.mxu1 %v6805_v0 }
 0x7cb   : > { %6224 = vmatmul.mubr.msk.f32.vlgmr.msra.gmra.mrb[58].mxu0 %vm332_vm2, %v4561_v17  ;;  %6231 = vmatmul.mubr.msk.f32.vlgmr.msra.gmra.mrb[58].mxu1 %vm332_vm2, %v4561_v17 }
 0x7cc   : > { %6543 = vmatpush3.bf16.msra.mxu0 %v6938_v19  ;;  %6549 = vmatpush3.bf16.msra.mxu1 %v6943_v20 }
 0x7cd   : > { %6544 = vmatprep.subr.bf16.mxu0 %v6805_v0  ;;  %6550 = vmatprep.subr.bf16.mxu1 %v6805_v0 }
 0x7ce   : > { %6241 = vmatprep.mubr.msk.f32.mxu0 %vm6807_vm1, %v6806_v1  ;;  %6252 = vmatprep.mubr.msk.f32.mxu1 %vm6807_vm1, %v6806_v1 }
 0x7d0   : > { %6546 = vmatpush3.bf16.msra.mxu0 %v6957_v25  ;;  %6552 = vmatpush3.bf16.msra.mxu1 %v6961_v26 }
 0x7d1   : > { %6553 = vmatprep.subr.bf16.mxu0 %v6805_v0  ;;  %6559 = vmatprep.subr.bf16.mxu1 %v6805_v0 }
 0x7d3   : > { %6242 = vmatmul.mubr.msk.f32.vlgmr.msra.gmra.mrb[60].mxu0 %vm616_vm3, %v4560_v13  ;;  %6253 = vmatmul.mubr.msk.f32.vlgmr.msra.gmra.mrb[60].mxu1 %vm616_vm3, %v4560_v13 }
 0x7d4   : > { %6555 = vmatpush3.bf16.msra.mxu0 %v6978_v32  ;;  %6561 = vmatpush3.bf16.msra.mxu1 %v6982_v33 }
 0x7d5   : > { %6556 = vmatprep.subr.bf16.mxu0 %v6805_v0  ;;  %6562 = vmatprep.subr.bf16.mxu1 %v6805_v0 }
 0x7d6   : > { %6263 = vmatprep.mubr.msk.f32.mxu0 %vm6807_vm1, %v6806_v1  ;;  %6274 = vmatprep.mubr.msk.f32.mxu1 %vm6807_vm1, %v6806_v1 }
 0x7d8   : > { %6558 = vmatpush3.bf16.msra.mxu0 %v6992_v38  ;;  %6564 = vmatpush3.bf16.msra.mxu1 %v6996_v39 }
 0x7db   : > { %6264 = vmatmul.mubr.msk.f32.vlgmr.msra.gmra.mrb[62].mxu0 %vm616_vm3, %v4560_v13  ;;  %6275 = vmatmul.mubr.msk.f32.vlgmr.msra.gmra.mrb[62].mxu1 %vm616_vm3, %v4560_v13 }
 0x89a   : > { %v4631_v14 = vpop.f32.mrb[56].mxu0  ;;  %v4701_v19 = vpop.f32.mrb[56].mxu1 }
 0x89b   : > { %v6211_v20 = vpop.f32.mrb[57].mxu0  ;;  %v6218_v25 = vpop.f32.mrb[57].mxu1 }
 0x89e   : > { %v4771_v26 = vpop.f32.mrb[58].mxu0  ;;  %v4841_v0 = vpop.f32.mrb[58].mxu1 }
 0x89f   : > { %v6225_v32 = vpop.f32.mrb[59].mxu0  ;;  %v6232_v33 = vpop.f32.mrb[59].mxu1 }
 0x8a6   : > { %v4914_v18 = vpop.f32.mrb[60].mxu0  ;;  %v4984_v21 = vpop.f32.mrb[60].mxu1 }
 0x8a7   : > { %v4915_v22 = vadd.f32 %v4914_v18, %v4631_v14  ;;  %v4985_v1 = vadd.f32 %v4984_v21, %v4701_v19  ;;  %v6243_v23 = vpop.f32.mrb[61].mxu0  ;;  %v6254_v38 = vpop.f32.mrb[61].mxu1 }
 0x8a9   : > { %v5128_v39 = vadd.f32 %v7381_v49, %v4915_v22  ;;  %v5129_v24 = vadd.f32 %v7453_v43, %v4985_v1 }
 0x8ab   : > { %v5434_v27 = vmul.f32 -1.442695, %v5128_v39  ;;  %v5435_v28 = vmul.f32 -1.442695, %v5129_v24 }
 0x8ad   : > { %6721 = vpow2.f32 %v5434_v27 }
 0x8ae   : > { %6723 = vpow2.f32 %v5435_v28  ;;  %v5054_v29 = vpop.f32.mrb[62].mxu0  ;;  %v5124_v30 = vpop.f32.mrb[62].mxu1 }
 0x8af   : > { %v5055_v31 = vadd.f32 %v5054_v29, %v4771_v26  ;;  %v5125_v5 = vadd.f32 %v5124_v30, %v4841_v0  ;;  %v6265_v34 = vpop.f32.mrb[63].mxu0  ;;  %v6276_v9 = vpop.f32.mrb[63].mxu1 }
 0x8b1   : > { %v5131_v35 = vadd.f32 %v7457_v56, %v5125_v5  ;;  %v5130_v37 = vadd.f32 %v7461_v59, %v5055_v31 }
 0x8b3   : > { %v5436_v36 = vmul.f32 -1.442695, %v5131_v35 }
 0x8b5   : > { %6725 = vpow2.f32 %v5436_v36 }
 0x8b6   : > { %6727 = vtanh.f32 %v5130_v37 }
 0x8b7   : > { %v6722_v40 = vpop.eup %6721 }
 0x8b8   : > { %v6724_v41 = vpop.eup %6723  ;;  %v5135_v49 = vadd.f32 1.0, %v6722_v40 }
 0x8b9   : > { %v5141_v42 = vadd.f32 1.0, %v6724_v41 }
 0x8ba   : > { %6729 = vrcp.f32 %v5135_v49 }
 0x8bb   : > { %6731 = vrcp.f32 %v5141_v42 }
 0x8bf   : > { %v6726_v43 = vpop.eup %6725 }
 0x8c0   : > { %v6728_v44 = vpop.eup %6727  ;;  %v5148_v52 = vadd.f32 1.0, %v6726_v43 }
 0x8c2   : > { %6733 = vrcp.f32 %v5148_v52 }
 0x8c4   : > { %v6730_v45 = vpop.eup %6729 }
 0x8c5   : > { %v6732_v46 = vpop.eup %6731  ;;  %v5153_v50 = vmul.f32 %v6730_v45, %v6728_v44 }
 0x8c6   : > { %v5152_v53 = vmul.f32 %v6732_v46, %v5151_v47 }
 0x8c8   : > { %v5154_v54 = vadd.f32 %v5153_v50, %v5152_v53 }
 0x8ca   : > { %6735 = vtanh.f32 %v5154_v54  ;;  %5158 = vst.msk [vmem:[#allocation3] sm:$0x3] %vm324_vm0, %v5154_v54 }
 0x8cc   : > { %v6734_v55 = vpop.eup %6733 }
 0x8d4   : > { %v6736_v56 = vpop.eup %6735 }
 0x8d5   : > { %v5156_v57 = vmul.f32 %v6736_v56, %v6734_v55 }
 0x8d7   : > { %5157 = vst.msk [vmem:[#allocation2] sm:$0x3] %vm324_vm0, %v5156_v57  ;;  %5160 = vst.msk [vmem:[%s5159_s23] sm:$0x3] %vm324_vm0, %v5156_v57 }
 0x8d8   : > { %6754 = shalt.err (!%p6751_p3)
}
 0x8d9   : > { %s6755_s8 = scalar_lea.hbm %s7531_s6, 256  ;;  %s6759_s14 = scalar_lea.hbm %s7589_s4, 512 }
 0x8da   : > { %p6756_p4 = scmp.ne.s32.totalorder %s7531_s6, %s6755_s8  ;;  %p6760_p9 = scmp.lt.u32.totalorder %s7531_s6, %s7589_s4 }
 0x8db   : > { %p6761_p10 = scmp.lt.u32.totalorder %s6759_s14, %s6755_s8  ;;  %p6763_p12 = scmp.lt.u32.totalorder %s6755_s8, %s7531_s6 }
 0x8dc   : > { %p6757_p7 = pnand %p6756_p4, %p6881_p5 }
 0x8dd   : > { %p6762_p11 = por %p6761_p10, %p6760_p9 }
 0x8de   : > { %p6758_p8 = pneg %p6757_p7 }
 0x8df   : > { %p6764_p13 = por %p6763_p12, %p6762_p11 }
 0x8e1   : > { %p6765_p0 = pnand %p6764_p13, %p6758_p8 }
 0x8e3   : > { %6768 = shalt.err (!%p6765_p0)
}
 0x8e4   : > { %s6809_s23 = smov 32   ;;  %s6810_s25 = smov 2   ;;  %v5161_v58 = vld [vmem:[#allocation2] sm:$0x3] }
 0x8e5   : > { %6565 = dma.vmem_to_hbm [thread:$0]  (%p6881_p5), %s7533_s17, 256, %s7531_s6, %s7539_s22, %s6809_s23, %s6809_s23, %s6810_s25  }
 0x8e6   : > { %s5336_s26 = sshll.u32 %s6899_s30, 1 }
 0x8e7   : > { %s270_s7 = scalar_lea.vmem %s7590_s5, %s5336_s26 }
 0x8e8   : > { %5162 = vst.msk [vmem:[%s270_s7] sm:$0x3] %vm324_vm0, %v5161_v58 }
 0x8e9 PF: > { %p6571_p1 = scmp.ge.s32.totalorder %s6803_s21, 2  ;;  %s5199_s11 = sand.u32 1, %s6791_s18  }
 0x8ea   : > { %s5200_s8 = scalar_lea.sflag [#allocation5], %s5199_s11 }
 0x8eb   : > { %p6568_p2 = pnand %p6571_p1, %p6885_p6 }
 0x8ed   : > { %6786 = dma.done.wait (!%p6568_p2), %s5200_s8, 256  }
 0x8ee   : > { %6788 = vsyncadd (!%p6568_p2), %s5200_s8, 4294967040  ;;  %p16_p5 = scmp.ge.s32.totalorder %s6866_s24, 4   ;;  %s7593_s18 = smov %s6795_s19 }
 0x8ef   : > { %s7594_s19 = smov %s6799_s20  ;;  %s7595_s20 = smov %s6877_s27 }
 0x8f0   : > { %s7596_s21 = smov %s6866_s24  ;;  %18 = sbr.rel (!%p16_p5) target bundleno = 3 (0x3), region = 105 }
 0x8f7   :  { %5212 = vsyncpa [#allocation5], 1 }
 0x8f8   :  { %5214 = vsyncpa [#allocation5 + $0x1], 1 }

</bundles_post_ra>
